<compile_context>
chip_gen: v7x
topology: tpu7x:2x2x1
jax: 0.10.0
libtpu: 0.0.40
codegen_flags: <defaults>
</compile_context>

<pallas_src>
import numpy as np
import jax
import jax.numpy as jnp
from jax.experimental import pallas as pl
from jax.experimental.pallas import tpu as pltpu


# ----------------------------------------------------------------------------
# Model configuration (factor = 0.25 -> channels 16 / 32 / 64, 32x32x3 input)
# ----------------------------------------------------------------------------
FACTOR = 0.25
NUM_CLASSES = 10
IMG = 32
C1 = int(64 * FACTOR)     # 16
C2 = int(128 * FACTOR)    # 32
C3 = int(256 * FACTOR)    # 64

# (H_in, W_in, Cin, Cout, pooled_after)
LAYERS = [
    (32, 32, 3,  C1, False),
    (32, 32, C1, C1, True),
    (16, 16, C1, C2, False),
    (16, 16, C2, C2, True),
    (8,  8,  C2, C3, False),
    (8,  8,  C3, C3, True),
]


# ----------------------------------------------------------------------------
# Fused whole-network kernel (runs once per image; grid=(batch,))
# ----------------------------------------------------------------------------
def conv6_kernel(x_ref,
                 cw1, cw2, cw3, cw4, cw5, cw6,
                 cb1, cb2, cb3, cb4, cb5, cb6,
                 lw0, lw1, lw2, lb0, lb1, lb2,
                 o_ref,
                 buf2, buf3, buf4, buf5, buf6):
    cws = (cw1, cw2, cw3, cw4, cw5, cw6)
    cbs = (cb1, cb2, cb3, cb4, cb5, cb6)

    def conv_layer(a_pad, idx):
        # a_pad: (H+2, W*Cin) value; rows 0 and H+1 are the zero halo.
        H, W, _cin, Cout, pooled = LAYERS[idx]
        a = a_pad.astype(jnp.bfloat16)                       # bf16 MXU operands
        acc = jnp.zeros((H, W * Cout), jnp.float32)
        for dy in range(3):                                  # 3 lane-dense matmuls
            acc = acc + jnp.dot(a[dy:dy + H, :], cws[idx][dy],
                                preferred_element_type=jnp.float32)
        if not pooled:
            return jnp.maximum(acc + cbs[idx][...], 0.0)     # (H, W*Cout)

        # Fused 2x2 max-pool.  Output columns are pre-permuted [even-w | odd-w],
        # so pooling along w is a max of the two lane halves.
        half = (W // 2) * Cout
        z = jnp.maximum(acc[:, :half], acc[:, half:])        # (H, (W/2)*Cout)
        # Pooling along h: permute rows to [even rows | odd rows] with a tiny
        # 0/1 matmul (exact selection), then max the two row halves.
        row = jax.lax.broadcasted_iota(jnp.int32, (H, H), 0)
        col = jax.lax.broadcasted_iota(jnp.int32, (H, H), 1)
        perm = jnp.logical_or(col == 2 * row,
                              col == 2 * (row - H // 2) + 1).astype(jnp.float32)
        zp = jnp.dot(perm, z, preferred_element_type=jnp.float32)
        p = jnp.maximum(zp[:H // 2, :], zp[H // 2:, :])      # (H/2, (W/2)*Cout)
        return jnp.maximum(p + cbs[idx][...], 0.0)

    def store_padded(buf, y, h_rows):
        # Write the layer output into the next layer's padded buffer:
        # zeroed top/bottom halo rows + interior rows 1..h_rows (lane offset 0).
        width = buf.shape[1]
        buf[0:1, :] = jnp.zeros((1, width), jnp.float32)
        buf[h_rows + 1:h_rows + 2, :] = jnp.zeros((1, width), jnp.float32)
        buf[1:h_rows + 1, :] = y

    y = conv_layer(x_ref[0], 0);   store_padded(buf2, y, 32)   # 32x32x16
    y = conv_layer(buf2[...], 1);  store_padded(buf3, y, 16)   # pool -> 16x16x16
    y = conv_layer(buf3[...], 2);  store_padded(buf4, y, 16)   # 16x16x32
    y = conv_layer(buf4[...], 3);  store_padded(buf5, y, 8)    # pool -> 8x8x32
    y = conv_layer(buf5[...], 4);  store_padded(buf6, y, 8)    # 8x8x64
    feat = conv_layer(buf6[...], 5)                            # pool -> (4, 4*C3) f32

    # Fused linear head (f32); intermediates never leave VMEM/registers.
    h = jnp.zeros((1, C3), jnp.float32)
    for r in range(4):                                         # contract the (4, 256) feature map
        h = h + jnp.dot(feat[r:r + 1, :], lw0[r],
                        preferred_element_type=jnp.float32)
    h = jnp.maximum(h + lb0[...], 0.0)
    h = jnp.maximum(jnp.dot(h, lw1[...], preferred_element_type=jnp.float32) + lb1[...], 0.0)
    logits = jnp.dot(h, lw2[...], preferred_element_type=jnp.float32) + lb2[...]
    o_ref[0] = logits


# ----------------------------------------------------------------------------
# pallas_call wrapper
# ----------------------------------------------------------------------------
def conv6_forward(x_nchw, cws, cbs, lws, lbs):
    batch = x_nchw.shape[0]
    # NCHW -> lane-dense padded rows: (B, 34, 32*3); rows 0/33 are the zero halo.
    x = jnp.transpose(x_nchw, (0, 2, 3, 1)).reshape(batch, IMG, IMG * 3)
    x = jnp.pad(x, ((0, 0), (1, 1), (0, 0))).astype(jnp.bfloat16)

    def full_spec(arr):
        n = arr.ndim
        return pl.BlockSpec(arr.shape, lambda i, _n=n: (0,) * _n)

    in_specs = [pl.BlockSpec((1, IMG + 2, IMG * 3), lambda i: (i, 0, 0))]
    in_specs += [full_spec(a) for a in (*cws, *cbs, *lws, *lbs)]

    out = pl.pallas_call(
        conv6_kernel,
        out_shape=jax.ShapeDtypeStruct((batch, 1, NUM_CLASSES), jnp.float32),
        grid=(batch,),
        in_specs=in_specs,
        out_specs=pl.BlockSpec((1, 1, NUM_CLASSES), lambda i: (i, 0, 0)),
        scratch_shapes=[
            pltpu.VMEM((IMG + 2, IMG * C1), jnp.float32),      # buf2: 34 x 512
            pltpu.VMEM((16 + 2, 16 * C1), jnp.float32),        # buf3: 18 x 256
            pltpu.VMEM((16 + 2, 16 * C2), jnp.float32),        # buf4: 18 x 512
            pltpu.VMEM((8 + 2, 8 * C2), jnp.float32),          # buf5: 10 x 256
            pltpu.VMEM((8 + 2, 8 * C3), jnp.float32),          # buf6: 10 x 512
        ],
        compiler_params=pltpu.CompilerParams(
            dimension_semantics=("parallel",),
            vmem_limit_bytes=48 * 1024 * 1024,
        ),
    )(x, *cws, *cbs, *lws, *lbs)
    return out.reshape(batch, NUM_CLASSES)


# ----------------------------------------------------------------------------
# Parameter construction / preparation (init-time, host side)
# ----------------------------------------------------------------------------
def init_params(key):
    conv_dims = [(3, C1), (C1, C1), (C1, C2), (C2, C2), (C2, C3), (C3, C3)]
    lin_dims = [(C3 * 4 * 4, C3), (C3, C3), (C3, NUM_CLASSES)]
    keys = jax.random.split(key, 2 * (len(conv_dims) + len(lin_dims)))
    params = {"conv": [], "lin": []}
    k = 0
    for cin, cout in conv_dims:
        w = jax.random.normal(keys[k], (3, 3, cin, cout), jnp.float32) * (2.0 / (9 * cin)) ** 0.5
        b = jax.random.uniform(keys[k + 1], (cout,), jnp.float32, -0.05, 0.05)
        params["conv"].append((w, b)); k += 2
    for cin, cout in lin_dims:
        w = jax.random.normal(keys[k], (cin, cout), jnp.float32) * (2.0 / cin) ** 0.5
        b = jax.random.uniform(keys[k + 1], (cout,), jnp.float32, -0.05, 0.05)
        params["lin"].append((w, b)); k += 2
    return params


def build_banded(w_hwio, W, pooled):
    """Fold a 3x3 HWIO conv weight into 3 banded (W*Cin, W*Cout) matrices.
    B_dy[wi*Cin + ci, wo*Cout + co] = w[dy, wi-wo+1, ci, co]; entries that would
    read outside [0, W) implement the left/right zero padding.  For pooled layers
    the output columns are permuted to [even-w blocks | odd-w blocks]."""
    _, _, Cin, Cout = w_hwio.shape
    B = np.zeros((3, W * Cin, W * Cout), np.float32)
    for dy in range(3):
        for dx in range(3):
            blk = w_hwio[dy, dx]
            for wo in range(W):
                wi = wo + dx - 1
                if 0 <= wi < W:
                    B[dy, wi * Cin:(wi + 1) * Cin, wo * Cout:(wo + 1) * Cout] = blk
    if pooled:
        order = np.concatenate([np.arange(0, W, 2), np.arange(1, W, 2)])
        cols = (order[:, None] * Cout + np.arange(Cout)[None, :]).reshape(-1)
        B = B[:, :, cols]
    return B


def prepare_params(params):
    cws, cbs = [], []
    for (w, b), (_H, W, _cin, _cout, pooled) in zip(params["conv"], LAYERS):
        cws.append(jnp.asarray(build_banded(np.asarray(w), W, pooled), jnp.bfloat16))
        reps = W // 2 if pooled else W
        cbs.append(jnp.asarray(np.tile(np.asarray(b), reps)[None, :], jnp.float32))
    (w0, b0), (w1, b1), (w2, b2) = params["lin"]
    # Fold PyTorch's (C, H, W) flatten order into lw0: row (c*16 + h*4 + w) ->
    # [h, w*C3 + c] so the kernel can consume the lane-dense (4, 4*C3) feature map.
    w0np = np.asarray(w0).reshape(C3, 4, 4, C3)            # (c, h, w, co)
    w0np = np.transpose(w0np, (1, 2, 0, 3)).reshape(4, 4 * C3, C3)
    lws = [jnp.asarray(w0np, jnp.float32), w1, w2]
    lbs = [b0.reshape(1, -1), b1.reshape(1, -1), b2.reshape(1, -1)]
    return cws, cbs, lws, lbs


# ----------------------------------------------------------------------------
# Pure-XLA reference with matching bf16-operand / f32-accumulate numerics.
# ----------------------------------------------------------------------------
def conv6_reference(params, x_nchw):
    x = jnp.transpose(x_nchw, (0, 2, 3, 1))
    for (w, b), (_H, _W, _cin, _cout, pooled) in zip(params["conv"], LAYERS):
        y = jax.lax.conv_general_dilated(
            x.astype(jnp.bfloat16), w.astype(jnp.bfloat16),
            window_strides=(1, 1), padding=((1, 1), (1, 1)),
            dimension_numbers=("NHWC", "HWIO", "NHWC"),
            preferred_element_type=jnp.float32)
        y = jnp.maximum(y + b, 0.0)
        if pooled:
            y = jax.lax.reduce_window(y, -jnp.inf, jax.lax.max,
                                      (1, 2, 2, 1), (1, 2, 2, 1), "VALID")
        x = y
    batch = x.shape[0]
    feat = jnp.transpose(x, (0, 3, 1, 2)).reshape(batch, -1)   # PyTorch (C,H,W) flatten
    (w0, b0), (w1, b1), (w2, b2) = params["lin"]
    h = jnp.maximum(feat @ w0 + b0, 0.0)
    h = jnp.maximum(h @ w1 + b1, 0.0)
    return h @ w2 + b2


# ----------------------------------------------------------------------------
if __name__ == "__main__":
    root = jax.random.PRNGKey(0)
    pkey, xkey = jax.random.split(root)

    params = init_params(pkey)
    cws, cbs, lws, lbs = prepare_params(params)

    batch = 2
    # The module asserts image_size == 32, num_channels == 3 (NCHW input).
    x = jax.random.normal(xkey, (batch, 3, IMG, IMG), jnp.float32)

    fwd = jax.jit(conv6_forward)
    out = jax.block_until_ready(fwd(x, cws, cbs, lws, lbs))

    assert out.shape == (batch, NUM_CLASSES), out.shape
    assert bool(jnp.all(jnp.isfinite(out)))

    # Cross-check against the XLA reference (same bf16 operands, f32 accumulation;
    # remaining difference is only f32 summation order).
    ref = jax.block_until_ready(jax.jit(conv6_reference)(params, x))
    np.testing.assert_allclose(np.asarray(out), np.asarray(ref), rtol=2e-2, atol=2e-2)

    print("KERNEL_OK")
</pallas_src>

<mosaic_0001>
module attributes {stable_mosaic.version = 11 : i64} {
  func.func @conv6_kernel(%arg0: i32, %arg1: memref<1x34x96xbf16, #tpu.memory_space<vmem>>, %arg2: memref<3x96x512xbf16, #tpu.memory_space<vmem>>, %arg3: memref<3x512x512xbf16, #tpu.memory_space<vmem>>, %arg4: memref<3x256x512xbf16, #tpu.memory_space<vmem>>, %arg5: memref<3x512x512xbf16, #tpu.memory_space<vmem>>, %arg6: memref<3x256x512xbf16, #tpu.memory_space<vmem>>, %arg7: memref<3x512x512xbf16, #tpu.memory_space<vmem>>, %arg8: memref<1x512xf32, #tpu.memory_space<vmem>>, %arg9: memref<1x256xf32, #tpu.memory_space<vmem>>, %arg10: memref<1x512xf32, #tpu.memory_space<vmem>>, %arg11: memref<1x256xf32, #tpu.memory_space<vmem>>, %arg12: memref<1x512xf32, #tpu.memory_space<vmem>>, %arg13: memref<1x256xf32, #tpu.memory_space<vmem>>, %arg14: memref<4x256x64xf32, #tpu.memory_space<vmem>>, %arg15: memref<64x64xf32, #tpu.memory_space<vmem>>, %arg16: memref<64x10xf32, #tpu.memory_space<vmem>>, %arg17: memref<1x64xf32, #tpu.memory_space<vmem>>, %arg18: memref<1x64xf32, #tpu.memory_space<vmem>>, %arg19: memref<1x10xf32, #tpu.memory_space<vmem>>, %arg20: memref<1x1x10xf32, #tpu.memory_space<vmem>>, %arg21: memref<34x512xf32, #tpu.memory_space<vmem>>, %arg22: memref<18x256xf32, #tpu.memory_space<vmem>>, %arg23: memref<18x512xf32, #tpu.memory_space<vmem>>, %arg24: memref<10x256xf32, #tpu.memory_space<vmem>>, %arg25: memref<10x512xf32, #tpu.memory_space<vmem>>) attributes {dimension_semantics = [#tpu.dimension_semantics<parallel>], iteration_bounds = array<i64: 2>, scalar_prefetch = 0 : i64, scratch_operands = 5 : i64, tpu.core_type = #tpu.core_type<tc>, window_params = [{transform_indices = @transform_0, window_bounds = array<i64: 1, 34, 96>}, {pipeline_mode = #tpu.pipeline_mode<synchronous>, transform_indices = @transform_1, window_bounds = array<i64: 3, 96, 512>}, {pipeline_mode = #tpu.pipeline_mode<synchronous>, transform_indices = @transform_2, window_bounds = array<i64: 3, 512, 512>}, {pipeline_mode = #tpu.pipeline_mode<synchronous>, transform_indices = @transform_3, window_bounds = array<i64: 3, 256, 512>}, {pipeline_mode = #tpu.pipeline_mode<synchronous>, transform_indices = @transform_4, window_bounds = array<i64: 3, 512, 512>}, {pipeline_mode = #tpu.pipeline_mode<synchronous>, transform_indices = @transform_5, window_bounds = array<i64: 3, 256, 512>}, {pipeline_mode = #tpu.pipeline_mode<synchronous>, transform_indices = @transform_6, window_bounds = array<i64: 3, 512, 512>}, {pipeline_mode = #tpu.pipeline_mode<synchronous>, transform_indices = @transform_7, window_bounds = array<i64: 1, 512>}, {pipeline_mode = #tpu.pipeline_mode<synchronous>, transform_indices = @transform_8, window_bounds = array<i64: 1, 256>}, {pipeline_mode = #tpu.pipeline_mode<synchronous>, transform_indices = @transform_9, window_bounds = array<i64: 1, 512>}, {pipeline_mode = #tpu.pipeline_mode<synchronous>, transform_indices = @transform_10, window_bounds = array<i64: 1, 256>}, {pipeline_mode = #tpu.pipeline_mode<synchronous>, transform_indices = @transform_11, window_bounds = array<i64: 1, 512>}, {pipeline_mode = #tpu.pipeline_mode<synchronous>, transform_indices = @transform_12, window_bounds = array<i64: 1, 256>}, {pipeline_mode = #tpu.pipeline_mode<synchronous>, transform_indices = @transform_13, window_bounds = array<i64: 4, 256, 64>}, {pipeline_mode = #tpu.pipeline_mode<synchronous>, transform_indices = @transform_14, window_bounds = array<i64: 64, 64>}, {pipeline_mode = #tpu.pipeline_mode<synchronous>, transform_indices = @transform_15, window_bounds = array<i64: 64, 10>}, {pipeline_mode = #tpu.pipeline_mode<synchronous>, transform_indices = @transform_16, window_bounds = array<i64: 1, 64>}, {pipeline_mode = #tpu.pipeline_mode<synchronous>, transform_indices = @transform_17, window_bounds = array<i64: 1, 64>}, {pipeline_mode = #tpu.pipeline_mode<synchronous>, transform_indices = @transform_18, window_bounds = array<i64: 1, 10>}, {transform_indices = @transform_19, window_bounds = array<i64: 1, 1, 10>}]} {
    %c0 = arith.constant 0 : index
    %c0_0 = arith.constant 0 : index
    %c0_1 = arith.constant 0 : index
    %0 = vector.load %arg1[%c0, %c0_0, %c0_1] : memref<1x34x96xbf16, #tpu.memory_space<vmem>>, vector<1x34x96xbf16>
    %1 = vector.shape_cast %0 : vector<1x34x96xbf16> to vector<34x96xbf16>
    %cst = arith.constant 0.000000e+00 : f32
    %2 = vector.broadcast %cst : f32 to vector<32x512xf32>
    %3 = vector.extract_strided_slice %1 {offsets = [0, 0], sizes = [32, 96], strides = [1, 1]} : vector<34x96xbf16> to vector<32x96xbf16>
    %c0_2 = arith.constant 0 : index
    %c0_3 = arith.constant 0 : index
    %c0_4 = arith.constant 0 : index
    %4 = vector.load %arg2[%c0_2, %c0_3, %c0_4] : memref<3x96x512xbf16, #tpu.memory_space<vmem>>, vector<1x96x512xbf16>
    %5 = vector.shape_cast %4 : vector<1x96x512xbf16> to vector<96x512xbf16>
    %cst_5 = arith.constant dense<0.000000e+00> : vector<32x512xf32>
    %6 = tpu.matmul %3, %5, %cst_5 {dimension_numbers = #tpu.dot_dimension_numbers<[1], [0], [0], [1], [0, 0, 1, 1], [], []>} : vector<32x96xbf16>, vector<96x512xbf16>, vector<32x512xf32> -> vector<32x512xf32>
    %7 = arith.addf %2, %6 : vector<32x512xf32>
    %8 = vector.extract_strided_slice %1 {offsets = [1, 0], sizes = [32, 96], strides = [1, 1]} : vector<34x96xbf16> to vector<32x96xbf16>
    %c1 = arith.constant 1 : index
    %c0_6 = arith.constant 0 : index
    %c0_7 = arith.constant 0 : index
    %9 = vector.load %arg2[%c1, %c0_6, %c0_7] : memref<3x96x512xbf16, #tpu.memory_space<vmem>>, vector<1x96x512xbf16>
    %10 = vector.shape_cast %9 : vector<1x96x512xbf16> to vector<96x512xbf16>
    %cst_8 = arith.constant dense<0.000000e+00> : vector<32x512xf32>
    %11 = tpu.matmul %8, %10, %cst_8 {dimension_numbers = #tpu.dot_dimension_numbers<[1], [0], [0], [1], [0, 0, 1, 1], [], []>} : vector<32x96xbf16>, vector<96x512xbf16>, vector<32x512xf32> -> vector<32x512xf32>
    %12 = arith.addf %7, %11 : vector<32x512xf32>
    %13 = vector.extract_strided_slice %1 {offsets = [2, 0], sizes = [32, 96], strides = [1, 1]} : vector<34x96xbf16> to vector<32x96xbf16>
    %c2 = arith.constant 2 : index
    %c0_9 = arith.constant 0 : index
    %c0_10 = arith.constant 0 : index
    %14 = vector.load %arg2[%c2, %c0_9, %c0_10] : memref<3x96x512xbf16, #tpu.memory_space<vmem>>, vector<1x96x512xbf16>
    %15 = vector.shape_cast %14 : vector<1x96x512xbf16> to vector<96x512xbf16>
    %cst_11 = arith.constant dense<0.000000e+00> : vector<32x512xf32>
    %16 = tpu.matmul %13, %15, %cst_11 {dimension_numbers = #tpu.dot_dimension_numbers<[1], [0], [0], [1], [0, 0, 1, 1], [], []>} : vector<32x96xbf16>, vector<96x512xbf16>, vector<32x512xf32> -> vector<32x512xf32>
    %17 = arith.addf %12, %16 : vector<32x512xf32>
    %c0_12 = arith.constant 0 : index
    %c0_13 = arith.constant 0 : index
    %18 = vector.load %arg8[%c0_12, %c0_13] : memref<1x512xf32, #tpu.memory_space<vmem>>, vector<1x512xf32>
    %19 = vector.broadcast %18 : vector<1x512xf32> to vector<32x512xf32>
    %20 = arith.addf %17, %19 : vector<32x512xf32>
    %cst_14 = arith.constant 0.000000e+00 : f32
    %21 = vector.broadcast %cst_14 : f32 to vector<32x512xf32>
    %22 = arith.maximumf %20, %21 : vector<32x512xf32>
    %cst_15 = arith.constant 0.000000e+00 : f32
    %23 = vector.broadcast %cst_15 : f32 to vector<1x512xf32>
    %c0_16 = arith.constant 0 : index
    %c0_17 = arith.constant 0 : index
    %24 = vector.load %arg21[%c0_16, %c0_17] : memref<34x512xf32, #tpu.memory_space<vmem>>, vector<1x512xf32>
    tpu.vector_store %arg21[%c0_16, %c0_17], %23 {strides = array<i32>} : memref<34x512xf32, #tpu.memory_space<vmem>>, vector<1x512xf32>,
    %cst_18 = arith.constant 0.000000e+00 : f32
    %25 = vector.broadcast %cst_18 : f32 to vector<1x512xf32>
    %c33 = arith.constant 33 : index
    %c0_19 = arith.constant 0 : index
    %26 = vector.load %arg21[%c33, %c0_19] : memref<34x512xf32, #tpu.memory_space<vmem>>, vector<1x512xf32>
    tpu.vector_store %arg21[%c33, %c0_19], %25 {strides = array<i32>} : memref<34x512xf32, #tpu.memory_space<vmem>>, vector<1x512xf32>,
    %c1_20 = arith.constant 1 : index
    %c0_21 = arith.constant 0 : index
    %27 = vector.load %arg21[%c1_20, %c0_21] : memref<34x512xf32, #tpu.memory_space<vmem>>, vector<32x512xf32>
    tpu.vector_store %arg21[%c1_20, %c0_21], %22 {strides = array<i32>} : memref<34x512xf32, #tpu.memory_space<vmem>>, vector<32x512xf32>,
    %c0_22 = arith.constant 0 : index
    %c0_23 = arith.constant 0 : index
    %28 = vector.load %arg21[%c0_22, %c0_23] : memref<34x512xf32, #tpu.memory_space<vmem>>, vector<34x512xf32>
    %29 = arith.truncf %28 : vector<34x512xf32> to vector<34x512xbf16>
    %cst_24 = arith.constant 0.000000e+00 : f32
    %30 = vector.broadcast %cst_24 : f32 to vector<32x512xf32>
    %31 = vector.extract_strided_slice %29 {offsets = [0, 0], sizes = [32, 512], strides = [1, 1]} : vector<34x512xbf16> to vector<32x512xbf16>
    %c0_25 = arith.constant 0 : index
    %c0_26 = arith.constant 0 : index
    %c0_27 = arith.constant 0 : index
    %32 = vector.load %arg3[%c0_25, %c0_26, %c0_27] : memref<3x512x512xbf16, #tpu.memory_space<vmem>>, vector<1x512x512xbf16>
    %33 = vector.shape_cast %32 : vector<1x512x512xbf16> to vector<512x512xbf16>
    %cst_28 = arith.constant dense<0.000000e+00> : vector<32x512xf32>
    %34 = tpu.matmul %31, %33, %cst_28 {dimension_numbers = #tpu.dot_dimension_numbers<[1], [0], [0], [1], [0, 0, 1, 1], [], []>} : vector<32x512xbf16>, vector<512x512xbf16>, vector<32x512xf32> -> vector<32x512xf32>
    %35 = arith.addf %30, %34 : vector<32x512xf32>
    %36 = vector.extract_strided_slice %29 {offsets = [1, 0], sizes = [32, 512], strides = [1, 1]} : vector<34x512xbf16> to vector<32x512xbf16>
    %c1_29 = arith.constant 1 : index
    %c0_30 = arith.constant 0 : index
    %c0_31 = arith.constant 0 : index
    %37 = vector.load %arg3[%c1_29, %c0_30, %c0_31] : memref<3x512x512xbf16, #tpu.memory_space<vmem>>, vector<1x512x512xbf16>
    %38 = vector.shape_cast %37 : vector<1x512x512xbf16> to vector<512x512xbf16>
    %cst_32 = arith.constant dense<0.000000e+00> : vector<32x512xf32>
    %39 = tpu.matmul %36, %38, %cst_32 {dimension_numbers = #tpu.dot_dimension_numbers<[1], [0], [0], [1], [0, 0, 1, 1], [], []>} : vector<32x512xbf16>, vector<512x512xbf16>, vector<32x512xf32> -> vector<32x512xf32>
    %40 = arith.addf %35, %39 : vector<32x512xf32>
    %41 = vector.extract_strided_slice %29 {offsets = [2, 0], sizes = [32, 512], strides = [1, 1]} : vector<34x512xbf16> to vector<32x512xbf16>
    %c2_33 = arith.constant 2 : index
    %c0_34 = arith.constant 0 : index
    %c0_35 = arith.constant 0 : index
    %42 = vector.load %arg3[%c2_33, %c0_34, %c0_35] : memref<3x512x512xbf16, #tpu.memory_space<vmem>>, vector<1x512x512xbf16>
    %43 = vector.shape_cast %42 : vector<1x512x512xbf16> to vector<512x512xbf16>
    %cst_36 = arith.constant dense<0.000000e+00> : vector<32x512xf32>
    %44 = tpu.matmul %41, %43, %cst_36 {dimension_numbers = #tpu.dot_dimension_numbers<[1], [0], [0], [1], [0, 0, 1, 1], [], []>} : vector<32x512xbf16>, vector<512x512xbf16>, vector<32x512xf32> -> vector<32x512xf32>
    %45 = arith.addf %40, %44 : vector<32x512xf32>
    %46 = vector.extract_strided_slice %45 {offsets = [0, 0], sizes = [32, 256], strides = [1, 1]} : vector<32x512xf32> to vector<32x256xf32>
    %47 = vector.extract_strided_slice %45 {offsets = [0, 256], sizes = [32, 256], strides = [1, 1]} : vector<32x512xf32> to vector<32x256xf32>
    %48 = arith.maximumf %46, %47 : vector<32x256xf32>
    %49 = tpu.iota {dimensions = array<i32: 0>} : vector<32x32xi32>
    %50 = tpu.iota {dimensions = array<i32: 1>} : vector<32x32xi32>
    %c2_i32 = arith.constant 2 : i32
    %51 = vector.broadcast %c2_i32 : i32 to vector<32x32xi32>
    %52 = arith.muli %51, %49 : vector<32x32xi32>
    %53 = arith.cmpi eq, %50, %52 : vector<32x32xi32>
    %c16_i32 = arith.constant 16 : i32
    %54 = vector.broadcast %c16_i32 : i32 to vector<32x32xi32>
    %55 = arith.subi %49, %54 : vector<32x32xi32>
    %c2_i32_37 = arith.constant 2 : i32
    %56 = vector.broadcast %c2_i32_37 : i32 to vector<32x32xi32>
    %57 = arith.muli %56, %55 : vector<32x32xi32>
    %c1_i32 = arith.constant 1 : i32
    %58 = vector.broadcast %c1_i32 : i32 to vector<32x32xi32>
    %59 = arith.addi %57, %58 : vector<32x32xi32>
    %60 = arith.cmpi eq, %50, %59 : vector<32x32xi32>
    %61 = arith.ori %53, %60 : vector<32x32xi1>
    %62 = arith.extui %61 : vector<32x32xi1> to vector<32x32xi32>
    %63 = arith.sitofp %62 : vector<32x32xi32> to vector<32x32xf32>
    %cst_38 = arith.constant dense<0.000000e+00> : vector<32x256xf32>
    %64 = tpu.matmul %63, %48, %cst_38 {dimension_numbers = #tpu.dot_dimension_numbers<[1], [0], [0], [1], [0, 0, 1, 1], [], []>} : vector<32x32xf32>, vector<32x256xf32>, vector<32x256xf32> -> vector<32x256xf32>
    %65 = vector.extract_strided_slice %64 {offsets = [0, 0], sizes = [16, 256], strides = [1, 1]} : vector<32x256xf32> to vector<16x256xf32>
    %66 = vector.extract_strided_slice %64 {offsets = [16, 0], sizes = [16, 256], strides = [1, 1]} : vector<32x256xf32> to vector<16x256xf32>
    %67 = arith.maximumf %65, %66 : vector<16x256xf32>
    %c0_39 = arith.constant 0 : index
    %c0_40 = arith.constant 0 : index
    %68 = vector.load %arg9[%c0_39, %c0_40] : memref<1x256xf32, #tpu.memory_space<vmem>>, vector<1x256xf32>
    %69 = vector.broadcast %68 : vector<1x256xf32> to vector<16x256xf32>
    %70 = arith.addf %67, %69 : vector<16x256xf32>
    %cst_41 = arith.constant 0.000000e+00 : f32
    %71 = vector.broadcast %cst_41 : f32 to vector<16x256xf32>
    %72 = arith.maximumf %70, %71 : vector<16x256xf32>
    %cst_42 = arith.constant 0.000000e+00 : f32
    %73 = vector.broadcast %cst_42 : f32 to vector<1x256xf32>
    %c0_43 = arith.constant 0 : index
    %c0_44 = arith.constant 0 : index
    %74 = vector.load %arg22[%c0_43, %c0_44] : memref<18x256xf32, #tpu.memory_space<vmem>>, vector<1x256xf32>
    tpu.vector_store %arg22[%c0_43, %c0_44], %73 {strides = array<i32>} : memref<18x256xf32, #tpu.memory_space<vmem>>, vector<1x256xf32>,
    %cst_45 = arith.constant 0.000000e+00 : f32
    %75 = vector.broadcast %cst_45 : f32 to vector<1x256xf32>
    %c17 = arith.constant 17 : index
    %c0_46 = arith.constant 0 : index
    %76 = vector.load %arg22[%c17, %c0_46] : memref<18x256xf32, #tpu.memory_space<vmem>>, vector<1x256xf32>
    tpu.vector_store %arg22[%c17, %c0_46], %75 {strides = array<i32>} : memref<18x256xf32, #tpu.memory_space<vmem>>, vector<1x256xf32>,
    %c1_47 = arith.constant 1 : index
    %c0_48 = arith.constant 0 : index
    %77 = vector.load %arg22[%c1_47, %c0_48] : memref<18x256xf32, #tpu.memory_space<vmem>>, vector<16x256xf32>
    tpu.vector_store %arg22[%c1_47, %c0_48], %72 {strides = array<i32>} : memref<18x256xf32, #tpu.memory_space<vmem>>, vector<16x256xf32>,
    %c0_49 = arith.constant 0 : index
    %c0_50 = arith.constant 0 : index
    %78 = vector.load %arg22[%c0_49, %c0_50] : memref<18x256xf32, #tpu.memory_space<vmem>>, vector<18x256xf32>
    %79 = arith.truncf %78 : vector<18x256xf32> to vector<18x256xbf16>
    %cst_51 = arith.constant 0.000000e+00 : f32
    %80 = vector.broadcast %cst_51 : f32 to vector<16x512xf32>
    %81 = vector.extract_strided_slice %79 {offsets = [0, 0], sizes = [16, 256], strides = [1, 1]} : vector<18x256xbf16> to vector<16x256xbf16>
    %c0_52 = arith.constant 0 : index
    %c0_53 = arith.constant 0 : index
    %c0_54 = arith.constant 0 : index
    %82 = vector.load %arg4[%c0_52, %c0_53, %c0_54] : memref<3x256x512xbf16, #tpu.memory_space<vmem>>, vector<1x256x512xbf16>
    %83 = vector.shape_cast %82 : vector<1x256x512xbf16> to vector<256x512xbf16>
    %cst_55 = arith.constant dense<0.000000e+00> : vector<16x512xf32>
    %84 = tpu.matmul %81, %83, %cst_55 {dimension_numbers = #tpu.dot_dimension_numbers<[1], [0], [0], [1], [0, 0, 1, 1], [], []>} : vector<16x256xbf16>, vector<256x512xbf16>, vector<16x512xf32> -> vector<16x512xf32>
    %85 = arith.addf %80, %84 : vector<16x512xf32>
    %86 = vector.extract_strided_slice %79 {offsets = [1, 0], sizes = [16, 256], strides = [1, 1]} : vector<18x256xbf16> to vector<16x256xbf16>
    %c1_56 = arith.constant 1 : index
    %c0_57 = arith.constant 0 : index
    %c0_58 = arith.constant 0 : index
    %87 = vector.load %arg4[%c1_56, %c0_57, %c0_58] : memref<3x256x512xbf16, #tpu.memory_space<vmem>>, vector<1x256x512xbf16>
    %88 = vector.shape_cast %87 : vector<1x256x512xbf16> to vector<256x512xbf16>
    %cst_59 = arith.constant dense<0.000000e+00> : vector<16x512xf32>
    %89 = tpu.matmul %86, %88, %cst_59 {dimension_numbers = #tpu.dot_dimension_numbers<[1], [0], [0], [1], [0, 0, 1, 1], [], []>} : vector<16x256xbf16>, vector<256x512xbf16>, vector<16x512xf32> -> vector<16x512xf32>
    %90 = arith.addf %85, %89 : vector<16x512xf32>
    %91 = vector.extract_strided_slice %79 {offsets = [2, 0], sizes = [16, 256], strides = [1, 1]} : vector<18x256xbf16> to vector<16x256xbf16>
    %c2_60 = arith.constant 2 : index
    %c0_61 = arith.constant 0 : index
    %c0_62 = arith.constant 0 : index
    %92 = vector.load %arg4[%c2_60, %c0_61, %c0_62] : memref<3x256x512xbf16, #tpu.memory_space<vmem>>, vector<1x256x512xbf16>
    %93 = vector.shape_cast %92 : vector<1x256x512xbf16> to vector<256x512xbf16>
    %cst_63 = arith.constant dense<0.000000e+00> : vector<16x512xf32>
    %94 = tpu.matmul %91, %93, %cst_63 {dimension_numbers = #tpu.dot_dimension_numbers<[1], [0], [0], [1], [0, 0, 1, 1], [], []>} : vector<16x256xbf16>, vector<256x512xbf16>, vector<16x512xf32> -> vector<16x512xf32>
    %95 = arith.addf %90, %94 : vector<16x512xf32>
    %c0_64 = arith.constant 0 : index
    %c0_65 = arith.constant 0 : index
    %96 = vector.load %arg10[%c0_64, %c0_65] : memref<1x512xf32, #tpu.memory_space<vmem>>, vector<1x512xf32>
    %97 = vector.broadcast %96 : vector<1x512xf32> to vector<16x512xf32>
    %98 = arith.addf %95, %97 : vector<16x512xf32>
    %cst_66 = arith.constant 0.000000e+00 : f32
    %99 = vector.broadcast %cst_66 : f32 to vector<16x512xf32>
    %100 = arith.maximumf %98, %99 : vector<16x512xf32>
    %cst_67 = arith.constant 0.000000e+00 : f32
    %101 = vector.broadcast %cst_67 : f32 to vector<1x512xf32>
    %c0_68 = arith.constant 0 : index
    %c0_69 = arith.constant 0 : index
    %102 = vector.load %arg23[%c0_68, %c0_69] : memref<18x512xf32, #tpu.memory_space<vmem>>, vector<1x512xf32>
    tpu.vector_store %arg23[%c0_68, %c0_69], %101 {strides = array<i32>} : memref<18x512xf32, #tpu.memory_space<vmem>>, vector<1x512xf32>,
    %cst_70 = arith.constant 0.000000e+00 : f32
    %103 = vector.broadcast %cst_70 : f32 to vector<1x512xf32>
    %c17_71 = arith.constant 17 : index
    %c0_72 = arith.constant 0 : index
    %104 = vector.load %arg23[%c17_71, %c0_72] : memref<18x512xf32, #tpu.memory_space<vmem>>, vector<1x512xf32>
    tpu.vector_store %arg23[%c17_71, %c0_72], %103 {strides = array<i32>} : memref<18x512xf32, #tpu.memory_space<vmem>>, vector<1x512xf32>,
    %c1_73 = arith.constant 1 : index
    %c0_74 = arith.constant 0 : index
    %105 = vector.load %arg23[%c1_73, %c0_74] : memref<18x512xf32, #tpu.memory_space<vmem>>, vector<16x512xf32>
    tpu.vector_store %arg23[%c1_73, %c0_74], %100 {strides = array<i32>} : memref<18x512xf32, #tpu.memory_space<vmem>>, vector<16x512xf32>,
    %c0_75 = arith.constant 0 : index
    %c0_76 = arith.constant 0 : index
    %106 = vector.load %arg23[%c0_75, %c0_76] : memref<18x512xf32, #tpu.memory_space<vmem>>, vector<18x512xf32>
    %107 = arith.truncf %106 : vector<18x512xf32> to vector<18x512xbf16>
    %cst_77 = arith.constant 0.000000e+00 : f32
    %108 = vector.broadcast %cst_77 : f32 to vector<16x512xf32>
    %109 = vector.extract_strided_slice %107 {offsets = [0, 0], sizes = [16, 512], strides = [1, 1]} : vector<18x512xbf16> to vector<16x512xbf16>
    %c0_78 = arith.constant 0 : index
    %c0_79 = arith.constant 0 : index
    %c0_80 = arith.constant 0 : index
    %110 = vector.load %arg5[%c0_78, %c0_79, %c0_80] : memref<3x512x512xbf16, #tpu.memory_space<vmem>>, vector<1x512x512xbf16>
    %111 = vector.shape_cast %110 : vector<1x512x512xbf16> to vector<512x512xbf16>
    %cst_81 = arith.constant dense<0.000000e+00> : vector<16x512xf32>
    %112 = tpu.matmul %109, %111, %cst_81 {dimension_numbers = #tpu.dot_dimension_numbers<[1], [0], [0], [1], [0, 0, 1, 1], [], []>} : vector<16x512xbf16>, vector<512x512xbf16>, vector<16x512xf32> -> vector<16x512xf32>
    %113 = arith.addf %108, %112 : vector<16x512xf32>
    %114 = vector.extract_strided_slice %107 {offsets = [1, 0], sizes = [16, 512], strides = [1, 1]} : vector<18x512xbf16> to vector<16x512xbf16>
    %c1_82 = arith.constant 1 : index
    %c0_83 = arith.constant 0 : index
    %c0_84 = arith.constant 0 : index
    %115 = vector.load %arg5[%c1_82, %c0_83, %c0_84] : memref<3x512x512xbf16, #tpu.memory_space<vmem>>, vector<1x512x512xbf16>
    %116 = vector.shape_cast %115 : vector<1x512x512xbf16> to vector<512x512xbf16>
    %cst_85 = arith.constant dense<0.000000e+00> : vector<16x512xf32>
    %117 = tpu.matmul %114, %116, %cst_85 {dimension_numbers = #tpu.dot_dimension_numbers<[1], [0], [0], [1], [0, 0, 1, 1], [], []>} : vector<16x512xbf16>, vector<512x512xbf16>, vector<16x512xf32> -> vector<16x512xf32>
    %118 = arith.addf %113, %117 : vector<16x512xf32>
    %119 = vector.extract_strided_slice %107 {offsets = [2, 0], sizes = [16, 512], strides = [1, 1]} : vector<18x512xbf16> to vector<16x512xbf16>
    %c2_86 = arith.constant 2 : index
    %c0_87 = arith.constant 0 : index
    %c0_88 = arith.constant 0 : index
    %120 = vector.load %arg5[%c2_86, %c0_87, %c0_88] : memref<3x512x512xbf16, #tpu.memory_space<vmem>>, vector<1x512x512xbf16>
    %121 = vector.shape_cast %120 : vector<1x512x512xbf16> to vector<512x512xbf16>
    %cst_89 = arith.constant dense<0.000000e+00> : vector<16x512xf32>
    %122 = tpu.matmul %119, %121, %cst_89 {dimension_numbers = #tpu.dot_dimension_numbers<[1], [0], [0], [1], [0, 0, 1, 1], [], []>} : vector<16x512xbf16>, vector<512x512xbf16>, vector<16x512xf32> -> vector<16x512xf32>
    %123 = arith.addf %118, %122 : vector<16x512xf32>
    %124 = vector.extract_strided_slice %123 {offsets = [0, 0], sizes = [16, 256], strides = [1, 1]} : vector<16x512xf32> to vector<16x256xf32>
    %125 = vector.extract_strided_slice %123 {offsets = [0, 256], sizes = [16, 256], strides = [1, 1]} : vector<16x512xf32> to vector<16x256xf32>
    %126 = arith.maximumf %124, %125 : vector<16x256xf32>
    %127 = tpu.iota {dimensions = array<i32: 0>} : vector<16x16xi32>
    %128 = tpu.iota {dimensions = array<i32: 1>} : vector<16x16xi32>
    %c2_i32_90 = arith.constant 2 : i32
    %129 = vector.broadcast %c2_i32_90 : i32 to vector<16x16xi32>
    %130 = arith.muli %129, %127 : vector<16x16xi32>
    %131 = arith.cmpi eq, %128, %130 : vector<16x16xi32>
    %c8_i32 = arith.constant 8 : i32
    %132 = vector.broadcast %c8_i32 : i32 to vector<16x16xi32>
    %133 = arith.subi %127, %132 : vector<16x16xi32>
    %c2_i32_91 = arith.constant 2 : i32
    %134 = vector.broadcast %c2_i32_91 : i32 to vector<16x16xi32>
    %135 = arith.muli %134, %133 : vector<16x16xi32>
    %c1_i32_92 = arith.constant 1 : i32
    %136 = vector.broadcast %c1_i32_92 : i32 to vector<16x16xi32>
    %137 = arith.addi %135, %136 : vector<16x16xi32>
    %138 = arith.cmpi eq, %128, %137 : vector<16x16xi32>
    %139 = arith.ori %131, %138 : vector<16x16xi1>
    %140 = arith.extui %139 : vector<16x16xi1> to vector<16x16xi32>
    %141 = arith.sitofp %140 : vector<16x16xi32> to vector<16x16xf32>
    %cst_93 = arith.constant dense<0.000000e+00> : vector<16x256xf32>
    %142 = tpu.matmul %141, %126, %cst_93 {dimension_numbers = #tpu.dot_dimension_numbers<[1], [0], [0], [1], [0, 0, 1, 1], [], []>} : vector<16x16xf32>, vector<16x256xf32>, vector<16x256xf32> -> vector<16x256xf32>
    %143 = vector.extract_strided_slice %142 {offsets = [0, 0], sizes = [8, 256], strides = [1, 1]} : vector<16x256xf32> to vector<8x256xf32>
    %144 = vector.extract_strided_slice %142 {offsets = [8, 0], sizes = [8, 256], strides = [1, 1]} : vector<16x256xf32> to vector<8x256xf32>
    %145 = arith.maximumf %143, %144 : vector<8x256xf32>
    %c0_94 = arith.constant 0 : index
    %c0_95 = arith.constant 0 : index
    %146 = vector.load %arg11[%c0_94, %c0_95] : memref<1x256xf32, #tpu.memory_space<vmem>>, vector<1x256xf32>
    %147 = vector.broadcast %146 : vector<1x256xf32> to vector<8x256xf32>
    %148 = arith.addf %145, %147 : vector<8x256xf32>
    %cst_96 = arith.constant 0.000000e+00 : f32
    %149 = vector.broadcast %cst_96 : f32 to vector<8x256xf32>
    %150 = arith.maximumf %148, %149 : vector<8x256xf32>
    %cst_97 = arith.constant 0.000000e+00 : f32
    %151 = vector.broadcast %cst_97 : f32 to vector<1x256xf32>
    %c0_98 = arith.constant 0 : index
    %c0_99 = arith.constant 0 : index
    %152 = vector.load %arg24[%c0_98, %c0_99] : memref<10x256xf32, #tpu.memory_space<vmem>>, vector<1x256xf32>
    tpu.vector_store %arg24[%c0_98, %c0_99], %151 {strides = array<i32>} : memref<10x256xf32, #tpu.memory_space<vmem>>, vector<1x256xf32>,
    %cst_100 = arith.constant 0.000000e+00 : f32
    %153 = vector.broadcast %cst_100 : f32 to vector<1x256xf32>
    %c9 = arith.constant 9 : index
    %c0_101 = arith.constant 0 : index
    %154 = vector.load %arg24[%c9, %c0_101] : memref<10x256xf32, #tpu.memory_space<vmem>>, vector<1x256xf32>
    tpu.vector_store %arg24[%c9, %c0_101], %153 {strides = array<i32>} : memref<10x256xf32, #tpu.memory_space<vmem>>, vector<1x256xf32>,
    %c1_102 = arith.constant 1 : index
    %c0_103 = arith.constant 0 : index
    %155 = vector.load %arg24[%c1_102, %c0_103] : memref<10x256xf32, #tpu.memory_space<vmem>>, vector<8x256xf32>
    tpu.vector_store %arg24[%c1_102, %c0_103], %150 {strides = array<i32>} : memref<10x256xf32, #tpu.memory_space<vmem>>, vector<8x256xf32>,
    %c0_104 = arith.constant 0 : index
    %c0_105 = arith.constant 0 : index
    %156 = vector.load %arg24[%c0_104, %c0_105] : memref<10x256xf32, #tpu.memory_space<vmem>>, vector<10x256xf32>
    %157 = arith.truncf %156 : vector<10x256xf32> to vector<10x256xbf16>
    %cst_106 = arith.constant 0.000000e+00 : f32
    %158 = vector.broadcast %cst_106 : f32 to vector<8x512xf32>
    %159 = vector.extract_strided_slice %157 {offsets = [0, 0], sizes = [8, 256], strides = [1, 1]} : vector<10x256xbf16> to vector<8x256xbf16>
    %c0_107 = arith.constant 0 : index
    %c0_108 = arith.constant 0 : index
    %c0_109 = arith.constant 0 : index
    %160 = vector.load %arg6[%c0_107, %c0_108, %c0_109] : memref<3x256x512xbf16, #tpu.memory_space<vmem>>, vector<1x256x512xbf16>
    %161 = vector.shape_cast %160 : vector<1x256x512xbf16> to vector<256x512xbf16>
    %cst_110 = arith.constant dense<0.000000e+00> : vector<8x512xf32>
    %162 = tpu.matmul %159, %161, %cst_110 {dimension_numbers = #tpu.dot_dimension_numbers<[1], [0], [0], [1], [0, 0, 1, 1], [], []>} : vector<8x256xbf16>, vector<256x512xbf16>, vector<8x512xf32> -> vector<8x512xf32>
    %163 = arith.addf %158, %162 : vector<8x512xf32>
    %164 = vector.extract_strided_slice %157 {offsets = [1, 0], sizes = [8, 256], strides = [1, 1]} : vector<10x256xbf16> to vector<8x256xbf16>
    %c1_111 = arith.constant 1 : index
    %c0_112 = arith.constant 0 : index
    %c0_113 = arith.constant 0 : index
    %165 = vector.load %arg6[%c1_111, %c0_112, %c0_113] : memref<3x256x512xbf16, #tpu.memory_space<vmem>>, vector<1x256x512xbf16>
    %166 = vector.shape_cast %165 : vector<1x256x512xbf16> to vector<256x512xbf16>
    %cst_114 = arith.constant dense<0.000000e+00> : vector<8x512xf32>
    %167 = tpu.matmul %164, %166, %cst_114 {dimension_numbers = #tpu.dot_dimension_numbers<[1], [0], [0], [1], [0, 0, 1, 1], [], []>} : vector<8x256xbf16>, vector<256x512xbf16>, vector<8x512xf32> -> vector<8x512xf32>
    %168 = arith.addf %163, %167 : vector<8x512xf32>
    %169 = vector.extract_strided_slice %157 {offsets = [2, 0], sizes = [8, 256], strides = [1, 1]} : vector<10x256xbf16> to vector<8x256xbf16>
    %c2_115 = arith.constant 2 : index
    %c0_116 = arith.constant 0 : index
    %c0_117 = arith.constant 0 : index
    %170 = vector.load %arg6[%c2_115, %c0_116, %c0_117] : memref<3x256x512xbf16, #tpu.memory_space<vmem>>, vector<1x256x512xbf16>
    %171 = vector.shape_cast %170 : vector<1x256x512xbf16> to vector<256x512xbf16>
    %cst_118 = arith.constant dense<0.000000e+00> : vector<8x512xf32>
    %172 = tpu.matmul %169, %171, %cst_118 {dimension_numbers = #tpu.dot_dimension_numbers<[1], [0], [0], [1], [0, 0, 1, 1], [], []>} : vector<8x256xbf16>, vector<256x512xbf16>, vector<8x512xf32> -> vector<8x512xf32>
    %173 = arith.addf %168, %172 : vector<8x512xf32>
    %c0_119 = arith.constant 0 : index
    %c0_120 = arith.constant 0 : index
    %174 = vector.load %arg12[%c0_119, %c0_120] : memref<1x512xf32, #tpu.memory_space<vmem>>, vector<1x512xf32>
    %175 = vector.broadcast %174 : vector<1x512xf32> to vector<8x512xf32>
    %176 = arith.addf %173, %175 : vector<8x512xf32>
    %cst_121 = arith.constant 0.000000e+00 : f32
    %177 = vector.broadcast %cst_121 : f32 to vector<8x512xf32>
    %178 = arith.maximumf %176, %177 : vector<8x512xf32>
    %cst_122 = arith.constant 0.000000e+00 : f32
    %179 = vector.broadcast %cst_122 : f32 to vector<1x512xf32>
    %c0_123 = arith.constant 0 : index
    %c0_124 = arith.constant 0 : index
    %180 = vector.load %arg25[%c0_123, %c0_124] : memref<10x512xf32, #tpu.memory_space<vmem>>, vector<1x512xf32>
    tpu.vector_store %arg25[%c0_123, %c0_124], %179 {strides = array<i32>} : memref<10x512xf32, #tpu.memory_space<vmem>>, vector<1x512xf32>,
    %cst_125 = arith.constant 0.000000e+00 : f32
    %181 = vector.broadcast %cst_125 : f32 to vector<1x512xf32>
    %c9_126 = arith.constant 9 : index
    %c0_127 = arith.constant 0 : index
    %182 = vector.load %arg25[%c9_126, %c0_127] : memref<10x512xf32, #tpu.memory_space<vmem>>, vector<1x512xf32>
    tpu.vector_store %arg25[%c9_126, %c0_127], %181 {strides = array<i32>} : memref<10x512xf32, #tpu.memory_space<vmem>>, vector<1x512xf32>,
    %c1_128 = arith.constant 1 : index
    %c0_129 = arith.constant 0 : index
    %183 = vector.load %arg25[%c1_128, %c0_129] : memref<10x512xf32, #tpu.memory_space<vmem>>, vector<8x512xf32>
    tpu.vector_store %arg25[%c1_128, %c0_129], %178 {strides = array<i32>} : memref<10x512xf32, #tpu.memory_space<vmem>>, vector<8x512xf32>,
    %c0_130 = arith.constant 0 : index
    %c0_131 = arith.constant 0 : index
    %184 = vector.load %arg25[%c0_130, %c0_131] : memref<10x512xf32, #tpu.memory_space<vmem>>, vector<10x512xf32>
    %185 = arith.truncf %184 : vector<10x512xf32> to vector<10x512xbf16>
    %cst_132 = arith.constant 0.000000e+00 : f32
    %186 = vector.broadcast %cst_132 : f32 to vector<8x512xf32>
    %187 = vector.extract_strided_slice %185 {offsets = [0, 0], sizes = [8, 512], strides = [1, 1]} : vector<10x512xbf16> to vector<8x512xbf16>
    %c0_133 = arith.constant 0 : index
    %c0_134 = arith.constant 0 : index
    %c0_135 = arith.constant 0 : index
    %188 = vector.load %arg7[%c0_133, %c0_134, %c0_135] : memref<3x512x512xbf16, #tpu.memory_space<vmem>>, vector<1x512x512xbf16>
    %189 = vector.shape_cast %188 : vector<1x512x512xbf16> to vector<512x512xbf16>
    %cst_136 = arith.constant dense<0.000000e+00> : vector<8x512xf32>
    %190 = tpu.matmul %187, %189, %cst_136 {dimension_numbers = #tpu.dot_dimension_numbers<[1], [0], [0], [1], [0, 0, 1, 1], [], []>} : vector<8x512xbf16>, vector<512x512xbf16>, vector<8x512xf32> -> vector<8x512xf32>
    %191 = arith.addf %186, %190 : vector<8x512xf32>
    %192 = vector.extract_strided_slice %185 {offsets = [1, 0], sizes = [8, 512], strides = [1, 1]} : vector<10x512xbf16> to vector<8x512xbf16>
    %c1_137 = arith.constant 1 : index
    %c0_138 = arith.constant 0 : index
    %c0_139 = arith.constant 0 : index
    %193 = vector.load %arg7[%c1_137, %c0_138, %c0_139] : memref<3x512x512xbf16, #tpu.memory_space<vmem>>, vector<1x512x512xbf16>
    %194 = vector.shape_cast %193 : vector<1x512x512xbf16> to vector<512x512xbf16>
    %cst_140 = arith.constant dense<0.000000e+00> : vector<8x512xf32>
    %195 = tpu.matmul %192, %194, %cst_140 {dimension_numbers = #tpu.dot_dimension_numbers<[1], [0], [0], [1], [0, 0, 1, 1], [], []>} : vector<8x512xbf16>, vector<512x512xbf16>, vector<8x512xf32> -> vector<8x512xf32>
    %196 = arith.addf %191, %195 : vector<8x512xf32>
    %197 = vector.extract_strided_slice %185 {offsets = [2, 0], sizes = [8, 512], strides = [1, 1]} : vector<10x512xbf16> to vector<8x512xbf16>
    %c2_141 = arith.constant 2 : index
    %c0_142 = arith.constant 0 : index
    %c0_143 = arith.constant 0 : index
    %198 = vector.load %arg7[%c2_141, %c0_142, %c0_143] : memref<3x512x512xbf16, #tpu.memory_space<vmem>>, vector<1x512x512xbf16>
    %199 = vector.shape_cast %198 : vector<1x512x512xbf16> to vector<512x512xbf16>
    %cst_144 = arith.constant dense<0.000000e+00> : vector<8x512xf32>
    %200 = tpu.matmul %197, %199, %cst_144 {dimension_numbers = #tpu.dot_dimension_numbers<[1], [0], [0], [1], [0, 0, 1, 1], [], []>} : vector<8x512xbf16>, vector<512x512xbf16>, vector<8x512xf32> -> vector<8x512xf32>
    %201 = arith.addf %196, %200 : vector<8x512xf32>
    %202 = vector.extract_strided_slice %201 {offsets = [0, 0], sizes = [8, 256], strides = [1, 1]} : vector<8x512xf32> to vector<8x256xf32>
    %203 = vector.extract_strided_slice %201 {offsets = [0, 256], sizes = [8, 256], strides = [1, 1]} : vector<8x512xf32> to vector<8x256xf32>
    %204 = arith.maximumf %202, %203 : vector<8x256xf32>
    %205 = tpu.iota {dimensions = array<i32: 0>} : vector<8x8xi32>
    %206 = tpu.iota {dimensions = array<i32: 1>} : vector<8x8xi32>
    %c2_i32_145 = arith.constant 2 : i32
    %207 = vector.broadcast %c2_i32_145 : i32 to vector<8x8xi32>
    %208 = arith.muli %207, %205 : vector<8x8xi32>
    %209 = arith.cmpi eq, %206, %208 : vector<8x8xi32>
    %c4_i32 = arith.constant 4 : i32
    %210 = vector.broadcast %c4_i32 : i32 to vector<8x8xi32>
    %211 = arith.subi %205, %210 : vector<8x8xi32>
    %c2_i32_146 = arith.constant 2 : i32
    %212 = vector.broadcast %c2_i32_146 : i32 to vector<8x8xi32>
    %213 = arith.muli %212, %211 : vector<8x8xi32>
    %c1_i32_147 = arith.constant 1 : i32
    %214 = vector.broadcast %c1_i32_147 : i32 to vector<8x8xi32>
    %215 = arith.addi %213, %214 : vector<8x8xi32>
    %216 = arith.cmpi eq, %206, %215 : vector<8x8xi32>
    %217 = arith.ori %209, %216 : vector<8x8xi1>
    %218 = arith.extui %217 : vector<8x8xi1> to vector<8x8xi32>
    %219 = arith.sitofp %218 : vector<8x8xi32> to vector<8x8xf32>
    %cst_148 = arith.constant dense<0.000000e+00> : vector<8x256xf32>
    %220 = tpu.matmul %219, %204, %cst_148 {dimension_numbers = #tpu.dot_dimension_numbers<[1], [0], [0], [1], [0, 0, 1, 1], [], []>} : vector<8x8xf32>, vector<8x256xf32>, vector<8x256xf32> -> vector<8x256xf32>
    %221 = vector.extract_strided_slice %220 {offsets = [0, 0], sizes = [4, 256], strides = [1, 1]} : vector<8x256xf32> to vector<4x256xf32>
    %222 = vector.extract_strided_slice %220 {offsets = [4, 0], sizes = [4, 256], strides = [1, 1]} : vector<8x256xf32> to vector<4x256xf32>
    %223 = arith.maximumf %221, %222 : vector<4x256xf32>
    %c0_149 = arith.constant 0 : index
    %c0_150 = arith.constant 0 : index
    %224 = vector.load %arg13[%c0_149, %c0_150] : memref<1x256xf32, #tpu.memory_space<vmem>>, vector<1x256xf32>
    %225 = vector.broadcast %224 : vector<1x256xf32> to vector<4x256xf32>
    %226 = arith.addf %223, %225 : vector<4x256xf32>
    %cst_151 = arith.constant 0.000000e+00 : f32
    %227 = vector.broadcast %cst_151 : f32 to vector<4x256xf32>
    %228 = arith.maximumf %226, %227 : vector<4x256xf32>
    %cst_152 = arith.constant 0.000000e+00 : f32
    %229 = vector.broadcast %cst_152 : f32 to vector<1x64xf32>
    %230 = vector.extract_strided_slice %228 {offsets = [0, 0], sizes = [1, 256], strides = [1, 1]} : vector<4x256xf32> to vector<1x256xf32>
    %c0_153 = arith.constant 0 : index
    %c0_154 = arith.constant 0 : index
    %c0_155 = arith.constant 0 : index
    %231 = vector.load %arg14[%c0_153, %c0_154, %c0_155] : memref<4x256x64xf32, #tpu.memory_space<vmem>>, vector<1x256x64xf32>
    %232 = vector.shape_cast %231 : vector<1x256x64xf32> to vector<256x64xf32>
    %cst_156 = arith.constant dense<0.000000e+00> : vector<1x64xf32>
    %233 = tpu.matmul %230, %232, %cst_156 {dimension_numbers = #tpu.dot_dimension_numbers<[1], [0], [0], [1], [0, 0, 1, 1], [], []>} : vector<1x256xf32>, vector<256x64xf32>, vector<1x64xf32> -> vector<1x64xf32>
    %234 = arith.addf %229, %233 : vector<1x64xf32>
    %235 = vector.extract_strided_slice %228 {offsets = [1, 0], sizes = [1, 256], strides = [1, 1]} : vector<4x256xf32> to vector<1x256xf32>
    %c1_157 = arith.constant 1 : index
    %c0_158 = arith.constant 0 : index
    %c0_159 = arith.constant 0 : index
    %236 = vector.load %arg14[%c1_157, %c0_158, %c0_159] : memref<4x256x64xf32, #tpu.memory_space<vmem>>, vector<1x256x64xf32>
    %237 = vector.shape_cast %236 : vector<1x256x64xf32> to vector<256x64xf32>
    %cst_160 = arith.constant dense<0.000000e+00> : vector<1x64xf32>
    %238 = tpu.matmul %235, %237, %cst_160 {dimension_numbers = #tpu.dot_dimension_numbers<[1], [0], [0], [1], [0, 0, 1, 1], [], []>} : vector<1x256xf32>, vector<256x64xf32>, vector<1x64xf32> -> vector<1x64xf32>
    %239 = arith.addf %234, %238 : vector<1x64xf32>
    %240 = vector.extract_strided_slice %228 {offsets = [2, 0], sizes = [1, 256], strides = [1, 1]} : vector<4x256xf32> to vector<1x256xf32>
    %c2_161 = arith.constant 2 : index
    %c0_162 = arith.constant 0 : index
    %c0_163 = arith.constant 0 : index
    %241 = vector.load %arg14[%c2_161, %c0_162, %c0_163] : memref<4x256x64xf32, #tpu.memory_space<vmem>>, vector<1x256x64xf32>
    %242 = vector.shape_cast %241 : vector<1x256x64xf32> to vector<256x64xf32>
    %cst_164 = arith.constant dense<0.000000e+00> : vector<1x64xf32>
    %243 = tpu.matmul %240, %242, %cst_164 {dimension_numbers = #tpu.dot_dimension_numbers<[1], [0], [0], [1], [0, 0, 1, 1], [], []>} : vector<1x256xf32>, vector<256x64xf32>, vector<1x64xf32> -> vector<1x64xf32>
    %244 = arith.addf %239, %243 : vector<1x64xf32>
    %245 = vector.extract_strided_slice %228 {offsets = [3, 0], sizes = [1, 256], strides = [1, 1]} : vector<4x256xf32> to vector<1x256xf32>
    %c3 = arith.constant 3 : index
    %c0_165 = arith.constant 0 : index
    %c0_166 = arith.constant 0 : index
    %246 = vector.load %arg14[%c3, %c0_165, %c0_166] : memref<4x256x64xf32, #tpu.memory_space<vmem>>, vector<1x256x64xf32>
    %247 = vector.shape_cast %246 : vector<1x256x64xf32> to vector<256x64xf32>
    %cst_167 = arith.constant dense<0.000000e+00> : vector<1x64xf32>
    %248 = tpu.matmul %245, %247, %cst_167 {dimension_numbers = #tpu.dot_dimension_numbers<[1], [0], [0], [1], [0, 0, 1, 1], [], []>} : vector<1x256xf32>, vector<256x64xf32>, vector<1x64xf32> -> vector<1x64xf32>
    %249 = arith.addf %244, %248 : vector<1x64xf32>
    %c0_168 = arith.constant 0 : index
    %c0_169 = arith.constant 0 : index
    %250 = vector.load %arg17[%c0_168, %c0_169] : memref<1x64xf32, #tpu.memory_space<vmem>>, vector<1x64xf32>
    %251 = arith.addf %249, %250 : vector<1x64xf32>
    %cst_170 = arith.constant 0.000000e+00 : f32
    %252 = vector.broadcast %cst_170 : f32 to vector<1x64xf32>
    %253 = arith.maximumf %251, %252 : vector<1x64xf32>
    %c0_171 = arith.constant 0 : index
    %c0_172 = arith.constant 0 : index
    %254 = vector.load %arg15[%c0_171, %c0_172] : memref<64x64xf32, #tpu.memory_space<vmem>>, vector<64x64xf32>
    %cst_173 = arith.constant dense<0.000000e+00> : vector<1x64xf32>
    %255 = tpu.matmul %253, %254, %cst_173 {dimension_numbers = #tpu.dot_dimension_numbers<[1], [0], [0], [1], [0, 0, 1, 1], [], []>} : vector<1x64xf32>, vector<64x64xf32>, vector<1x64xf32> -> vector<1x64xf32>
    %c0_174 = arith.constant 0 : index
    %c0_175 = arith.constant 0 : index
    %256 = vector.load %arg18[%c0_174, %c0_175] : memref<1x64xf32, #tpu.memory_space<vmem>>, vector<1x64xf32>
    %257 = arith.addf %255, %256 : vector<1x64xf32>
    %cst_176 = arith.constant 0.000000e+00 : f32
    %258 = vector.broadcast %cst_176 : f32 to vector<1x64xf32>
    %259 = arith.maximumf %257, %258 : vector<1x64xf32>
    %c0_177 = arith.constant 0 : index
    %c0_178 = arith.constant 0 : index
    %260 = vector.load %arg16[%c0_177, %c0_178] : memref<64x10xf32, #tpu.memory_space<vmem>>, vector<64x10xf32>
    %cst_179 = arith.constant dense<0.000000e+00> : vector<1x10xf32>
    %261 = tpu.matmul %259, %260, %cst_179 {dimension_numbers = #tpu.dot_dimension_numbers<[1], [0], [0], [1], [0, 0, 1, 1], [], []>} : vector<1x64xf32>, vector<64x10xf32>, vector<1x10xf32> -> vector<1x10xf32>
    %c0_180 = arith.constant 0 : index
    %c0_181 = arith.constant 0 : index
    %262 = vector.load %arg19[%c0_180, %c0_181] : memref<1x10xf32, #tpu.memory_space<vmem>>, vector<1x10xf32>
    %263 = arith.addf %261, %262 : vector<1x10xf32>
    %c0_182 = arith.constant 0 : index
    %c0_183 = arith.constant 0 : index
    %c0_184 = arith.constant 0 : index
    %264 = vector.load %arg20[%c0_182, %c0_183, %c0_184] : memref<1x1x10xf32, #tpu.memory_space<vmem>>, vector<1x1x10xf32>
    %265 = vector.shape_cast %264 : vector<1x1x10xf32> to vector<1x10xf32>
    %266 = vector.shape_cast %263 : vector<1x10xf32> to vector<1x1x10xf32>
    tpu.vector_store %arg20[%c0_182, %c0_183, %c0_184], %266 {strides = array<i32>} : memref<1x1x10xf32, #tpu.memory_space<vmem>>, vector<1x1x10xf32>,
    return
  }
  func.func @transform_0(%arg0: i32) -> (i32, i32, i32) {
    %c0_i32 = arith.constant 0 : i32
    %c0_i32_0 = arith.constant 0 : i32
    %c0_i32_1 = arith.constant 0 : i32
    return %arg0, %c0_i32, %c0_i32_0 : i32, i32, i32
  }
  func.func @transform_1(%arg0: i32) -> (i32, i32, i32) {
    %c0_i32 = arith.constant 0 : i32
    %c0_i32_0 = arith.constant 0 : i32
    %c0_i32_1 = arith.constant 0 : i32
    %c0_i32_2 = arith.constant 0 : i32
    return %c0_i32, %c0_i32_0, %c0_i32_1 : i32, i32, i32
  }
  func.func @transform_2(%arg0: i32) -> (i32, i32, i32) {
    %c0_i32 = arith.constant 0 : i32
    %c0_i32_0 = arith.constant 0 : i32
    %c0_i32_1 = arith.constant 0 : i32
    %c0_i32_2 = arith.constant 0 : i32
    return %c0_i32, %c0_i32_0, %c0_i32_1 : i32, i32, i32
  }
  func.func @transform_3(%arg0: i32) -> (i32, i32, i32) {
    %c0_i32 = arith.constant 0 : i32
    %c0_i32_0 = arith.constant 0 : i32
    %c0_i32_1 = arith.constant 0 : i32
    %c0_i32_2 = arith.constant 0 : i32
    return %c0_i32, %c0_i32_0, %c0_i32_1 : i32, i32, i32
  }
  func.func @transform_4(%arg0: i32) -> (i32, i32, i32) {
    %c0_i32 = arith.constant 0 : i32
    %c0_i32_0 = arith.constant 0 : i32
    %c0_i32_1 = arith.constant 0 : i32
    %c0_i32_2 = arith.constant 0 : i32
    return %c0_i32, %c0_i32_0, %c0_i32_1 : i32, i32, i32
  }
  func.func @transform_5(%arg0: i32) -> (i32, i32, i32) {
    %c0_i32 = arith.constant 0 : i32
    %c0_i32_0 = arith.constant 0 : i32
    %c0_i32_1 = arith.constant 0 : i32
    %c0_i32_2 = arith.constant 0 : i32
    return %c0_i32, %c0_i32_0, %c0_i32_1 : i32, i32, i32
  }
  func.func @transform_6(%arg0: i32) -> (i32, i32, i32) {
    %c0_i32 = arith.constant 0 : i32
    %c0_i32_0 = arith.constant 0 : i32
    %c0_i32_1 = arith.constant 0 : i32
    %c0_i32_2 = arith.constant 0 : i32
    return %c0_i32, %c0_i32_0, %c0_i32_1 : i32, i32, i32
  }
  func.func @transform_7(%arg0: i32) -> (i32, i32) {
    %c0_i32 = arith.constant 0 : i32
    %c0_i32_0 = arith.constant 0 : i32
    %c0_i32_1 = arith.constant 0 : i32
    return %c0_i32, %c0_i32_0 : i32, i32
  }
  func.func @transform_8(%arg0: i32) -> (i32, i32) {
    %c0_i32 = arith.constant 0 : i32
    %c0_i32_0 = arith.constant 0 : i32
    %c0_i32_1 = arith.constant 0 : i32
    return %c0_i32, %c0_i32_0 : i32, i32
  }
  func.func @transform_9(%arg0: i32) -> (i32, i32) {
    %c0_i32 = arith.constant 0 : i32
    %c0_i32_0 = arith.constant 0 : i32
    %c0_i32_1 = arith.constant 0 : i32
    return %c0_i32, %c0_i32_0 : i32, i32
  }
  func.func @transform_10(%arg0: i32) -> (i32, i32) {
    %c0_i32 = arith.constant 0 : i32
    %c0_i32_0 = arith.constant 0 : i32
    %c0_i32_1 = arith.constant 0 : i32
    return %c0_i32, %c0_i32_0 : i32, i32
  }
  func.func @transform_11(%arg0: i32) -> (i32, i32) {
    %c0_i32 = arith.constant 0 : i32
    %c0_i32_0 = arith.constant 0 : i32
    %c0_i32_1 = arith.constant 0 : i32
    return %c0_i32, %c0_i32_0 : i32, i32
  }
  func.func @transform_12(%arg0: i32) -> (i32, i32) {
    %c0_i32 = arith.constant 0 : i32
    %c0_i32_0 = arith.constant 0 : i32
    %c0_i32_1 = arith.constant 0 : i32
    return %c0_i32, %c0_i32_0 : i32, i32
  }
  func.func @transform_13(%arg0: i32) -> (i32, i32, i32) {
    %c0_i32 = arith.constant 0 : i32
    %c0_i32_0 = arith.constant 0 : i32
    %c0_i32_1 = arith.constant 0 : i32
    %c0_i32_2 = arith.constant 0 : i32
    return %c0_i32, %c0_i32_0, %c0_i32_1 : i32, i32, i32
  }
  func.func @transform_14(%arg0: i32) -> (i32, i32) {
    %c0_i32 = arith.constant 0 : i32
    %c0_i32_0 = arith.constant 0 : i32
    %c0_i32_1 = arith.constant 0 : i32
    return %c0_i32, %c0_i32_0 : i32, i32
  }
  func.func @transform_15(%arg0: i32) -> (i32, i32) {
    %c0_i32 = arith.constant 0 : i32
    %c0_i32_0 = arith.constant 0 : i32
    %c0_i32_1 = arith.constant 0 : i32
    return %c0_i32, %c0_i32_0 : i32, i32
  }
  func.func @transform_16(%arg0: i32) -> (i32, i32) {
    %c0_i32 = arith.constant 0 : i32
    %c0_i32_0 = arith.constant 0 : i32
    %c0_i32_1 = arith.constant 0 : i32
    return %c0_i32, %c0_i32_0 : i32, i32
  }
  func.func @transform_17(%arg0: i32) -> (i32, i32) {
    %c0_i32 = arith.constant 0 : i32
    %c0_i32_0 = arith.constant 0 : i32
    %c0_i32_1 = arith.constant 0 : i32
    return %c0_i32, %c0_i32_0 : i32, i32
  }
  func.func @transform_18(%arg0: i32) -> (i32, i32) {
    %c0_i32 = arith.constant 0 : i32
    %c0_i32_0 = arith.constant 0 : i32
    %c0_i32_1 = arith.constant 0 : i32
    return %c0_i32, %c0_i32_0 : i32, i32
  }
  func.func @transform_19(%arg0: i32) -> (i32, i32, i32) {
    %c0_i32 = arith.constant 0 : i32
    %c0_i32_0 = arith.constant 0 : i32
    %c0_i32_1 = arith.constant 0 : i32
    return %arg0, %c0_i32, %c0_i32_0 : i32, i32, i32
  }
}

</mosaic_0001>

<bundles_post_ra>
// kernel: conv6_forward.1
= control target key start
LH: loop header
LB: loop body
LE: loop exit
PB: predicated region body
PF: predicated region fallthrough
CT: control target
= control target key end

     0   :  { %s22593_s0 = inlined_call_operand.vmem [shape: bf16[2,34,96], index: 0, kind: input, shape index: {}]   ;;  %s22594_s1 = inlined_call_operand.hbm [shape: bf16[3,96,512], index: 1, kind: input, shape index: {}]   ;;  %s22595_s2 = inlined_call_operand.hbm [shape: bf16[3,512,512], index: 2, kind: input, shape index: {}]   ;;  %s22596_s3 = inlined_call_operand.vmem [shape: bf16[3,256,512], index: 3, kind: input, shape index: {}]   ;;  %s22597_s4 = inlined_call_operand.hbm [shape: bf16[3,512,512], index: 4, kind: input, shape index: {}]   ;;  %s22598_s5 = inlined_call_operand.hbm [shape: bf16[3,256,512], index: 5, kind: input, shape index: {}]   ;;  %s22599_s6 = inlined_call_operand.hbm [shape: bf16[3,512,512], index: 6, kind: input, shape index: {}]   ;;  %s22600_s7 = inlined_call_operand.hbm [shape: f32[1,512], index: 7, kind: input, shape index: {}]   ;;  %s22601_s8 = inlined_call_operand.hbm [shape: f32[1,256], index: 8, kind: input, shape index: {}]   ;;  %s22602_s9 = inlined_call_operand.hbm [shape: f32[1,512], index: 9, kind: input, shape index: {}]   ;;  %s22603_s10 = inlined_call_operand.hbm [shape: f32[1,256], index: 10, kind: input, shape index: {}]   ;;  %s22604_s11 = inlined_call_operand.hbm [shape: f32[1,512], index: 11, kind: input, shape index: {}]   ;;  %s22605_s12 = inlined_call_operand.hbm [shape: f32[1,256], index: 12, kind: input, shape index: {}]   ;;  %s22606_s13 = inlined_call_operand.vmem [shape: f32[4,256,64], index: 13, kind: input, shape index: {}]   ;;  %s22607_s14 = inlined_call_operand.hbm [shape: f32[64,64], index: 14, kind: input, shape index: {}]   ;;  %s22608_s15 = inlined_call_operand.vmem [shape: f32[64,10], index: 15, kind: input, shape index: {}]   ;;  %s22609_s16 = inlined_call_operand.hbm [shape: f32[1,64], index: 16, kind: input, shape index: {}]   ;;  %s22610_s17 = inlined_call_operand.hbm [shape: f32[1,64], index: 17, kind: input, shape index: {}]   ;;  %s22611_s18 = inlined_call_operand.hbm [shape: f32[1,10], index: 18, kind: input, shape index: {}]   ;;  %s22612_s19 = inlined_call_operand.hbm [shape: f32[2,1,10], index: 19, kind: output, shape index: {}]  }
   0x1   :  { %22637 = sst [smem:[#allocation50_spill]] %s22593_s0 }
   0x2   :  { %22638 = sst [smem:[#allocation51_spill]] %s22594_s1 }
   0x3   :  { %22639 = sst [smem:[#allocation52_spill]] %s22595_s2 }
   0x4   :  { %22640 = sst [smem:[#allocation53_spill]] %s22596_s3 }
   0x5   :  { %22641 = sst [smem:[#allocation54_spill]] %s22598_s5 }
   0x6   :  { %22642 = sst [smem:[#allocation55_spill]] %s22606_s13 }
   0x7   :  { %22643 = sst [smem:[#allocation56_spill]] %s22608_s15 }
   0x8   :  { %22644 = sst [smem:[#allocation57_spill]] %s22612_s19 }
   0x9   :  { %24 = vsyncpa [#allocation8], 0 }
   0xa   :  { %25 = vsyncpa [#allocation11], 0 }
   0xb   :  { %26 = vsyncpa [#allocation14], 0 }
   0xc   :  { %27 = vsyncpa [#allocation17], 0 }
   0xd   :  { %28 = vsyncpa [#allocation20], 0 }
   0xe   :  { %29 = vsyncpa [#allocation23], 0 }
   0xf   :  { %30 = vsyncpa [#allocation26], 0 }
  0x10   :  { %31 = vsyncpa [#allocation29], 0 }
  0x11   :  { %32 = vsyncpa [#allocation9], 0 }
  0x12   :  { %34 = vsyncpa [#allocation9 + $0x1], 0  ;;  %s20705_s0 = smov 0   ;;  %s20707_s30 = smov 0  }
  0x13   :  { %s20709_s20 = smov 0   ;;  %s20711_s21 = smov 0  }
  0x14 LB: > { %22645 = sst [smem:[#allocation41_spill]] %s20567_s0  ;;  %s20726_s1 = sadd.s32 4294967295, %s20579_s21   ;;  %s20579_s21 = sphi %s20711_s21, %s22698_s21   ;;  %s20575_s20 = sphi %s20709_s20, %s22701_s20   ;;  %s20571_s30 = sphi %s20707_s30, %s22700_s30   ;;  %s20567_s0 = sphi %s20705_s0, %s22699_s0  }
  0x15   : > { %22646 = sst [smem:[#allocation42_spill]] %s20571_s30  ;;  %s14977_s22 = sadd.s32 4294967294, %s20579_s21  }
  0x16   : > { %22647 = sst [smem:[#allocation43_spill]] %s20575_s20  ;;  %s20730_s2 = sadd.s32 1, %s20579_s21  }
  0x17   : > { %22648 = sst [smem:[#allocation44_spill]] %s20579_s21  ;;  %s451_s23 = sadd.s32 1, %s20575_s20 }
  0x18   : > { %22649 = sst [smem:[#allocation45_spill]] %s20726_s1  ;;  %s448_s24 = ssub.s32 %s20579_s21, %s20730_s2 }
  0x19   : > { %22650 = sst [smem:[#allocation46_spill]] %s20730_s2  ;;  %p461_p0 = scmp.ne.s32.totalorder %s20575_s20, %s20571_s30 }
  0x1a   : > { %p449_p1 = scmp.eq.s32.totalorder %s448_s24, 0  ;;  %p462_p2 = scmp.eq.s32.totalorder %s20726_s1, 1 }
  0x1b   : > { %p467_p3 = scmp.ne.s32.totalorder %s20571_s30, %s20567_s0  ;;  %p468_p4 = scmp.eq.s32.totalorder %s14977_s22, 1 }
  0x1c   : > { %s20741_s25 = scalar_select %p449_p1, %s20575_s20, %s451_s23  }
  0x1d   : > { %p20743_p5 = por %p462_p2, %p461_p0  ;;  %p20747_p6 = por %p468_p4, %p467_p3 }
  0x1e   : > { %22651 = sst [smem:[#allocation47_spill]] %s20741_s25  ;;  %p14978_p7 = scmp.ge.s32.totalorder %s20579_s21, 1 }
  0x1f   : > { %s22652_s3 = scalar_select %p20743_p5, 1, 0 }
  0x20   : > { %s22654_s26 = scalar_select %p20747_p6, 1, 0 }
  0x21   : > { %22653 = sst [smem:[#allocation48_spill]] %s22652_s3  ;;  %p475_p8 = scmp.lt.s32.totalorder %s20579_s21, 3 }
  0x22   : > { %22655 = sst [smem:[#allocation49_spill]] %s22654_s26  ;;  %p22626_p9 = scmp.eq.s32.totalorder %s20726_s1, 0 }
  0x23   : > { %p20754_p10 = pnand %p14978_p7, %p475_p8  ;;  %s20581_s28 = smov [#allocation10]  }
  0x24   : > { %s500_s29 = sshll.u32 %s20581_s28, 4  ;;  %s20582_s23 = smov [#allocation13]   ;;  %s20760_s29 = int_to_ptr.vmem [resolvable:$true] %s500_s29 }
  0x25   : > { %s22656_s27 = scalar_select %p20754_p10, 1, 0 }
  0x26   : > { %p17514_p11 = pneg %p20754_p10  ;;  %s529_s24 = sshll.u32 %s20582_s23, 4  ;;  %s20768_s24 = int_to_ptr.vmem [resolvable:$true] %s529_s24 }
  0x27   : > { %s20583_s25 = smov [#allocation16]   ;;  %s22658_s0 = sld [smem:[#allocation52_spill]] }
  0x28   : > { %p20764_p12 = pnand %p22626_p9, %p17514_p11  ;;  %s20770_s20 = sshll.u32 %s20583_s25, 4  ;;  %s557_s20 = int_to_ptr.vmem [resolvable:$true] %s20770_s20 }
  0x2a   : > { %p20780_p0 = pneg %p20764_p12 }
  0x2d   : > { %s22659_s19 = smov %s22658_s0  ;;  %s20065_s21 = scalar_lea.hbm %s22658_s0, 49152 }
  0x2e   : > { %p20066_p13 = scmp.ne.s32.totalorder %s22659_s19, %s20065_s21  ;;  %p20072_p3 = scmp.lt.u32.totalorder %s20065_s21, %s22659_s19 }
  0x30   : > { %p20068_p1 = pnand %p20780_p0, %p20066_p13 }
  0x32   : > { %p20069_p2 = pneg %p20068_p1 }
  0x34   : > { %p20074_p4 = pnand %p20072_p3, %p20069_p2 }
  0x36   : > { %20077 = shalt.err (!%p20074_p4)
}
  0x37   : > { %s20078_s0 = scalar_lea.vmem %s20760_s29, 49152  ;;  %p20086_p9 = scmp.lt.s32.totalorder %s20760_s29, %s20760_s29 }
  0x38   : > { %p20079_p7 = scmp.ne.s32.totalorder %s20760_s29, %s20078_s0  ;;  %p20087_p6 = scmp.lt.s32.totalorder %s20078_s0, %s20078_s0 }
  0x3a   : > { %p20081_p8 = pnand %p20079_p7, %p20780_p0  ;;  %p20088_p13 = por %p20087_p6, %p20086_p9 }
  0x3c   : > { %p20082_p11 = pneg %p20081_p8 }
  0x3e   : > { %p20089_p1 = pnand %p20088_p13, %p20082_p11 }
  0x40   : > { %20092 = shalt.err (!%p20089_p1)
}
  0x41   : > { %s22633_s2 = smov 256   ;;  %s22635_s21 = smov 16  }
  0x42   : > { %17520 = dma.hbm_to_vmem [thread:$0]  (!%p20764_p12), %s22659_s19, 49152, %s20760_s29, [#allocation11], %s22633_s2, %s22633_s2, %s22635_s21  }
  0x43   : > { %s22661_s5 = sld [smem:[#allocation54_spill]] }
  0x49   : > { %s20093_s25 = scalar_lea.hbm %s22661_s5, 24576 }
  0x4a   : > { %p20094_p6 = scmp.ne.s32.totalorder %s22661_s5, %s20093_s25  ;;  %p20100_p3 = scmp.lt.u32.totalorder %s20093_s25, %s22661_s5 }
  0x4c   : > { %p20096_p9 = pnand %p20094_p6, %p20780_p0 }
  0x4e   : > { %p20097_p2 = pneg %p20096_p9 }
  0x50   : > { %p20102_p4 = pnand %p20100_p3, %p20097_p2 }
  0x52   : > { %20105 = shalt.err (!%p20102_p4)
}
  0x53   : > { %s20106_s29 = scalar_lea.vmem %s20768_s24, 24576  ;;  %p20114_p13 = scmp.lt.s32.totalorder %s20768_s24, %s20768_s24 }
  0x54   : > { %p20107_p7 = scmp.ne.s32.totalorder %s20768_s24, %s20106_s29  ;;  %p20115_p1 = scmp.lt.s32.totalorder %s20106_s29, %s20106_s29 }
  0x56   : > { %p20109_p8 = pnand %p20107_p7, %p20780_p0  ;;  %p20116_p6 = por %p20115_p1, %p20114_p13 }
  0x58   : > { %p20110_p11 = pneg %p20109_p8 }
  0x5a   : > { %p20117_p9 = pnand %p20116_p6, %p20110_p11 }
  0x5c   : > { %20120 = shalt.err (!%p20117_p9)
}
  0x5d   : > { %17526 = dma.hbm_to_vmem [thread:$0]  (!%p20764_p12), %s22661_s5, 24576, %s20768_s24, [#allocation14], %s22633_s2, %s22633_s2, %s22635_s21  }
  0x5e   : > { %s20121_s26 = scalar_lea.hbm %s22600_s7, 64 }
  0x5f   : > { %p20122_p2 = scmp.ne.s32.totalorder %s22600_s7, %s20121_s26  ;;  %p20128_p7 = scmp.lt.u32.totalorder %s20121_s26, %s22600_s7 }
  0x61   : > { %p20124_p3 = pnand %p20122_p2, %p20780_p0 }
  0x63   : > { %p20125_p4 = pneg %p20124_p3 }
  0x65   : > { %p20130_p8 = pnand %p20128_p7, %p20125_p4 }
  0x67   : > { %20133 = shalt.err (!%p20130_p8)
}
  0x68   : > { %s20134_s29 = scalar_lea.vmem %s557_s20, 64  ;;  %p20142_p6 = scmp.lt.s32.totalorder %s557_s20, %s557_s20 }
  0x69   : > { %p20135_p11 = scmp.ne.s32.totalorder %s557_s20, %s20134_s29  ;;  %p20143_p9 = scmp.lt.s32.totalorder %s20134_s29, %s20134_s29 }
  0x6b   : > { %p20137_p13 = pnand %p20135_p11, %p20780_p0  ;;  %p20144_p5 = por %p20143_p9, %p20142_p6 }
  0x6d   : > { %p20138_p1 = pneg %p20137_p13 }
  0x6f   : > { %p20145_p10 = pnand %p20144_p5, %p20138_p1 }
  0x71   : > { %20148 = shalt.err (!%p20145_p10)
}
  0x72   : > { %17532 = dma.hbm_to_vmem [thread:$0]  (!%p20764_p12), %s22600_s7, 64, %s557_s20, [#allocation17]  }
  0x73   : > { %s20586_s15 = smov [#allocation19]   ;;  %s20587_s3 = smov [#allocation22]  }
  0x74   : > { %s578_s1 = sshll.u32 %s20586_s15, 4  ;;  %s600_s26 = sshll.u32 %s20587_s3, 4  ;;  %s579_s1 = int_to_ptr.vmem [resolvable:$true] %s578_s1  ;;  %s601_s26 = int_to_ptr.vmem [resolvable:$true] %s600_s26 }
  0x75   : > { %s20149_s25 = scalar_lea.hbm %s22602_s9, 64 }
  0x76   : > { %p20150_p5 = scmp.ne.s32.totalorder %s22602_s9, %s20149_s25  ;;  %p20156_p3 = scmp.lt.u32.totalorder %s20149_s25, %s22602_s9 }
  0x78   : > { %p20152_p10 = pnand %p20150_p5, %p20780_p0 }
  0x7a   : > { %p20153_p2 = pneg %p20152_p10 }
  0x7c   : > { %p20158_p4 = pnand %p20156_p3, %p20153_p2 }
  0x7e   : > { %20161 = shalt.err (!%p20158_p4)
}
  0x7f   : > { %s20162_s20 = scalar_lea.vmem %s579_s1, 64  ;;  %p20170_p13 = scmp.lt.s32.totalorder %s579_s1, %s579_s1 }
  0x80   : > { %p20163_p7 = scmp.ne.s32.totalorder %s579_s1, %s20162_s20  ;;  %p20171_p1 = scmp.lt.s32.totalorder %s20162_s20, %s20162_s20 }
  0x82   : > { %p20165_p8 = pnand %p20163_p7, %p20780_p0  ;;  %p20172_p6 = por %p20171_p1, %p20170_p13 }
  0x84   : > { %p20166_p11 = pneg %p20165_p8 }
  0x86   : > { %p20173_p9 = pnand %p20172_p6, %p20166_p11 }
  0x88   : > { %20176 = shalt.err (!%p20173_p9)
}
  0x89   : > { %17538 = dma.hbm_to_vmem [thread:$0]  (!%p20764_p12), %s22602_s9, 64, %s579_s1, [#allocation20]  }
  0x8a   : > { %s20177_s28 = scalar_lea.hbm %s22604_s11, 64 }
  0x8b   : > { %p20178_p5 = scmp.ne.s32.totalorder %s22604_s11, %s20177_s28  ;;  %p20184_p3 = scmp.lt.u32.totalorder %s20177_s28, %s22604_s11 }
  0x8d   : > { %p20180_p10 = pnand %p20178_p5, %p20780_p0 }
  0x8f   : > { %p20181_p2 = pneg %p20180_p10 }
  0x91   : > { %p20186_p4 = pnand %p20184_p3, %p20181_p2 }
  0x93   : > { %20189 = shalt.err (!%p20186_p4)
}
  0x94   : > { %s20190_s24 = scalar_lea.vmem %s601_s26, 64  ;;  %p20198_p13 = scmp.lt.s32.totalorder %s601_s26, %s601_s26 }
  0x95   : > { %p20191_p7 = scmp.ne.s32.totalorder %s601_s26, %s20190_s24  ;;  %p20199_p1 = scmp.lt.s32.totalorder %s20190_s24, %s20190_s24 }
  0x97   : > { %p20193_p8 = pnand %p20191_p7, %p20780_p0  ;;  %p20200_p6 = por %p20199_p1, %p20198_p13 }
  0x99   : > { %p20194_p11 = pneg %p20193_p8 }
  0x9b   : > { %p20201_p9 = pnand %p20200_p6, %p20194_p11 }
  0x9d   : > { %20204 = shalt.err (!%p20201_p9)
}
  0x9e   : > { %17544 = dma.hbm_to_vmem [thread:$0]  (!%p20764_p12), %s22604_s11, 64, %s601_s26, [#allocation23]  }
  0x9f   : > { %s20588_s13 = smov [#allocation25]   ;;  %s20205_s28 = scalar_lea.hbm %s22607_s14, 1024 }
  0xa0   : > { %s624_s15 = sshll.u32 %s20588_s13, 4  ;;  %p20206_p5 = scmp.ne.s32.totalorder %s22607_s14, %s20205_s28  ;;  %s625_s15 = int_to_ptr.vmem [resolvable:$true] %s624_s15 }
  0xa1   : > { %p20212_p3 = scmp.lt.u32.totalorder %s20205_s28, %s22607_s14 }
  0xa2   : > { %p20208_p10 = pnand %p20206_p5, %p20780_p0 }
  0xa4   : > { %p20209_p2 = pneg %p20208_p10 }
  0xa6   : > { %p20214_p4 = pnand %p20212_p3, %p20209_p2 }
  0xa8   : > { %20217 = shalt.err (!%p20214_p4)
}
  0xa9   : > { %s20218_s26 = scalar_lea.vmem %s625_s15, 1024  ;;  %p20226_p13 = scmp.lt.s32.totalorder %s625_s15, %s625_s15 }
  0xaa   : > { %p20219_p7 = scmp.ne.s32.totalorder %s625_s15, %s20218_s26  ;;  %p20227_p1 = scmp.lt.s32.totalorder %s20218_s26, %s20218_s26 }
  0xac   : > { %p20221_p8 = pnand %p20219_p7, %p20780_p0  ;;  %p20228_p6 = por %p20227_p1, %p20226_p13 }
  0xae   : > { %p20222_p11 = pneg %p20221_p8 }
  0xb0   : > { %p20229_p9 = pnand %p20228_p6, %p20222_p11 }
  0xb2   : > { %20232 = shalt.err (!%p20229_p9)
}
  0xb3   : > { %s20589_s24 = smov 128   ;;  %s20590_s1 = smov 8  }
  0xb4   : > { %17550 = dma.hbm_to_vmem [thread:$0]  (!%p20764_p12), %s22607_s14, 1024, %s625_s15, [#allocation26], %s20589_s24, %s20589_s24, %s20590_s1  }
  0xb5   : > { %s20591_s2 = smov [#allocation28]   ;;  %s20592_s28 = smov [#allocation7]  }
  0xb6   : > { %s652_s3 = sshll.u32 %s20591_s2, 4  ;;  %s487_s23 = sshll.u32 %s20592_s28, 4  ;;  %s653_s3 = int_to_ptr.vmem [resolvable:$true] %s652_s3  ;;  %s20903_s23 = int_to_ptr.vmem [resolvable:$true] %s487_s23 }
  0xb7   : > { %s20233_s29 = scalar_lea.hbm %s22610_s17, 16 }
  0xb8   : > { %p20234_p5 = scmp.ne.s32.totalorder %s22610_s17, %s20233_s29  ;;  %p20240_p3 = scmp.lt.u32.totalorder %s20233_s29, %s22610_s17 }
  0xba   : > { %p20236_p10 = pnand %p20234_p5, %p20780_p0 }
  0xbc   : > { %p20237_p2 = pneg %p20236_p10 }
  0xbe   : > { %p20242_p4 = pnand %p20240_p3, %p20237_p2 }
  0xc0   : > { %20245 = shalt.err (!%p20242_p4)
}
  0xc1   : > { %s20246_s24 = scalar_lea.vmem %s653_s3, 16  ;;  %s20253_s1 = scalar_lea.vmem %s653_s3, 32 }
  0xc2   : > { %p20247_p7 = scmp.ne.s32.totalorder %s653_s3, %s20246_s24  ;;  %p20254_p13 = scmp.lt.s32.totalorder %s653_s3, %s653_s3 }
  0xc3   : > { %p20255_p1 = scmp.lt.s32.totalorder %s20253_s1, %s20246_s24 }
  0xc4   : > { %p20249_p8 = pnand %p20247_p7, %p20780_p0 }
  0xc5   : > { %p20256_p6 = por %p20255_p1, %p20254_p13 }
  0xc6   : > { %p20250_p11 = pneg %p20249_p8 }
  0xc8   : > { %p20257_p9 = pnand %p20256_p6, %p20250_p11 }
  0xca   : > { %20260 = shalt.err (!%p20257_p9)
}
  0xcb   : > { %17556 = dma.hbm_to_vmem [thread:$0]  (!%p20764_p12), %s22610_s17, 16, %s653_s3, [#allocation29]  }
  0xcc   : > { %s22662_s25 = sld [smem:[#allocation51_spill]] }
  0xd2   : > { %s20261_s0 = scalar_lea.hbm %s22662_s25, 9216 }
  0xd3   : > { %p20262_p5 = scmp.ne.s32.totalorder %s22662_s25, %s20261_s0  ;;  %p20268_p3 = scmp.lt.u32.totalorder %s20261_s0, %s22662_s25 }
  0xd5   : > { %p20264_p10 = pnand %p20262_p5, %p20780_p0 }
  0xd7   : > { %p20265_p2 = pneg %p20264_p10 }
  0xd9   : > { %p20270_p4 = pnand %p20268_p3, %p20265_p2 }
  0xdb   : > { %20273 = shalt.err (!%p20270_p4)
}
  0xdc   : > { %s20274_s3 = scalar_lea.vmem %s20903_s23, 9216  ;;  %p20282_p13 = scmp.lt.s32.totalorder %s20903_s23, %s20903_s23 }
  0xdd   : > { %p20275_p7 = scmp.ne.s32.totalorder %s20903_s23, %s20274_s3  ;;  %p20283_p1 = scmp.lt.s32.totalorder %s20274_s3, %s20274_s3 }
  0xdf   : > { %p20277_p8 = pnand %p20275_p7, %p20780_p0  ;;  %p20284_p6 = por %p20283_p1, %p20282_p13 }
  0xe1   : > { %p20278_p11 = pneg %p20277_p8 }
  0xe3   : > { %p20285_p9 = pnand %p20284_p6, %p20278_p11 }
  0xe5   : > { %20288 = shalt.err (!%p20285_p9)
}
  0xe6   : > { %s22663_s24 = smov 16   ;;  %s22664_s1 = smov 256  }
  0xe7   : > { %17517 = dma.hbm_to_vmem [thread:$0]  (!%p20764_p12), %s22662_s25, 9216, %s20903_s23, [#allocation8], %s22664_s1, %s22664_s1, %s22663_s24  }
  0xe8   : > { %s20593_s2 = smov [#allocation12]   ;;  %s20594_s0 = smov [#allocation15]  }
  0xe9   : > { %s516_s28 = sshll.u32 %s20593_s2, 4  ;;  %s542_s29 = sshll.u32 %s20594_s0, 4  ;;  %s517_s28 = int_to_ptr.vmem [resolvable:$true] %s516_s28  ;;  %s20949_s29 = int_to_ptr.vmem [resolvable:$true] %s542_s29 }
  0xea   : > { %s20289_s15 = scalar_lea.hbm %s22597_s4, 49152 }
  0xeb   : > { %p20290_p5 = scmp.ne.s32.totalorder %s22597_s4, %s20289_s15  ;;  %p20296_p3 = scmp.lt.u32.totalorder %s20289_s15, %s22597_s4 }
  0xed   : > { %p20292_p10 = pnand %p20290_p5, %p20780_p0 }
  0xef   : > { %p20293_p2 = pneg %p20292_p10 }
  0xf1   : > { %p20298_p4 = pnand %p20296_p3, %p20293_p2 }
  0xf3   : > { %20301 = shalt.err (!%p20298_p4)
}
  0xf4   : > { %s20302_s13 = scalar_lea.vmem %s517_s28, 49152  ;;  %p20310_p13 = scmp.lt.s32.totalorder %s517_s28, %s517_s28 }
  0xf5   : > { %p20303_p7 = scmp.ne.s32.totalorder %s517_s28, %s20302_s13  ;;  %p20311_p1 = scmp.lt.s32.totalorder %s20302_s13, %s20302_s13 }
  0xf7   : > { %p20305_p8 = pnand %p20303_p7, %p20780_p0  ;;  %p20312_p6 = por %p20311_p1, %p20310_p13 }
  0xf9   : > { %p20306_p11 = pneg %p20305_p8 }
  0xfb   : > { %p20313_p9 = pnand %p20312_p6, %p20306_p11 }
  0xfd   : > { %20316 = shalt.err (!%p20313_p9)
}
  0xfe   : > { %17523 = dma.hbm_to_vmem [thread:$0]  (!%p20764_p12), %s22597_s4, 49152, %s517_s28, [#allocation11], %s22664_s1, %s22664_s1, %s22663_s24  }
  0xff   : > { %s20317_s20 = scalar_lea.hbm %s22599_s6, 49152 }
 0x100   : > { %p20318_p5 = scmp.ne.s32.totalorder %s22599_s6, %s20317_s20  ;;  %p20324_p3 = scmp.lt.u32.totalorder %s20317_s20, %s22599_s6 }
 0x102   : > { %p20320_p10 = pnand %p20318_p5, %p20780_p0 }
 0x104   : > { %p20321_p2 = pneg %p20320_p10 }
 0x106   : > { %p20326_p4 = pnand %p20324_p3, %p20321_p2 }
 0x108   : > { %20329 = shalt.err (!%p20326_p4)
}
 0x109   : > { %s20330_s28 = scalar_lea.vmem %s20949_s29, 49152  ;;  %p20338_p13 = scmp.lt.s32.totalorder %s20949_s29, %s20949_s29 }
 0x10a   : > { %p20331_p7 = scmp.ne.s32.totalorder %s20949_s29, %s20330_s28  ;;  %p20339_p1 = scmp.lt.s32.totalorder %s20330_s28, %s20330_s28 }
 0x10c   : > { %p20333_p8 = pnand %p20331_p7, %p20780_p0  ;;  %p20340_p6 = por %p20339_p1, %p20338_p13 }
 0x10e   : > { %p20334_p11 = pneg %p20333_p8 }
 0x110   : > { %p20341_p9 = pnand %p20340_p6, %p20334_p11 }
 0x112   : > { %20344 = shalt.err (!%p20341_p9)
}
 0x113   : > { %17529 = dma.hbm_to_vmem [thread:$0]  (!%p20764_p12), %s22599_s6, 49152, %s20949_s29, [#allocation14], %s22664_s1, %s22664_s1, %s22663_s24  }
 0x114   : > { %s20595_s2 = smov [#allocation18]   ;;  %s20596_s26 = smov [#allocation21]  }
 0x115   : > { %s567_s0 = sshll.u32 %s20595_s2, 4  ;;  %s589_s20 = sshll.u32 %s20596_s26, 4  ;;  %s568_s0 = int_to_ptr.vmem [resolvable:$true] %s567_s0  ;;  %s20998_s20 = int_to_ptr.vmem [resolvable:$true] %s589_s20 }
 0x116   : > { %s20345_s21 = scalar_lea.hbm %s22601_s8, 32 }
 0x117   : > { %p20346_p5 = scmp.ne.s32.totalorder %s22601_s8, %s20345_s21  ;;  %p20352_p3 = scmp.lt.u32.totalorder %s20345_s21, %s22601_s8 }
 0x119   : > { %p20348_p10 = pnand %p20346_p5, %p20780_p0 }
 0x11b   : > { %p20349_p2 = pneg %p20348_p10 }
 0x11d   : > { %p20354_p4 = pnand %p20352_p3, %p20349_p2 }
 0x11f   : > { %20357 = shalt.err (!%p20354_p4)
}
 0x120   : > { %s20358_s1 = scalar_lea.vmem %s568_s0, 32  ;;  %p20366_p13 = scmp.lt.s32.totalorder %s568_s0, %s568_s0 }
 0x121   : > { %p20359_p7 = scmp.ne.s32.totalorder %s568_s0, %s20358_s1  ;;  %p20367_p1 = scmp.lt.s32.totalorder %s20358_s1, %s20358_s1 }
 0x123   : > { %p20361_p8 = pnand %p20359_p7, %p20780_p0  ;;  %p20368_p6 = por %p20367_p1, %p20366_p13 }
 0x125   : > { %p20362_p11 = pneg %p20361_p8 }
 0x127   : > { %p20369_p9 = pnand %p20368_p6, %p20362_p11 }
 0x129   : > { %20372 = shalt.err (!%p20369_p9)
}
 0x12a   : > { %17535 = dma.hbm_to_vmem [thread:$0]  (!%p20764_p12), %s22601_s8, 32, %s568_s0, [#allocation17]  }
 0x12b   : > { %s20373_s15 = scalar_lea.hbm %s22603_s10, 32 }
 0x12c   : > { %p20374_p5 = scmp.ne.s32.totalorder %s22603_s10, %s20373_s15  ;;  %p20380_p3 = scmp.lt.u32.totalorder %s20373_s15, %s22603_s10 }
 0x12e   : > { %p20376_p10 = pnand %p20374_p5, %p20780_p0 }
 0x130   : > { %p20377_p2 = pneg %p20376_p10 }
 0x132   : > { %p20382_p4 = pnand %p20380_p3, %p20377_p2 }
 0x134   : > { %20385 = shalt.err (!%p20382_p4)
}
 0x135   : > { %s20386_s0 = scalar_lea.vmem %s20998_s20, 32  ;;  %p20394_p13 = scmp.lt.s32.totalorder %s20998_s20, %s20998_s20 }
 0x136   : > { %p20387_p7 = scmp.ne.s32.totalorder %s20998_s20, %s20386_s0  ;;  %p20395_p1 = scmp.lt.s32.totalorder %s20386_s0, %s20386_s0 }
 0x138   : > { %p20389_p8 = pnand %p20387_p7, %p20780_p0  ;;  %p20396_p6 = por %p20395_p1, %p20394_p13 }
 0x13a   : > { %p20390_p11 = pneg %p20389_p8 }
 0x13c   : > { %p20397_p9 = pnand %p20396_p6, %p20390_p11 }
 0x13e   : > { %20400 = shalt.err (!%p20397_p9)
}
 0x13f   : > { %17541 = dma.hbm_to_vmem [thread:$0]  (!%p20764_p12), %s22603_s10, 32, %s20998_s20, [#allocation20]  }
 0x140   : > { %s20597_s1 = smov [#allocation24]   ;;  %s20598_s5 = smov [#allocation27]  }
 0x141   : > { %s611_s29 = sshll.u32 %s20597_s1, 4  ;;  %s641_s2 = sshll.u32 %s20598_s5, 4  ;;  %s612_s29 = int_to_ptr.vmem [resolvable:$true] %s611_s29  ;;  %s21041_s2 = int_to_ptr.vmem [resolvable:$true] %s641_s2 }
 0x142   : > { %s20401_s3 = scalar_lea.hbm %s22605_s12, 32 }
 0x143   : > { %p20402_p5 = scmp.ne.s32.totalorder %s22605_s12, %s20401_s3  ;;  %p20408_p3 = scmp.lt.u32.totalorder %s20401_s3, %s22605_s12 }
 0x145   : > { %p20404_p10 = pnand %p20402_p5, %p20780_p0 }
 0x147   : > { %p20405_p2 = pneg %p20404_p10 }
 0x149   : > { %p20410_p4 = pnand %p20408_p3, %p20405_p2 }
 0x14b   : > { %20413 = shalt.err (!%p20410_p4)
}
 0x14c   : > { %s20414_s0 = scalar_lea.vmem %s612_s29, 32  ;;  %p20422_p13 = scmp.lt.s32.totalorder %s612_s29, %s612_s29 }
 0x14d   : > { %p20415_p7 = scmp.ne.s32.totalorder %s612_s29, %s20414_s0  ;;  %p20423_p1 = scmp.lt.s32.totalorder %s20414_s0, %s20414_s0 }
 0x14f   : > { %p20417_p8 = pnand %p20415_p7, %p20780_p0  ;;  %p20424_p6 = por %p20423_p1, %p20422_p13 }
 0x151   : > { %p20418_p11 = pneg %p20417_p8 }
 0x153   : > { %p20425_p9 = pnand %p20424_p6, %p20418_p11 }
 0x155   : > { %20428 = shalt.err (!%p20425_p9)
}
 0x156   : > { %17547 = dma.hbm_to_vmem [thread:$0]  (!%p20764_p12), %s22605_s12, 32, %s612_s29, [#allocation23]  }
 0x157   : > { %s20429_s26 = scalar_lea.hbm %s22609_s16, 16 }
 0x158   : > { %p20430_p5 = scmp.ne.s32.totalorder %s22609_s16, %s20429_s26  ;;  %p20436_p3 = scmp.lt.u32.totalorder %s20429_s26, %s22609_s16 }
 0x15a   : > { %p20432_p10 = pnand %p20430_p5, %p20780_p0 }
 0x15c   : > { %p20433_p2 = pneg %p20432_p10 }
 0x15e   : > { %p20438_p4 = pnand %p20436_p3, %p20433_p2 }
 0x160   : > { %20441 = shalt.err (!%p20438_p4)
}
 0x161   : > { %s20442_s29 = scalar_lea.vmem %s21041_s2, 16  ;;  %s20449_s28 = scalar_lea.vmem %s21041_s2, 32 }
 0x162   : > { %p20443_p7 = scmp.ne.s32.totalorder %s21041_s2, %s20442_s29  ;;  %p20450_p13 = scmp.lt.s32.totalorder %s21041_s2, %s21041_s2 }
 0x163   : > { %p20451_p1 = scmp.lt.s32.totalorder %s20449_s28, %s20442_s29 }
 0x164   : > { %p20445_p8 = pnand %p20443_p7, %p20780_p0 }
 0x165   : > { %p20452_p6 = por %p20451_p1, %p20450_p13 }
 0x166   : > { %p20446_p11 = pneg %p20445_p8 }
 0x168   : > { %p20453_p9 = pnand %p20452_p6, %p20446_p11 }
 0x16a   : > { %20456 = shalt.err (!%p20453_p9)
}
 0x16b   : > { %17553 = dma.hbm_to_vmem [thread:$0]  (!%p20764_p12), %s22609_s16, 16, %s21041_s2, [#allocation26]  }
 0x16c   : > { %s20599_s13 = smov [#allocation30]   ;;  %s20457_s26 = scalar_lea.hbm %s22611_s18, 16 }
 0x16d   : > { %s663_s24 = sshll.u32 %s20599_s13, 4  ;;  %p20458_p5 = scmp.ne.s32.totalorder %s22611_s18, %s20457_s26  ;;  %s664_s24 = int_to_ptr.vmem [resolvable:$true] %s663_s24 }
 0x16e   : > { %p20464_p3 = scmp.lt.u32.totalorder %s20457_s26, %s22611_s18 }
 0x16f   : > { %p20460_p10 = pnand %p20458_p5, %p20780_p0 }
 0x171   : > { %p20461_p2 = pneg %p20460_p10 }
 0x173   : > { %p20466_p4 = pnand %p20464_p3, %p20461_p2 }
 0x175   : > { %20469 = shalt.err (!%p20466_p4)
}
 0x176   : > { %s20470_s2 = scalar_lea.vmem %s664_s24, 16  ;;  %s20477_s29 = scalar_lea.vmem %s664_s24, 32 }
 0x177   : > { %p20471_p7 = scmp.ne.s32.totalorder %s664_s24, %s20470_s2  ;;  %p20478_p13 = scmp.lt.s32.totalorder %s664_s24, %s664_s24 }
 0x178   : > { %p20479_p1 = scmp.lt.s32.totalorder %s20477_s29, %s20470_s2 }
 0x179   : > { %p20473_p8 = pnand %p20471_p7, %p20780_p0 }
 0x17a   : > { %p20480_p6 = por %p20479_p1, %p20478_p13 }
 0x17b   : > { %p20474_p11 = pneg %p20473_p8 }
 0x17d   : > { %p20481_p9 = pnand %p20480_p6, %p20474_p11 }
 0x17f   : > { %20484 = shalt.err (!%p20481_p9)
}
 0x180   : > { %17559 = dma.hbm_to_vmem [thread:$0]  (!%p20764_p12), %s22611_s18, 16, %s664_s24, [#allocation29]  }
 0x181   : > { %p22665_p5 = scmp.ne.s32.totalorder %s22656_s27, 0 }
 0x182   : > { %s22666_s0 = sld [smem:[#allocation45_spill]] (!%p22665_p5) }
 0x183   : > { %684 = sbr.rel (%p22665_p5) target bundleno = 4513 (0x11a1), region = 96 }
 0x188   : > { %p22667_p10 = scmp.eq.s32.totalorder (!%p22665_p5), %s22666_s0, 0 }
 0x18a   : > { %20530 = dma.done.wait (%p22667_p10), [#allocation8], 9216   ;;  %p22668_p0 = pmov %p22667_p10 }
 0x18c   : > { %20532 = vsyncadd (%p22668_p0), [#allocation8], 4294958080  ;;  %p22669_p2 = pmov %p22668_p0 }
 0x18d   : > { %p22670_p3 = pmov %p22668_p0 }
 0x18e   : > { %20534 = dma.done.wait (%p22669_p2), [#allocation11], 98304  }
 0x18f   : > { %20536 = vsyncadd (%p22670_p3), [#allocation11], 4294868992  ;;  %p22671_p4 = pmov %p22668_p0 }
 0x190   : > { %p22672_p12 = pmov %p22668_p0 }
 0x191   : > { %20538 = dma.done.wait (%p22671_p4), [#allocation14], 73728  }
 0x192   : > { %20540 = vsyncadd (%p22672_p12), [#allocation14], 4294893568  ;;  %p22673_p7 = pmov %p22668_p0 }
 0x193   : > { %p22674_p8 = pmov %p22668_p0 }
 0x194   : > { %20542 = dma.done.wait (%p22673_p7), [#allocation17], 96  }
 0x195   : > { %20544 = vsyncadd (%p22674_p8), [#allocation17], 4294967200  ;;  %p22675_p11 = pmov %p22668_p0 }
 0x196   : > { %p22676_p13 = pmov %p22668_p0 }
 0x197   : > { %20546 = dma.done.wait (%p22675_p11), [#allocation20], 96  }
 0x198   : > { %20548 = vsyncadd (%p22676_p13), [#allocation20], 4294967200  ;;  %p22677_p1 = pmov %p22668_p0 }
 0x199   : > { %p22678_p6 = pmov %p22668_p0 }
 0x19a   : > { %20550 = dma.done.wait (%p22677_p1), [#allocation23], 96  }
 0x19b   : > { %20552 = vsyncadd (%p22678_p6), [#allocation23], 4294967200  ;;  %p22679_p9 = pmov %p22668_p0 }
 0x19c   : > { %p22680_p5 = pmov %p22668_p0 }
 0x19d   : > { %20554 = dma.done.wait (%p22679_p9), [#allocation26], 1040  }
 0x19e   : > { %20556 = vsyncadd (%p22680_p5), [#allocation26], 4294966256  ;;  %p22681_p10 = pmov %p22668_p0 }
 0x1a0   : > { %20558 = dma.done.wait (%p22681_p10), [#allocation29], 32  }
 0x1a1   : > { %20560 = vsyncadd (%p22668_p0), [#allocation29], 4294967264  ;;  %v20600_v0 = vmov 0   ;;  %v17650_v1 = vld [vmem:[#allocation7 + $0xc4] ss:$16 sps:$4 sm:$0xff]   ;;  %p795_p2 = scmp.lt.s32.totalorder %s22666_s0, 1 }
 0x1a2   : > { %1048 = vmatprep.mubr.bf16.mxu0 %v20600_v0  ;;  %1101 = vmatprep.mubr.bf16.mxu1 %v20600_v0  ;;  %v17652_v2 = vld [vmem:[#allocation7 + $0xc0] ss:$16 sps:$4 sm:$0xff]   ;;  %v17653_v3 = vld [vmem:[#allocation7 + $0xe4] ss:$16 sps:$4 sm:$0xff]   ;;  %v17655_v4 = vld [vmem:[#allocation7 + $0xcc] ss:$16 sps:$4 sm:$0xff]  }
 0x1a3   : > { %1016 = vmatprep.subr.bf16.mxu0 %v17650_v1  ;;  %v17657_v5 = vld [vmem:[#allocation7 + $0xe0] ss:$16 sps:$4 sm:$0xff]   ;;  %v17658_v6 = vld [vmem:[#allocation7 + $0xc8] ss:$16 sps:$4 sm:$0xff]   ;;  %v17659_v7 = vld [vmem:[#allocation7 + $0x104] ss:$16 sps:$4 sm:$0xff]   ;;  %1069 = vmatprep.subr.bf16.mxu1 %v17655_v4 }
 0x1a4   : > { %1017 = vmatpush1.bf16.msra.mxu0 %v17652_v2  ;;  %v17661_v8 = vld [vmem:[#allocation7 + $0xec] ss:$16 sps:$4 sm:$0xff]   ;;  %1070 = vmatpush1.bf16.msra.mxu1 %v17658_v6  ;;  %v17664_v9 = vld [vmem:[#allocation7 + $0xe8] ss:$16 sps:$4 sm:$0xff]   ;;  %v17663_v10 = vld [vmem:[#allocation7 + $0x100] ss:$16 sps:$4 sm:$0xff]  }
 0x1a5   : > { %1018 = vmatprep.subr.bf16.mxu0 %v17653_v3  ;;  %1071 = vmatprep.subr.bf16.mxu1 %v17661_v8  ;;  %s796_s30 = scalar_select %p795_p2, %s22666_s0, 1  ;;  %v17665_v11 = vld [vmem:[#allocation7 + $0x124] ss:$16 sps:$4 sm:$0xff]   ;;  %v17667_v12 = vld [vmem:[#allocation7 + $0x10c] ss:$16 sps:$4 sm:$0xff]   ;;  %vm1009_vm1 = vcmask 785408  }
 0x1a6   : > { %v17670_v13 = vld [vmem:[#allocation7 + $0x108] ss:$16 sps:$4 sm:$0xff]   ;;  %v17669_v14 = vld [vmem:[#allocation7 + $0x120] ss:$16 sps:$4 sm:$0xff]   ;;  %v17673_v15 = vld [vmem:[#allocation7 + $0x12c] ss:$16 sps:$4 sm:$0xff]  }
 0x1a7   : > { %s17451_s27 = smul.u32 20, %s796_s30  ;;  %v17671_v16 = vld [vmem:[#allocation7 + $0x144] ss:$16 sps:$4 sm:$0xff]   ;;  %v17675_v17 = vld [vmem:[#allocation7 + $0x140] ss:$16 sps:$4 sm:$0xff]   ;;  %s22682_s24 = sld [smem:[#allocation50_spill]] }
 0x1a8   : > { %1019 = vmatpush1.bf16.msra.mxu0 %v17657_v5  ;;  %1072 = vmatpush1.bf16.msra.mxu1 %v17664_v9  ;;  %v17676_v18 = vld [vmem:[#allocation7 + $0x128] ss:$16 sps:$4 sm:$0xff]   ;;  %v17679_v19 = vld [vmem:[#allocation7 + $0x14c] ss:$16 sps:$4 sm:$0xff]   ;;  %v17677_v20 = vld [vmem:[#allocation7 + $0x164] ss:$16 sps:$4 sm:$0xff]  }
 0x1a9   : > { %1020 = vmatprep.subr.bf16.mxu0 %v17659_v7  ;;  %1073 = vmatprep.subr.bf16.mxu1 %v17667_v12  ;;  %v17682_v21 = vld [vmem:[#allocation7 + $0x148] ss:$16 sps:$4 sm:$0xff]   ;;  %v17681_v22 = vld [vmem:[#allocation7 + $0x160] ss:$16 sps:$4 sm:$0xff]   ;;  %v17683_v25 = vld [vmem:[#allocation7 + $0x16c] ss:$16 sps:$4 sm:$0xff]  }
 0x1aa   : > { %v17687_v26 = vld [vmem:[#allocation7 + $0x4] ss:$16 sps:$4 sm:$0xff]   ;;  %v17690_v32 = vld [vmem:[#allocation7 + $0x168] ss:$16 sps:$4 sm:$0xff]   ;;  %vm868_vm0 = vsmask.f32 7424 }
 0x1ab   : > { %v17696_v33 = vld [vmem:[#allocation7 + $0xc] ss:$16 sps:$4 sm:$0xff]   ;;  %v17685_v34 = vld [vmem:[#allocation7] ss:$16 sps:$4 sm:$0xff]   ;;  %v17693_v36 = vld [vmem:[#allocation7 + $0x24] ss:$16 sps:$4 sm:$0xff]  }
 0x1ac   : > { %1021 = vmatpush1.bf16.msra.mxu0 %v17663_v10  ;;  %1074 = vmatpush1.bf16.msra.mxu1 %v17670_v13  ;;  %v17694_v38 = vld [vmem:[#allocation7 + $0x8] ss:$16 sps:$4 sm:$0xff]   ;;  %v17702_v39 = vld [vmem:[#allocation7 + $0x2c] ss:$16 sps:$4 sm:$0xff]   ;;  %v17691_v40 = vld [vmem:[#allocation7 + $0x20] ss:$16 sps:$4 sm:$0xff]  }
 0x1ad   : > { %1022 = vmatprep.subr.bf16.mxu0 %v17665_v11  ;;  %1075 = vmatprep.subr.bf16.mxu1 %v17673_v15  ;;  %s21146_s1 = scalar_lea.vmem %s22682_s24, %s17451_s27  ;;  %v17699_v41 = vld [vmem:[#allocation7 + $0x44] ss:$16 sps:$4 sm:$0xff]   ;;  %v17700_v43 = vld [vmem:[#allocation7 + $0x28] ss:$16 sps:$4 sm:$0xff]   ;;  %v17708_v44 = vld [vmem:[#allocation7 + $0x4c] ss:$16 sps:$4 sm:$0xff]  }
 0x1ae   : > { %v21149_v23 = vld [vmem:[%s21146_s1] sm:$0xff]   ;;  %v21152_v24 = vld [vmem:[%s21146_s1 + $0x8] sm:$0xff]   ;;  %v21164_v45 = vld [vmem:[%s21146_s1 + $0x10] ss:$0 sps:$4 sm:$0x11]   ;;  %vm1377_vm2 = vcmask 1046528  }
 0x1af   : > { %v870_v27 = vshrl.u32 %v21149_v23, 16  ;;  %v872_v28 = vshll.u32 %v21149_v23, 16  ;;  %v877_v29 = vshll.u32 %v21152_v24, 16  ;;  %v881_v42 = vshrl.u32 %v21152_v24, 16  ;;  %v17697_v46 = vld [vmem:[#allocation7 + $0x40] ss:$16 sps:$4 sm:$0xff]  }
 0x1b0   : > { %1023 = vmatpush1.bf16.msra.mxu0 %v17669_v14  ;;  %1076 = vmatpush1.bf16.msra.mxu1 %v17676_v18  ;;  %v17705_v47 = vld [vmem:[#allocation7 + $0x64] ss:$16 sps:$4 sm:$0xff]   ;;  %v885_v49 = vshll.u32 %v21164_v45, 16  ;;  %v17706_v50 = vld [vmem:[#allocation7 + $0x48] ss:$16 sps:$4 sm:$0xff]   ;;  %vm1710_vm4 = vcmask 1040384  }
 0x1b1   : > { %1024 = vmatprep.subr.bf16.mxu0 %v17671_v16  ;;  %1077 = vmatprep.subr.bf16.mxu1 %v17679_v19  ;;  %v874_v30 = vrot.slane %v872_v28, 1  ;;  %v879_v31 = vrot.slane %v877_v29, 1  ;;  %v17714_v51 = vld [vmem:[#allocation7 + $0x6c] ss:$16 sps:$4 sm:$0xff]   ;;  %v17703_v53 = vld [vmem:[#allocation7 + $0x60] ss:$16 sps:$4 sm:$0xff]  }
 0x1b2   : > { %v887_v52 = vrot.slane %v885_v49, 1  ;;  %v17711_v54 = vld [vmem:[#allocation7 + $0x84] ss:$16 sps:$4 sm:$0xff]   ;;  %v17712_v56 = vld [vmem:[#allocation7 + $0x68] ss:$16 sps:$4 sm:$0xff]   ;;  %s22683_s15 = sld [smem:[#allocation53_spill]] }
 0x1b3   : > { %v875_v35 = vor.u32 %v874_v30, %v870_v27  ;;  %v883_v48 = vor.u32 %v881_v42, %v879_v31  ;;  %v17721_v57 = vld [vmem:[#allocation7 + $0x8c] ss:$16 sps:$4 sm:$0xff]   ;;  %v17709_v58 = vld [vmem:[#allocation7 + $0x80] ss:$16 sps:$4 sm:$0xff]   ;;  %v17718_v59 = vld [vmem:[#allocation7 + $0xa4] ss:$16 sps:$4 sm:$0xff]  }
 0x1b4   : > { %1025 = vmatpush1.bf16.msra.mxu0 %v17675_v17  ;;  %1078 = vmatpush1.bf16.msra.mxu1 %v17682_v21  ;;  %v17719_v60 = vld [vmem:[#allocation7 + $0x88] ss:$16 sps:$4 sm:$0xff]   ;;  %v17724_v61 = vld [vmem:[#allocation7 + $0xac] ss:$16 sps:$4 sm:$0xff]   ;;  %v17716_v62 = vld [vmem:[#allocation7 + $0xa0] ss:$16 sps:$4 sm:$0xff]  }
 0x1b5   : > { %1026 = vmatprep.subr.bf16.mxu0 %v17677_v20  ;;  %1079 = vmatprep.subr.bf16.mxu1 %v17683_v25  ;;  %v880_v37 = vsel %vm868_vm0, %v875_v35, %v879_v31  ;;  %v888_v55 = vsel %vm868_vm0, %v883_v48, %v887_v52  ;;  %v17727_v63 = vld [vmem:[#allocation7 + $0x184] ss:$16 sps:$4 sm:$0xff]   ;;  %v17722_v1 = vld [vmem:[#allocation7 + $0xa8] ss:$16 sps:$4 sm:$0xff]   ;;  %v17733_v2 = vld [vmem:[#allocation7 + $0x18c] ss:$16 sps:$4 sm:$0xff]  }
 0x1b6   : > { %v17725_v3 = vld [vmem:[#allocation7 + $0x180] ss:$16 sps:$4 sm:$0xff]   ;;  %v17730_v4 = vld [vmem:[#allocation7 + $0x1a4] ss:$16 sps:$4 sm:$0xff]   ;;  %v17731_v5 = vld [vmem:[#allocation7 + $0x188] ss:$16 sps:$4 sm:$0xff]  }
 0x1b7   : > { %v17739_v6 = vld [vmem:[#allocation7 + $0x1ac] ss:$16 sps:$4 sm:$0xff]   ;;  %v17728_v7 = vld [vmem:[#allocation7 + $0x1a0] ss:$16 sps:$4 sm:$0xff]   ;;  %v17736_v8 = vld [vmem:[#allocation7 + $0x1c4] ss:$16 sps:$4 sm:$0xff]  }
 0x1b8   : > { %1027 = vmatpush1.bf16.msra.mxu0 %v17681_v22  ;;  %1080 = vmatpush1.bf16.msra.mxu1 %v17690_v32  ;;  %v17737_v9 = vld [vmem:[#allocation7 + $0x1a8] ss:$16 sps:$4 sm:$0xff]   ;;  %v17745_v10 = vld [vmem:[#allocation7 + $0x1cc] ss:$16 sps:$4 sm:$0xff]   ;;  %v17734_v11 = vld [vmem:[#allocation7 + $0x1c0] ss:$16 sps:$4 sm:$0xff]  }
 0x1b9   : > { %1246 = vmatprep.subr.bf16.mxu0 %v17687_v26  ;;  %1299 = vmatprep.subr.bf16.mxu1 %v17696_v33  ;;  %v17742_v12 = vld [vmem:[#allocation7 + $0x1e4] ss:$16 sps:$4 sm:$0xff]   ;;  %v17743_v13 = vld [vmem:[#allocation7 + $0x1c8] ss:$16 sps:$4 sm:$0xff]   ;;  %v17751_v14 = vld [vmem:[#allocation7 + $0x1ec] ss:$16 sps:$4 sm:$0xff]  }
 0x1ba   : > { %v17740_v15 = vld [vmem:[#allocation7 + $0x1e0] ss:$16 sps:$4 sm:$0xff]   ;;  %v17748_v16 = vld [vmem:[#allocation7 + $0x204] ss:$16 sps:$4 sm:$0xff]   ;;  %v17749_v17 = vld [vmem:[#allocation7 + $0x1e8] ss:$16 sps:$4 sm:$0xff]  }
 0x1bb   : > { %15039 = vmatmul.mubr.msk.bf16.vlgmr.msra.gmra.mrb[0].mxu0 %vm1009_vm1, %v880_v37  ;;  %15041 = vmatmul.mubr.msk.bf16.vlgmr.msra.gmra.mrb[0].mxu1 %vm1009_vm1, %v880_v37  ;;  %v17757_v18 = vld [vmem:[#allocation7 + $0x20c] ss:$16 sps:$4 sm:$0xff]   ;;  %v17746_v19 = vld [vmem:[#allocation7 + $0x200] ss:$16 sps:$4 sm:$0xff]   ;;  %v17754_v20 = vld [vmem:[#allocation7 + $0x224] ss:$16 sps:$4 sm:$0xff]  }
 0x1bc   : > { %1247 = vmatpush1.bf16.msra.mxu0 %v17685_v34  ;;  %1058 = vmatprep.mubr.bf16.mxu0 %v20600_v0  ;;  %v17755_v21 = vld [vmem:[#allocation7 + $0x208] ss:$16 sps:$4 sm:$0xff]   ;;  %v17760_v22 = vld [vmem:[#allocation7 + $0x22c] ss:$16 sps:$4 sm:$0xff]   ;;  %v17752_v25 = vld [vmem:[#allocation7 + $0x220] ss:$16 sps:$4 sm:$0xff]  }
 0x1bd   : > { %1248 = vmatprep.subr.bf16.mxu0 %v17693_v36  ;;  %1300 = vmatpush1.bf16.msra.mxu1 %v17694_v38  ;;  %v1378_v26 = vrot.slane %v21149_v23, 1  ;;  %v1379_v27 = vrot.slane %v21152_v24, 1  ;;  %v17763_v28 = vld [vmem:[#allocation10 + $0x404] ss:$16 sps:$4 sm:$0xff]   ;;  %v17758_v29 = vld [vmem:[#allocation7 + $0x228] ss:$16 sps:$4 sm:$0xff]  }
 0x1be   : > { %1111 = vmatprep.mubr.bf16.mxu1 %v20600_v0  ;;  %1301 = vmatprep.subr.bf16.mxu1 %v17702_v39  ;;  %v17761_v30 = vld [vmem:[#allocation10 + $0x400] ss:$16 sps:$4 sm:$0xff]   ;;  %v17766_v31 = vld [vmem:[#allocation10 + $0x40c] ss:$16 sps:$4 sm:$0xff]   ;;  %v17764_v33 = vld [vmem:[#allocation10 + $0x408] ss:$16 sps:$4 sm:$0xff]  }
 0x1bf   : > { %v1380_v32 = vsel %vm1377_vm2, %v1378_v26, %v1379_v27  ;;  %v17769_v34 = vld [vmem:[#allocation10 + $0x424] ss:$16 sps:$4 sm:$0xff]   ;;  %v17772_v35 = vld [vmem:[#allocation10 + $0x42c] ss:$16 sps:$4 sm:$0xff]   ;;  %v17767_v36 = vld [vmem:[#allocation10 + $0x420] ss:$16 sps:$4 sm:$0xff]  }
 0x1c0   : > { %1249 = vmatpush1.bf16.msra.mxu0 %v17691_v40  ;;  %v17770_v37 = vld [vmem:[#allocation10 + $0x428] ss:$16 sps:$4 sm:$0xff]   ;;  %v17778_v38 = vld [vmem:[#allocation10 + $0x44c] ss:$16 sps:$4 sm:$0xff]   ;;  %v17773_v39 = vld [vmem:[#allocation10 + $0x440] ss:$16 sps:$4 sm:$0xff]  }
 0x1c1   : > { %1250 = vmatprep.subr.bf16.mxu0 %v17699_v41  ;;  %1302 = vmatpush1.bf16.msra.mxu1 %v17700_v43  ;;  %v17781_v40 = vld [vmem:[#allocation10 + $0x464] ss:$16 sps:$4 sm:$0xff]   ;;  %v17776_v42 = vld [vmem:[#allocation10 + $0x448] ss:$16 sps:$4 sm:$0xff]   ;;  %v17784_v43 = vld [vmem:[#allocation10 + $0x46c] ss:$16 sps:$4 sm:$0xff]  }
 0x1c2   : > { %1303 = vmatprep.subr.bf16.mxu1 %v17708_v44  ;;  %v17779_v44 = vld [vmem:[#allocation10 + $0x460] ss:$16 sps:$4 sm:$0xff]   ;;  %v17793_v48 = vld [vmem:[#allocation10 + $0x4a4] ss:$16 sps:$4 sm:$0xff]   ;;  %v17788_v49 = vld [vmem:[#allocation10 + $0x488] ss:$16 sps:$4 sm:$0xff]  }
 0x1c3   : > { %15040 = vmatmul.mubr.msk.bf16.gmra.mrb[4].mxu0 %vm1009_vm1, %v888_v55  ;;  %15042 = vmatmul.mubr.msk.bf16.gmra.mrb[4].mxu1 %vm1009_vm1, %v888_v55  ;;  %v17799_v52 = vld [vmem:[#allocation10 + $0x4c4] ss:$16 sps:$4 sm:$0xff]   ;;  %v17797_v55 = vld [vmem:[#allocation10 + $0x4c0] ss:$16 sps:$4 sm:$0xff]   ;;  %vm4946_vm10 = vcmask 261120   ;;  %s22688_s22 = sld [smem:[#allocation55_spill]] }
 0x1c4   : > { %1251 = vmatpush1.bf16.msra.mxu0 %v17697_v46  ;;  %1278 = vmatprep.mubr.bf16.mxu0 %v20600_v0  ;;  %v17782_v46 = vld [vmem:[#allocation10 + $0x468] ss:$16 sps:$4 sm:$0xff]   ;;  %v17847_v26 = vld [vmem:[#allocation10 + $0x5c4] ss:$16 sps:$4 sm:$0xff]   ;;  %s22689_s26 = sld [smem:[#allocation56_spill]]  ;;  %s22690_s24 = sld [smem:[#allocation42_spill]] }
 0x1c5   : > { %1252 = vmatprep.subr.bf16.mxu0 %v17705_v47  ;;  %1304 = vmatpush1.bf16.msra.mxu1 %v17706_v50  ;;  %v17785_v47 = vld [vmem:[#allocation10 + $0x480] ss:$16 sps:$4 sm:$0xff]   ;;  %v17796_v50 = vld [vmem:[#allocation10 + $0x4ac] ss:$16 sps:$4 sm:$0xff]   ;;  %s22691_s23 = sld [smem:[#allocation48_spill]]  ;;  %s16880_s29 = sshll.u32 %s22666_s0, 4 }
 0x1c6   : > { %1305 = vmatprep.subr.bf16.mxu1 %v17714_v51  ;;  %1331 = vmatprep.mubr.bf16.mxu1 %v20600_v0  ;;  %v17791_v51 = vld [vmem:[#allocation10 + $0x4a0] ss:$16 sps:$4 sm:$0xff]   ;;  %s22692_s13 = sld [smem:[#allocation57_spill]]  ;;  %s20604_s0 = smov [#allocation31]  }
 0x1c7   : > { %s20489_s3 = sshll.u32 %s20604_s0, 4  ;;  %s20490_s3 = int_to_ptr.vmem [resolvable:$false] %s20489_s3 }
 0x1c8   : > { %1253 = vmatpush1.bf16.msra.mxu0 %v17703_v53  ;;  %v17794_v53 = vld [vmem:[#allocation10 + $0x4a8] ss:$16 sps:$4 sm:$0xff]   ;;  %s20491_s21 = scalar_lea.vmem %s20490_s3, 32 }
 0x1c9   : > { %1254 = vmatprep.subr.bf16.mxu0 %v17711_v54  ;;  %1306 = vmatpush1.bf16.msra.mxu1 %v17712_v56  ;;  %v17802_v54 = vld [vmem:[#allocation10 + $0x4cc] ss:$16 sps:$4 sm:$0xff]   ;;  %v17805_v56 = vld [vmem:[#allocation10 + $0x4e4] ss:$16 sps:$4 sm:$0xff]  }
 0x1ca   : > { %1307 = vmatprep.subr.bf16.mxu1 %v17721_v57  ;;  %v17800_v57 = vld [vmem:[#allocation10 + $0x4c8] ss:$16 sps:$4 sm:$0xff]   ;;  %s793_s2 = sand.u32 1, %s22690_s24  }
 0x1cb   : > { %s794_s28 = scalar_lea.vmem [#allocation31], %s793_s2  ;;  %s14765_s24 = scalar_lea.sflag [#allocation9], %s793_s2 }
 0x1cc   : > { %1255 = vmatpush1.bf16.msra.mxu0 %v17709_v58  ;;  %v17808_v58 = vld [vmem:[#allocation10 + $0x4ec] ss:$16 sps:$4 sm:$0xff]   ;;  %s14777_s20 = sshll.u32 %s794_s28, 4  ;;  %s22551_s1 = scalar_lea.hbm %s22692_s13, %s16880_s29  ;;  %s22553_s20 = int_to_ptr.vmem [resolvable:$true] %s14777_s20 }
 0x1cd   : > { %1256 = vmatprep.subr.bf16.mxu0 %v17718_v59  ;;  %1308 = vmatpush1.bf16.msra.mxu1 %v17719_v60  ;;  %v17803_v59 = vld [vmem:[#allocation10 + $0x4e0] ss:$16 sps:$4 sm:$0xff]   ;;  %v17806_v60 = vld [vmem:[#allocation10 + $0x4e8] ss:$16 sps:$4 sm:$0xff]   ;;  %s20485_s5 = scalar_lea.vmem %s22553_s20, 16  ;;  %p22693_p4 = scmp.ne.s32.totalorder %s22691_s23, 0 }
 0x1ce   : > { %1309 = vmatprep.subr.bf16.mxu1 %v17724_v61  ;;  %v17811_v61 = vld [vmem:[#allocation10 + $0x504] ss:$16 sps:$4 sm:$0xff]   ;;  %p20486_p3 = scmp.ne.s32.totalorder %s22553_s20, %s20485_s5  ;;  %p20492_p8 = scmp.lt.s32.totalorder %s22553_s20, %s20490_s3 }
 0x1cf   : > { %p20493_p11 = scmp.lt.s32.totalorder %s20491_s21, %s20485_s5 }
 0x1d0   : > { %1257 = vmatpush1.bf16.msra.mxu0 %v17716_v62  ;;  %v17814_v62 = vld [vmem:[#allocation10 + $0x50c] ss:$16 sps:$4 sm:$0xff]   ;;  %p20487_p12 = pnand %p20486_p3, %p22693_p4 }
 0x1d1   : > { %1509 = vmatprep.subr.bf16.mxu0 %v17727_v63  ;;  %1310 = vmatpush1.bf16.msra.mxu1 %v17722_v1  ;;  %v17809_v63 = vld [vmem:[#allocation10 + $0x500] ss:$16 sps:$4 sm:$0xff]   ;;  %v17812_v1 = vld [vmem:[#allocation10 + $0x508] ss:$16 sps:$4 sm:$0xff]   ;;  %p20494_p13 = por %p20493_p11, %p20492_p8 }
 0x1d2   : > { %1562 = vmatprep.subr.bf16.mxu1 %v17733_v2  ;;  %v17817_v2 = vld [vmem:[#allocation10 + $0x524] ss:$16 sps:$4 sm:$0xff]   ;;  %p20488_p7 = pneg %p20487_p12 }
 0x1d3   : > { %15067 = vmatmul.mubr.msk.bf16.vlgmr.msra.gmra.mrb[0].mxu0 %vm1009_vm1, %v21149_v23 }
 0x1d4   : > { %1510 = vmatpush1.bf16.msra.mxu0 %v17725_v3  ;;  %1288 = vmatprep.mubr.bf16.mxu0 %v20600_v0  ;;  %v17820_v3 = vld [vmem:[#allocation10 + $0x52c] ss:$16 sps:$4 sm:$0xff]   ;;  %p20495_p1 = pnand %p20494_p13, %p20488_p7 }
 0x1d5   : > { %1511 = vmatprep.subr.bf16.mxu0 %v17730_v4  ;;  %15069 = vmatmul.mubr.msk.bf16.vlgmr.msra.gmra.mrb[0].mxu1 %vm1009_vm1, %v21149_v23  ;;  %v17775_v23 = vld [vmem:[#allocation10 + $0x444] ss:$16 sps:$4 sm:$0xff]   ;;  %v17815_v4 = vld [vmem:[#allocation10 + $0x520] ss:$16 sps:$4 sm:$0xff]  }
 0x1d6   : > { %1563 = vmatpush1.bf16.msra.mxu1 %v17731_v5  ;;  %1341 = vmatprep.mubr.bf16.mxu1 %v20600_v0  ;;  %v17818_v5 = vld [vmem:[#allocation10 + $0x528] ss:$16 sps:$4 sm:$0xff]  }
 0x1d7   : > { %1564 = vmatprep.subr.bf16.mxu1 %v17739_v6  ;;  %v17823_v6 = vld [vmem:[#allocation10 + $0x544] ss:$16 sps:$4 sm:$0xff]  }
 0x1d8   : > { %1512 = vmatpush1.bf16.msra.mxu0 %v17728_v7  ;;  %v17826_v7 = vld [vmem:[#allocation10 + $0x54c] ss:$16 sps:$4 sm:$0xff]  }
 0x1d9   : > { %1513 = vmatprep.subr.bf16.mxu0 %v17736_v8  ;;  %v17821_v8 = vld [vmem:[#allocation10 + $0x540] ss:$16 sps:$4 sm:$0xff]  }
 0x1da   : > { %1565 = vmatpush1.bf16.msra.mxu1 %v17737_v9  ;;  %v17824_v9 = vld [vmem:[#allocation10 + $0x548] ss:$16 sps:$4 sm:$0xff]  }
 0x1db   : > { %1566 = vmatprep.subr.bf16.mxu1 %v17745_v10  ;;  %15068 = vmatmul.mubr.msk.bf16.gmra.mrb[4].mxu0 %vm1009_vm1, %v21152_v24  ;;  %v1633_v10 = vlaneseq }
 0x1dc   : > { %1514 = vmatpush1.bf16.msra.mxu0 %v17734_v11  ;;  %1541 = vmatprep.mubr.bf16.mxu0 %v20600_v0  ;;  %v17829_v11 = vld [vmem:[#allocation10 + $0x564] ss:$16 sps:$4 sm:$0xff]  }
 0x1dd   : > { %1515 = vmatprep.subr.bf16.mxu0 %v17742_v12  ;;  %15070 = vmatmul.mubr.msk.bf16.gmra.mrb[4].mxu1 %vm1009_vm1, %v21152_v24  ;;  %v1381_v24 = vrot.slane %v21164_v45, 1  ;;  %v17787_v45 = vld [vmem:[#allocation10 + $0x484] ss:$16 sps:$4 sm:$0xff]   ;;  %v17832_v12 = vld [vmem:[#allocation10 + $0x56c] ss:$16 sps:$4 sm:$0xff]   ;;  %vm1687_vm3 = vcmp.lt.s32.totalorder %v1633_v10, 512 }
 0x1de   : > { %1567 = vmatpush1.bf16.msra.mxu1 %v17743_v13  ;;  %1594 = vmatprep.mubr.bf16.mxu1 %v20600_v0  ;;  %v17827_v13 = vld [vmem:[#allocation10 + $0x560] ss:$16 sps:$4 sm:$0xff]  }
 0x1df   : > { %1568 = vmatprep.subr.bf16.mxu1 %v17751_v14  ;;  %v1382_v41 = vsel %vm1377_vm2, %v1379_v27, %v1381_v24  ;;  %v17830_v14 = vld [vmem:[#allocation10 + $0x568] ss:$16 sps:$4 sm:$0xff]   ;;  %v17850_v27 = vld [vmem:[#allocation10 + $0x5cc] ss:$16 sps:$4 sm:$0xff]   ;;  %v1631_v24 = vld [vmem:[#allocation16] sm:$0xf] }
 0x1e0   : > { %1516 = vmatpush1.bf16.msra.mxu0 %v17740_v15  ;;  %v20601_v15 = vmov 0.0  }
 0x1e1   : > { %1517 = vmatprep.subr.bf16.mxu0 %v17748_v16  ;;  %1689 = vst.msk [vmem:[#allocation2] ss:$8 sm:$0xf] %vm1687_vm3, %v20601_v15  ;;  %1692 = vst.msk [vmem:[#allocation2 + $0x81] ss:$8 sm:$0xf] %vm1687_vm3, %v20601_v15 }
 0x1e2   : > { %1569 = vmatpush1.bf16.msra.mxu1 %v17749_v17  ;;  %6607 = vst.msk [vmem:[#allocation4] ss:$8 sm:$0xf] %vm1687_vm3, %v20601_v15  ;;  %6610 = vst.msk [vmem:[#allocation4 + $0x41] ss:$8 sm:$0xf] %vm1687_vm3, %v20601_v15 }
 0x1e3   : > { %1570 = vmatprep.subr.bf16.mxu1 %v17757_v18  ;;  %11175 = vst.msk [vmem:[#allocation6] ss:$8 sm:$0xf] %vm1687_vm3, %v20601_v15  ;;  %11178 = vst.msk [vmem:[#allocation6 + $0x21] ss:$8 sm:$0xf] %vm1687_vm3, %v20601_v15 }
 0x1e4   : > { %1518 = vmatpush1.bf16.msra.mxu0 %v17746_v19  ;;  %v17835_v16 = vld [vmem:[#allocation10 + $0x584] ss:$16 sps:$4 sm:$0xff]   ;;  %v17838_v17 = vld [vmem:[#allocation10 + $0x58c] ss:$16 sps:$4 sm:$0xff]   ;;  %v17833_v18 = vld [vmem:[#allocation10 + $0x580] ss:$16 sps:$4 sm:$0xff]  }
 0x1e5   : > { %1519 = vmatprep.subr.bf16.mxu0 %v17754_v20  ;;  %v17836_v19 = vld [vmem:[#allocation10 + $0x588] ss:$16 sps:$4 sm:$0xff]   ;;  %v17841_v20 = vld [vmem:[#allocation10 + $0x5a4] ss:$16 sps:$4 sm:$0xff]  }
 0x1e6   : > { %1571 = vmatpush1.bf16.msra.mxu1 %v17755_v21  ;;  %v17844_v21 = vld [vmem:[#allocation10 + $0x5ac] ss:$16 sps:$4 sm:$0xff]  }
 0x1e7   : > { %1572 = vmatprep.subr.bf16.mxu1 %v17760_v22  ;;  %v17839_v22 = vld [vmem:[#allocation10 + $0x5a0] ss:$16 sps:$4 sm:$0xff]  }
 0x1e8   : > { %1520 = vmatpush1.bf16.msra.mxu0 %v17752_v25  ;;  %v17842_v25 = vld [vmem:[#allocation10 + $0x5a8] ss:$16 sps:$4 sm:$0xff]  }
 0x1e9   : > { %2796 = vmatprep.subr.bf16.mxu0 %v17763_v28  ;;  %v17845_v28 = vld [vmem:[#allocation10 + $0x5c0] ss:$16 sps:$4 sm:$0xff]  }
 0x1ea   : > { %1573 = vmatpush1.bf16.msra.mxu1 %v17758_v29  ;;  %v17848_v29 = vld [vmem:[#allocation10 + $0x5c8] ss:$16 sps:$4 sm:$0xff]  }
 0x1eb   : > { %15095 = vmatmul.mubr.msk.bf16.vlgmr.msra.gmra.mrb[0].mxu0 %vm1009_vm1, %v1380_v32  ;;  %2902 = vmatprep.subr.bf16.mxu1 %v17766_v31  ;;  %v17853_v31 = vld [vmem:[#allocation10 + $0x5e4] ss:$16 sps:$4 sm:$0xff]  }
 0x1ec   : > { %1551 = vmatprep.mubr.bf16.mxu0 %v20600_v0  ;;  %2797 = vmatpush1.bf16.msra.mxu0 %v17761_v30  ;;  %v17851_v30 = vld [vmem:[#allocation10 + $0x5e0] ss:$16 sps:$4 sm:$0xff]  }
 0x1ed   : > { %15097 = vmatmul.mubr.msk.bf16.vlgmr.msra.gmra.mrb[0].mxu1 %vm1009_vm1, %v1380_v32  ;;  %2798 = vmatprep.subr.bf16.mxu0 %v17769_v34  ;;  %v17854_v32 = vld [vmem:[#allocation10 + $0x5e8] ss:$16 sps:$4 sm:$0xff]   ;;  %v17859_v34 = vld [vmem:[#allocation10 + $0x604] ss:$16 sps:$4 sm:$0xff]  }
 0x1ee   : > { %1604 = vmatprep.mubr.bf16.mxu1 %v20600_v0  ;;  %2903 = vmatpush1.bf16.msra.mxu1 %v17764_v33  ;;  %v17790_v0 = vld [vmem:[#allocation10 + $0x48c] ss:$16 sps:$4 sm:$0xff]  }
 0x1ef   : > { %2904 = vmatprep.subr.bf16.mxu1 %v17772_v35  ;;  %v17856_v33 = vld [vmem:[#allocation10 + $0x5ec] ss:$16 sps:$4 sm:$0xff]  }
 0x1f0   : > { %2799 = vmatpush1.bf16.msra.mxu0 %v17767_v36  ;;  %v17862_v35 = vld [vmem:[#allocation10 + $0x60c] ss:$16 sps:$4 sm:$0xff]   ;;  %v21203_v36 = vshrl.u32 %v1633_v10, 7 }
 0x1f1   : > { %2800 = vmatprep.subr.bf16.mxu0 %v17775_v23 }
 0x1f2   : > { %2905 = vmatpush1.bf16.msra.mxu1 %v17770_v37  ;;  %v21206_v23 = vsub.s32 0, %v21203_v36  ;;  %v21209_v37 = vsub.s32 1, %v21203_v36 }
 0x1f3   : > { %15096 = vmatmul.mubr.msk.bf16.gmra.mrb[4].mxu0 %vm1009_vm1, %v1382_v41  ;;  %2906 = vmatprep.subr.bf16.mxu1 %v17778_v38  ;;  %v21212_v38 = vsub.s32 2, %v21203_v36 }
 0x1f4   : > { %2801 = vmatpush1.bf16.msra.mxu0 %v17773_v39  ;;  %v21215_v39 = vsub.s32 3, %v21203_v36 }
 0x1f5   : > { %15098 = vmatmul.mubr.msk.bf16.gmra.mrb[4].mxu1 %vm1009_vm1, %v1382_v41  ;;  %2802 = vmatprep.subr.bf16.mxu0 %v17781_v40  ;;  %v1636_v40 = vrot.slane %v1631_v24, %v21206_v23  ;;  %v1640_v41 = vrot.slane %v1631_v24, %v21209_v37 }
 0x1f6   : > { %2907 = vmatpush1.bf16.msra.mxu1 %v17776_v42  ;;  %v1644_v42 = vrot.slane %v1631_v24, %v21212_v38 }
 0x1f7   : > { %2908 = vmatprep.subr.bf16.mxu1 %v17784_v43 }
 0x1f8   : > { %2803 = vmatpush1.bf16.msra.mxu0 %v17779_v44  ;;  %v21221_v44 = vrot.slane %v1631_v24, %v21215_v39 }
 0x1f9   : > { %2804 = vmatprep.subr.bf16.mxu0 %v17787_v45 }
 0x1fa   : > { %2909 = vmatpush1.bf16.msra.mxu1 %v17782_v46 }
 0x1fb   : > { %2910 = vmatprep.subr.bf16.mxu1 %v17790_v0 }
 0x1fc   : > { %2805 = vmatpush1.bf16.msra.mxu0 %v17785_v47 }
 0x1fd   : > { %2806 = vmatprep.subr.bf16.mxu0 %v17793_v48 }
 0x1fe   : > { %2911 = vmatpush1.bf16.msra.mxu1 %v17788_v49 }
 0x1ff   : > { %2912 = vmatprep.subr.bf16.mxu1 %v17796_v50 }
 0x200   : > { %2807 = vmatpush1.bf16.msra.mxu0 %v17791_v51 }
 0x201   : > { %2808 = vmatprep.subr.bf16.mxu0 %v17799_v52 }
 0x202   : > { %2913 = vmatpush1.bf16.msra.mxu1 %v17794_v53 }
 0x203   : > { %2914 = vmatprep.subr.bf16.mxu1 %v17802_v54 }
 0x204   : > { %2809 = vmatpush1.bf16.msra.mxu0 %v17797_v55 }
 0x205   : > { %2810 = vmatprep.subr.bf16.mxu0 %v17805_v56 }
 0x206   : > { %2915 = vmatpush1.bf16.msra.mxu1 %v17800_v57 }
 0x207   : > { %2916 = vmatprep.subr.bf16.mxu1 %v17808_v58 }
 0x208   : > { %2811 = vmatpush1.bf16.msra.mxu0 %v17803_v59 }
 0x209   : > { %2812 = vmatprep.subr.bf16.mxu0 %v17811_v61 }
 0x20a   : > { %2917 = vmatpush1.bf16.msra.mxu1 %v17806_v60 }
 0x20b   : > { %2918 = vmatprep.subr.bf16.mxu1 %v17814_v62 }
 0x20c   : > { %2813 = vmatpush1.bf16.msra.mxu0 %v17809_v63 }
 0x20d   : > { %2814 = vmatprep.subr.bf16.mxu0 %v17817_v2 }
 0x20e   : > { %2919 = vmatpush1.bf16.msra.mxu1 %v17812_v1 }
 0x20f   : > { %2920 = vmatprep.subr.bf16.mxu1 %v17820_v3 }
 0x210   : > { %2815 = vmatpush1.bf16.msra.mxu0 %v17815_v4 }
 0x211   : > { %2816 = vmatprep.subr.bf16.mxu0 %v17823_v6 }
 0x212   : > { %2921 = vmatpush1.bf16.msra.mxu1 %v17818_v5 }
 0x213   : > { %2922 = vmatprep.subr.bf16.mxu1 %v17826_v7 }
 0x214   : > { %2817 = vmatpush1.bf16.msra.mxu0 %v17821_v8 }
 0x215   : > { %2818 = vmatprep.subr.bf16.mxu0 %v17829_v11 }
 0x216   : > { %2923 = vmatpush1.bf16.msra.mxu1 %v17824_v9 }
 0x217   : > { %2924 = vmatprep.subr.bf16.mxu1 %v17832_v12 }
 0x218   : > { %2819 = vmatpush1.bf16.msra.mxu0 %v17827_v13 }
 0x219   : > { %2820 = vmatprep.subr.bf16.mxu0 %v17835_v16 }
 0x21a   : > { %2925 = vmatpush1.bf16.msra.mxu1 %v17830_v14 }
 0x21b   : > { %2926 = vmatprep.subr.bf16.mxu1 %v17838_v17 }
 0x21c   : > { %2821 = vmatpush1.bf16.msra.mxu0 %v17833_v18 }
 0x21d   : > { %2822 = vmatprep.subr.bf16.mxu0 %v17841_v20 }
 0x21e   : > { %2927 = vmatpush1.bf16.msra.mxu1 %v17836_v19 }
 0x21f   : > { %2928 = vmatprep.subr.bf16.mxu1 %v17844_v21 }
 0x220   : > { %2823 = vmatpush1.bf16.msra.mxu0 %v17839_v22 }
 0x221   : > { %2824 = vmatprep.subr.bf16.mxu0 %v17847_v26 }
 0x222   : > { %2929 = vmatpush1.bf16.msra.mxu1 %v17842_v25 }
 0x223   : > { %2930 = vmatprep.subr.bf16.mxu1 %v17850_v27 }
 0x224   : > { %2825 = vmatpush1.bf16.msra.mxu0 %v17845_v28 }
 0x225   : > { %2826 = vmatprep.subr.bf16.mxu0 %v17853_v31 }
 0x226   : > { %2931 = vmatpush1.bf16.msra.mxu1 %v17848_v29 }
 0x227   : > { %2932 = vmatprep.subr.bf16.mxu1 %v17856_v33 }
 0x228   : > { %2827 = vmatpush1.bf16.msra.mxu0 %v17851_v30 }
 0x229   : > { %2849 = vmatprep.subr.bf16.mxu0 %v17859_v34 }
 0x22a   : > { %2933 = vmatpush1.bf16.msra.mxu1 %v17854_v32 }
 0x22b   : > { %2955 = vmatprep.subr.bf16.mxu1 %v17862_v35 }
 0x2be   : > { %v1543_v43 = vpop.f32.mrb[0].mxu0 }
 0x2bf   : > { %v1653_v45 = vadd.f32 %v1636_v40, %v1543_v43  ;;  %v1545_v46 = vpop.f32.mrb[1].mxu0 }
 0x2c0   : > { %v1654_v0 = vadd.f32 %v1640_v41, %v1545_v46  ;;  %v1547_v47 = vpop.f32.mrb[2].mxu0  ;;  %v1596_v48 = vpop.f32.mrb[0].mxu1 }
 0x2c1   : > { %v1669_v49 = vmax.f32 %v1653_v45, 0.0  ;;  %v1657_v50 = vadd.f32 %v1636_v40, %v1547_v47  ;;  %v1549_v51 = vpop.f32.mrb[3].mxu0  ;;  %v1655_v52 = vadd.f32 %v1644_v42, %v1596_v48  ;;  %v1598_v53 = vpop.f32.mrb[1].mxu1 }
 0x2c2   : > { %v1670_v54 = vmax.f32 %v1654_v0, 0.0  ;;  %v1658_v55 = vadd.f32 %v1640_v41, %v1549_v51  ;;  %v1656_v56 = vadd.f32 %v21221_v44, %v1598_v53  ;;  %v1600_v57 = vpop.f32.mrb[2].mxu1 }
 0x2c3   : > { %v1711_v58 = vrot.slane %v1669_v49, 7  ;;  %v1673_v59 = vmax.f32 %v1657_v50, 0.0  ;;  %v1671_v60 = vmax.f32 %v1655_v52, 0.0  ;;  %v1659_v61 = vadd.f32 %v1644_v42, %v1600_v57  ;;  %v1602_v62 = vpop.f32.mrb[3].mxu1 }
 0x2c4   : > { %v1712_v63 = vrot.slane %v1670_v54, 7  ;;  %v1674_v1 = vmax.f32 %v1658_v55, 0.0  ;;  %v1672_v2 = vmax.f32 %v1656_v56, 0.0  ;;  %v1660_v3 = vadd.f32 %v21221_v44, %v1602_v62 }
 0x2c5   : > { %1759 = vst [vmem:[#allocation2] sm:$0xfe] %v1711_v58  ;;  %v1715_v4 = vrot.slane %v1673_v59, 7  ;;  %v1713_v5 = vrot.slane %v1671_v60, 7  ;;  %v1675_v6 = vmax.f32 %v1659_v61, 0.0 }
 0x2c6   : > { %1760 = vst [vmem:[#allocation2 + $0x8] sm:$0xfe] %v1712_v63  ;;  %v1717_v7 = vrot.slane %v1674_v1, 7  ;;  %v1553_v8 = vpop.f32.mrb[4].mxu0  ;;  %v1714_v9 = vrot.slane %v1672_v2, 7  ;;  %v1676_v11 = vmax.f32 %v1660_v3, 0.0 }
 0x2c7   : > { %v1716_v12 = vsel %vm1710_vm4, %v1711_v58, %v1715_v4  ;;  %v1661_v13 = vadd.f32 %v1636_v40, %v1553_v8  ;;  %1761 = vst [vmem:[#allocation2 + $0x10] sm:$0xfe] %v1713_v5  ;;  %v1555_v14 = vpop.f32.mrb[5].mxu0  ;;  %v1719_v16 = vrot.slane %v1675_v6, 7 }
 0x2c8   : > { %v1718_v17 = vsel %vm1710_vm4, %v1712_v63, %v1717_v7  ;;  %v1662_v18 = vadd.f32 %v1640_v41, %v1555_v14  ;;  %1762 = vst [vmem:[#allocation2 + $0x18] sm:$0xfe] %v1714_v9  ;;  %v1557_v19 = vpop.f32.mrb[6].mxu0  ;;  %v1721_v20 = vrot.slane %v1676_v11, 7  ;;  %v1606_v21 = vpop.f32.mrb[4].mxu1 }
 0x2c9   : > { %v1677_v22 = vmax.f32 %v1661_v13, 0.0  ;;  %v1665_v25 = vadd.f32 %v1636_v40, %v1557_v19  ;;  %v21228_v26 = vsel %vm1710_vm4, %v1713_v5, %v1719_v16  ;;  %v1559_v27 = vpop.f32.mrb[7].mxu0  ;;  %v1663_v28 = vadd.f32 %v1644_v42, %v1606_v21  ;;  %v1608_v29 = vpop.f32.mrb[5].mxu1  ;;  %v17857_v13 = vld [vmem:[#allocation10 + $0x600] ss:$16 sps:$4 sm:$0xff]  }
 0x2ca   : > { %v1678_v30 = vmax.f32 %v1662_v18, 0.0  ;;  %v1666_v31 = vadd.f32 %v1640_v41, %v1559_v27  ;;  %v1722_v32 = vsel %vm1710_vm4, %v1714_v9, %v1721_v20  ;;  %v1664_v33 = vadd.f32 %v21221_v44, %v1608_v29  ;;  %v1610_v34 = vpop.f32.mrb[6].mxu1  ;;  %v17860_v21 = vld [vmem:[#allocation10 + $0x608] ss:$16 sps:$4 sm:$0xff]  }
 0x2cb   : > { %v1723_v35 = vrot.slane %v1677_v22, 7  ;;  %v1681_v24 = vmax.f32 %v1665_v25, 0.0  ;;  %v1679_v43 = vmax.f32 %v1663_v28, 0.0  ;;  %v1667_v45 = vadd.f32 %v1644_v42, %v1610_v34  ;;  %v1612_v46 = vpop.f32.mrb[7].mxu1  ;;  %v17865_v22 = vld [vmem:[#allocation10 + $0x624] ss:$16 sps:$4 sm:$0xff]  }
 0x2cc   : > { %v1725_v0 = vrot.slane %v1678_v30, 7  ;;  %v1682_v40 = vmax.f32 %v1666_v31, 0.0  ;;  %v1680_v47 = vmax.f32 %v1664_v33, 0.0  ;;  %v1668_v48 = vadd.f32 %v21221_v44, %v1612_v46  ;;  %v1779_v53 = vld [vmem:[#allocation2] sm:$0xff]  ;;  %v17868_v28 = vld [vmem:[#allocation10 + $0x62c] ss:$16 sps:$4 sm:$0xff]  }
 0x2cd   : > { %v1724_v49 = vsel %vm1710_vm4, %v1715_v4, %v1723_v35  ;;  %v1731_v50 = vrot.slane %v1681_v24, 7  ;;  %v1727_v51 = vrot.slane %v1679_v43, 7  ;;  %v1683_v41 = vmax.f32 %v1667_v45, 0.0  ;;  %v1780_v52 = vld [vmem:[#allocation2 + $0x8] sm:$0xff]  ;;  %v17863_v24 = vld [vmem:[#allocation10 + $0x620] ss:$16 sps:$4 sm:$0xff]  }
 0x2ce   : > { %v1726_v54 = vsel %vm1710_vm4, %v1717_v7, %v1725_v0  ;;  %v1733_v55 = vrot.slane %v1682_v40, 7  ;;  %v1729_v56 = vrot.slane %v1680_v47, 7  ;;  %v1684_v57 = vmax.f32 %v1668_v48, 0.0  ;;  %v17866_v43 = vld [vmem:[#allocation10 + $0x628] ss:$16 sps:$4 sm:$0xff]  }
 0x2cf   : > { %v1732_v42 = vsel %vm1710_vm4, %v1723_v35, %v1731_v50  ;;  %1775 = vst [vmem:[#allocation2 + $0x80] sm:$0x1] %v1731_v50  ;;  %v1728_v58 = vsel %vm1710_vm4, %v1719_v16, %v1727_v51  ;;  %v1735_v59 = vrot.slane %v1683_v41, 7  ;;  %v21237_v60 = vpack.c.bf16 %v1718_v17, %v1780_v52  ;;  %v1782_v1 = vld [vmem:[#allocation2 + $0x18] sm:$0xff] }
 0x2d0   : > { %v1734_v44 = vsel %vm1710_vm4, %v1725_v0, %v1733_v55  ;;  %1776 = vst [vmem:[#allocation2 + $0x88] sm:$0x1] %v1733_v55  ;;  %v1730_v61 = vsel %vm1710_vm4, %v1721_v20, %v1729_v56  ;;  %v1737_v62 = vrot.slane %v1684_v57, 7  ;;  %v21241_v63 = vpack.c.bf16 %v1716_v12, %v1779_v53  ;;  %v17874_v52 = vld [vmem:[#allocation10 + $0x64c] ss:$16 sps:$4 sm:$0xff]  }
 0x2d1   : > { %v1736_v2 = vsel %vm1710_vm4, %v1727_v51, %v1735_v59  ;;  %1777 = vst [vmem:[#allocation2 + $0x90] sm:$0x1] %v1735_v59  ;;  %v21244_v3 = vpack.c.bf16 %v1734_v44, %v1726_v54  ;;  %v2083_v4 = vshll.u32 %v21237_v60, 16  ;;  %v21248_v6 = vpack.c.bf16 %v1732_v42, %v1724_v49  ;;  %v17871_v49 = vld [vmem:[#allocation10 + $0x644] ss:$16 sps:$4 sm:$0xff]  }
 0x2d2   : > { %v1738_v5 = vsel %vm1710_vm4, %v1729_v56, %v1737_v62  ;;  %1778 = vst [vmem:[#allocation2 + $0x98] sm:$0x1] %v1737_v62  ;;  %v2071_v7 = vshll.u32 %v21241_v63, 16  ;;  %v2081_v8 = vshrl.u32 %v21237_v60, 16  ;;  %v21253_v12 = vpack.c.bf16 %v1722_v32, %v1782_v1  ;;  %v17869_v56 = vld [vmem:[#allocation10 + $0x640] ss:$16 sps:$4 sm:$0xff]  }
 0x2d3   : > { %v2085_v9 = vrot.slane %v2083_v4, 1  ;;  %v2088_v11 = vshll.u32 %v21244_v3, 16  ;;  %v2069_v14 = vshrl.u32 %v21241_v63, 16  ;;  %v2076_v17 = vshll.u32 %v21248_v6, 16  ;;  %v17872_v57 = vld [vmem:[#allocation10 + $0x648] ss:$16 sps:$4 sm:$0xff]  }
 0x2d4   : > { %v2073_v16 = vrot.slane %v2071_v7, 1  ;;  %v21257_v18 = vpack.c.bf16 %v1738_v5, %v1730_v61  ;;  %v2107_v30 = vshll.u32 %v21253_v12, 16  ;;  %v21267_v46 = vpack.c.bf16 %v1736_v2, %v1728_v58  ;;  %v17877_v59 = vld [vmem:[#allocation10 + $0x664] ss:$16 sps:$4 sm:$0xff]   ;;  %v17880_v44 = vld [vmem:[#allocation10 + $0x66c] ss:$16 sps:$4 sm:$0xff]  }
 0x2d5   : > { %v2086_v19 = vor.u32 %v2085_v9, %v2081_v8  ;;  %v2090_v20 = vrot.slane %v2088_v11, 1  ;;  %v2078_v27 = vrot.slane %v2076_v17, 1  ;;  %v2124_v0 = vshrl.u32 %v21244_v3, 16  ;;  %v17875_v2 = vld [vmem:[#allocation10 + $0x660] ss:$16 sps:$4 sm:$0xff]  }
 0x2d6   : > { %v2074_v25 = vor.u32 %v2073_v16, %v2069_v14  ;;  %v1795_v29 = vld [vmem:[#allocation2 + $0x80] sm:$0x3]  ;;  %v2105_v47 = vshrl.u32 %v21253_v12, 16  ;;  %v2109_v48 = vrot.slane %v2107_v30, 1  ;;  %v2116_v50 = vshrl.u32 %v21248_v6, 16 }
 0x2d7   : > { %v2091_v31 = vsel %vm868_vm0, %v2086_v19, %v2090_v20  ;;  %v1796_v32 = vld [vmem:[#allocation2 + $0x88] sm:$0x3]  ;;  %v21261_v33 = vpack.c.bf16 %v1795_v29, %v1795_v29  ;;  %v2126_v51 = vor.u32 %v2124_v0, %v2090_v20  ;;  %v2112_v54 = vshll.u32 %v21257_v18, 16  ;;  %v17883_v5 = vld [vmem:[#allocation10 + $0x684] ss:$16 sps:$4 sm:$0xff]  }
 0x2d8   : > { %2828 = vmatprep.mubr.bf16.mxu0 %v2091_v31  ;;  %2934 = vmatprep.mubr.bf16.mxu1 %v2091_v31  ;;  %v2079_v34 = vsel %vm868_vm0, %v2074_v25, %v2078_v27  ;;  %v21264_v35 = vpack.c.bf16 %v1796_v32, %v1796_v32  ;;  %v2118_v42 = vor.u32 %v2116_v50, %v2078_v27  ;;  %v17878_v4 = vld [vmem:[#allocation10 + $0x668] ss:$16 sps:$4 sm:$0xff]   ;;  %v17886_v7 = vld [vmem:[#allocation10 + $0x68c] ss:$16 sps:$4 sm:$0xff]   ;;  %v17881_v8 = vld [vmem:[#allocation10 + $0x680] ss:$16 sps:$4 sm:$0xff]  }
 0x2d9   : > { %2829 = vmatmul.mubr.bf16.vlgmr.msra.gmra.mrb[8].mxu0 %v2079_v34  ;;  %2935 = vmatmul.mubr.bf16.vlgmr.msra.gmra.mrb[8].mxu1 %v2079_v34  ;;  %v2120_v45 = vshll.u32 %v21261_v33, 16  ;;  %v2110_v58 = vor.u32 %v2109_v48, %v2105_v47  ;;  %v21276_v62 = vrot.slane %v2112_v54, 1  ;;  %v17884_v9 = vld [vmem:[#allocation10 + $0x688] ss:$16 sps:$4 sm:$0xff]   ;;  %v17889_v11 = vld [vmem:[#allocation10 + $0x6a4] ss:$16 sps:$4 sm:$0xff]  }
 0x2da   : > { %2850 = vmatpush1.bf16.msra.mxu0 %v17857_v13  ;;  %2956 = vmatpush1.bf16.msra.mxu1 %v17860_v21  ;;  %v2128_v40 = vshll.u32 %v21264_v35, 16  ;;  %v17892_v13 = vld [vmem:[#allocation10 + $0x6ac] ss:$16 sps:$4 sm:$0xff]   ;;  %v17887_v14 = vld [vmem:[#allocation10 + $0x6a0] ss:$16 sps:$4 sm:$0xff]  }
 0x2db   : > { %2851 = vmatprep.subr.bf16.mxu0 %v17865_v22  ;;  %2957 = vmatprep.subr.bf16.mxu1 %v17868_v28  ;;  %v2122_v53 = vrot.slane %v2120_v45, 1  ;;  %v2115_v1 = vsel %vm868_vm0, %v2110_v58, %v21276_v62  ;;  %v17890_v16 = vld [vmem:[#allocation10 + $0x6a8] ss:$16 sps:$4 sm:$0xff]   ;;  %v17895_v17 = vld [vmem:[#allocation10 + $0x6c4] ss:$16 sps:$4 sm:$0xff]  }
 0x2dc   : > { %v2130_v41 = vrot.slane %v2128_v40, 1  ;;  %v17898_v19 = vld [vmem:[#allocation10 + $0x6cc] ss:$16 sps:$4 sm:$0xff]   ;;  %v17893_v20 = vld [vmem:[#allocation10 + $0x6c0] ss:$16 sps:$4 sm:$0xff]  }
 0x2dd   : > { %v2123_v61 = vsel %vm868_vm0, %v2118_v42, %v2122_v53  ;;  %v17896_v21 = vld [vmem:[#allocation10 + $0x6c8] ss:$16 sps:$4 sm:$0xff]   ;;  %v17901_v22 = vld [vmem:[#allocation10 + $0x6e4] ss:$16 sps:$4 sm:$0xff]   ;;  %v17904_v25 = vld [vmem:[#allocation10 + $0x6ec] ss:$16 sps:$4 sm:$0xff]  }
 0x2de   : > { %v2131_v55 = vsel %vm868_vm0, %v2126_v51, %v2130_v41  ;;  %2852 = vmatpush1.bf16.msra.mxu0 %v17863_v24  ;;  %2958 = vmatpush1.bf16.msra.mxu1 %v17866_v43  ;;  %v17899_v27 = vld [vmem:[#allocation10 + $0x6e0] ss:$16 sps:$4 sm:$0xff]   ;;  %v17902_v28 = vld [vmem:[#allocation10 + $0x6e8] ss:$16 sps:$4 sm:$0xff]   ;;  %v17907_v29 = vld [vmem:[#allocation10 + $0x704] ss:$16 sps:$4 sm:$0xff]  }
 0x2df   : > { %2838 = vmatprep.mubr.bf16.mxu0 %v2131_v55  ;;  %2944 = vmatprep.mubr.bf16.mxu1 %v2131_v55  ;;  %v17910_v30 = vld [vmem:[#allocation10 + $0x70c] ss:$16 sps:$4 sm:$0xff]   ;;  %v17905_v31 = vld [vmem:[#allocation10 + $0x700] ss:$16 sps:$4 sm:$0xff]   ;;  %v17908_v32 = vld [vmem:[#allocation10 + $0x708] ss:$16 sps:$4 sm:$0xff]  }
 0x2e0   : > { %2853 = vmatprep.subr.bf16.mxu0 %v17871_v49  ;;  %2959 = vmatprep.subr.bf16.mxu1 %v17874_v52  ;;  %v17913_v34 = vld [vmem:[#allocation10 + $0x724] ss:$16 sps:$4 sm:$0xff]   ;;  %v17916_v24 = vld [vmem:[#allocation10 + $0x72c] ss:$16 sps:$4 sm:$0xff]   ;;  %v17911_v43 = vld [vmem:[#allocation10 + $0x720] ss:$16 sps:$4 sm:$0xff]  }
 0x2e1   : > { %2839 = vmatmul.mubr.bf16.gmra.mrb[12].mxu0 %v2123_v61  ;;  %2945 = vmatmul.mubr.bf16.gmra.mrb[12].mxu1 %v2123_v61  ;;  %v17914_v45 = vld [vmem:[#allocation10 + $0x728] ss:$16 sps:$4 sm:$0xff]   ;;  %v17919_v0 = vld [vmem:[#allocation10 + $0x744] ss:$16 sps:$4 sm:$0xff]   ;;  %v17922_v40 = vld [vmem:[#allocation10 + $0x74c] ss:$16 sps:$4 sm:$0xff]  }
 0x2e2   : > { %2854 = vmatpush1.bf16.msra.mxu0 %v17869_v56  ;;  %2960 = vmatpush1.bf16.msra.mxu1 %v17872_v57  ;;  %v17917_v47 = vld [vmem:[#allocation10 + $0x740] ss:$16 sps:$4 sm:$0xff]   ;;  %v17920_v48 = vld [vmem:[#allocation10 + $0x748] ss:$16 sps:$4 sm:$0xff]   ;;  %v17925_v49 = vld [vmem:[#allocation10 + $0x764] ss:$16 sps:$4 sm:$0xff]  }
 0x2e3   : > { %2881 = vmatprep.mubr.bf16.mxu0 %v2115_v1  ;;  %2987 = vmatprep.mubr.bf16.mxu1 %v2115_v1  ;;  %v17928_v50 = vld [vmem:[#allocation10 + $0x76c] ss:$16 sps:$4 sm:$0xff]   ;;  %v17923_v51 = vld [vmem:[#allocation10 + $0x760] ss:$16 sps:$4 sm:$0xff]   ;;  %v17926_v41 = vld [vmem:[#allocation10 + $0x768] ss:$16 sps:$4 sm:$0xff]  }
 0x2e4   : > { %2855 = vmatprep.subr.bf16.mxu0 %v17877_v59  ;;  %2961 = vmatprep.subr.bf16.mxu1 %v17880_v44  ;;  %v17931_v52 = vld [vmem:[#allocation10 + $0x784] ss:$16 sps:$4 sm:$0xff]   ;;  %v17934_v53 = vld [vmem:[#allocation10 + $0x78c] ss:$16 sps:$4 sm:$0xff]   ;;  %v17929_v54 = vld [vmem:[#allocation10 + $0x780] ss:$16 sps:$4 sm:$0xff]  }
 0x2e5   : > { %v17932_v55 = vld [vmem:[#allocation10 + $0x788] ss:$16 sps:$4 sm:$0xff]   ;;  %v17937_v56 = vld [vmem:[#allocation10 + $0x7a4] ss:$16 sps:$4 sm:$0xff]   ;;  %v17940_v57 = vld [vmem:[#allocation10 + $0x7ac] ss:$16 sps:$4 sm:$0xff]  }
 0x2e6   : > { %2856 = vmatpush1.bf16.msra.mxu0 %v17875_v2  ;;  %2962 = vmatpush1.bf16.msra.mxu1 %v17878_v4  ;;  %v1781_v42 = vld [vmem:[#allocation2 + $0x10] sm:$0xff]  ;;  %v17938_v59 = vld [vmem:[#allocation10 + $0x7a8] ss:$16 sps:$4 sm:$0xff]   ;;  %v17946_v1 = vld [vmem:[#allocation10 + $0x7cc] ss:$16 sps:$4 sm:$0xff]  }
 0x2e7   : > { %2857 = vmatprep.subr.bf16.mxu0 %v17883_v5  ;;  %2963 = vmatprep.subr.bf16.mxu1 %v17886_v7  ;;  %v17935_v58 = vld [vmem:[#allocation10 + $0x7a0] ss:$16 sps:$4 sm:$0xff]   ;;  %v21281_v44 = vpack.c.bf16 %v21228_v26, %v1781_v42  ;;  %v17943_v61 = vld [vmem:[#allocation10 + $0x7c4] ss:$16 sps:$4 sm:$0xff]   ;;  %v1798_v2 = vld [vmem:[#allocation2 + $0x98] sm:$0x3] }
 0x2e8   : > { %v17941_v4 = vld [vmem:[#allocation10 + $0x7c0] ss:$16 sps:$4 sm:$0xff]   ;;  %v17944_v5 = vld [vmem:[#allocation10 + $0x7c8] ss:$16 sps:$4 sm:$0xff]  }
 0x2e9   : > { %v2095_v7 = vshll.u32 %v21281_v44, 16  ;;  %v17947_v26 = vld [vmem:[#allocation10 + $0x7e0] ss:$16 sps:$4 sm:$0xff]   ;;  %v17974_v42 = vld [vmem:[#allocation10 + $0x68] ss:$16 sps:$4 sm:$0xff]  }
 0x2ea   : > { %2858 = vmatpush1.bf16.msra.mxu0 %v17881_v8  ;;  %2964 = vmatpush1.bf16.msra.mxu1 %v17884_v9  ;;  %v17949_v8 = vld [vmem:[#allocation10 + $0x7e4] ss:$16 sps:$4 sm:$0xff]   ;;  %v17952_v9 = vld [vmem:[#allocation10 + $0x7ec] ss:$16 sps:$4 sm:$0xff]  }
 0x2eb   : > { %2859 = vmatprep.subr.bf16.mxu0 %v17889_v11  ;;  %2965 = vmatprep.subr.bf16.mxu1 %v17892_v13  ;;  %v21284_v11 = vpack.c.bf16 %v1798_v2, %v1798_v2  ;;  %v17950_v13 = vld [vmem:[#allocation10 + $0x7e8] ss:$16 sps:$4 sm:$0xff]   ;;  %v17985_v2 = vld [vmem:[#allocation10 + $0xa4] ss:$16 sps:$4 sm:$0xff]  }
 0x2ee   : > { %2860 = vmatpush1.bf16.msra.mxu0 %v17887_v14  ;;  %2966 = vmatpush1.bf16.msra.mxu1 %v17890_v16  ;;  %v2093_v14 = vshrl.u32 %v21281_v44, 16  ;;  %v2097_v16 = vrot.slane %v2095_v7, 1  ;;  %v17986_v7 = vld [vmem:[#allocation10 + $0xa8] ss:$16 sps:$4 sm:$0xff]  }
 0x2ef   : > { %2861 = vmatprep.subr.bf16.mxu0 %v17895_v17  ;;  %2967 = vmatprep.subr.bf16.mxu1 %v17898_v19  ;;  %v17955_v17 = vld [vmem:[#allocation10 + $0x4] ss:$16 sps:$4 sm:$0xff]   ;;  %v17958_v19 = vld [vmem:[#allocation10 + $0xc] ss:$16 sps:$4 sm:$0xff]  }
 0x2f2   : > { %2862 = vmatpush1.bf16.msra.mxu0 %v17893_v20  ;;  %2968 = vmatpush1.bf16.msra.mxu1 %v17896_v21  ;;  %v2140_v20 = vshrl.u32 %v21257_v18, 16  ;;  %v2144_v21 = vshll.u32 %v21284_v11, 16 }
 0x2f3   : > { %2863 = vmatprep.subr.bf16.mxu0 %v17901_v22  ;;  %2969 = vmatprep.subr.bf16.mxu1 %v17904_v25  ;;  %v1797_v22 = vld [vmem:[#allocation2 + $0x90] sm:$0x3]  ;;  %v2100_v25 = vshll.u32 %v21267_v46, 16 }
 0x2f6   : > { %2864 = vmatpush1.bf16.msra.mxu0 %v17899_v27  ;;  %2970 = vmatpush1.bf16.msra.mxu1 %v17902_v28  ;;  %v2098_v27 = vor.u32 %v2097_v16, %v2093_v14  ;;  %v21290_v28 = vpack.c.bf16 %v1797_v22, %v1797_v22  ;;  %v17997_v14 = vld [vmem:[#allocation10 + $0xe4] ss:$16 sps:$4 sm:$0xff]   ;;  %v18000_v16 = vld [vmem:[#allocation10 + $0xec] ss:$16 sps:$4 sm:$0xff]   ;;  %v18001_v22 = vld [vmem:[#allocation10 + $0x100] ss:$16 sps:$4 sm:$0xff]  }
 0x2f7   : > { %2865 = vmatprep.subr.bf16.mxu0 %v17907_v29  ;;  %2971 = vmatprep.subr.bf16.mxu1 %v17910_v30  ;;  %v17953_v29 = vld [vmem:[#allocation10] ss:$16 sps:$4 sm:$0xff]   ;;  %v17956_v30 = vld [vmem:[#allocation10 + $0x8] ss:$16 sps:$4 sm:$0xff]  }
 0x2fa   : > { %2866 = vmatpush1.bf16.msra.mxu0 %v17905_v31  ;;  %2972 = vmatpush1.bf16.msra.mxu1 %v17908_v32  ;;  %v2142_v31 = vor.u32 %v2140_v20, %v21276_v62  ;;  %v2146_v32 = vrot.slane %v2144_v21, 1  ;;  %v17959_v62 = vld [vmem:[#allocation10 + $0x20] ss:$16 sps:$4 sm:$0xff]   ;;  %v18003_v20 = vld [vmem:[#allocation10 + $0x104] ss:$16 sps:$4 sm:$0xff]  }
 0x2fb   : > { %2867 = vmatprep.subr.bf16.mxu0 %v17913_v34  ;;  %2973 = vmatprep.subr.bf16.mxu1 %v17916_v24  ;;  %v2102_v34 = vrot.slane %v2100_v25, 1  ;;  %v17961_v24 = vld [vmem:[#allocation10 + $0x24] ss:$16 sps:$4 sm:$0xff]   ;;  %v18006_v21 = vld [vmem:[#allocation10 + $0x10c] ss:$16 sps:$4 sm:$0xff]  }
 0x2fc   : > { %v18004_v25 = vld [vmem:[#allocation10 + $0x108] ss:$16 sps:$4 sm:$0xff]  }
 0x2fe   : > { %2868 = vmatpush1.bf16.msra.mxu0 %v17911_v43  ;;  %2974 = vmatpush1.bf16.msra.mxu1 %v17914_v45  ;;  %v17964_v43 = vld [vmem:[#allocation10 + $0x2c] ss:$16 sps:$4 sm:$0xff]   ;;  %v2103_v45 = vsel %vm868_vm0, %v2098_v27, %v2102_v34  ;;  %v18009_v27 = vld [vmem:[#allocation10 + $0x124] ss:$16 sps:$4 sm:$0xff]  }
 0x2ff   : > { %2869 = vmatprep.subr.bf16.mxu0 %v17919_v0  ;;  %2975 = vmatprep.subr.bf16.mxu1 %v17922_v40  ;;  %v2132_v0 = vshrl.u32 %v21267_v46, 16  ;;  %v2136_v40 = vshll.u32 %v21290_v28, 16 }
 0x302   : > { %2870 = vmatpush1.bf16.msra.mxu0 %v17917_v47  ;;  %2976 = vmatpush1.bf16.msra.mxu1 %v17920_v48  ;;  %v2147_v47 = vsel %vm868_vm0, %v2142_v31, %v2146_v32  ;;  %v17962_v48 = vld [vmem:[#allocation10 + $0x28] ss:$16 sps:$4 sm:$0xff]   ;;  %v18015_v32 = vld [vmem:[#allocation10 + $0x144] ss:$16 sps:$4 sm:$0xff]  }
 0x303   : > { %2871 = vmatprep.subr.bf16.mxu0 %v17925_v49  ;;  %2977 = vmatprep.subr.bf16.mxu1 %v17928_v50  ;;  %v17967_v49 = vld [vmem:[#allocation10 + $0x44] ss:$16 sps:$4 sm:$0xff]   ;;  %v17970_v50 = vld [vmem:[#allocation10 + $0x4c] ss:$16 sps:$4 sm:$0xff]   ;;  %v18010_v31 = vld [vmem:[#allocation10 + $0x128] ss:$16 sps:$4 sm:$0xff]  }
 0x306   : > { %2872 = vmatpush1.bf16.msra.mxu0 %v17923_v51  ;;  %2978 = vmatpush1.bf16.msra.mxu1 %v17926_v41  ;;  %v2134_v51 = vor.u32 %v2132_v0, %v2102_v34  ;;  %v2138_v41 = vrot.slane %v2136_v40, 1  ;;  %v18018_v34 = vld [vmem:[#allocation10 + $0x14c] ss:$16 sps:$4 sm:$0xff]   ;;  %v18019_v40 = vld [vmem:[#allocation10 + $0x160] ss:$16 sps:$4 sm:$0xff]  }
 0x307   : > { %2873 = vmatprep.subr.bf16.mxu0 %v17931_v52  ;;  %2979 = vmatprep.subr.bf16.mxu1 %v17934_v53  ;;  %v17965_v52 = vld [vmem:[#allocation10 + $0x40] ss:$16 sps:$4 sm:$0xff]   ;;  %v17968_v53 = vld [vmem:[#allocation10 + $0x48] ss:$16 sps:$4 sm:$0xff]   ;;  %v18024_v0 = vld [vmem:[#allocation10 + $0x16c] ss:$16 sps:$4 sm:$0xff]  }
 0x30a   : > { %2874 = vmatpush1.bf16.msra.mxu0 %v17929_v54  ;;  %2980 = vmatpush1.bf16.msra.mxu1 %v17932_v55  ;;  %v17973_v54 = vld [vmem:[#allocation10 + $0x64] ss:$16 sps:$4 sm:$0xff]   ;;  %v17976_v55 = vld [vmem:[#allocation10 + $0x6c] ss:$16 sps:$4 sm:$0xff]  }
 0x30b   : > { %2875 = vmatprep.subr.bf16.mxu0 %v17937_v56  ;;  %2981 = vmatprep.subr.bf16.mxu1 %v17940_v57  ;;  %v2139_v56 = vsel %vm868_vm0, %v2134_v51, %v2138_v41  ;;  %v17971_v57 = vld [vmem:[#allocation10 + $0x60] ss:$16 sps:$4 sm:$0xff]   ;;  %v18033_v51 = vld [vmem:[#allocation10 + $0x1a4] ss:$16 sps:$4 sm:$0xff]   ;;  %v18036_v41 = vld [vmem:[#allocation10 + $0x1ac] ss:$16 sps:$4 sm:$0xff]  }
 0x30e   : > { %2876 = vmatpush1.bf16.msra.mxu0 %v17935_v58  ;;  %2982 = vmatpush1.bf16.msra.mxu1 %v17938_v59  ;;  %v17979_v58 = vld [vmem:[#allocation10 + $0x84] ss:$16 sps:$4 sm:$0xff]   ;;  %v17982_v59 = vld [vmem:[#allocation10 + $0x8c] ss:$16 sps:$4 sm:$0xff]  }
 0x30f   : > { %2877 = vmatprep.subr.bf16.mxu0 %v17943_v61  ;;  %2983 = vmatprep.subr.bf16.mxu1 %v17946_v1  ;;  %v17977_v61 = vld [vmem:[#allocation10 + $0x80] ss:$16 sps:$4 sm:$0xff]   ;;  %v17980_v1 = vld [vmem:[#allocation10 + $0x88] ss:$16 sps:$4 sm:$0xff]  }
 0x312   : > { %2878 = vmatpush1.bf16.msra.mxu0 %v17941_v4  ;;  %2984 = vmatpush1.bf16.msra.mxu1 %v17944_v5  ;;  %v17988_v4 = vld [vmem:[#allocation10 + $0xac] ss:$16 sps:$4 sm:$0xff]   ;;  %v17983_v5 = vld [vmem:[#allocation10 + $0xa0] ss:$16 sps:$4 sm:$0xff]  }
 0x313   : > { %2879 = vmatprep.subr.bf16.mxu0 %v17949_v8  ;;  %2985 = vmatprep.subr.bf16.mxu1 %v17952_v9  ;;  %v17991_v8 = vld [vmem:[#allocation10 + $0xc4] ss:$16 sps:$4 sm:$0xff]   ;;  %v17994_v9 = vld [vmem:[#allocation10 + $0xcc] ss:$16 sps:$4 sm:$0xff]  }
 0x316   : > { %2880 = vmatpush1.bf16.msra.mxu0 %v17947_v26  ;;  %2986 = vmatpush1.bf16.msra.mxu1 %v17950_v13  ;;  %v17989_v26 = vld [vmem:[#allocation10 + $0xc0] ss:$16 sps:$4 sm:$0xff]   ;;  %v17992_v13 = vld [vmem:[#allocation10 + $0xc8] ss:$16 sps:$4 sm:$0xff]  }
 0x317   : > { %3648 = vmatprep.subr.bf16.mxu0 %v17955_v17  ;;  %3754 = vmatprep.subr.bf16.mxu1 %v17958_v19  ;;  %v17995_v17 = vld [vmem:[#allocation10 + $0xe0] ss:$16 sps:$4 sm:$0xff]   ;;  %v17998_v19 = vld [vmem:[#allocation10 + $0xe8] ss:$16 sps:$4 sm:$0xff]  }
 0x319   : > { %2882 = vmatmul.mubr.bf16.vlgmr.msra.gmra.mrb[8].mxu0 %v2103_v45  ;;  %2988 = vmatmul.mubr.bf16.vlgmr.msra.gmra.mrb[8].mxu1 %v2103_v45  ;;  %v18021_v45 = vld [vmem:[#allocation10 + $0x164] ss:$16 sps:$4 sm:$0xff]  }
 0x31a   : > { %2891 = vmatprep.mubr.bf16.mxu0 %v2147_v47  ;;  %2997 = vmatprep.mubr.bf16.mxu1 %v2147_v47  ;;  %v18022_v47 = vld [vmem:[#allocation10 + $0x168] ss:$16 sps:$4 sm:$0xff]  }
 0x31b   : > { %3649 = vmatpush1.bf16.msra.mxu0 %v17953_v29  ;;  %3755 = vmatpush1.bf16.msra.mxu1 %v17956_v30  ;;  %v18012_v29 = vld [vmem:[#allocation10 + $0x12c] ss:$16 sps:$4 sm:$0xff]   ;;  %v18007_v30 = vld [vmem:[#allocation10 + $0x120] ss:$16 sps:$4 sm:$0xff]  }
 0x31c   : > { %3650 = vmatprep.subr.bf16.mxu0 %v17961_v24  ;;  %3756 = vmatprep.subr.bf16.mxu1 %v17964_v43  ;;  %v18013_v24 = vld [vmem:[#allocation10 + $0x140] ss:$16 sps:$4 sm:$0xff]   ;;  %v18016_v43 = vld [vmem:[#allocation10 + $0x148] ss:$16 sps:$4 sm:$0xff]  }
 0x31f   : > { %3651 = vmatpush1.bf16.msra.mxu0 %v17959_v62  ;;  %3757 = vmatpush1.bf16.msra.mxu1 %v17962_v48  ;;  %v18027_v62 = vld [vmem:[#allocation10 + $0x184] ss:$16 sps:$4 sm:$0xff]   ;;  %v18030_v48 = vld [vmem:[#allocation10 + $0x18c] ss:$16 sps:$4 sm:$0xff]  }
 0x320   : > { %3652 = vmatprep.subr.bf16.mxu0 %v17967_v49  ;;  %3758 = vmatprep.subr.bf16.mxu1 %v17970_v50  ;;  %v18025_v49 = vld [vmem:[#allocation10 + $0x180] ss:$16 sps:$4 sm:$0xff]   ;;  %v18028_v50 = vld [vmem:[#allocation10 + $0x188] ss:$16 sps:$4 sm:$0xff]  }
 0x321   : > { %2892 = vmatmul.mubr.bf16.gmra.mrb[12].mxu0 %v2139_v56  ;;  %2998 = vmatmul.mubr.bf16.gmra.mrb[12].mxu1 %v2139_v56  ;;  %v18037_v56 = vld [vmem:[#allocation10 + $0x1c0] ss:$16 sps:$4 sm:$0xff]  }
 0x322   : > { %3680 = vmatprep.mubr.bf16.mxu0 %v21237_v60  ;;  %3786 = vmatprep.mubr.bf16.mxu1 %v21237_v60 }
 0x323   : > { %3653 = vmatpush1.bf16.msra.mxu0 %v17965_v52  ;;  %3759 = vmatpush1.bf16.msra.mxu1 %v17968_v53  ;;  %v18031_v52 = vld [vmem:[#allocation10 + $0x1a0] ss:$16 sps:$4 sm:$0xff]   ;;  %v18034_v53 = vld [vmem:[#allocation10 + $0x1a8] ss:$16 sps:$4 sm:$0xff]  }
 0x324   : > { %3654 = vmatprep.subr.bf16.mxu0 %v17973_v54  ;;  %3760 = vmatprep.subr.bf16.mxu1 %v17976_v55  ;;  %v18039_v54 = vld [vmem:[#allocation10 + $0x1c4] ss:$16 sps:$4 sm:$0xff]   ;;  %v18042_v55 = vld [vmem:[#allocation10 + $0x1cc] ss:$16 sps:$4 sm:$0xff]  }
 0x327   : > { %3655 = vmatpush1.bf16.msra.mxu0 %v17971_v57  ;;  %3761 = vmatpush1.bf16.msra.mxu1 %v17974_v42  ;;  %v18040_v57 = vld [vmem:[#allocation10 + $0x1c8] ss:$16 sps:$4 sm:$0xff]   ;;  %v18045_v42 = vld [vmem:[#allocation10 + $0x1e4] ss:$16 sps:$4 sm:$0xff]  }
 0x328   : > { %3656 = vmatprep.subr.bf16.mxu0 %v17979_v58  ;;  %3762 = vmatprep.subr.bf16.mxu1 %v17982_v59  ;;  %v18048_v58 = vld [vmem:[#allocation10 + $0x1ec] ss:$16 sps:$4 sm:$0xff]   ;;  %v18043_v59 = vld [vmem:[#allocation10 + $0x1e0] ss:$16 sps:$4 sm:$0xff]  }
 0x32b   : > { %3657 = vmatpush1.bf16.msra.mxu0 %v17977_v61  ;;  %3763 = vmatpush1.bf16.msra.mxu1 %v17980_v1  ;;  %v18046_v61 = vld [vmem:[#allocation10 + $0x1e8] ss:$16 sps:$4 sm:$0xff]   ;;  %v18051_v1 = vld [vmem:[#allocation10 + $0x204] ss:$16 sps:$4 sm:$0xff]  }
 0x32c   : > { %3658 = vmatprep.subr.bf16.mxu0 %v17985_v2  ;;  %3764 = vmatprep.subr.bf16.mxu1 %v17988_v4  ;;  %v18054_v2 = vld [vmem:[#allocation10 + $0x20c] ss:$16 sps:$4 sm:$0xff]   ;;  %v18049_v4 = vld [vmem:[#allocation10 + $0x200] ss:$16 sps:$4 sm:$0xff]  }
 0x32f   : > { %3659 = vmatpush1.bf16.msra.mxu0 %v17983_v5  ;;  %3765 = vmatpush1.bf16.msra.mxu1 %v17986_v7  ;;  %v18052_v5 = vld [vmem:[#allocation10 + $0x208] ss:$16 sps:$4 sm:$0xff]   ;;  %v18057_v7 = vld [vmem:[#allocation10 + $0x224] ss:$16 sps:$4 sm:$0xff]  }
 0x330   : > { %3660 = vmatprep.subr.bf16.mxu0 %v17991_v8  ;;  %3766 = vmatprep.subr.bf16.mxu1 %v17994_v9  ;;  %v18060_v8 = vld [vmem:[#allocation10 + $0x22c] ss:$16 sps:$4 sm:$0xff]   ;;  %v18055_v9 = vld [vmem:[#allocation10 + $0x220] ss:$16 sps:$4 sm:$0xff]  }
 0x333   : > { %3661 = vmatpush1.bf16.msra.mxu0 %v17989_v26  ;;  %3767 = vmatpush1.bf16.msra.mxu1 %v17992_v13  ;;  %v18058_v26 = vld [vmem:[#allocation10 + $0x228] ss:$16 sps:$4 sm:$0xff]   ;;  %v18063_v13 = vld [vmem:[#allocation10 + $0x244] ss:$16 sps:$4 sm:$0xff]  }
 0x334   : > { %3662 = vmatprep.subr.bf16.mxu0 %v17997_v14  ;;  %3768 = vmatprep.subr.bf16.mxu1 %v18000_v16  ;;  %v18066_v14 = vld [vmem:[#allocation10 + $0x24c] ss:$16 sps:$4 sm:$0xff]   ;;  %v18061_v16 = vld [vmem:[#allocation10 + $0x240] ss:$16 sps:$4 sm:$0xff]  }
 0x337   : > { %3663 = vmatpush1.bf16.msra.mxu0 %v17995_v17  ;;  %3769 = vmatpush1.bf16.msra.mxu1 %v17998_v19  ;;  %v18064_v17 = vld [vmem:[#allocation10 + $0x248] ss:$16 sps:$4 sm:$0xff]   ;;  %v18069_v19 = vld [vmem:[#allocation10 + $0x264] ss:$16 sps:$4 sm:$0xff]  }
 0x338   : > { %3664 = vmatprep.subr.bf16.mxu0 %v18003_v20  ;;  %3770 = vmatprep.subr.bf16.mxu1 %v18006_v21  ;;  %v18072_v20 = vld [vmem:[#allocation10 + $0x26c] ss:$16 sps:$4 sm:$0xff]   ;;  %v18067_v21 = vld [vmem:[#allocation10 + $0x260] ss:$16 sps:$4 sm:$0xff]  }
 0x33b   : > { %3665 = vmatpush1.bf16.msra.mxu0 %v18001_v22  ;;  %3771 = vmatpush1.bf16.msra.mxu1 %v18004_v25  ;;  %v18070_v22 = vld [vmem:[#allocation10 + $0x268] ss:$16 sps:$4 sm:$0xff]   ;;  %v18075_v25 = vld [vmem:[#allocation10 + $0x284] ss:$16 sps:$4 sm:$0xff]  }
 0x33c   : > { %3666 = vmatprep.subr.bf16.mxu0 %v18009_v27  ;;  %3772 = vmatprep.subr.bf16.mxu1 %v18012_v29  ;;  %v18078_v27 = vld [vmem:[#allocation10 + $0x28c] ss:$16 sps:$4 sm:$0xff]   ;;  %v18073_v29 = vld [vmem:[#allocation10 + $0x280] ss:$16 sps:$4 sm:$0xff]  }
 0x33f   : > { %3667 = vmatpush1.bf16.msra.mxu0 %v18007_v30  ;;  %3773 = vmatpush1.bf16.msra.mxu1 %v18010_v31  ;;  %v18076_v30 = vld [vmem:[#allocation10 + $0x288] ss:$16 sps:$4 sm:$0xff]   ;;  %v18081_v31 = vld [vmem:[#allocation10 + $0x2a4] ss:$16 sps:$4 sm:$0xff]  }
 0x340   : > { %3668 = vmatprep.subr.bf16.mxu0 %v18015_v32  ;;  %3774 = vmatprep.subr.bf16.mxu1 %v18018_v34  ;;  %v18084_v32 = vld [vmem:[#allocation10 + $0x2ac] ss:$16 sps:$4 sm:$0xff]   ;;  %v18079_v34 = vld [vmem:[#allocation10 + $0x2a0] ss:$16 sps:$4 sm:$0xff]  }
 0x343   : > { %3669 = vmatpush1.bf16.msra.mxu0 %v18013_v24  ;;  %3775 = vmatpush1.bf16.msra.mxu1 %v18016_v43  ;;  %v18082_v24 = vld [vmem:[#allocation10 + $0x2a8] ss:$16 sps:$4 sm:$0xff]   ;;  %v18087_v43 = vld [vmem:[#allocation10 + $0x2c4] ss:$16 sps:$4 sm:$0xff]  }
 0x344   : > { %3670 = vmatprep.subr.bf16.mxu0 %v18021_v45  ;;  %3776 = vmatprep.subr.bf16.mxu1 %v18024_v0  ;;  %v18090_v45 = vld [vmem:[#allocation10 + $0x2cc] ss:$16 sps:$4 sm:$0xff]   ;;  %v18085_v0 = vld [vmem:[#allocation10 + $0x2c0] ss:$16 sps:$4 sm:$0xff]  }
 0x347   : > { %3671 = vmatpush1.bf16.msra.mxu0 %v18019_v40  ;;  %3777 = vmatpush1.bf16.msra.mxu1 %v18022_v47  ;;  %v18088_v40 = vld [vmem:[#allocation10 + $0x2c8] ss:$16 sps:$4 sm:$0xff]   ;;  %v18093_v47 = vld [vmem:[#allocation10 + $0x2e4] ss:$16 sps:$4 sm:$0xff]  }
 0x348   : > { %3672 = vmatprep.subr.bf16.mxu0 %v18027_v62  ;;  %3778 = vmatprep.subr.bf16.mxu1 %v18030_v48  ;;  %v18096_v62 = vld [vmem:[#allocation10 + $0x2ec] ss:$16 sps:$4 sm:$0xff]   ;;  %v18091_v48 = vld [vmem:[#allocation10 + $0x2e0] ss:$16 sps:$4 sm:$0xff]  }
 0x34b   : > { %3673 = vmatpush1.bf16.msra.mxu0 %v18025_v49  ;;  %3779 = vmatpush1.bf16.msra.mxu1 %v18028_v50  ;;  %v18094_v49 = vld [vmem:[#allocation10 + $0x2e8] ss:$16 sps:$4 sm:$0xff]   ;;  %v18099_v50 = vld [vmem:[#allocation10 + $0x304] ss:$16 sps:$4 sm:$0xff]  }
 0x34c   : > { %3674 = vmatprep.subr.bf16.mxu0 %v18033_v51  ;;  %3780 = vmatprep.subr.bf16.mxu1 %v18036_v41  ;;  %v18102_v51 = vld [vmem:[#allocation10 + $0x30c] ss:$16 sps:$4 sm:$0xff]   ;;  %v18097_v41 = vld [vmem:[#allocation10 + $0x300] ss:$16 sps:$4 sm:$0xff]  }
 0x34f   : > { %3675 = vmatpush1.bf16.msra.mxu0 %v18031_v52  ;;  %3781 = vmatpush1.bf16.msra.mxu1 %v18034_v53  ;;  %v18100_v52 = vld [vmem:[#allocation10 + $0x308] ss:$16 sps:$4 sm:$0xff]   ;;  %v18105_v53 = vld [vmem:[#allocation10 + $0x324] ss:$16 sps:$4 sm:$0xff]  }
 0x350   : > { %3676 = vmatprep.subr.bf16.mxu0 %v18039_v54  ;;  %3782 = vmatprep.subr.bf16.mxu1 %v18042_v55  ;;  %v18108_v54 = vld [vmem:[#allocation10 + $0x32c] ss:$16 sps:$4 sm:$0xff]   ;;  %v18103_v55 = vld [vmem:[#allocation10 + $0x320] ss:$16 sps:$4 sm:$0xff]  }
 0x353   : > { %3677 = vmatpush1.bf16.msra.mxu0 %v18037_v56  ;;  %3783 = vmatpush1.bf16.msra.mxu1 %v18040_v57  ;;  %v18106_v56 = vld [vmem:[#allocation10 + $0x328] ss:$16 sps:$4 sm:$0xff]   ;;  %v18111_v57 = vld [vmem:[#allocation10 + $0x344] ss:$16 sps:$4 sm:$0xff]  }
 0x354   : > { %3678 = vmatprep.subr.bf16.mxu0 %v18045_v42  ;;  %3784 = vmatprep.subr.bf16.mxu1 %v18048_v58  ;;  %v18114_v42 = vld [vmem:[#allocation10 + $0x34c] ss:$16 sps:$4 sm:$0xff]   ;;  %v18109_v58 = vld [vmem:[#allocation10 + $0x340] ss:$16 sps:$4 sm:$0xff]  }
 0x357   : > { %3679 = vmatpush1.bf16.msra.mxu0 %v18043_v59  ;;  %3785 = vmatpush1.bf16.msra.mxu1 %v18046_v61  ;;  %v18112_v59 = vld [vmem:[#allocation10 + $0x348] ss:$16 sps:$4 sm:$0xff]   ;;  %v18117_v61 = vld [vmem:[#allocation10 + $0x364] ss:$16 sps:$4 sm:$0xff]  }
 0x358   : > { %3701 = vmatprep.subr.bf16.mxu0 %v18051_v1  ;;  %3807 = vmatprep.subr.bf16.mxu1 %v18054_v2  ;;  %v18120_v1 = vld [vmem:[#allocation10 + $0x36c] ss:$16 sps:$4 sm:$0xff]   ;;  %v18115_v2 = vld [vmem:[#allocation10 + $0x360] ss:$16 sps:$4 sm:$0xff]  }
 0x35a   : > { %3681 = vmatmul.mubr.bf16.vlgmr.msra.gmra.mrb[8].mxu0 %v21241_v63  ;;  %3787 = vmatmul.mubr.bf16.vlgmr.msra.gmra.mrb[8].mxu1 %v21241_v63 }
 0x35b   : > { %3690 = vmatprep.mubr.bf16.mxu0 %v21244_v3  ;;  %3702 = vmatpush1.bf16.msra.mxu0 %v18049_v4  ;;  %v18118_v4 = vld [vmem:[#allocation10 + $0x368] ss:$16 sps:$4 sm:$0xff]  }
 0x35c   : > { %3796 = vmatprep.mubr.bf16.mxu1 %v21244_v3  ;;  %3808 = vmatpush1.bf16.msra.mxu1 %v18052_v5  ;;  %v18123_v5 = vld [vmem:[#allocation10 + $0x384] ss:$16 sps:$4 sm:$0xff]  }
 0x35d   : > { %3703 = vmatprep.subr.bf16.mxu0 %v18057_v7  ;;  %3809 = vmatprep.subr.bf16.mxu1 %v18060_v8  ;;  %v18126_v7 = vld [vmem:[#allocation10 + $0x38c] ss:$16 sps:$4 sm:$0xff]   ;;  %v18121_v8 = vld [vmem:[#allocation10 + $0x380] ss:$16 sps:$4 sm:$0xff]  }
 0x35f   : > { %3704 = vmatpush1.bf16.msra.mxu0 %v18055_v9  ;;  %v18124_v9 = vld [vmem:[#allocation10 + $0x388] ss:$16 sps:$4 sm:$0xff]  }
 0x360   : > { %3810 = vmatpush1.bf16.msra.mxu1 %v18058_v26  ;;  %3705 = vmatprep.subr.bf16.mxu0 %v18063_v13  ;;  %v18129_v26 = vld [vmem:[#allocation10 + $0x3a4] ss:$16 sps:$4 sm:$0xff]   ;;  %v18132_v13 = vld [vmem:[#allocation10 + $0x3ac] ss:$16 sps:$4 sm:$0xff]  }
 0x361   : > { %3811 = vmatprep.subr.bf16.mxu1 %v18066_v14  ;;  %v18127_v14 = vld [vmem:[#allocation10 + $0x3a0] ss:$16 sps:$4 sm:$0xff]  }
 0x362   : > { %3691 = vmatmul.mubr.bf16.gmra.mrb[12].mxu0 %v21248_v6  ;;  %3797 = vmatmul.mubr.bf16.gmra.mrb[12].mxu1 %v21248_v6 }
 0x363   : > { %3706 = vmatpush1.bf16.msra.mxu0 %v18061_v16  ;;  %3733 = vmatprep.mubr.bf16.mxu0 %v21253_v12  ;;  %v18130_v16 = vld [vmem:[#allocation10 + $0x3a8] ss:$16 sps:$4 sm:$0xff]  }
 0x364   : > { %3812 = vmatpush1.bf16.msra.mxu1 %v18064_v17  ;;  %3839 = vmatprep.mubr.bf16.mxu1 %v21253_v12  ;;  %v18135_v17 = vld [vmem:[#allocation10 + $0x3c4] ss:$16 sps:$4 sm:$0xff]  }
 0x365   : > { %3707 = vmatprep.subr.bf16.mxu0 %v18069_v19  ;;  %3813 = vmatprep.subr.bf16.mxu1 %v18072_v20  ;;  %v18138_v19 = vld [vmem:[#allocation10 + $0x3cc] ss:$16 sps:$4 sm:$0xff]   ;;  %v18133_v20 = vld [vmem:[#allocation10 + $0x3c0] ss:$16 sps:$4 sm:$0xff]  }
 0x367   : > { %3708 = vmatpush1.bf16.msra.mxu0 %v18067_v21  ;;  %v18136_v21 = vld [vmem:[#allocation10 + $0x3c8] ss:$16 sps:$4 sm:$0xff]  }
 0x368   : > { %3814 = vmatpush1.bf16.msra.mxu1 %v18070_v22  ;;  %3709 = vmatprep.subr.bf16.mxu0 %v18075_v25  ;;  %v18141_v22 = vld [vmem:[#allocation10 + $0x3e4] ss:$16 sps:$4 sm:$0xff]   ;;  %v18144_v25 = vld [vmem:[#allocation10 + $0x3ec] ss:$16 sps:$4 sm:$0xff]  }
 0x369   : > { %3815 = vmatprep.subr.bf16.mxu1 %v18078_v27  ;;  %v18139_v27 = vld [vmem:[#allocation10 + $0x3e0] ss:$16 sps:$4 sm:$0xff]  }
 0x36b   : > { %3710 = vmatpush1.bf16.msra.mxu0 %v18073_v29  ;;  %v18142_v29 = vld [vmem:[#allocation10 + $0x3e8] ss:$16 sps:$4 sm:$0xff]  }
 0x36c   : > { %3816 = vmatpush1.bf16.msra.mxu1 %v18076_v30  ;;  %3711 = vmatprep.subr.bf16.mxu0 %v18081_v31  ;;  %v18147_v30 = vld [vmem:[#allocation10 + $0x804] ss:$16 sps:$4 sm:$0xff]   ;;  %v18150_v31 = vld [vmem:[#allocation10 + $0x80c] ss:$16 sps:$4 sm:$0xff]  }
 0x36d   : > { %3817 = vmatprep.subr.bf16.mxu1 %v18084_v32  ;;  %v18145_v32 = vld [vmem:[#allocation10 + $0x800] ss:$16 sps:$4 sm:$0xff]  }
 0x36f   : > { %3712 = vmatpush1.bf16.msra.mxu0 %v18079_v34  ;;  %v18148_v34 = vld [vmem:[#allocation10 + $0x808] ss:$16 sps:$4 sm:$0xff]  }
 0x370   : > { %3818 = vmatpush1.bf16.msra.mxu1 %v18082_v24  ;;  %3713 = vmatprep.subr.bf16.mxu0 %v18087_v43  ;;  %v18153_v24 = vld [vmem:[#allocation10 + $0x824] ss:$16 sps:$4 sm:$0xff]   ;;  %v18156_v43 = vld [vmem:[#allocation10 + $0x82c] ss:$16 sps:$4 sm:$0xff]  }
 0x371   : > { %3819 = vmatprep.subr.bf16.mxu1 %v18090_v45  ;;  %v18151_v45 = vld [vmem:[#allocation10 + $0x820] ss:$16 sps:$4 sm:$0xff]  }
 0x373   : > { %3714 = vmatpush1.bf16.msra.mxu0 %v18085_v0  ;;  %v18154_v0 = vld [vmem:[#allocation10 + $0x828] ss:$16 sps:$4 sm:$0xff]  }
 0x374   : > { %3820 = vmatpush1.bf16.msra.mxu1 %v18088_v40  ;;  %3715 = vmatprep.subr.bf16.mxu0 %v18093_v47  ;;  %v18159_v40 = vld [vmem:[#allocation10 + $0x844] ss:$16 sps:$4 sm:$0xff]   ;;  %v18162_v47 = vld [vmem:[#allocation10 + $0x84c] ss:$16 sps:$4 sm:$0xff]  }
 0x375   : > { %3821 = vmatprep.subr.bf16.mxu1 %v18096_v62  ;;  %v18157_v62 = vld [vmem:[#allocation10 + $0x840] ss:$16 sps:$4 sm:$0xff]  }
 0x377   : > { %3716 = vmatpush1.bf16.msra.mxu0 %v18091_v48  ;;  %v4005_v48 = vrot.slane %v21244_v3, 1  ;;  %v4011_v3 = vrot.slane %v21257_v18, 1 }
 0x378   : > { %3822 = vmatpush1.bf16.msra.mxu1 %v18094_v49  ;;  %3717 = vmatprep.subr.bf16.mxu0 %v18099_v50  ;;  %v18160_v49 = vld [vmem:[#allocation10 + $0x848] ss:$16 sps:$4 sm:$0xff]   ;;  %v18165_v50 = vld [vmem:[#allocation10 + $0x864] ss:$16 sps:$4 sm:$0xff]  }
 0x379   : > { %3823 = vmatprep.subr.bf16.mxu1 %v18102_v51  ;;  %v4004_v51 = vrot.slane %v21237_v60, 1  ;;  %v18169_v60 = vld [vmem:[#allocation10 + $0x880] ss:$16 sps:$4 sm:$0xff]  }
 0x37b   : > { %3718 = vmatpush1.bf16.msra.mxu0 %v18097_v41  ;;  %v18168_v41 = vld [vmem:[#allocation10 + $0x86c] ss:$16 sps:$4 sm:$0xff]  }
 0x37c   : > { %3824 = vmatpush1.bf16.msra.mxu1 %v18100_v52  ;;  %3719 = vmatprep.subr.bf16.mxu0 %v18105_v53  ;;  %v4006_v52 = vsel %vm1377_vm2, %v4004_v51, %v4005_v48  ;;  %v18163_v53 = vld [vmem:[#allocation10 + $0x860] ss:$16 sps:$4 sm:$0xff]   ;;  %v18231_v51 = vld [vmem:[#allocation10 + $0x9c4] ss:$16 sps:$4 sm:$0xff]  }
 0x37d   : > { %3825 = vmatprep.subr.bf16.mxu1 %v18108_v54  ;;  %v18166_v54 = vld [vmem:[#allocation10 + $0x868] ss:$16 sps:$4 sm:$0xff]  }
 0x37f   : > { %3720 = vmatpush1.bf16.msra.mxu0 %v18103_v55  ;;  %v18171_v55 = vld [vmem:[#allocation10 + $0x884] ss:$16 sps:$4 sm:$0xff]  }
 0x380   : > { %3826 = vmatpush1.bf16.msra.mxu1 %v18106_v56  ;;  %3721 = vmatprep.subr.bf16.mxu0 %v18111_v57  ;;  %v18174_v56 = vld [vmem:[#allocation10 + $0x88c] ss:$16 sps:$4 sm:$0xff]   ;;  %v18172_v57 = vld [vmem:[#allocation10 + $0x888] ss:$16 sps:$4 sm:$0xff]  }
 0x381   : > { %3827 = vmatprep.subr.bf16.mxu1 %v18114_v42  ;;  %v18177_v42 = vld [vmem:[#allocation10 + $0x8a4] ss:$16 sps:$4 sm:$0xff]  }
 0x383   : > { %3722 = vmatpush1.bf16.msra.mxu0 %v18109_v58  ;;  %v18180_v58 = vld [vmem:[#allocation10 + $0x8ac] ss:$16 sps:$4 sm:$0xff]  }
 0x384   : > { %3828 = vmatpush1.bf16.msra.mxu1 %v18112_v59  ;;  %3723 = vmatprep.subr.bf16.mxu0 %v18117_v61  ;;  %v18175_v59 = vld [vmem:[#allocation10 + $0x8a0] ss:$16 sps:$4 sm:$0xff]   ;;  %v18178_v61 = vld [vmem:[#allocation10 + $0x8a8] ss:$16 sps:$4 sm:$0xff]  }
 0x385   : > { %3829 = vmatprep.subr.bf16.mxu1 %v18120_v1  ;;  %v18183_v1 = vld [vmem:[#allocation10 + $0x8c4] ss:$16 sps:$4 sm:$0xff]  }
 0x387   : > { %3724 = vmatpush1.bf16.msra.mxu0 %v18115_v2  ;;  %v18186_v2 = vld [vmem:[#allocation10 + $0x8cc] ss:$16 sps:$4 sm:$0xff]  }
 0x388   : > { %3830 = vmatpush1.bf16.msra.mxu1 %v18118_v4  ;;  %3725 = vmatprep.subr.bf16.mxu0 %v18123_v5  ;;  %v18181_v4 = vld [vmem:[#allocation10 + $0x8c0] ss:$16 sps:$4 sm:$0xff]   ;;  %v18184_v5 = vld [vmem:[#allocation10 + $0x8c8] ss:$16 sps:$4 sm:$0xff]  }
 0x389   : > { %3831 = vmatprep.subr.bf16.mxu1 %v18126_v7  ;;  %v18189_v7 = vld [vmem:[#allocation10 + $0x8e4] ss:$16 sps:$4 sm:$0xff]  }
 0x38b   : > { %3726 = vmatpush1.bf16.msra.mxu0 %v18121_v8  ;;  %v18192_v8 = vld [vmem:[#allocation10 + $0x8ec] ss:$16 sps:$4 sm:$0xff]  }
 0x38c   : > { %3832 = vmatpush1.bf16.msra.mxu1 %v18124_v9  ;;  %3727 = vmatprep.subr.bf16.mxu0 %v18129_v26  ;;  %v18187_v9 = vld [vmem:[#allocation10 + $0x8e0] ss:$16 sps:$4 sm:$0xff]   ;;  %v18190_v26 = vld [vmem:[#allocation10 + $0x8e8] ss:$16 sps:$4 sm:$0xff]  }
 0x38d   : > { %3833 = vmatprep.subr.bf16.mxu1 %v18132_v13  ;;  %v18195_v13 = vld [vmem:[#allocation10 + $0x904] ss:$16 sps:$4 sm:$0xff]  }
 0x38f   : > { %3728 = vmatpush1.bf16.msra.mxu0 %v18127_v14  ;;  %v18198_v14 = vld [vmem:[#allocation10 + $0x90c] ss:$16 sps:$4 sm:$0xff]  }
 0x390   : > { %3834 = vmatpush1.bf16.msra.mxu1 %v18130_v16  ;;  %3729 = vmatprep.subr.bf16.mxu0 %v18135_v17  ;;  %v18193_v16 = vld [vmem:[#allocation10 + $0x900] ss:$16 sps:$4 sm:$0xff]   ;;  %v18196_v17 = vld [vmem:[#allocation10 + $0x908] ss:$16 sps:$4 sm:$0xff]  }
 0x391   : > { %3835 = vmatprep.subr.bf16.mxu1 %v18138_v19  ;;  %v18201_v19 = vld [vmem:[#allocation10 + $0x924] ss:$16 sps:$4 sm:$0xff]  }
 0x393   : > { %3730 = vmatpush1.bf16.msra.mxu0 %v18133_v20  ;;  %v18204_v20 = vld [vmem:[#allocation10 + $0x92c] ss:$16 sps:$4 sm:$0xff]  }
 0x394   : > { %3836 = vmatpush1.bf16.msra.mxu1 %v18136_v21  ;;  %3731 = vmatprep.subr.bf16.mxu0 %v18141_v22  ;;  %v18199_v21 = vld [vmem:[#allocation10 + $0x920] ss:$16 sps:$4 sm:$0xff]   ;;  %v18202_v22 = vld [vmem:[#allocation10 + $0x928] ss:$16 sps:$4 sm:$0xff]  }
 0x395   : > { %3837 = vmatprep.subr.bf16.mxu1 %v18144_v25  ;;  %v18207_v25 = vld [vmem:[#allocation10 + $0x944] ss:$16 sps:$4 sm:$0xff]  }
 0x397   : > { %3732 = vmatpush1.bf16.msra.mxu0 %v18139_v27  ;;  %v18210_v27 = vld [vmem:[#allocation10 + $0x94c] ss:$16 sps:$4 sm:$0xff]  }
 0x398   : > { %3838 = vmatpush1.bf16.msra.mxu1 %v18142_v29  ;;  %4669 = vmatprep.subr.bf16.mxu0 %v18147_v30  ;;  %v18205_v29 = vld [vmem:[#allocation10 + $0x940] ss:$16 sps:$4 sm:$0xff]   ;;  %v18208_v30 = vld [vmem:[#allocation10 + $0x948] ss:$16 sps:$4 sm:$0xff]  }
 0x399   : > { %4775 = vmatprep.subr.bf16.mxu1 %v18150_v31  ;;  %v18213_v31 = vld [vmem:[#allocation10 + $0x964] ss:$16 sps:$4 sm:$0xff]  }
 0x39a   : > { %3734 = vmatmul.mubr.bf16.vlgmr.msra.gmra.mrb[8].mxu0 %v21281_v44 }
 0x39b   : > { %3840 = vmatmul.mubr.bf16.vlgmr.msra.gmra.mrb[8].mxu1 %v21281_v44  ;;  %3743 = vmatprep.mubr.bf16.mxu0 %v21257_v18 }
 0x39c   : > { %3849 = vmatprep.mubr.bf16.mxu1 %v21257_v18  ;;  %4670 = vmatpush1.bf16.msra.mxu0 %v18145_v32  ;;  %v18216_v32 = vld [vmem:[#allocation10 + $0x96c] ss:$16 sps:$4 sm:$0xff]   ;;  %v18339_v18 = vld [vmem:[%s22683_s15 + $0x204] ss:$16 sps:$4 sm:$0xff]  }
 0x39d   : > { %4776 = vmatpush1.bf16.msra.mxu1 %v18148_v34  ;;  %4671 = vmatprep.subr.bf16.mxu0 %v18153_v24  ;;  %v18211_v34 = vld [vmem:[#allocation10 + $0x960] ss:$16 sps:$4 sm:$0xff]   ;;  %v18214_v24 = vld [vmem:[#allocation10 + $0x968] ss:$16 sps:$4 sm:$0xff]  }
 0x39e   : > { %4777 = vmatprep.subr.bf16.mxu1 %v18156_v43  ;;  %v18219_v43 = vld [vmem:[#allocation10 + $0x984] ss:$16 sps:$4 sm:$0xff]  }
 0x3a0   : > { %4672 = vmatpush1.bf16.msra.mxu0 %v18151_v45  ;;  %v18222_v45 = vld [vmem:[#allocation10 + $0x98c] ss:$16 sps:$4 sm:$0xff]  }
 0x3a1   : > { %4778 = vmatpush1.bf16.msra.mxu1 %v18154_v0  ;;  %4673 = vmatprep.subr.bf16.mxu0 %v18159_v40  ;;  %v18217_v0 = vld [vmem:[#allocation10 + $0x980] ss:$16 sps:$4 sm:$0xff]   ;;  %v18220_v40 = vld [vmem:[#allocation10 + $0x988] ss:$16 sps:$4 sm:$0xff]  }
 0x3a2   : > { %3744 = vmatmul.mubr.bf16.gmra.mrb[12].mxu0 %v21267_v46  ;;  %4779 = vmatprep.subr.bf16.mxu1 %v18162_v47  ;;  %v18225_v47 = vld [vmem:[#allocation10 + $0x9a4] ss:$16 sps:$4 sm:$0xff]  }
 0x3a3   : > { %3850 = vmatmul.mubr.bf16.gmra.mrb[12].mxu1 %v21267_v46  ;;  %4701 = vmatprep.mubr.bf16.mxu0 %v4006_v52 }
 0x3a4   : > { %4674 = vmatpush1.bf16.msra.mxu0 %v18157_v62  ;;  %4807 = vmatprep.mubr.bf16.mxu1 %v4006_v52  ;;  %v18228_v62 = vld [vmem:[#allocation10 + $0x9ac] ss:$16 sps:$4 sm:$0xff]   ;;  %v18229_v52 = vld [vmem:[#allocation10 + $0x9c0] ss:$16 sps:$4 sm:$0xff]  }
 0x3a5   : > { %4780 = vmatpush1.bf16.msra.mxu1 %v18160_v49  ;;  %4675 = vmatprep.subr.bf16.mxu0 %v18165_v50  ;;  %v18223_v49 = vld [vmem:[#allocation10 + $0x9a0] ss:$16 sps:$4 sm:$0xff]   ;;  %v18226_v50 = vld [vmem:[#allocation10 + $0x9a8] ss:$16 sps:$4 sm:$0xff]  }
 0x3a6   : > { %4781 = vmatprep.subr.bf16.mxu1 %v18168_v41  ;;  %v18234_v41 = vld [vmem:[#allocation10 + $0x9cc] ss:$16 sps:$4 sm:$0xff]  }
 0x3a8   : > { %4676 = vmatpush1.bf16.msra.mxu0 %v18163_v53  ;;  %v18232_v53 = vld [vmem:[#allocation10 + $0x9c8] ss:$16 sps:$4 sm:$0xff]  }
 0x3a9   : > { %4782 = vmatpush1.bf16.msra.mxu1 %v18166_v54  ;;  %4677 = vmatprep.subr.bf16.mxu0 %v18171_v55  ;;  %v18237_v54 = vld [vmem:[#allocation10 + $0x9e4] ss:$16 sps:$4 sm:$0xff]   ;;  %v18240_v55 = vld [vmem:[#allocation10 + $0x9ec] ss:$16 sps:$4 sm:$0xff]  }
 0x3aa   : > { %4783 = vmatprep.subr.bf16.mxu1 %v18174_v56  ;;  %v18235_v56 = vld [vmem:[#allocation10 + $0x9e0] ss:$16 sps:$4 sm:$0xff]  }
 0x3ac   : > { %4678 = vmatpush1.bf16.msra.mxu0 %v18169_v60  ;;  %v18238_v60 = vld [vmem:[#allocation10 + $0x9e8] ss:$16 sps:$4 sm:$0xff]  }
 0x3ad   : > { %4784 = vmatpush1.bf16.msra.mxu1 %v18172_v57  ;;  %4679 = vmatprep.subr.bf16.mxu0 %v18177_v42  ;;  %v18243_v57 = vld [vmem:[#allocation10 + $0xa04] ss:$16 sps:$4 sm:$0xff]   ;;  %v18246_v42 = vld [vmem:[#allocation10 + $0xa0c] ss:$16 sps:$4 sm:$0xff]  }
 0x3ae   : > { %4785 = vmatprep.subr.bf16.mxu1 %v18180_v58  ;;  %v4002_v58 = vrot.slane %v21248_v6, 1  ;;  %v18247_v6 = vld [vmem:[#allocation10 + $0xa20] ss:$16 sps:$4 sm:$0xff]  }
 0x3b0   : > { %4680 = vmatpush1.bf16.msra.mxu0 %v18175_v59  ;;  %v18241_v59 = vld [vmem:[#allocation10 + $0xa00] ss:$16 sps:$4 sm:$0xff]  }
 0x3b1   : > { %4786 = vmatpush1.bf16.msra.mxu1 %v18178_v61  ;;  %4681 = vmatprep.subr.bf16.mxu0 %v18183_v1  ;;  %v4015_v61 = vrot.slane %v21264_v35, 1  ;;  %v4001_v1 = vrot.slane %v21241_v63, 1  ;;  %v18250_v35 = vld [vmem:[#allocation10 + $0xa28] ss:$16 sps:$4 sm:$0xff]   ;;  %v18258_v63 = vld [vmem:[#allocation10 + $0xa4c] ss:$16 sps:$4 sm:$0xff]  }
 0x3b2   : > { %4787 = vmatprep.subr.bf16.mxu1 %v18186_v2  ;;  %v18244_v2 = vld [vmem:[#allocation10 + $0xa08] ss:$16 sps:$4 sm:$0xff]  }
 0x3b4   : > { %4682 = vmatpush1.bf16.msra.mxu0 %v18181_v4  ;;  %v18249_v4 = vld [vmem:[#allocation10 + $0xa24] ss:$16 sps:$4 sm:$0xff]  }
 0x3b5   : > { %4788 = vmatpush1.bf16.msra.mxu1 %v18184_v5  ;;  %4683 = vmatprep.subr.bf16.mxu0 %v18189_v7  ;;  %v18252_v5 = vld [vmem:[#allocation10 + $0xa2c] ss:$16 sps:$4 sm:$0xff]   ;;  %v4003_v7 = vsel %vm1377_vm2, %v4001_v1, %v4002_v58  ;;  %v18310_v1 = vld [vmem:[#allocation10 + $0xb68] ss:$16 sps:$4 sm:$0xff]  }
 0x3b6   : > { %4789 = vmatprep.subr.bf16.mxu1 %v18192_v8  ;;  %v4016_v8 = vsel %vm1377_vm2, %v4005_v48, %v4015_v61  ;;  %v18261_v48 = vld [vmem:[#allocation10 + $0xa64] ss:$16 sps:$4 sm:$0xff]   ;;  %v18307_v61 = vld [vmem:[#allocation10 + $0xb60] ss:$16 sps:$4 sm:$0xff]  }
 0x3b8   : > { %4684 = vmatpush1.bf16.msra.mxu0 %v18187_v9  ;;  %v18255_v9 = vld [vmem:[#allocation10 + $0xa44] ss:$16 sps:$4 sm:$0xff]  }
 0x3b9   : > { %4790 = vmatpush1.bf16.msra.mxu1 %v18190_v26  ;;  %4685 = vmatprep.subr.bf16.mxu0 %v18195_v13  ;;  %v4013_v26 = vrot.slane %v21261_v33, 1  ;;  %v18253_v13 = vld [vmem:[#allocation10 + $0xa40] ss:$16 sps:$4 sm:$0xff]  }
 0x3ba   : > { %4791 = vmatprep.subr.bf16.mxu1 %v18198_v14  ;;  %v4010_v14 = vrot.slane %v21253_v12, 1  ;;  %v18262_v12 = vld [vmem:[#allocation10 + $0xa68] ss:$16 sps:$4 sm:$0xff]  }
 0x3bc   : > { %4686 = vmatpush1.bf16.msra.mxu0 %v18193_v16  ;;  %v18256_v16 = vld [vmem:[#allocation10 + $0xa48] ss:$16 sps:$4 sm:$0xff]   ;;  %v4012_v33 = vsel %vm1377_vm2, %v4010_v14, %v4011_v3 }
 0x3bd   : > { %4792 = vmatpush1.bf16.msra.mxu1 %v18196_v17  ;;  %4687 = vmatprep.subr.bf16.mxu0 %v18201_v19  ;;  %v18264_v17 = vld [vmem:[#allocation10 + $0xa6c] ss:$16 sps:$4 sm:$0xff]   ;;  %v4014_v19 = vsel %vm1377_vm2, %v4002_v58, %v4013_v26  ;;  %v18309_v58 = vld [vmem:[#allocation10 + $0xb64] ss:$16 sps:$4 sm:$0xff]   ;;  %v18328_v14 = vld [vmem:[#allocation10 + $0xbc8] ss:$16 sps:$4 sm:$0xff]  }
 0x3be   : > { %4793 = vmatprep.subr.bf16.mxu1 %v18204_v20  ;;  %v18259_v20 = vld [vmem:[#allocation10 + $0xa60] ss:$16 sps:$4 sm:$0xff]   ;;  %v18330_v26 = vld [vmem:[#allocation10 + $0xbcc] ss:$16 sps:$4 sm:$0xff]  }
 0x3c0   : > { %4688 = vmatpush1.bf16.msra.mxu0 %v18199_v21  ;;  %v18267_v21 = vld [vmem:[#allocation10 + $0xa84] ss:$16 sps:$4 sm:$0xff]  }
 0x3c1   : > { %4794 = vmatpush1.bf16.msra.mxu1 %v18202_v22  ;;  %4689 = vmatprep.subr.bf16.mxu0 %v18207_v25  ;;  %v18270_v22 = vld [vmem:[#allocation10 + $0xa8c] ss:$16 sps:$4 sm:$0xff]   ;;  %v18265_v25 = vld [vmem:[#allocation10 + $0xa80] ss:$16 sps:$4 sm:$0xff]  }
 0x3c2   : > { %4795 = vmatprep.subr.bf16.mxu1 %v18210_v27  ;;  %v18268_v27 = vld [vmem:[#allocation10 + $0xa88] ss:$16 sps:$4 sm:$0xff]  }
 0x3c4   : > { %4690 = vmatpush1.bf16.msra.mxu0 %v18205_v29  ;;  %v18273_v29 = vld [vmem:[#allocation10 + $0xaa4] ss:$16 sps:$4 sm:$0xff]  }
 0x3c5   : > { %4796 = vmatpush1.bf16.msra.mxu1 %v18208_v30  ;;  %4691 = vmatprep.subr.bf16.mxu0 %v18213_v31  ;;  %v18276_v30 = vld [vmem:[#allocation10 + $0xaac] ss:$16 sps:$4 sm:$0xff]   ;;  %v18271_v31 = vld [vmem:[#allocation10 + $0xaa0] ss:$16 sps:$4 sm:$0xff]  }
 0x3c6   : > { %4797 = vmatprep.subr.bf16.mxu1 %v18216_v32  ;;  %v18274_v32 = vld [vmem:[#allocation10 + $0xaa8] ss:$16 sps:$4 sm:$0xff]  }
 0x3c8   : > { %4692 = vmatpush1.bf16.msra.mxu0 %v18211_v34  ;;  %v18279_v34 = vld [vmem:[#allocation10 + $0xac4] ss:$16 sps:$4 sm:$0xff]  }
 0x3c9   : > { %4798 = vmatpush1.bf16.msra.mxu1 %v18214_v24  ;;  %4693 = vmatprep.subr.bf16.mxu0 %v18219_v43  ;;  %v18282_v24 = vld [vmem:[#allocation10 + $0xacc] ss:$16 sps:$4 sm:$0xff]   ;;  %v18277_v43 = vld [vmem:[#allocation10 + $0xac0] ss:$16 sps:$4 sm:$0xff]  }
 0x3ca   : > { %4799 = vmatprep.subr.bf16.mxu1 %v18222_v45  ;;  %v18280_v45 = vld [vmem:[#allocation10 + $0xac8] ss:$16 sps:$4 sm:$0xff]  }
 0x3cc   : > { %4694 = vmatpush1.bf16.msra.mxu0 %v18217_v0  ;;  %v18285_v0 = vld [vmem:[#allocation10 + $0xae4] ss:$16 sps:$4 sm:$0xff]  }
 0x3cd   : > { %4800 = vmatpush1.bf16.msra.mxu1 %v18220_v40  ;;  %4695 = vmatprep.subr.bf16.mxu0 %v18225_v47  ;;  %v18288_v40 = vld [vmem:[#allocation10 + $0xaec] ss:$16 sps:$4 sm:$0xff]   ;;  %v18283_v47 = vld [vmem:[#allocation10 + $0xae0] ss:$16 sps:$4 sm:$0xff]  }
 0x3ce   : > { %4801 = vmatprep.subr.bf16.mxu1 %v18228_v62  ;;  %v18286_v62 = vld [vmem:[#allocation10 + $0xae8] ss:$16 sps:$4 sm:$0xff]  }
 0x3d0   : > { %4696 = vmatpush1.bf16.msra.mxu0 %v18223_v49  ;;  %v18291_v49 = vld [vmem:[#allocation10 + $0xb04] ss:$16 sps:$4 sm:$0xff]  }
 0x3d1   : > { %4802 = vmatpush1.bf16.msra.mxu1 %v18226_v50  ;;  %4697 = vmatprep.subr.bf16.mxu0 %v18231_v51  ;;  %v18294_v50 = vld [vmem:[#allocation10 + $0xb0c] ss:$16 sps:$4 sm:$0xff]   ;;  %v18289_v51 = vld [vmem:[#allocation10 + $0xb00] ss:$16 sps:$4 sm:$0xff]  }
 0x3d2   : > { %4803 = vmatprep.subr.bf16.mxu1 %v18234_v41  ;;  %v18292_v41 = vld [vmem:[#allocation10 + $0xb08] ss:$16 sps:$4 sm:$0xff]  }
 0x3d4   : > { %4698 = vmatpush1.bf16.msra.mxu0 %v18229_v52  ;;  %v18297_v52 = vld [vmem:[#allocation10 + $0xb24] ss:$16 sps:$4 sm:$0xff]  }
 0x3d5   : > { %4804 = vmatpush1.bf16.msra.mxu1 %v18232_v53  ;;  %4699 = vmatprep.subr.bf16.mxu0 %v18237_v54  ;;  %v18300_v53 = vld [vmem:[#allocation10 + $0xb2c] ss:$16 sps:$4 sm:$0xff]   ;;  %v18295_v54 = vld [vmem:[#allocation10 + $0xb20] ss:$16 sps:$4 sm:$0xff]  }
 0x3d6   : > { %4805 = vmatprep.subr.bf16.mxu1 %v18240_v55  ;;  %v18298_v55 = vld [vmem:[#allocation10 + $0xb28] ss:$16 sps:$4 sm:$0xff]  }
 0x3d8   : > { %4700 = vmatpush1.bf16.msra.mxu0 %v18235_v56  ;;  %v18303_v56 = vld [vmem:[#allocation10 + $0xb44] ss:$16 sps:$4 sm:$0xff]  }
 0x3d9   : > { %4806 = vmatpush1.bf16.msra.mxu1 %v18238_v60  ;;  %4722 = vmatprep.subr.bf16.mxu0 %v18243_v57  ;;  %v18306_v60 = vld [vmem:[#allocation10 + $0xb4c] ss:$16 sps:$4 sm:$0xff]   ;;  %v18301_v57 = vld [vmem:[#allocation10 + $0xb40] ss:$16 sps:$4 sm:$0xff]  }
 0x3da   : > { %4828 = vmatprep.subr.bf16.mxu1 %v18246_v42  ;;  %v18304_v42 = vld [vmem:[#allocation10 + $0xb48] ss:$16 sps:$4 sm:$0xff]  }
 0x3db   : > { %4702 = vmatmul.mubr.bf16.vlgmr.msra.gmra.mrb[8].mxu0 %v4003_v7 }
 0x3dc   : > { %4808 = vmatmul.mubr.bf16.vlgmr.msra.gmra.mrb[8].mxu1 %v4003_v7  ;;  %4711 = vmatprep.mubr.bf16.mxu0 %v4016_v8  ;;  %v18316_v7 = vld [vmem:[#allocation10 + $0xb88] ss:$16 sps:$4 sm:$0xff]  }
 0x3dd   : > { %4723 = vmatpush1.bf16.msra.mxu0 %v18241_v59  ;;  %4817 = vmatprep.mubr.bf16.mxu1 %v4016_v8  ;;  %v18312_v59 = vld [vmem:[#allocation10 + $0xb6c] ss:$16 sps:$4 sm:$0xff]   ;;  %v18321_v8 = vld [vmem:[#allocation10 + $0xba4] ss:$16 sps:$4 sm:$0xff]  }
 0x3de   : > { %4829 = vmatpush1.bf16.msra.mxu1 %v18244_v2  ;;  %4724 = vmatprep.subr.bf16.mxu0 %v18249_v4  ;;  %v18315_v2 = vld [vmem:[#allocation10 + $0xb84] ss:$16 sps:$4 sm:$0xff]   ;;  %v18318_v4 = vld [vmem:[#allocation10 + $0xb8c] ss:$16 sps:$4 sm:$0xff]  }
 0x3df   : > { %4830 = vmatprep.subr.bf16.mxu1 %v18252_v5  ;;  %v18313_v5 = vld [vmem:[#allocation10 + $0xb80] ss:$16 sps:$4 sm:$0xff]  }
 0x3e1   : > { %4725 = vmatpush1.bf16.msra.mxu0 %v18247_v6  ;;  %v18324_v6 = vld [vmem:[#allocation10 + $0xbac] ss:$16 sps:$4 sm:$0xff]  }
 0x3e2   : > { %4831 = vmatpush1.bf16.msra.mxu1 %v18250_v35  ;;  %4726 = vmatprep.subr.bf16.mxu0 %v18255_v9  ;;  %v18319_v35 = vld [vmem:[#allocation10 + $0xba0] ss:$16 sps:$4 sm:$0xff]   ;;  %v18322_v9 = vld [vmem:[#allocation10 + $0xba8] ss:$16 sps:$4 sm:$0xff]  }
 0x3e3   : > { %4712 = vmatmul.mubr.bf16.gmra.mrb[12].mxu0 %v4014_v19  ;;  %4832 = vmatprep.subr.bf16.mxu1 %v18258_v63  ;;  %v18327_v63 = vld [vmem:[#allocation10 + $0xbc4] ss:$16 sps:$4 sm:$0xff]  }
 0x3e4   : > { %4818 = vmatmul.mubr.bf16.gmra.mrb[12].mxu1 %v4014_v19  ;;  %4754 = vmatprep.mubr.bf16.mxu0 %v4012_v33  ;;  %v18334_v19 = vld [vmem:[#allocation10 + $0xbe8] ss:$16 sps:$4 sm:$0xff]  }
 0x3e5   : > { %4727 = vmatpush1.bf16.msra.mxu0 %v18253_v13  ;;  %4860 = vmatprep.mubr.bf16.mxu1 %v4012_v33  ;;  %v18325_v13 = vld [vmem:[#allocation10 + $0xbc0] ss:$16 sps:$4 sm:$0xff]   ;;  %v4007_v33 = vrot.slane %v21281_v44, 1 }
 0x3e6   : > { %4833 = vmatpush1.bf16.msra.mxu1 %v18256_v16  ;;  %4728 = vmatprep.subr.bf16.mxu0 %v18261_v48  ;;  %v18333_v16 = vld [vmem:[#allocation10 + $0xbe4] ss:$16 sps:$4 sm:$0xff]   ;;  %v18336_v48 = vld [vmem:[#allocation10 + $0xbec] ss:$16 sps:$4 sm:$0xff]  }
 0x3e7   : > { %4834 = vmatprep.subr.bf16.mxu1 %v18264_v17  ;;  %v18331_v17 = vld [vmem:[#allocation10 + $0xbe0] ss:$16 sps:$4 sm:$0xff]  }
 0x3e9   : > { %4729 = vmatpush1.bf16.msra.mxu0 %v18259_v20  ;;  %v4008_v20 = vrot.slane %v21267_v46, 1  ;;  %v18337_v46 = vld [vmem:[%s22683_s15 + $0x200] ss:$16 sps:$4 sm:$0xff]  }
 0x3ea   : > { %4835 = vmatpush1.bf16.msra.mxu1 %v18262_v12  ;;  %4730 = vmatprep.subr.bf16.mxu0 %v18267_v21  ;;  %v4019_v12 = vrot.slane %v21284_v11, 1  ;;  %v18345_v11 = vld [vmem:[%s22683_s15 + $0x224] ss:$16 sps:$4 sm:$0xff]  }
 0x3eb   : > { %4836 = vmatprep.subr.bf16.mxu1 %v18270_v22  ;;  %v4009_v21 = vsel %vm1377_vm2, %v4007_v33, %v4008_v20 }
 0x3ec   : > { %v4020_v22 = vsel %vm1377_vm2, %v4011_v3, %v4019_v12  ;;  %v18351_v3 = vld [vmem:[%s22683_s15 + $0x244] ss:$16 sps:$4 sm:$0xff]  }
 0x3ed   : > { %4731 = vmatpush1.bf16.msra.mxu0 %v18265_v25  ;;  %v4017_v25 = vrot.slane %v21290_v28, 1  ;;  %v18343_v28 = vld [vmem:[%s22683_s15 + $0x220] ss:$16 sps:$4 sm:$0xff]  }
 0x3ee   : > { %4837 = vmatpush1.bf16.msra.mxu1 %v18268_v27  ;;  %4732 = vmatprep.subr.bf16.mxu0 %v18273_v29  ;;  %v18349_v27 = vld [vmem:[%s22683_s15 + $0x240] ss:$16 sps:$4 sm:$0xff]   ;;  %v18357_v29 = vld [vmem:[%s22683_s15 + $0x264] ss:$16 sps:$4 sm:$0xff]  }
 0x3ef   : > { %4838 = vmatprep.subr.bf16.mxu1 %v18276_v30  ;;  %v4018_v44 = vsel %vm1377_vm2, %v4008_v20, %v4017_v25  ;;  %v18355_v30 = vld [vmem:[%s22683_s15 + $0x260] ss:$16 sps:$4 sm:$0xff]   ;;  %v18342_v25 = vld [vmem:[%s22683_s15 + $0x20c] ss:$16 sps:$4 sm:$0xff]  }
 0x3f1   : > { %4733 = vmatpush1.bf16.msra.mxu0 %v18271_v31  ;;  %v18363_v31 = vld [vmem:[%s22683_s15 + $0x284] ss:$16 sps:$4 sm:$0xff]  }
 0x3f2   : > { %4839 = vmatpush1.bf16.msra.mxu1 %v18274_v32  ;;  %4734 = vmatprep.subr.bf16.mxu0 %v18279_v34  ;;  %v18361_v32 = vld [vmem:[%s22683_s15 + $0x280] ss:$16 sps:$4 sm:$0xff]   ;;  %v18369_v34 = vld [vmem:[%s22683_s15 + $0x2a4] ss:$16 sps:$4 sm:$0xff]  }
 0x3f3   : > { %4840 = vmatprep.subr.bf16.mxu1 %v18282_v24  ;;  %v18367_v24 = vld [vmem:[%s22683_s15 + $0x2a0] ss:$16 sps:$4 sm:$0xff]  }
 0x3f5   : > { %4735 = vmatpush1.bf16.msra.mxu0 %v18277_v43  ;;  %v15483_v43 = vadd.s32 4294967280, %v21203_v36 }
 0x3f6   : > { %4841 = vmatpush1.bf16.msra.mxu1 %v18280_v45  ;;  %4736 = vmatprep.subr.bf16.mxu0 %v18285_v0  ;;  %v4907_v0 = vadd.s32 8, %v21203_v36 }
 0x3f7   : > { %4842 = vmatprep.subr.bf16.mxu1 %v18288_v40 }
 0x3f9   : > { %4737 = vmatpush1.bf16.msra.mxu0 %v18283_v47 }
 0x3fa   : > { %4843 = vmatpush1.bf16.msra.mxu1 %v18286_v62  ;;  %4738 = vmatprep.subr.bf16.mxu0 %v18291_v49 }
 0x3fb   : > { %4844 = vmatprep.subr.bf16.mxu1 %v18294_v50 }
 0x3fd   : > { %4739 = vmatpush1.bf16.msra.mxu0 %v18289_v51 }
 0x3fe   : > { %4845 = vmatpush1.bf16.msra.mxu1 %v18292_v41  ;;  %4740 = vmatprep.subr.bf16.mxu0 %v18297_v52 }
 0x3ff   : > { %4846 = vmatprep.subr.bf16.mxu1 %v18300_v53  ;;  %v4923_v53 = vmul.u32 2, %v15483_v43  ;;  %v18360_v43 = vld [vmem:[%s22683_s15 + $0x26c] ss:$16 sps:$4 sm:$0xff]  }
 0x401   : > { %4741 = vmatpush1.bf16.msra.mxu0 %v18295_v54 }
 0x402   : > { %4847 = vmatpush1.bf16.msra.mxu1 %v18298_v55  ;;  %4742 = vmatprep.subr.bf16.mxu0 %v18303_v56  ;;  %v15484_v56 = vadd.s32 4294967280, %v4907_v0 }
 0x403   : > { %4848 = vmatprep.subr.bf16.mxu1 %v18306_v60 }
 0x405   : > { %4743 = vmatpush1.bf16.msra.mxu0 %v18301_v57 }
 0x406   : > { %4849 = vmatpush1.bf16.msra.mxu1 %v18304_v42  ;;  %4744 = vmatprep.subr.bf16.mxu0 %v18309_v58  ;;  %v21382_v58 = vand.u32 127, %v1633_v10 }
 0x407   : > { %4850 = vmatprep.subr.bf16.mxu1 %v18312_v59  ;;  %v4912_v59 = vmul.u32 2, %v21203_v36 }
 0x409   : > { %4745 = vmatpush1.bf16.msra.mxu0 %v18307_v61  ;;  %v4926_v61 = vadd.s32 1, %v4923_v53  ;;  %vm21387_vm5 = vcmp.eq.s32.totalorder %v21382_v58, %v4912_v59  ;;  %v18379_v53 = vld [vmem:[%s22683_s15 + $0x2e0] ss:$16 sps:$4 sm:$0xff]  }
 0x40a   : > { %4851 = vmatpush1.bf16.msra.mxu1 %v18310_v1  ;;  %4746 = vmatprep.subr.bf16.mxu0 %v18315_v2  ;;  %v4924_v2 = vmul.u32 2, %v15484_v56  ;;  %v18384_v56 = vld [vmem:[%s22683_s15 + $0x2ec] ss:$16 sps:$4 sm:$0xff]  }
 0x40b   : > { %4852 = vmatprep.subr.bf16.mxu1 %v18318_v4  ;;  %v4909_v4 = vadd.s32 24, %v21203_v36  ;;  %vm4930_vm6 = vcmp.eq.s32.totalorder %v21382_v58, %v4926_v61  ;;  %v18393_v61 = vld [vmem:[%s22683_s15 + $0x324] ss:$16 sps:$4 sm:$0xff]  }
 0x40c   : > { %vm4934_vm7 = vmor %vm21387_vm5, %vm4930_vm6  ;;  %vm5072_vm6 = vcmp.lt.s32.totalorder %v1633_v10, 256  ;;  %v18423_v10 = vld [vmem:[%s22683_s15 + $0x3c4] ss:$16 sps:$4 sm:$0xff]  }
 0x40d   : > { %4747 = vmatpush1.bf16.msra.mxu0 %v18313_v5  ;;  %v15485_v33 = vadd.s32 4294967280, %v4909_v4  ;;  %5074 = vst.msk [vmem:[#allocation3] ss:$8 sm:$0x3] %vm5072_vm6, %v20601_v15 }
 0x40e   : > { %4853 = vmatpush1.bf16.msra.mxu1 %v18316_v7  ;;  %4748 = vmatprep.subr.bf16.mxu0 %v18321_v8  ;;  %5077 = vst.msk [vmem:[#allocation3 + $0x21] ss:$8 sm:$0x3] %vm5072_vm6, %v20601_v15  ;;  %9698 = vst.msk [vmem:[#allocation5] ss:$8 sm:$0x3] %vm5072_vm6, %v20601_v15 }
 0x40f   : > { %4854 = vmatprep.subr.bf16.mxu1 %v18324_v6  ;;  %9701 = vst.msk [vmem:[#allocation5 + $0x11] ss:$8 sm:$0x3] %vm5072_vm6, %v20601_v15 }
 0x411   : > { %4749 = vmatpush1.bf16.msra.mxu0 %v18319_v35 }
 0x412   : > { %4855 = vmatpush1.bf16.msra.mxu1 %v18322_v9  ;;  %4750 = vmatprep.subr.bf16.mxu0 %v18327_v63 }
 0x413   : > { %4856 = vmatprep.subr.bf16.mxu1 %v18330_v26 }
 0x415   : > { %4751 = vmatpush1.bf16.msra.mxu0 %v18325_v13  ;;  %v14185_v13 = vld [vmem:[%s22688_s22 + $0x98] sm:$0xff] }
 0x416   : > { %4857 = vmatpush1.bf16.msra.mxu1 %v18328_v14  ;;  %4752 = vmatprep.subr.bf16.mxu0 %v18333_v16  ;;  %v4913_v14 = vmul.u32 2, %v4907_v0  ;;  %v18358_v0 = vld [vmem:[%s22683_s15 + $0x268] ss:$16 sps:$4 sm:$0xff]  }
 0x417   : > { %4858 = vmatprep.subr.bf16.mxu1 %v18336_v48 }
 0x418   : > { %vm21396_vm8 = vcmp.eq.s32.totalorder %v21382_v58, %v4913_v14  ;;  %v18411_v14 = vld [vmem:[%s22683_s15 + $0x384] ss:$16 sps:$4 sm:$0xff]  }
 0x419   : > { %4753 = vmatpush1.bf16.msra.mxu0 %v18331_v17  ;;  %v4927_v17 = vadd.s32 1, %v4924_v2  ;;  %v18391_v2 = vld [vmem:[%s22683_s15 + $0x320] ss:$16 sps:$4 sm:$0xff]  }
 0x41a   : > { %4859 = vmatpush1.bf16.msra.mxu1 %v18334_v19  ;;  %v4908_v19 = vadd.s32 16, %v21203_v36 }
 0x41b   : > { %5586 = vmatprep.subr.bf16.mxu1 %v18339_v18  ;;  %vm4931_vm9 = vcmp.eq.s32.totalorder %v21382_v58, %v4927_v17  ;;  %v4925_v18 = vmul.u32 2, %v15485_v33  ;;  %v18412_v17 = vld [vmem:[%s22683_s15 + $0x388] ss:$16 sps:$4 sm:$0xff]   ;;  %v18420_v33 = vld [vmem:[%s22683_s15 + $0x3ac] ss:$16 sps:$4 sm:$0xff]  }
 0x41c   : > { %4755 = vmatmul.mubr.bf16.vlgmr.msra.gmra.mrb[8].mxu0 %v4009_v21  ;;  %vm4935_vm11 = vmor %vm21396_vm8, %vm4931_vm9 }
 0x41d   : > { %4861 = vmatmul.mubr.bf16.vlgmr.msra.gmra.mrb[8].mxu1 %v4009_v21  ;;  %4764 = vmatprep.mubr.bf16.mxu0 %v4020_v22 }
 0x41e   : > { %4870 = vmatprep.mubr.bf16.mxu1 %v4020_v22  ;;  %5587 = vmatpush1.bf16.msra.mxu1 %v18337_v46  ;;  %v21404_v46 = vadd.s32 1, %v4912_v59  ;;  %v18388_v59 = vld [vmem:[%s22683_s15 + $0x308] ss:$16 sps:$4 sm:$0xff]   ;;  %v19227_v22 = vld [vmem:[#allocation13 + $0x284] ss:$16 sps:$4 sm:$0xff]  }
 0x41f   : > { %5588 = vmatprep.subr.bf16.mxu1 %v18345_v11  ;;  %v15486_v11 = vsel %vm4934_vm7, 1.0, %v20601_v15 }
 0x420   : > { %vm4932_vm13 = vcmp.eq.s32.totalorder %v21382_v58, %v21404_v46  ;;  %v19219_v46 = vld [vmem:[#allocation13 + $0x260] ss:$16 sps:$4 sm:$0xff]  }
 0x421   : > { %vm9591_vm7 = vmor %vm21396_vm8, %vm4932_vm13 }
 0x422   : > { %5589 = vmatpush1.bf16.msra.mxu1 %v18343_v28  ;;  %v18340_v28 = vld [vmem:[%s22683_s15 + $0x208] ss:$16 sps:$4 sm:$0xff]  }
 0x423   : > { %5590 = vmatprep.subr.bf16.mxu1 %v18351_v3  ;;  %v18348_v3 = vld [vmem:[%s22683_s15 + $0x22c] ss:$16 sps:$4 sm:$0xff]  }
 0x424   : > { %4765 = vmatmul.mubr.bf16.gmra.mrb[12].mxu0 %v4018_v44 }
 0x425   : > { %4871 = vmatmul.mubr.bf16.gmra.mrb[12].mxu1 %v4018_v44  ;;  %5023 = vmatprep.mubr.f32.mxu0 %v20601_v15  ;;  %v4914_v44 = vmul.u32 2, %v4908_v19  ;;  %v18417_v19 = vld [vmem:[%s22683_s15 + $0x3a4] ss:$16 sps:$4 sm:$0xff]  }
 0x426   : > { %5591 = vmatpush1.bf16.msra.mxu1 %v18349_v27  ;;  %v4915_v27 = vmul.u32 2, %v4909_v4  ;;  %v18394_v4 = vld [vmem:[%s22683_s15 + $0x328] ss:$16 sps:$4 sm:$0xff]  }
 0x427   : > { %5592 = vmatprep.subr.bf16.mxu1 %v18357_v29  ;;  %vm4918_vm12 = vcmp.eq.s32.totalorder %v21382_v58, %v4914_v44  ;;  %v4929_v29 = vadd.s32 1, %v4925_v18  ;;  %v18424_v44 = vld [vmem:[%s22683_s15 + $0x3c8] ss:$16 sps:$4 sm:$0xff]   ;;  %v18429_v18 = vld [vmem:[%s22683_s15 + $0x3e4] ss:$16 sps:$4 sm:$0xff]  }
 0x428   : > { %vm4936_vm14 = vmor %vm4918_vm12, %vm4932_vm13  ;;  %vm4919_vm15 = vcmp.eq.s32.totalorder %v21382_v58, %v4915_v27  ;;  %v18435_v27 = vld [vmem:[%s22683_s15 + $0x4] ss:$16 sps:$4 sm:$0xff]   ;;  %vm14762_vm12 = vcmask 73728  }
 0x429   : > { %vm4933_vm1 = vcmp.eq.s32.totalorder %v21382_v58, %v4929_v29  ;;  %v18438_v29 = vld [vmem:[%s22683_s15 + $0xc] ss:$16 sps:$4 sm:$0xff]  }
 0x42a   : > { %5593 = vmatpush1.bf16.msra.mxu1 %v18355_v30  ;;  %v15487_v30 = vsel %vm4935_vm11, 1.0, %v20601_v15  ;;  %vm4937_vm3 = vmor %vm4919_vm15, %vm4933_vm1  ;;  %vm14605_vm11 = vcmask 523264  }
 0x42b   : > { %5594 = vmatprep.subr.bf16.mxu1 %v18363_v31  ;;  %v18346_v31 = vld [vmem:[%s22683_s15 + $0x228] ss:$16 sps:$4 sm:$0xff]  }
 0x42e   : > { %5595 = vmatpush1.bf16.msra.mxu1 %v18361_v32  ;;  %v18354_v32 = vld [vmem:[%s22683_s15 + $0x24c] ss:$16 sps:$4 sm:$0xff]  }
 0x42f   : > { %5596 = vmatprep.subr.bf16.mxu1 %v18369_v34  ;;  %v15488_v34 = vsel %vm4936_vm14, 1.0, %v20601_v15 }
 0x432   : > { %5597 = vmatpush1.bf16.msra.mxu1 %v18367_v24  ;;  %v18352_v24 = vld [vmem:[%s22683_s15 + $0x248] ss:$16 sps:$4 sm:$0xff]  }
 0x4ef   : > { %v4756_v45 = vpop.f32.mrb[8].mxu0 }
 0x4f0   : > { %v4862_v40 = vpop.f32.mrb[8].mxu1  ;;  %v4758_v47 = vpop.f32.mrb[9].mxu0 }
 0x4f1   : > { %v4897_v62 = vmax.f32 %v4756_v45, %v4862_v40  ;;  %v4864_v49 = vpop.f32.mrb[9].mxu1  ;;  %v4760_v50 = vpop.f32.mrb[10].mxu0  ;;  %v15489_v45 = vsel %vm4937_vm3, 1.0, %v20601_v15  ;;  %v18366_v40 = vld [vmem:[%s22683_s15 + $0x28c] ss:$16 sps:$4 sm:$0xff]  }
 0x4f2   : > { %v4898_v51 = vmax.f32 %v4758_v47, %v4864_v49  ;;  %v4866_v41 = vpop.f32.mrb[10].mxu1  ;;  %v4762_v52 = vpop.f32.mrb[11].mxu0  ;;  %v18364_v47 = vld [vmem:[%s22683_s15 + $0x288] ss:$16 sps:$4 sm:$0xff]  }
 0x4f3   : > { %v4899_v54 = vmax.f32 %v4760_v50, %v4866_v41  ;;  %v4868_v55 = vpop.f32.mrb[11].mxu1  ;;  %v18370_v49 = vld [vmem:[%s22683_s15 + $0x2a8] ss:$16 sps:$4 sm:$0xff]   ;;  %v18373_v50 = vld [vmem:[%s22683_s15 + $0x2c0] ss:$16 sps:$4 sm:$0xff]  }
 0x4f4   : > { %v4900_v60 = vmax.f32 %v4762_v52, %v4868_v55  ;;  %v18376_v41 = vld [vmem:[%s22683_s15 + $0x2c8] ss:$16 sps:$4 sm:$0xff]   ;;  %v18378_v52 = vld [vmem:[%s22683_s15 + $0x2cc] ss:$16 sps:$4 sm:$0xff]  }
 0x4f5   : > { %v17081_v57 = vpack.c.bf16 %v4899_v54, %v4897_v62  ;;  %v18372_v62 = vld [vmem:[%s22683_s15 + $0x2ac] ss:$16 sps:$4 sm:$0xff]   ;;  %v18381_v54 = vld [vmem:[%s22683_s15 + $0x2e4] ss:$16 sps:$4 sm:$0xff]   ;;  %v18382_v55 = vld [vmem:[%s22683_s15 + $0x2e8] ss:$16 sps:$4 sm:$0xff]  }
 0x4f6   : > { %v17079_v42 = vpack.c.bf16 %v4900_v60, %v4898_v51  ;;  %v18375_v51 = vld [vmem:[%s22683_s15 + $0x2c4] ss:$16 sps:$4 sm:$0xff]  }
 0x4f7   : > { %v4766_v1 = vpop.f32.mrb[12].mxu0  ;;  %5598 = vmatprep.subr.bf16.mxu1 %v18375_v51  ;;  %v18387_v60 = vld [vmem:[%s22683_s15 + $0x304] ss:$16 sps:$4 sm:$0xff]  }
 0x4f8   : > { %v4872_v5 = vpop.f32.mrb[12].mxu1  ;;  %17080 = vmatprep.subr.bf16.mxu0 %v17079_v42  ;;  %v4768_v7 = vpop.f32.mrb[13].mxu0  ;;  %5599 = vmatpush1.bf16.msra.mxu1 %v18373_v50  ;;  %v18385_v42 = vld [vmem:[%s22683_s15 + $0x300] ss:$16 sps:$4 sm:$0xff]  }
 0x4f9   : > { %v4901_v8 = vmax.f32 %v4766_v1, %v4872_v5  ;;  %v4874_v6 = vpop.f32.mrb[13].mxu1  ;;  %17082 = vmatpush1.bf16.msra.mxu0 %v17081_v57  ;;  %v4770_v35 = vpop.f32.mrb[14].mxu0  ;;  %5600 = vmatprep.subr.bf16.mxu1 %v18381_v54  ;;  %v18390_v57 = vld [vmem:[%s22683_s15 + $0x30c] ss:$16 sps:$4 sm:$0xff]   ;;  %v18399_v5 = vld [vmem:[%s22683_s15 + $0x344] ss:$16 sps:$4 sm:$0xff]  }
 0x4fa   : > { %v4902_v9 = vmax.f32 %v4768_v7, %v4874_v6  ;;  %v4876_v63 = vpop.f32.mrb[14].mxu1  ;;  %v4772_v26 = vpop.f32.mrb[15].mxu0  ;;  %v18396_v1 = vld [vmem:[%s22683_s15 + $0x32c] ss:$16 sps:$4 sm:$0xff]   ;;  %v18400_v6 = vld [vmem:[%s22683_s15 + $0x348] ss:$16 sps:$4 sm:$0xff]  }
 0x4fb   : > { %v4903_v16 = vmax.f32 %v4770_v35, %v4876_v63  ;;  %v4878_v48 = vpop.f32.mrb[15].mxu1  ;;  %v18402_v7 = vld [vmem:[%s22683_s15 + $0x34c] ss:$16 sps:$4 sm:$0xff]   ;;  %v18405_v35 = vld [vmem:[%s22683_s15 + $0x364] ss:$16 sps:$4 sm:$0xff]  }
 0x4fc   : > { %v4904_v20 = vmax.f32 %v4772_v26, %v4878_v48  ;;  %5601 = vmatpush1.bf16.msra.mxu1 %v18379_v53  ;;  %v18403_v63 = vld [vmem:[%s22683_s15 + $0x360] ss:$16 sps:$4 sm:$0xff]   ;;  %v18406_v26 = vld [vmem:[%s22683_s15 + $0x368] ss:$16 sps:$4 sm:$0xff]  }
 0x4fd   : > { %v17085_v12 = vpack.c.bf16 %v4903_v16, %v4901_v8  ;;  %5602 = vmatprep.subr.bf16.mxu1 %v18387_v60  ;;  %v18397_v8 = vld [vmem:[%s22683_s15 + $0x340] ss:$16 sps:$4 sm:$0xff]   ;;  %v18414_v16 = vld [vmem:[%s22683_s15 + $0x38c] ss:$16 sps:$4 sm:$0xff]  }
 0x4fe   : > { %v17083_v21 = vpack.c.bf16 %v4904_v20, %v4902_v9  ;;  %v18408_v9 = vld [vmem:[%s22683_s15 + $0x36c] ss:$16 sps:$4 sm:$0xff]   ;;  %v18409_v48 = vld [vmem:[%s22683_s15 + $0x380] ss:$16 sps:$4 sm:$0xff]  }
 0x4ff   : > { %v18415_v20 = vld [vmem:[%s22683_s15 + $0x3a0] ss:$16 sps:$4 sm:$0xff]  }
 0x500   : > { %17084 = vmatprep.subr.bf16.mxu0 %v17083_v21  ;;  %5603 = vmatpush1.bf16.msra.mxu1 %v18385_v42  ;;  %v18426_v21 = vld [vmem:[%s22683_s15 + $0x3cc] ss:$16 sps:$4 sm:$0xff]  }
 0x501   : > { %17086 = vmatpush1.bf16.msra.mxu0 %v17085_v12  ;;  %5604 = vmatprep.subr.bf16.mxu1 %v18393_v61  ;;  %v18418_v12 = vld [vmem:[%s22683_s15 + $0x3a8] ss:$16 sps:$4 sm:$0xff]  }
 0x502   : > { %5629 = vmatprep.subr.bf16.mxu0 %v18342_v25  ;;  %v18421_v25 = vld [vmem:[%s22683_s15 + $0x3c0] ss:$16 sps:$4 sm:$0xff]  }
 0x504   : > { %15490 = vmatmul.mubr.msk.f32.vlgmr.msra.gmra.mrb[16].mxu0 %vm4946_vm10, %v15486_v11  ;;  %5605 = vmatpush1.bf16.msra.mxu1 %v18391_v2  ;;  %v18432_v11 = vld [vmem:[%s22683_s15 + $0x3ec] ss:$16 sps:$4 sm:$0xff]  }
 0x505   : > { %5029 = vmatprep.mubr.f32.mxu0 %v20601_v15  ;;  %5630 = vmatpush1.bf16.msra.mxu0 %v18340_v28  ;;  %v18427_v28 = vld [vmem:[%s22683_s15 + $0x3e0] ss:$16 sps:$4 sm:$0xff]  }
 0x506   : > { %5631 = vmatprep.subr.bf16.mxu0 %v18348_v3  ;;  %5606 = vmatprep.subr.bf16.mxu1 %v18399_v5  ;;  %v18430_v3 = vld [vmem:[%s22683_s15 + $0x3e8] ss:$16 sps:$4 sm:$0xff]  }
 0x508   : > { %15491 = vmatmul.mubr.msk.f32.gmra.mrb[18].mxu0 %vm4946_vm10, %v15487_v30  ;;  %5607 = vmatpush1.bf16.msra.mxu1 %v18397_v8 }
 0x509   : > { %5035 = vmatprep.mubr.f32.mxu0 %v20601_v15  ;;  %5632 = vmatpush1.bf16.msra.mxu0 %v18346_v31 }
 0x50a   : > { %5633 = vmatprep.subr.bf16.mxu0 %v18354_v32  ;;  %5608 = vmatprep.subr.bf16.mxu1 %v18405_v35 }
 0x50c   : > { %15492 = vmatmul.mubr.msk.f32.gmra.mrb[20].mxu0 %vm4946_vm10, %v15488_v34  ;;  %5609 = vmatpush1.bf16.msra.mxu1 %v18403_v63  ;;  %v5052_v34 = vld [vmem:[#allocation18] sm:$0x3] }
 0x50d   : > { %5041 = vmatprep.mubr.f32.mxu0 %v20601_v15  ;;  %5634 = vmatpush1.bf16.msra.mxu0 %v18352_v24 }
 0x50e   : > { %5635 = vmatprep.subr.bf16.mxu0 %v18360_v43  ;;  %5610 = vmatprep.subr.bf16.mxu1 %v18411_v14  ;;  %v5057_v43 = vrot.slane %v5052_v34, %v21206_v23 }
 0x510   : > { %15493 = vmatmul.mubr.msk.f32.gmra.mrb[22].mxu0 %vm4946_vm10, %v15489_v45  ;;  %5611 = vmatpush1.bf16.msra.mxu1 %v18409_v48  ;;  %vm20603_vm10 = vmmov 0  }
 0x511   : > { %5636 = vmatpush1.bf16.msra.mxu0 %v18358_v0  ;;  %5612 = vmatprep.subr.bf16.mxu1 %v18417_v19  ;;  %v5061_v0 = vrot.slane %v5052_v34, %v21209_v37  ;;  %v18444_v34 = vld [vmem:[%s22683_s15 + $0x2c] ss:$16 sps:$4 sm:$0xff]  }
 0x512   : > { %5637 = vmatprep.subr.bf16.mxu0 %v18366_v40 }
 0x514   : > { %5613 = vmatpush1.bf16.msra.mxu1 %v18415_v20 }
 0x515   : > { %5638 = vmatpush1.bf16.msra.mxu0 %v18364_v47  ;;  %5614 = vmatprep.subr.bf16.mxu1 %v18423_v10 }
 0x516   : > { %5639 = vmatprep.subr.bf16.mxu0 %v18372_v62 }
 0x518   : > { %5615 = vmatpush1.bf16.msra.mxu1 %v18421_v25 }
 0x519   : > { %5640 = vmatpush1.bf16.msra.mxu0 %v18370_v49  ;;  %5616 = vmatprep.subr.bf16.mxu1 %v18429_v18 }
 0x51a   : > { %5641 = vmatprep.subr.bf16.mxu0 %v18378_v52 }
 0x51c   : > { %5617 = vmatpush1.bf16.msra.mxu1 %v18427_v28 }
 0x51d   : > { %5642 = vmatpush1.bf16.msra.mxu0 %v18376_v41  ;;  %5992 = vmatprep.subr.bf16.mxu1 %v18435_v27  ;;  %v18436_v27 = vld [vmem:[%s22683_s15 + $0x8] ss:$16 sps:$4 sm:$0xff]  }
 0x51e   : > { %5643 = vmatprep.subr.bf16.mxu0 %v18384_v56 }
 0x521   : > { %5644 = vmatpush1.bf16.msra.mxu0 %v18382_v55 }
 0x522   : > { %5645 = vmatprep.subr.bf16.mxu0 %v18390_v57 }
 0x525   : > { %5646 = vmatpush1.bf16.msra.mxu0 %v18388_v59 }
 0x526   : > { %5647 = vmatprep.subr.bf16.mxu0 %v18396_v1 }
 0x529   : > { %5648 = vmatpush1.bf16.msra.mxu0 %v18394_v4 }
 0x52a   : > { %5649 = vmatprep.subr.bf16.mxu0 %v18402_v7 }
 0x52d   : > { %5650 = vmatpush1.bf16.msra.mxu0 %v18400_v6 }
 0x52e   : > { %5651 = vmatprep.subr.bf16.mxu0 %v18408_v9 }
 0x531   : > { %5652 = vmatpush1.bf16.msra.mxu0 %v18406_v26 }
 0x532   : > { %5653 = vmatprep.subr.bf16.mxu0 %v18414_v16 }
 0x535   : > { %5654 = vmatpush1.bf16.msra.mxu0 %v18412_v17 }
 0x536   : > { %5655 = vmatprep.subr.bf16.mxu0 %v18420_v33 }
 0x539   : > { %5656 = vmatpush1.bf16.msra.mxu0 %v18418_v12 }
 0x53a   : > { %5657 = vmatprep.subr.bf16.mxu0 %v18426_v21 }
 0x53d   : > { %5658 = vmatpush1.bf16.msra.mxu0 %v18424_v44 }
 0x53e   : > { %5659 = vmatprep.subr.bf16.mxu0 %v18432_v11 }
 0x541   : > { %5660 = vmatpush1.bf16.msra.mxu0 %v18430_v3  ;;  %v18433_v3 = vld [vmem:[%s22683_s15] ss:$16 sps:$4 sm:$0xff]  }
 0x542   : > { %6035 = vmatprep.subr.bf16.mxu0 %v18438_v29 }
 0x5d7   : > { %v5025_v30 = vpop.f32.mrb[16].mxu0 }
 0x5d8   : > { %v5027_v31 = vpop.f32.mrb[17].mxu0 }
 0x5db   : > { %v5031_v32 = vpop.f32.mrb[18].mxu0 }
 0x5dc   : > { %v5033_v24 = vpop.f32.mrb[19].mxu0 }
 0x5df   : > { %v5037_v45 = vpop.f32.mrb[20].mxu0 }
 0x5e0   : > { %v5048_v40 = vmax.f32 %v5025_v30, %v5037_v45  ;;  %v5039_v47 = vpop.f32.mrb[21].mxu0  ;;  %v18447_v45 = vld [vmem:[%s22683_s15 + $0x44] ss:$16 sps:$4 sm:$0xff]  }
 0x5e1   : > { %v5049_v62 = vmax.f32 %v5027_v31, %v5039_v47  ;;  %v18448_v47 = vld [vmem:[%s22683_s15 + $0x48] ss:$16 sps:$4 sm:$0xff]  }
 0x5e2   : > { %v5064_v49 = vadd.f32 %v5057_v43, %v5048_v40  ;;  %v18445_v40 = vld [vmem:[%s22683_s15 + $0x40] ss:$16 sps:$4 sm:$0xff]  }
 0x5e3   : > { %v5065_v50 = vadd.f32 %v5061_v0, %v5049_v62  ;;  %v5043_v51 = vpop.f32.mrb[22].mxu0  ;;  %v18453_v62 = vld [vmem:[%s22683_s15 + $0x64] ss:$16 sps:$4 sm:$0xff]  }
 0x5e4   : > { %v5068_v41 = vmax.f32 %v5064_v49, 0.0  ;;  %v5050_v52 = vmax.f32 %v5031_v32, %v5043_v51  ;;  %v5045_v53 = vpop.f32.mrb[23].mxu0  ;;  %v18441_v32 = vld [vmem:[%s22683_s15 + $0x24] ss:$16 sps:$4 sm:$0xff]   ;;  %v18456_v49 = vld [vmem:[%s22683_s15 + $0x6c] ss:$16 sps:$4 sm:$0xff]  }
 0x5e5   : > { %v5069_v54 = vmax.f32 %v5065_v50, 0.0  ;;  %v5051_v55 = vmax.f32 %v5033_v24, %v5045_v53  ;;  %v18439_v24 = vld [vmem:[%s22683_s15 + $0x20] ss:$16 sps:$4 sm:$0xff]   ;;  %v18454_v51 = vld [vmem:[%s22683_s15 + $0x68] ss:$16 sps:$4 sm:$0xff]  }
 0x5e6   : > { %v5083_v56 = vrot.slane %v5068_v41, 7  ;;  %v5066_v60 = vadd.f32 %v5057_v43, %v5050_v52  ;;  %v18442_v43 = vld [vmem:[%s22683_s15 + $0x28] ss:$16 sps:$4 sm:$0xff]   ;;  %v18451_v50 = vld [vmem:[%s22683_s15 + $0x60] ss:$16 sps:$4 sm:$0xff]  }
 0x5e7   : > { %v5084_v57 = vrot.slane %v5069_v54, 7  ;;  %v5067_v42 = vadd.f32 %v5061_v0, %v5051_v55  ;;  %v18450_v0 = vld [vmem:[%s22683_s15 + $0x4c] ss:$16 sps:$4 sm:$0xff]   ;;  %v18459_v41 = vld [vmem:[%s22683_s15 + $0x84] ss:$16 sps:$4 sm:$0xff]  }
 0x5e8   : > { %5095 = vst [vmem:[#allocation3] sm:$0xfe] %v5083_v56  ;;  %v5070_v59 = vmax.f32 %v5066_v60, 0.0  ;;  %v18462_v52 = vld [vmem:[%s22683_s15 + $0x8c] ss:$16 sps:$4 sm:$0xff]  }
 0x5e9   : > { %5096 = vst [vmem:[#allocation3 + $0x8] sm:$0xfe] %v5084_v57  ;;  %v5071_v61 = vmax.f32 %v5067_v42, 0.0  ;;  %v18457_v53 = vld [vmem:[%s22683_s15 + $0x80] ss:$16 sps:$4 sm:$0xff]  }
 0x5ea   : > { %v5085_v1 = vrot.slane %v5070_v59, 7  ;;  %v18460_v54 = vld [vmem:[%s22683_s15 + $0x88] ss:$16 sps:$4 sm:$0xff]   ;;  %v18465_v55 = vld [vmem:[%s22683_s15 + $0xa4] ss:$16 sps:$4 sm:$0xff]  }
 0x5eb   : > { %v5087_v2 = vrot.slane %v5071_v61, 7  ;;  %v18463_v60 = vld [vmem:[%s22683_s15 + $0xa0] ss:$16 sps:$4 sm:$0xff]   ;;  %v18471_v42 = vld [vmem:[%s22683_s15 + $0xc4] ss:$16 sps:$4 sm:$0xff]  }
 0x5ec   : > { %v5086_v4 = vsel %vm1710_vm4, %v5083_v56, %v5085_v1  ;;  %5099 = vst [vmem:[#allocation3 + $0x20] sm:$0x1] %v5085_v1  ;;  %v18468_v56 = vld [vmem:[%s22683_s15 + $0xac] ss:$16 sps:$4 sm:$0xff]   ;;  %v18469_v61 = vld [vmem:[%s22683_s15 + $0xc0] ss:$16 sps:$4 sm:$0xff]  }
 0x5ed   : > { %v5088_v5 = vsel %vm1710_vm4, %v5084_v57, %v5087_v2  ;;  %5100 = vst [vmem:[#allocation3 + $0x28] sm:$0x1] %v5087_v2  ;;  %v18466_v57 = vld [vmem:[%s22683_s15 + $0xa8] ss:$16 sps:$4 sm:$0xff]   ;;  %v18474_v59 = vld [vmem:[%s22683_s15 + $0xcc] ss:$16 sps:$4 sm:$0xff]  }
 0x5ee   : > { %v18472_v1 = vld [vmem:[%s22683_s15 + $0xc8] ss:$16 sps:$4 sm:$0xff]   ;;  %v18477_v2 = vld [vmem:[%s22683_s15 + $0xe4] ss:$16 sps:$4 sm:$0xff]  }
 0x5ef   : > { %v5101_v7 = vld [vmem:[#allocation3] sm:$0xff] }
 0x5f0   : > { %v5102_v8 = vld [vmem:[#allocation3 + $0x8] sm:$0xff]  ;;  %v21595_v6 = vpack.c.bf16 %v5086_v4, %v5101_v7 }
 0x5f1   : > { %v5108_v35 = vpack.c.bf16 %v5088_v5, %v5102_v8  ;;  %v18480_v4 = vld [vmem:[%s22683_s15 + $0xec] ss:$16 sps:$4 sm:$0xff]   ;;  %v18475_v5 = vld [vmem:[%s22683_s15 + $0xe0] ss:$16 sps:$4 sm:$0xff]   ;;  %v18478_v7 = vld [vmem:[%s22683_s15 + $0xe8] ss:$16 sps:$4 sm:$0xff]  }
 0x5f2   : > { %v5243_v9 = vshll.u32 %v21595_v6, 16  ;;  %v5241_v25 = vshrl.u32 %v21595_v6, 16  ;;  %v18483_v8 = vld [vmem:[%s22683_s15 + $0x104] ss:$16 sps:$4 sm:$0xff]  }
 0x5f3   : > { %v5255_v63 = vshll.u32 %v5108_v35, 16  ;;  %v5105_v26 = vld [vmem:[#allocation3 + $0x20] sm:$0x3]  ;;  %v5253_v20 = vshrl.u32 %v5108_v35, 16  ;;  %v6150_v10 = vrot.slane %v5108_v35, 1 }
 0x5f4   : > { %v5106_v14 = vld [vmem:[#allocation3 + $0x28] sm:$0x3]  ;;  %v21598_v16 = vpack.c.bf16 %v5105_v26, %v5105_v26  ;;  %v5245_v19 = vrot.slane %v5243_v9, 1  ;;  %v18481_v9 = vld [vmem:[%s22683_s15 + $0x100] ss:$16 sps:$4 sm:$0xff]  }
 0x5f5   : > { %v5110_v48 = vpack.c.bf16 %v5106_v14, %v5106_v14  ;;  %v5257_v17 = vrot.slane %v5255_v63, 1  ;;  %v18484_v63 = vld [vmem:[%s22683_s15 + $0x108] ss:$16 sps:$4 sm:$0xff]   ;;  %v18489_v26 = vld [vmem:[%s22683_s15 + $0x124] ss:$16 sps:$4 sm:$0xff]  }
 0x5f6   : > { %v5248_v33 = vshll.u32 %v21598_v16, 16  ;;  %v5246_v29 = vor.u32 %v5245_v19, %v5241_v25  ;;  %v18492_v14 = vld [vmem:[%s22683_s15 + $0x12c] ss:$16 sps:$4 sm:$0xff]   ;;  %v18495_v19 = vld [vmem:[%s22683_s15 + $0x144] ss:$16 sps:$4 sm:$0xff]  }
 0x5f7   : > { %v5260_v12 = vshll.u32 %v5110_v48, 16  ;;  %v6151_v21 = vrot.slane %v5110_v48, 1  ;;  %v5258_v18 = vor.u32 %v5257_v17, %v5253_v20  ;;  %v18487_v48 = vld [vmem:[%s22683_s15 + $0x120] ss:$16 sps:$4 sm:$0xff]   ;;  %v18490_v17 = vld [vmem:[%s22683_s15 + $0x128] ss:$16 sps:$4 sm:$0xff]  }
 0x5f8   : > { %v5250_v44 = vrot.slane %v5248_v33, 1  ;;  %v18498_v33 = vld [vmem:[%s22683_s15 + $0x14c] ss:$16 sps:$4 sm:$0xff]   ;;  %v18493_v20 = vld [vmem:[%s22683_s15 + $0x140] ss:$16 sps:$4 sm:$0xff]  }
 0x5f9   : > { %v5262_v11 = vrot.slane %v5260_v12, 1  ;;  %v21603_v28 = vsel %vm1377_vm2, %v6150_v10, %v6151_v21  ;;  %v18496_v12 = vld [vmem:[%s22683_s15 + $0x148] ss:$16 sps:$4 sm:$0xff]   ;;  %v18501_v10 = vld [vmem:[%s22683_s15 + $0x164] ss:$16 sps:$4 sm:$0xff]  }
 0x5fa   : > { %v5251_v31 = vsel %vm868_vm0, %v5246_v29, %v5250_v44  ;;  %v18504_v21 = vld [vmem:[%s22683_s15 + $0x16c] ss:$16 sps:$4 sm:$0xff]   ;;  %v18499_v25 = vld [vmem:[%s22683_s15 + $0x160] ss:$16 sps:$4 sm:$0xff]   ;;  %v18502_v44 = vld [vmem:[%s22683_s15 + $0x168] ss:$16 sps:$4 sm:$0xff]  }
 0x5fb   : > { %v5263_v30 = vsel %vm868_vm0, %v5258_v18, %v5262_v11  ;;  %v18507_v18 = vld [vmem:[%s22683_s15 + $0x184] ss:$16 sps:$4 sm:$0xff]   ;;  %v18510_v11 = vld [vmem:[%s22683_s15 + $0x18c] ss:$16 sps:$4 sm:$0xff]  }
 0x5fc   : > { %5618 = vmatprep.mubr.bf16.mxu1 %v5263_v30  ;;  %5661 = vmatprep.mubr.bf16.mxu0 %v5263_v30  ;;  %v18513_v29 = vld [vmem:[%s22683_s15 + $0x1a4] ss:$16 sps:$4 sm:$0xff]   ;;  %v18516_v30 = vld [vmem:[%s22683_s15 + $0x1ac] ss:$16 sps:$4 sm:$0xff]  }
 0x5fd   : > { %5619 = vmatmul.mubr.bf16.vlgmr.msra.gmra.mrb[16].mxu1 %v5251_v31  ;;  %5662 = vmatmul.mubr.bf16.vlgmr.msra.gmra.mrb[24].mxu0 %v5251_v31  ;;  %v18511_v31 = vld [vmem:[%s22683_s15 + $0x1a0] ss:$16 sps:$4 sm:$0xff]  }
 0x5fe   : > { %5993 = vmatpush1.bf16.msra.mxu1 %v18433_v3  ;;  %6036 = vmatpush1.bf16.msra.mxu0 %v18436_v27  ;;  %v18505_v3 = vld [vmem:[%s22683_s15 + $0x180] ss:$16 sps:$4 sm:$0xff]   ;;  %v18508_v27 = vld [vmem:[%s22683_s15 + $0x188] ss:$16 sps:$4 sm:$0xff]  }
 0x5ff   : > { %6024 = vmatprep.mubr.bf16.mxu1 %v5108_v35  ;;  %6067 = vmatprep.mubr.bf16.mxu0 %v5108_v35  ;;  %v18486_v35 = vld [vmem:[%s22683_s15 + $0x10c] ss:$16 sps:$4 sm:$0xff]  }
 0x600   : > { %5994 = vmatprep.subr.bf16.mxu1 %v18441_v32  ;;  %6037 = vmatprep.subr.bf16.mxu0 %v18444_v34  ;;  %v18514_v32 = vld [vmem:[%s22683_s15 + $0x1a8] ss:$16 sps:$4 sm:$0xff]   ;;  %v18519_v34 = vld [vmem:[%s22683_s15 + $0x1c4] ss:$16 sps:$4 sm:$0xff]  }
 0x602   : > { %5995 = vmatpush1.bf16.msra.mxu1 %v18439_v24  ;;  %6038 = vmatpush1.bf16.msra.mxu0 %v18442_v43  ;;  %v18522_v24 = vld [vmem:[%s22683_s15 + $0x1cc] ss:$16 sps:$4 sm:$0xff]   ;;  %v18517_v43 = vld [vmem:[%s22683_s15 + $0x1c0] ss:$16 sps:$4 sm:$0xff]  }
 0x603   : > { %5996 = vmatprep.subr.bf16.mxu1 %v18447_v45  ;;  %6039 = vmatprep.subr.bf16.mxu0 %v18450_v0  ;;  %v18520_v45 = vld [vmem:[%s22683_s15 + $0x1c8] ss:$16 sps:$4 sm:$0xff]   ;;  %v18525_v0 = vld [vmem:[%s22683_s15 + $0x1e4] ss:$16 sps:$4 sm:$0xff]  }
 0x606   : > { %5997 = vmatpush1.bf16.msra.mxu1 %v18445_v40  ;;  %6040 = vmatpush1.bf16.msra.mxu0 %v18448_v47  ;;  %v18528_v40 = vld [vmem:[%s22683_s15 + $0x1ec] ss:$16 sps:$4 sm:$0xff]   ;;  %v18523_v47 = vld [vmem:[%s22683_s15 + $0x1e0] ss:$16 sps:$4 sm:$0xff]  }
 0x607   : > { %5998 = vmatprep.subr.bf16.mxu1 %v18453_v62  ;;  %6041 = vmatprep.subr.bf16.mxu0 %v18456_v49  ;;  %v18526_v62 = vld [vmem:[%s22683_s15 + $0x1e8] ss:$16 sps:$4 sm:$0xff]   ;;  %v18531_v49 = vld [vmem:[%s22683_s15 + $0x404] ss:$16 sps:$4 sm:$0xff]  }
 0x60a   : > { %5999 = vmatpush1.bf16.msra.mxu1 %v18451_v50  ;;  %6042 = vmatpush1.bf16.msra.mxu0 %v18454_v51  ;;  %v18534_v50 = vld [vmem:[%s22683_s15 + $0x40c] ss:$16 sps:$4 sm:$0xff]   ;;  %v18529_v51 = vld [vmem:[%s22683_s15 + $0x400] ss:$16 sps:$4 sm:$0xff]  }
 0x60b   : > { %6000 = vmatprep.subr.bf16.mxu1 %v18459_v41  ;;  %6043 = vmatprep.subr.bf16.mxu0 %v18462_v52  ;;  %v18532_v41 = vld [vmem:[%s22683_s15 + $0x408] ss:$16 sps:$4 sm:$0xff]   ;;  %v18537_v52 = vld [vmem:[%s22683_s15 + $0x424] ss:$16 sps:$4 sm:$0xff]  }
 0x60e   : > { %6001 = vmatpush1.bf16.msra.mxu1 %v18457_v53  ;;  %6044 = vmatpush1.bf16.msra.mxu0 %v18460_v54  ;;  %v18540_v53 = vld [vmem:[%s22683_s15 + $0x42c] ss:$16 sps:$4 sm:$0xff]   ;;  %v18535_v54 = vld [vmem:[%s22683_s15 + $0x420] ss:$16 sps:$4 sm:$0xff]  }
 0x60f   : > { %6002 = vmatprep.subr.bf16.mxu1 %v18465_v55  ;;  %6045 = vmatprep.subr.bf16.mxu0 %v18468_v56  ;;  %v18538_v55 = vld [vmem:[%s22683_s15 + $0x428] ss:$16 sps:$4 sm:$0xff]   ;;  %v18543_v56 = vld [vmem:[%s22683_s15 + $0x444] ss:$16 sps:$4 sm:$0xff]  }
 0x612   : > { %6003 = vmatpush1.bf16.msra.mxu1 %v18463_v60  ;;  %6046 = vmatpush1.bf16.msra.mxu0 %v18466_v57  ;;  %v18546_v60 = vld [vmem:[%s22683_s15 + $0x44c] ss:$16 sps:$4 sm:$0xff]   ;;  %v18541_v57 = vld [vmem:[%s22683_s15 + $0x440] ss:$16 sps:$4 sm:$0xff]  }
 0x613   : > { %6004 = vmatprep.subr.bf16.mxu1 %v18471_v42  ;;  %6047 = vmatprep.subr.bf16.mxu0 %v18474_v59  ;;  %v18549_v42 = vld [vmem:[%s22683_s15 + $0x464] ss:$16 sps:$4 sm:$0xff]   ;;  %v18552_v59 = vld [vmem:[%s22683_s15 + $0x46c] ss:$16 sps:$4 sm:$0xff]  }
 0x616   : > { %6005 = vmatpush1.bf16.msra.mxu1 %v18469_v61  ;;  %6048 = vmatpush1.bf16.msra.mxu0 %v18472_v1  ;;  %v18547_v61 = vld [vmem:[%s22683_s15 + $0x460] ss:$16 sps:$4 sm:$0xff]   ;;  %v18550_v1 = vld [vmem:[%s22683_s15 + $0x468] ss:$16 sps:$4 sm:$0xff]  }
 0x617   : > { %6006 = vmatprep.subr.bf16.mxu1 %v18477_v2  ;;  %6049 = vmatprep.subr.bf16.mxu0 %v18480_v4  ;;  %v18555_v2 = vld [vmem:[%s22683_s15 + $0x484] ss:$16 sps:$4 sm:$0xff]   ;;  %v18558_v4 = vld [vmem:[%s22683_s15 + $0x48c] ss:$16 sps:$4 sm:$0xff]  }
 0x61a   : > { %6007 = vmatpush1.bf16.msra.mxu1 %v18475_v5  ;;  %6050 = vmatpush1.bf16.msra.mxu0 %v18478_v7  ;;  %v18553_v5 = vld [vmem:[%s22683_s15 + $0x480] ss:$16 sps:$4 sm:$0xff]   ;;  %v18556_v7 = vld [vmem:[%s22683_s15 + $0x488] ss:$16 sps:$4 sm:$0xff]  }
 0x61b   : > { %6008 = vmatprep.subr.bf16.mxu1 %v18483_v8  ;;  %6051 = vmatprep.subr.bf16.mxu0 %v18486_v35  ;;  %v18561_v8 = vld [vmem:[%s22683_s15 + $0x4a4] ss:$16 sps:$4 sm:$0xff]   ;;  %v18564_v35 = vld [vmem:[%s22683_s15 + $0x4ac] ss:$16 sps:$4 sm:$0xff]  }
 0x61e   : > { %6009 = vmatpush1.bf16.msra.mxu1 %v18481_v9  ;;  %6052 = vmatpush1.bf16.msra.mxu0 %v18484_v63  ;;  %v18559_v9 = vld [vmem:[%s22683_s15 + $0x4a0] ss:$16 sps:$4 sm:$0xff]   ;;  %v18562_v63 = vld [vmem:[%s22683_s15 + $0x4a8] ss:$16 sps:$4 sm:$0xff]  }
 0x61f   : > { %6010 = vmatprep.subr.bf16.mxu1 %v18489_v26  ;;  %6053 = vmatprep.subr.bf16.mxu0 %v18492_v14  ;;  %v18567_v26 = vld [vmem:[%s22683_s15 + $0x4c4] ss:$16 sps:$4 sm:$0xff]   ;;  %v18570_v14 = vld [vmem:[%s22683_s15 + $0x4cc] ss:$16 sps:$4 sm:$0xff]  }
 0x622   : > { %6011 = vmatpush1.bf16.msra.mxu1 %v18487_v48  ;;  %6054 = vmatpush1.bf16.msra.mxu0 %v18490_v17  ;;  %v18565_v48 = vld [vmem:[%s22683_s15 + $0x4c0] ss:$16 sps:$4 sm:$0xff]   ;;  %v18568_v17 = vld [vmem:[%s22683_s15 + $0x4c8] ss:$16 sps:$4 sm:$0xff]  }
 0x623   : > { %6012 = vmatprep.subr.bf16.mxu1 %v18495_v19  ;;  %6055 = vmatprep.subr.bf16.mxu0 %v18498_v33  ;;  %v18573_v19 = vld [vmem:[%s22683_s15 + $0x4e4] ss:$16 sps:$4 sm:$0xff]   ;;  %v18576_v33 = vld [vmem:[%s22683_s15 + $0x4ec] ss:$16 sps:$4 sm:$0xff]  }
 0x626   : > { %6013 = vmatpush1.bf16.msra.mxu1 %v18493_v20  ;;  %6056 = vmatpush1.bf16.msra.mxu0 %v18496_v12  ;;  %v18571_v20 = vld [vmem:[%s22683_s15 + $0x4e0] ss:$16 sps:$4 sm:$0xff]   ;;  %v18574_v12 = vld [vmem:[%s22683_s15 + $0x4e8] ss:$16 sps:$4 sm:$0xff]  }
 0x627   : > { %6014 = vmatprep.subr.bf16.mxu1 %v18501_v10  ;;  %6057 = vmatprep.subr.bf16.mxu0 %v18504_v21  ;;  %v18579_v10 = vld [vmem:[%s22683_s15 + $0x504] ss:$16 sps:$4 sm:$0xff]   ;;  %v18582_v21 = vld [vmem:[%s22683_s15 + $0x50c] ss:$16 sps:$4 sm:$0xff]  }
 0x62a   : > { %6015 = vmatpush1.bf16.msra.mxu1 %v18499_v25  ;;  %6058 = vmatpush1.bf16.msra.mxu0 %v18502_v44  ;;  %v18577_v25 = vld [vmem:[%s22683_s15 + $0x500] ss:$16 sps:$4 sm:$0xff]   ;;  %v18580_v44 = vld [vmem:[%s22683_s15 + $0x508] ss:$16 sps:$4 sm:$0xff]  }
 0x62b   : > { %6016 = vmatprep.subr.bf16.mxu1 %v18507_v18  ;;  %6059 = vmatprep.subr.bf16.mxu0 %v18510_v11  ;;  %v18585_v18 = vld [vmem:[%s22683_s15 + $0x524] ss:$16 sps:$4 sm:$0xff]   ;;  %v18588_v11 = vld [vmem:[%s22683_s15 + $0x52c] ss:$16 sps:$4 sm:$0xff]  }
 0x62e   : > { %6017 = vmatpush1.bf16.msra.mxu1 %v18505_v3  ;;  %6060 = vmatpush1.bf16.msra.mxu0 %v18508_v27  ;;  %v18583_v3 = vld [vmem:[%s22683_s15 + $0x520] ss:$16 sps:$4 sm:$0xff]   ;;  %v18586_v27 = vld [vmem:[%s22683_s15 + $0x528] ss:$16 sps:$4 sm:$0xff]  }
 0x62f   : > { %6018 = vmatprep.subr.bf16.mxu1 %v18513_v29  ;;  %6061 = vmatprep.subr.bf16.mxu0 %v18516_v30  ;;  %v18591_v29 = vld [vmem:[%s22683_s15 + $0x544] ss:$16 sps:$4 sm:$0xff]   ;;  %v18594_v30 = vld [vmem:[%s22683_s15 + $0x54c] ss:$16 sps:$4 sm:$0xff]  }
 0x632   : > { %6019 = vmatpush1.bf16.msra.mxu1 %v18511_v31  ;;  %6062 = vmatpush1.bf16.msra.mxu0 %v18514_v32  ;;  %v18589_v31 = vld [vmem:[%s22683_s15 + $0x540] ss:$16 sps:$4 sm:$0xff]   ;;  %v18592_v32 = vld [vmem:[%s22683_s15 + $0x548] ss:$16 sps:$4 sm:$0xff]  }
 0x633   : > { %6020 = vmatprep.subr.bf16.mxu1 %v18519_v34  ;;  %6063 = vmatprep.subr.bf16.mxu0 %v18522_v24  ;;  %v18597_v34 = vld [vmem:[%s22683_s15 + $0x564] ss:$16 sps:$4 sm:$0xff]   ;;  %v18600_v24 = vld [vmem:[%s22683_s15 + $0x56c] ss:$16 sps:$4 sm:$0xff]  }
 0x636   : > { %6021 = vmatpush1.bf16.msra.mxu1 %v18517_v43  ;;  %6064 = vmatpush1.bf16.msra.mxu0 %v18520_v45  ;;  %v18595_v43 = vld [vmem:[%s22683_s15 + $0x560] ss:$16 sps:$4 sm:$0xff]   ;;  %v18598_v45 = vld [vmem:[%s22683_s15 + $0x568] ss:$16 sps:$4 sm:$0xff]  }
 0x637   : > { %6022 = vmatprep.subr.bf16.mxu1 %v18525_v0  ;;  %6065 = vmatprep.subr.bf16.mxu0 %v18528_v40  ;;  %v18603_v0 = vld [vmem:[%s22683_s15 + $0x584] ss:$16 sps:$4 sm:$0xff]   ;;  %v18606_v40 = vld [vmem:[%s22683_s15 + $0x58c] ss:$16 sps:$4 sm:$0xff]  }
 0x63a   : > { %6023 = vmatpush1.bf16.msra.mxu1 %v18523_v47  ;;  %6066 = vmatpush1.bf16.msra.mxu0 %v18526_v62  ;;  %v18601_v47 = vld [vmem:[%s22683_s15 + $0x580] ss:$16 sps:$4 sm:$0xff]   ;;  %v18604_v62 = vld [vmem:[%s22683_s15 + $0x588] ss:$16 sps:$4 sm:$0xff]  }
 0x63b   : > { %6475 = vmatprep.subr.bf16.mxu1 %v18531_v49  ;;  %6518 = vmatprep.subr.bf16.mxu0 %v18534_v50  ;;  %v18609_v49 = vld [vmem:[%s22683_s15 + $0x5a4] ss:$16 sps:$4 sm:$0xff]   ;;  %v18612_v50 = vld [vmem:[%s22683_s15 + $0x5ac] ss:$16 sps:$4 sm:$0xff]  }
 0x63d   : > { %6025 = vmatmul.mubr.bf16.vlgmr.msra.gmra.mrb[16].mxu1 %v21595_v6  ;;  %6068 = vmatmul.mubr.bf16.vlgmr.msra.gmra.mrb[24].mxu0 %v21595_v6 }
 0x63e   : > { %6476 = vmatpush1.bf16.msra.mxu1 %v18529_v51  ;;  %6507 = vmatprep.mubr.bf16.mxu1 %v21603_v28  ;;  %v18607_v51 = vld [vmem:[%s22683_s15 + $0x5a0] ss:$16 sps:$4 sm:$0xff]  }
 0x63f   : > { %6519 = vmatpush1.bf16.msra.mxu0 %v18532_v41  ;;  %6550 = vmatprep.mubr.bf16.mxu0 %v21603_v28  ;;  %v18544_v28 = vld [vmem:[%s22683_s15 + $0x448] ss:$16 sps:$4 sm:$0xff]  }
 0x640   : > { %6477 = vmatprep.subr.bf16.mxu1 %v18537_v52  ;;  %6520 = vmatprep.subr.bf16.mxu0 %v18540_v53  ;;  %v18610_v41 = vld [vmem:[%s22683_s15 + $0x5a8] ss:$16 sps:$4 sm:$0xff]   ;;  %v18615_v52 = vld [vmem:[%s22683_s15 + $0x5c4] ss:$16 sps:$4 sm:$0xff]   ;;  %v18618_v53 = vld [vmem:[%s22683_s15 + $0x5cc] ss:$16 sps:$4 sm:$0xff]  }
 0x642   : > { %6478 = vmatpush1.bf16.msra.mxu1 %v18535_v54  ;;  %v18613_v54 = vld [vmem:[%s22683_s15 + $0x5c0] ss:$16 sps:$4 sm:$0xff]  }
 0x643   : > { %6521 = vmatpush1.bf16.msra.mxu0 %v18538_v55  ;;  %6479 = vmatprep.subr.bf16.mxu1 %v18543_v56  ;;  %v18616_v55 = vld [vmem:[%s22683_s15 + $0x5c8] ss:$16 sps:$4 sm:$0xff]   ;;  %v18621_v56 = vld [vmem:[%s22683_s15 + $0x5e4] ss:$16 sps:$4 sm:$0xff]  }
 0x644   : > { %6522 = vmatprep.subr.bf16.mxu0 %v18546_v60  ;;  %v18624_v60 = vld [vmem:[%s22683_s15 + $0x5ec] ss:$16 sps:$4 sm:$0xff]  }
 0x646   : > { %6480 = vmatpush1.bf16.msra.mxu1 %v18541_v57  ;;  %v18619_v57 = vld [vmem:[%s22683_s15 + $0x5e0] ss:$16 sps:$4 sm:$0xff]  }
 0x647   : > { %6523 = vmatpush1.bf16.msra.mxu0 %v18544_v28  ;;  %6481 = vmatprep.subr.bf16.mxu1 %v18549_v42  ;;  %v18622_v28 = vld [vmem:[%s22683_s15 + $0x5e8] ss:$16 sps:$4 sm:$0xff]   ;;  %v18627_v42 = vld [vmem:[#allocation12 + $0x404] ss:$16 sps:$4 sm:$0xff]  }
 0x648   : > { %6524 = vmatprep.subr.bf16.mxu0 %v18552_v59  ;;  %v6148_v59 = vrot.slane %v21598_v16, 1  ;;  %v18634_v16 = vld [vmem:[#allocation12 + $0x428] ss:$16 sps:$4 sm:$0xff]  }
 0x64a   : > { %6482 = vmatpush1.bf16.msra.mxu1 %v18547_v61  ;;  %v18630_v61 = vld [vmem:[#allocation12 + $0x40c] ss:$16 sps:$4 sm:$0xff]  }
 0x64b   : > { %6525 = vmatpush1.bf16.msra.mxu0 %v18550_v1  ;;  %6483 = vmatprep.subr.bf16.mxu1 %v18555_v2  ;;  %v6147_v1 = vrot.slane %v21595_v6, 1  ;;  %v18625_v2 = vld [vmem:[#allocation12 + $0x400] ss:$16 sps:$4 sm:$0xff]  }
 0x64c   : > { %6526 = vmatprep.subr.bf16.mxu0 %v18558_v4  ;;  %v18628_v4 = vld [vmem:[#allocation12 + $0x408] ss:$16 sps:$4 sm:$0xff]   ;;  %v18637_v6 = vld [vmem:[#allocation12 + $0x440] ss:$16 sps:$4 sm:$0xff]  }
 0x64e   : > { %6484 = vmatpush1.bf16.msra.mxu1 %v18553_v5  ;;  %v18633_v5 = vld [vmem:[#allocation12 + $0x424] ss:$16 sps:$4 sm:$0xff]  }
 0x64f   : > { %6527 = vmatpush1.bf16.msra.mxu0 %v18556_v7  ;;  %6485 = vmatprep.subr.bf16.mxu1 %v18561_v8  ;;  %v6149_v7 = vsel %vm1377_vm2, %v6147_v1, %v6148_v59  ;;  %v18636_v8 = vld [vmem:[#allocation12 + $0x42c] ss:$16 sps:$4 sm:$0xff]   ;;  %v18705_v59 = vld [vmem:[#allocation12 + $0x5a4] ss:$16 sps:$4 sm:$0xff]   ;;  %v18703_v1 = vld [vmem:[#allocation12 + $0x5a0] ss:$16 sps:$4 sm:$0xff]  }
 0x650   : > { %6528 = vmatprep.subr.bf16.mxu0 %v18564_v35  ;;  %v18631_v35 = vld [vmem:[#allocation12 + $0x420] ss:$16 sps:$4 sm:$0xff]  }
 0x652   : > { %6486 = vmatpush1.bf16.msra.mxu1 %v18559_v9  ;;  %v18639_v9 = vld [vmem:[#allocation12 + $0x444] ss:$16 sps:$4 sm:$0xff]  }
 0x653   : > { %6529 = vmatpush1.bf16.msra.mxu0 %v18562_v63  ;;  %6487 = vmatprep.subr.bf16.mxu1 %v18567_v26  ;;  %v18642_v63 = vld [vmem:[#allocation12 + $0x44c] ss:$16 sps:$4 sm:$0xff]   ;;  %v18640_v26 = vld [vmem:[#allocation12 + $0x448] ss:$16 sps:$4 sm:$0xff]  }
 0x654   : > { %6530 = vmatprep.subr.bf16.mxu0 %v18570_v14  ;;  %v18645_v14 = vld [vmem:[#allocation12 + $0x464] ss:$16 sps:$4 sm:$0xff]  }
 0x656   : > { %6488 = vmatpush1.bf16.msra.mxu1 %v18565_v48  ;;  %v18648_v48 = vld [vmem:[#allocation12 + $0x46c] ss:$16 sps:$4 sm:$0xff]  }
 0x657   : > { %6531 = vmatpush1.bf16.msra.mxu0 %v18568_v17  ;;  %6489 = vmatprep.subr.bf16.mxu1 %v18573_v19  ;;  %v18643_v17 = vld [vmem:[#allocation12 + $0x460] ss:$16 sps:$4 sm:$0xff]   ;;  %v18646_v19 = vld [vmem:[#allocation12 + $0x468] ss:$16 sps:$4 sm:$0xff]  }
 0x658   : > { %6532 = vmatprep.subr.bf16.mxu0 %v18576_v33  ;;  %v18651_v33 = vld [vmem:[#allocation12 + $0x484] ss:$16 sps:$4 sm:$0xff]  }
 0x65a   : > { %6490 = vmatpush1.bf16.msra.mxu1 %v18571_v20  ;;  %v18654_v20 = vld [vmem:[#allocation12 + $0x48c] ss:$16 sps:$4 sm:$0xff]  }
 0x65b   : > { %6533 = vmatpush1.bf16.msra.mxu0 %v18574_v12  ;;  %6491 = vmatprep.subr.bf16.mxu1 %v18579_v10  ;;  %v18649_v12 = vld [vmem:[#allocation12 + $0x480] ss:$16 sps:$4 sm:$0xff]   ;;  %v18652_v10 = vld [vmem:[#allocation12 + $0x488] ss:$16 sps:$4 sm:$0xff]  }
 0x65c   : > { %6534 = vmatprep.subr.bf16.mxu0 %v18582_v21  ;;  %v18657_v21 = vld [vmem:[#allocation12 + $0x4a4] ss:$16 sps:$4 sm:$0xff]  }
 0x65e   : > { %6492 = vmatpush1.bf16.msra.mxu1 %v18577_v25  ;;  %v18660_v25 = vld [vmem:[#allocation12 + $0x4ac] ss:$16 sps:$4 sm:$0xff]  }
 0x65f   : > { %6535 = vmatpush1.bf16.msra.mxu0 %v18580_v44  ;;  %6493 = vmatprep.subr.bf16.mxu1 %v18585_v18  ;;  %v18655_v44 = vld [vmem:[#allocation12 + $0x4a0] ss:$16 sps:$4 sm:$0xff]   ;;  %v18658_v18 = vld [vmem:[#allocation12 + $0x4a8] ss:$16 sps:$4 sm:$0xff]  }
 0x660   : > { %6536 = vmatprep.subr.bf16.mxu0 %v18588_v11  ;;  %v18663_v11 = vld [vmem:[#allocation12 + $0x4c4] ss:$16 sps:$4 sm:$0xff]  }
 0x662   : > { %6494 = vmatpush1.bf16.msra.mxu1 %v18583_v3  ;;  %v18666_v3 = vld [vmem:[#allocation12 + $0x4cc] ss:$16 sps:$4 sm:$0xff]  }
 0x663   : > { %6537 = vmatpush1.bf16.msra.mxu0 %v18586_v27  ;;  %6495 = vmatprep.subr.bf16.mxu1 %v18591_v29  ;;  %v18661_v27 = vld [vmem:[#allocation12 + $0x4c0] ss:$16 sps:$4 sm:$0xff]   ;;  %v18664_v29 = vld [vmem:[#allocation12 + $0x4c8] ss:$16 sps:$4 sm:$0xff]  }
 0x664   : > { %6538 = vmatprep.subr.bf16.mxu0 %v18594_v30  ;;  %v18669_v30 = vld [vmem:[#allocation12 + $0x4e4] ss:$16 sps:$4 sm:$0xff]  }
 0x666   : > { %6496 = vmatpush1.bf16.msra.mxu1 %v18589_v31  ;;  %v18672_v31 = vld [vmem:[#allocation12 + $0x4ec] ss:$16 sps:$4 sm:$0xff]  }
 0x667   : > { %6539 = vmatpush1.bf16.msra.mxu0 %v18592_v32  ;;  %6497 = vmatprep.subr.bf16.mxu1 %v18597_v34  ;;  %v18667_v32 = vld [vmem:[#allocation12 + $0x4e0] ss:$16 sps:$4 sm:$0xff]   ;;  %v18670_v34 = vld [vmem:[#allocation12 + $0x4e8] ss:$16 sps:$4 sm:$0xff]  }
 0x668   : > { %6540 = vmatprep.subr.bf16.mxu0 %v18600_v24  ;;  %v18675_v24 = vld [vmem:[#allocation12 + $0x504] ss:$16 sps:$4 sm:$0xff]  }
 0x66a   : > { %6498 = vmatpush1.bf16.msra.mxu1 %v18595_v43  ;;  %v18678_v43 = vld [vmem:[#allocation12 + $0x50c] ss:$16 sps:$4 sm:$0xff]  }
 0x66b   : > { %6541 = vmatpush1.bf16.msra.mxu0 %v18598_v45  ;;  %6499 = vmatprep.subr.bf16.mxu1 %v18603_v0  ;;  %v18673_v45 = vld [vmem:[#allocation12 + $0x500] ss:$16 sps:$4 sm:$0xff]   ;;  %v18676_v0 = vld [vmem:[#allocation12 + $0x508] ss:$16 sps:$4 sm:$0xff]  }
 0x66c   : > { %6542 = vmatprep.subr.bf16.mxu0 %v18606_v40  ;;  %v18681_v40 = vld [vmem:[#allocation12 + $0x524] ss:$16 sps:$4 sm:$0xff]  }
 0x66e   : > { %6500 = vmatpush1.bf16.msra.mxu1 %v18601_v47  ;;  %v18684_v47 = vld [vmem:[#allocation12 + $0x52c] ss:$16 sps:$4 sm:$0xff]  }
 0x66f   : > { %6543 = vmatpush1.bf16.msra.mxu0 %v18604_v62  ;;  %6501 = vmatprep.subr.bf16.mxu1 %v18609_v49  ;;  %v18679_v62 = vld [vmem:[#allocation12 + $0x520] ss:$16 sps:$4 sm:$0xff]   ;;  %v18682_v49 = vld [vmem:[#allocation12 + $0x528] ss:$16 sps:$4 sm:$0xff]  }
 0x670   : > { %6544 = vmatprep.subr.bf16.mxu0 %v18612_v50  ;;  %v18687_v50 = vld [vmem:[#allocation12 + $0x544] ss:$16 sps:$4 sm:$0xff]  }
 0x672   : > { %6502 = vmatpush1.bf16.msra.mxu1 %v18607_v51  ;;  %v18690_v51 = vld [vmem:[#allocation12 + $0x54c] ss:$16 sps:$4 sm:$0xff]  }
 0x673   : > { %6545 = vmatpush1.bf16.msra.mxu0 %v18610_v41  ;;  %6503 = vmatprep.subr.bf16.mxu1 %v18615_v52  ;;  %v18685_v41 = vld [vmem:[#allocation12 + $0x540] ss:$16 sps:$4 sm:$0xff]   ;;  %v18688_v52 = vld [vmem:[#allocation12 + $0x548] ss:$16 sps:$4 sm:$0xff]  }
 0x674   : > { %6546 = vmatprep.subr.bf16.mxu0 %v18618_v53  ;;  %v18691_v53 = vld [vmem:[#allocation12 + $0x560] ss:$16 sps:$4 sm:$0xff]  }
 0x676   : > { %6504 = vmatpush1.bf16.msra.mxu1 %v18613_v54  ;;  %v18693_v54 = vld [vmem:[#allocation12 + $0x564] ss:$16 sps:$4 sm:$0xff]  }
 0x677   : > { %6547 = vmatpush1.bf16.msra.mxu0 %v18616_v55  ;;  %6505 = vmatprep.subr.bf16.mxu1 %v18621_v56  ;;  %v18694_v55 = vld [vmem:[#allocation12 + $0x568] ss:$16 sps:$4 sm:$0xff]   ;;  %v18696_v56 = vld [vmem:[#allocation12 + $0x56c] ss:$16 sps:$4 sm:$0xff]  }
 0x678   : > { %6548 = vmatprep.subr.bf16.mxu0 %v18624_v60  ;;  %v18699_v60 = vld [vmem:[#allocation12 + $0x584] ss:$16 sps:$4 sm:$0xff]  }
 0x67a   : > { %6506 = vmatpush1.bf16.msra.mxu1 %v18619_v57  ;;  %v18702_v57 = vld [vmem:[#allocation12 + $0x58c] ss:$16 sps:$4 sm:$0xff]  }
 0x67b   : > { %6549 = vmatpush1.bf16.msra.mxu0 %v18622_v28  ;;  %7625 = vmatprep.subr.bf16.mxu1 %v18627_v42  ;;  %v18697_v28 = vld [vmem:[#allocation12 + $0x580] ss:$16 sps:$4 sm:$0xff]   ;;  %v18700_v42 = vld [vmem:[#allocation12 + $0x588] ss:$16 sps:$4 sm:$0xff]  }
 0x67c   : > { %7711 = vmatprep.subr.bf16.mxu0 %v18630_v61  ;;  %v18708_v61 = vld [vmem:[#allocation12 + $0x5ac] ss:$16 sps:$4 sm:$0xff]  }
 0x67d   : > { %6508 = vmatmul.mubr.bf16.vlgmr.msra.gmra.mrb[16].mxu1 %v6149_v7 }
 0x67e   : > { %6551 = vmatmul.mubr.bf16.vlgmr.msra.gmra.mrb[24].mxu0 %v6149_v7  ;;  %7626 = vmatpush1.bf16.msra.mxu1 %v18625_v2  ;;  %v18706_v2 = vld [vmem:[#allocation12 + $0x5a8] ss:$16 sps:$4 sm:$0xff]   ;;  %v18709_v7 = vld [vmem:[#allocation12 + $0x5c0] ss:$16 sps:$4 sm:$0xff]  }
 0x67f   : > { %7712 = vmatpush1.bf16.msra.mxu0 %v18628_v4  ;;  %7627 = vmatprep.subr.bf16.mxu1 %v18633_v5  ;;  %v18711_v4 = vld [vmem:[#allocation12 + $0x5c4] ss:$16 sps:$4 sm:$0xff]   ;;  %v18714_v5 = vld [vmem:[#allocation12 + $0x5cc] ss:$16 sps:$4 sm:$0xff]  }
 0x680   : > { %7713 = vmatprep.subr.bf16.mxu0 %v18636_v8  ;;  %v18712_v8 = vld [vmem:[#allocation12 + $0x5c8] ss:$16 sps:$4 sm:$0xff]  }
 0x682   : > { %7628 = vmatpush1.bf16.msra.mxu1 %v18631_v35  ;;  %v18717_v35 = vld [vmem:[#allocation12 + $0x5e4] ss:$16 sps:$4 sm:$0xff]  }
 0x683   : > { %7714 = vmatpush1.bf16.msra.mxu0 %v18634_v16  ;;  %7629 = vmatprep.subr.bf16.mxu1 %v18639_v9  ;;  %v18720_v16 = vld [vmem:[#allocation12 + $0x5ec] ss:$16 sps:$4 sm:$0xff]   ;;  %v18715_v9 = vld [vmem:[#allocation12 + $0x5e0] ss:$16 sps:$4 sm:$0xff]  }
 0x684   : > { %7715 = vmatprep.subr.bf16.mxu0 %v18642_v63  ;;  %v18718_v63 = vld [vmem:[#allocation12 + $0x5e8] ss:$16 sps:$4 sm:$0xff]  }
 0x686   : > { %7630 = vmatpush1.bf16.msra.mxu1 %v18637_v6  ;;  %v18723_v6 = vld [vmem:[#allocation12 + $0x604] ss:$16 sps:$4 sm:$0xff]  }
 0x687   : > { %7716 = vmatpush1.bf16.msra.mxu0 %v18640_v26  ;;  %7631 = vmatprep.subr.bf16.mxu1 %v18645_v14  ;;  %v18726_v26 = vld [vmem:[#allocation12 + $0x60c] ss:$16 sps:$4 sm:$0xff]   ;;  %v6569_v14 = vld [vmem:[#allocation19] sm:$0xf] }
 0x688   : > { %7717 = vmatprep.subr.bf16.mxu0 %v18648_v48  ;;  %v6574_v48 = vrot.slane %v6569_v14, %v21206_v23 }
 0x68a   : > { %7632 = vmatpush1.bf16.msra.mxu1 %v18643_v17  ;;  %v6582_v17 = vrot.slane %v6569_v14, %v21212_v38 }
 0x68b   : > { %7718 = vmatpush1.bf16.msra.mxu0 %v18646_v19  ;;  %7633 = vmatprep.subr.bf16.mxu1 %v18651_v33  ;;  %v6578_v19 = vrot.slane %v6569_v14, %v21209_v37  ;;  %v6586_v33 = vrot.slane %v6569_v14, %v21215_v39 }
 0x68c   : > { %7719 = vmatprep.subr.bf16.mxu0 %v18654_v20 }
 0x68e   : > { %7634 = vmatpush1.bf16.msra.mxu1 %v18649_v12 }
 0x68f   : > { %7720 = vmatpush1.bf16.msra.mxu0 %v18652_v10  ;;  %7635 = vmatprep.subr.bf16.mxu1 %v18657_v21 }
 0x690   : > { %7721 = vmatprep.subr.bf16.mxu0 %v18660_v25 }
 0x692   : > { %7636 = vmatpush1.bf16.msra.mxu1 %v18655_v44 }
 0x693   : > { %7722 = vmatpush1.bf16.msra.mxu0 %v18658_v18  ;;  %7637 = vmatprep.subr.bf16.mxu1 %v18663_v11 }
 0x694   : > { %7723 = vmatprep.subr.bf16.mxu0 %v18666_v3 }
 0x696   : > { %7638 = vmatpush1.bf16.msra.mxu1 %v18661_v27 }
 0x697   : > { %7724 = vmatpush1.bf16.msra.mxu0 %v18664_v29  ;;  %7639 = vmatprep.subr.bf16.mxu1 %v18669_v30 }
 0x698   : > { %7725 = vmatprep.subr.bf16.mxu0 %v18672_v31 }
 0x69a   : > { %7640 = vmatpush1.bf16.msra.mxu1 %v18667_v32 }
 0x69b   : > { %7726 = vmatpush1.bf16.msra.mxu0 %v18670_v34  ;;  %7641 = vmatprep.subr.bf16.mxu1 %v18675_v24 }
 0x69c   : > { %7727 = vmatprep.subr.bf16.mxu0 %v18678_v43 }
 0x69e   : > { %7642 = vmatpush1.bf16.msra.mxu1 %v18673_v45 }
 0x69f   : > { %7728 = vmatpush1.bf16.msra.mxu0 %v18676_v0  ;;  %7643 = vmatprep.subr.bf16.mxu1 %v18681_v40 }
 0x6a0   : > { %7729 = vmatprep.subr.bf16.mxu0 %v18684_v47 }
 0x6a2   : > { %7644 = vmatpush1.bf16.msra.mxu1 %v18679_v62 }
 0x6a3   : > { %7730 = vmatpush1.bf16.msra.mxu0 %v18682_v49  ;;  %7645 = vmatprep.subr.bf16.mxu1 %v18687_v50 }
 0x6a4   : > { %7731 = vmatprep.subr.bf16.mxu0 %v18690_v51 }
 0x6a6   : > { %7646 = vmatpush1.bf16.msra.mxu1 %v18685_v41 }
 0x6a7   : > { %7732 = vmatpush1.bf16.msra.mxu0 %v18688_v52  ;;  %7647 = vmatprep.subr.bf16.mxu1 %v18693_v54 }
 0x6a8   : > { %7733 = vmatprep.subr.bf16.mxu0 %v18696_v56 }
 0x6aa   : > { %7648 = vmatpush1.bf16.msra.mxu1 %v18691_v53 }
 0x6ab   : > { %7734 = vmatpush1.bf16.msra.mxu0 %v18694_v55  ;;  %7649 = vmatprep.subr.bf16.mxu1 %v18699_v60 }
 0x6ac   : > { %7735 = vmatprep.subr.bf16.mxu0 %v18702_v57 }
 0x6ae   : > { %7650 = vmatpush1.bf16.msra.mxu1 %v18697_v28 }
 0x6af   : > { %7736 = vmatpush1.bf16.msra.mxu0 %v18700_v42  ;;  %7651 = vmatprep.subr.bf16.mxu1 %v18705_v59 }
 0x6b0   : > { %7737 = vmatprep.subr.bf16.mxu0 %v18708_v61 }
 0x6b2   : > { %7652 = vmatpush1.bf16.msra.mxu1 %v18703_v1 }
 0x6b3   : > { %7738 = vmatpush1.bf16.msra.mxu0 %v18706_v2  ;;  %7653 = vmatprep.subr.bf16.mxu1 %v18711_v4 }
 0x6b4   : > { %7739 = vmatprep.subr.bf16.mxu0 %v18714_v5 }
 0x6b6   : > { %7654 = vmatpush1.bf16.msra.mxu1 %v18709_v7 }
 0x6b7   : > { %7740 = vmatpush1.bf16.msra.mxu0 %v18712_v8  ;;  %7655 = vmatprep.subr.bf16.mxu1 %v18717_v35 }
 0x6b8   : > { %7741 = vmatprep.subr.bf16.mxu0 %v18720_v16 }
 0x6ba   : > { %7656 = vmatpush1.bf16.msra.mxu1 %v18715_v9 }
 0x6bb   : > { %7742 = vmatpush1.bf16.msra.mxu0 %v18718_v63  ;;  %7668 = vmatprep.subr.bf16.mxu1 %v18723_v6 }
 0x6bc   : > { %7754 = vmatprep.subr.bf16.mxu0 %v18726_v26 }
 0x750   : > { %v6509_v20 = vpop.f32.mrb[16].mxu1 }
 0x751   : > { %v6591_v12 = vadd.f32 %v6574_v48, %v6509_v20  ;;  %v6552_v10 = vpop.f32.mrb[24].mxu0  ;;  %v6511_v21 = vpop.f32.mrb[17].mxu1 }
 0x752   : > { %v6593_v25 = vadd.f32 %v6582_v17, %v6552_v10  ;;  %v6592_v44 = vadd.f32 %v6578_v19, %v6511_v21  ;;  %v6554_v18 = vpop.f32.mrb[25].mxu0  ;;  %v6513_v11 = vpop.f32.mrb[18].mxu1 }
 0x753   : > { %v6599_v3 = vmax.f32 %v6591_v12, 0.0  ;;  %v6594_v27 = vadd.f32 %v6586_v33, %v6554_v18  ;;  %v6595_v29 = vadd.f32 %v6574_v48, %v6513_v11  ;;  %v6556_v30 = vpop.f32.mrb[26].mxu0  ;;  %v6515_v31 = vpop.f32.mrb[19].mxu1 }
 0x754   : > { %v6601_v32 = vmax.f32 %v6593_v25, 0.0  ;;  %v6600_v34 = vmax.f32 %v6592_v44, 0.0  ;;  %v6597_v24 = vadd.f32 %v6582_v17, %v6556_v30  ;;  %v6596_v43 = vadd.f32 %v6578_v19, %v6515_v31  ;;  %v6558_v45 = vpop.f32.mrb[27].mxu0  ;;  %v18724_v30 = vld [vmem:[#allocation12 + $0x608] ss:$16 sps:$4 sm:$0xff]  }
 0x755   : > { %v6620_v0 = vrot.slane %v6599_v3, 7  ;;  %v6602_v40 = vmax.f32 %v6594_v27, 0.0  ;;  %v6603_v47 = vmax.f32 %v6595_v29, 0.0  ;;  %v6598_v62 = vadd.f32 %v6586_v33, %v6558_v45  ;;  %v18721_v29 = vld [vmem:[#allocation12 + $0x600] ss:$16 sps:$4 sm:$0xff]  }
 0x756   : > { %v6622_v49 = vrot.slane %v6601_v32, 7  ;;  %v6621_v50 = vrot.slane %v6600_v34, 7  ;;  %v6605_v51 = vmax.f32 %v6597_v24, 0.0  ;;  %v6604_v41 = vmax.f32 %v6596_v43, 0.0  ;;  %v18729_v43 = vld [vmem:[#allocation12 + $0x624] ss:$16 sps:$4 sm:$0xff]  }
 0x757   : > { %6644 = vst [vmem:[#allocation4] sm:$0xfe] %v6620_v0  ;;  %v6623_v52 = vrot.slane %v6602_v40, 7  ;;  %v6624_v53 = vrot.slane %v6603_v47, 7  ;;  %v6606_v54 = vmax.f32 %v6598_v62, 0.0 }
 0x758   : > { %6646 = vst [vmem:[#allocation4 + $0x10] sm:$0xfe] %v6622_v49  ;;  %6645 = vst [vmem:[#allocation4 + $0x8] sm:$0xfe] %v6621_v50  ;;  %v6628_v55 = vrot.slane %v6605_v51, 7  ;;  %v6626_v56 = vrot.slane %v6604_v41, 7 }
 0x759   : > { %6647 = vst [vmem:[#allocation4 + $0x18] sm:$0xfe] %v6623_v52  ;;  %v6625_v60 = vsel %vm1710_vm4, %v6620_v0, %v6624_v53  ;;  %6652 = vst [vmem:[#allocation4 + $0x40] sm:$0x1] %v6624_v53  ;;  %v6630_v57 = vrot.slane %v6606_v54, 7 }
 0x75a   : > { %v21998_v28 = vsel %vm1710_vm4, %v6622_v49, %v6628_v55  ;;  %6654 = vst [vmem:[#allocation4 + $0x50] sm:$0x1] %v6628_v55  ;;  %v6627_v42 = vsel %vm1710_vm4, %v6621_v50, %v6626_v56  ;;  %6653 = vst [vmem:[#allocation4 + $0x48] sm:$0x1] %v6626_v56  ;;  %v18732_v45 = vld [vmem:[#allocation12 + $0x62c] ss:$16 sps:$4 sm:$0xff]  }
 0x75b   : > { %v6631_v59 = vsel %vm1710_vm4, %v6623_v52, %v6630_v57  ;;  %6655 = vst [vmem:[#allocation4 + $0x58] sm:$0x1] %v6630_v57  ;;  %v18727_v40 = vld [vmem:[#allocation12 + $0x620] ss:$16 sps:$4 sm:$0xff]   ;;  %v18730_v47 = vld [vmem:[#allocation12 + $0x628] ss:$16 sps:$4 sm:$0xff]  }
 0x75c   : > { %v18735_v62 = vld [vmem:[#allocation12 + $0x644] ss:$16 sps:$4 sm:$0xff]   ;;  %v18738_v49 = vld [vmem:[#allocation12 + $0x64c] ss:$16 sps:$4 sm:$0xff]   ;;  %v18733_v50 = vld [vmem:[#allocation12 + $0x640] ss:$16 sps:$4 sm:$0xff]  }
 0x75d   : > { %v18736_v51 = vld [vmem:[#allocation12 + $0x648] ss:$16 sps:$4 sm:$0xff]   ;;  %v18741_v41 = vld [vmem:[#allocation12 + $0x664] ss:$16 sps:$4 sm:$0xff]   ;;  %v18744_v52 = vld [vmem:[#allocation12 + $0x66c] ss:$16 sps:$4 sm:$0xff]  }
 0x75e   : > { %v6656_v61 = vld [vmem:[#allocation4] sm:$0xff]  ;;  %v18742_v54 = vld [vmem:[#allocation12 + $0x668] ss:$16 sps:$4 sm:$0xff]   ;;  %v18750_v56 = vld [vmem:[#allocation12 + $0x68c] ss:$16 sps:$4 sm:$0xff]   ;;  %vm9596_vm4 = vcmask 130048  }
 0x75f   : > { %v6657_v1 = vld [vmem:[#allocation4 + $0x8] sm:$0xff]  ;;  %v22002_v2 = vpack.c.bf16 %v6625_v60, %v6656_v61  ;;  %v18739_v53 = vld [vmem:[#allocation12 + $0x660] ss:$16 sps:$4 sm:$0xff]   ;;  %v18747_v55 = vld [vmem:[#allocation12 + $0x684] ss:$16 sps:$4 sm:$0xff]  }
 0x760   : > { %v22004_v4 = vpack.c.bf16 %v6627_v42, %v6657_v1  ;;  %v6664_v5 = vld [vmem:[#allocation4 + $0x40] sm:$0x3]  ;;  %v6659_v7 = vld [vmem:[#allocation4 + $0x18] sm:$0xff]  ;;  %v18753_v42 = vld [vmem:[#allocation12 + $0x6a4] ss:$16 sps:$4 sm:$0xff]  }
 0x761   : > { %v6665_v8 = vld [vmem:[#allocation4 + $0x48] sm:$0x3]  ;;  %v22006_v35 = vpack.c.bf16 %v6664_v5, %v6664_v5  ;;  %v6936_v16 = vshll.u32 %v22002_v2, 16  ;;  %v22009_v9 = vpack.c.bf16 %v6631_v59, %v6659_v7  ;;  %v6934_v14 = vshrl.u32 %v22002_v2, 16  ;;  %v18745_v60 = vld [vmem:[#allocation12 + $0x680] ss:$16 sps:$4 sm:$0xff]  }
 0x762   : > { %v22011_v63 = vpack.c.bf16 %v6665_v8, %v6665_v8  ;;  %v6948_v6 = vshll.u32 %v22004_v4, 16  ;;  %v6667_v26 = vld [vmem:[#allocation4 + $0x58] sm:$0x3]  ;;  %v6946_v33 = vshrl.u32 %v22004_v4, 16  ;;  %v18756_v59 = vld [vmem:[#allocation12 + $0x6ac] ss:$16 sps:$4 sm:$0xff]  }
 0x763   : > { %v6938_v48 = vrot.slane %v6936_v16, 1  ;;  %v6941_v17 = vshll.u32 %v22006_v35, 16  ;;  %v22016_v19 = vpack.c.bf16 %v6667_v26, %v6667_v26  ;;  %v6972_v10 = vshll.u32 %v22009_v9, 16  ;;  %v18748_v57 = vld [vmem:[#allocation12 + $0x688] ss:$16 sps:$4 sm:$0xff]  }
 0x764   : > { %v6950_v20 = vrot.slane %v6948_v6, 1  ;;  %v6953_v12 = vshll.u32 %v22011_v63, 16  ;;  %v6970_v3 = vshrl.u32 %v22009_v9, 16  ;;  %v18751_v61 = vld [vmem:[#allocation12 + $0x6a0] ss:$16 sps:$4 sm:$0xff]  }
 0x765   : > { %v6939_v21 = vor.u32 %v6938_v48, %v6934_v14  ;;  %v6943_v25 = vrot.slane %v6941_v17, 1  ;;  %v6977_v44 = vshll.u32 %v22016_v19, 16  ;;  %v6974_v27 = vrot.slane %v6972_v10, 1  ;;  %v18754_v1 = vld [vmem:[#allocation12 + $0x6a8] ss:$16 sps:$4 sm:$0xff]  }
 0x766   : > { %v6951_v18 = vor.u32 %v6950_v20, %v6946_v33  ;;  %v6955_v11 = vrot.slane %v6953_v12, 1  ;;  %v18759_v5 = vld [vmem:[#allocation12 + $0x6c4] ss:$16 sps:$4 sm:$0xff]   ;;  %v18762_v7 = vld [vmem:[#allocation12 + $0x6cc] ss:$16 sps:$4 sm:$0xff]  }
 0x767   : > { %v6979_v31 = vrot.slane %v6977_v44, 1  ;;  %v6975_v34 = vor.u32 %v6974_v27, %v6970_v3  ;;  %v6944_v24 = vsel %vm868_vm0, %v6939_v21, %v6943_v25  ;;  %v18757_v8 = vld [vmem:[#allocation12 + $0x6c0] ss:$16 sps:$4 sm:$0xff]   ;;  %v18760_v16 = vld [vmem:[#allocation12 + $0x6c8] ss:$16 sps:$4 sm:$0xff]  }
 0x768   : > { %v6956_v32 = vsel %vm868_vm0, %v6951_v18, %v6955_v11  ;;  %v18765_v6 = vld [vmem:[#allocation12 + $0x6e4] ss:$16 sps:$4 sm:$0xff]   ;;  %v18768_v26 = vld [vmem:[#allocation12 + $0x6ec] ss:$16 sps:$4 sm:$0xff]   ;;  %v18763_v14 = vld [vmem:[#allocation12 + $0x6e0] ss:$16 sps:$4 sm:$0xff]  }
 0x769   : > { %7657 = vmatprep.mubr.bf16.mxu1 %v6956_v32  ;;  %7743 = vmatprep.mubr.bf16.mxu0 %v6956_v32  ;;  %v6980_v0 = vsel %vm868_vm0, %v6975_v34, %v6979_v31  ;;  %v18766_v48 = vld [vmem:[#allocation12 + $0x6e8] ss:$16 sps:$4 sm:$0xff]   ;;  %v18771_v17 = vld [vmem:[#allocation12 + $0x704] ss:$16 sps:$4 sm:$0xff]   ;;  %v18774_v33 = vld [vmem:[#allocation12 + $0x70c] ss:$16 sps:$4 sm:$0xff]  }
 0x76a   : > { %7658 = vmatmul.mubr.bf16.vlgmr.msra.gmra.mrb[20].mxu1 %v6944_v24  ;;  %7744 = vmatmul.mubr.bf16.vlgmr.msra.gmra.mrb[28].mxu0 %v6944_v24  ;;  %v18769_v20 = vld [vmem:[#allocation12 + $0x700] ss:$16 sps:$4 sm:$0xff]   ;;  %v18772_v12 = vld [vmem:[#allocation12 + $0x708] ss:$16 sps:$4 sm:$0xff]   ;;  %v18777_v10 = vld [vmem:[#allocation12 + $0x724] ss:$16 sps:$4 sm:$0xff]  }
 0x76b   : > { %7669 = vmatpush1.bf16.msra.mxu1 %v18721_v29  ;;  %7755 = vmatpush1.bf16.msra.mxu0 %v18724_v30  ;;  %v18780_v21 = vld [vmem:[#allocation12 + $0x72c] ss:$16 sps:$4 sm:$0xff]   ;;  %v18775_v25 = vld [vmem:[#allocation12 + $0x720] ss:$16 sps:$4 sm:$0xff]   ;;  %v18778_v44 = vld [vmem:[#allocation12 + $0x728] ss:$16 sps:$4 sm:$0xff]  }
 0x76c   : > { %7700 = vmatprep.mubr.bf16.mxu1 %v6980_v0  ;;  %7786 = vmatprep.mubr.bf16.mxu0 %v6980_v0  ;;  %v18783_v18 = vld [vmem:[#allocation12 + $0x744] ss:$16 sps:$4 sm:$0xff]   ;;  %v18786_v11 = vld [vmem:[#allocation12 + $0x74c] ss:$16 sps:$4 sm:$0xff]   ;;  %v18781_v3 = vld [vmem:[#allocation12 + $0x740] ss:$16 sps:$4 sm:$0xff]  }
 0x76d   : > { %7670 = vmatprep.subr.bf16.mxu1 %v18729_v43  ;;  %7756 = vmatprep.subr.bf16.mxu0 %v18732_v45  ;;  %v18784_v27 = vld [vmem:[#allocation12 + $0x748] ss:$16 sps:$4 sm:$0xff]   ;;  %v18789_v29 = vld [vmem:[#allocation12 + $0x764] ss:$16 sps:$4 sm:$0xff]   ;;  %v18792_v30 = vld [vmem:[#allocation12 + $0x76c] ss:$16 sps:$4 sm:$0xff]  }
 0x76e   : > { %v18787_v31 = vld [vmem:[#allocation12 + $0x760] ss:$16 sps:$4 sm:$0xff]   ;;  %v18790_v32 = vld [vmem:[#allocation12 + $0x768] ss:$16 sps:$4 sm:$0xff]   ;;  %v18795_v34 = vld [vmem:[#allocation12 + $0x784] ss:$16 sps:$4 sm:$0xff]  }
 0x76f   : > { %7671 = vmatpush1.bf16.msra.mxu1 %v18727_v40  ;;  %7757 = vmatpush1.bf16.msra.mxu0 %v18730_v47  ;;  %v18798_v24 = vld [vmem:[#allocation12 + $0x78c] ss:$16 sps:$4 sm:$0xff]   ;;  %v6658_v43 = vld [vmem:[#allocation4 + $0x10] sm:$0xff]  ;;  %v18796_v0 = vld [vmem:[#allocation12 + $0x788] ss:$16 sps:$4 sm:$0xff]  }
 0x770   : > { %7672 = vmatprep.subr.bf16.mxu1 %v18735_v62  ;;  %7758 = vmatprep.subr.bf16.mxu0 %v18738_v49  ;;  %v18793_v45 = vld [vmem:[#allocation12 + $0x780] ss:$16 sps:$4 sm:$0xff]   ;;  %v18801_v40 = vld [vmem:[#allocation12 + $0x7a4] ss:$16 sps:$4 sm:$0xff]   ;;  %v18804_v47 = vld [vmem:[#allocation12 + $0x7ac] ss:$16 sps:$4 sm:$0xff]   ;;  %v22027_v62 = vpack.c.bf16 %v21998_v28, %v6658_v43 }
 0x771   : > { %v6666_v49 = vld [vmem:[#allocation4 + $0x50] sm:$0x3]  ;;  %v18813_v28 = vld [vmem:[#allocation12 + $0x7e4] ss:$16 sps:$4 sm:$0xff]   ;;  %v18850_v43 = vld [vmem:[#allocation12 + $0xa8] ss:$16 sps:$4 sm:$0xff]  }
 0x773   : > { %7673 = vmatpush1.bf16.msra.mxu1 %v18733_v50  ;;  %7759 = vmatpush1.bf16.msra.mxu0 %v18736_v51  ;;  %v18799_v50 = vld [vmem:[#allocation12 + $0x7a0] ss:$16 sps:$4 sm:$0xff]   ;;  %v18802_v51 = vld [vmem:[#allocation12 + $0x7a8] ss:$16 sps:$4 sm:$0xff]  }
 0x774   : > { %7674 = vmatprep.subr.bf16.mxu1 %v18741_v41  ;;  %7760 = vmatprep.subr.bf16.mxu0 %v18744_v52  ;;  %v18807_v41 = vld [vmem:[#allocation12 + $0x7c4] ss:$16 sps:$4 sm:$0xff]   ;;  %v18810_v52 = vld [vmem:[#allocation12 + $0x7cc] ss:$16 sps:$4 sm:$0xff]  }
 0x777   : > { %7675 = vmatpush1.bf16.msra.mxu1 %v18739_v53  ;;  %7761 = vmatpush1.bf16.msra.mxu0 %v18742_v54  ;;  %v22029_v53 = vpack.c.bf16 %v6666_v49, %v6666_v49  ;;  %v6960_v54 = vshll.u32 %v22027_v62, 16  ;;  %v18861_v49 = vld [vmem:[#allocation12 + $0xe4] ss:$16 sps:$4 sm:$0xff]  }
 0x778   : > { %7676 = vmatprep.subr.bf16.mxu1 %v18747_v55  ;;  %7762 = vmatprep.subr.bf16.mxu0 %v18750_v56  ;;  %v18805_v55 = vld [vmem:[#allocation12 + $0x7c0] ss:$16 sps:$4 sm:$0xff]   ;;  %v18808_v56 = vld [vmem:[#allocation12 + $0x7c8] ss:$16 sps:$4 sm:$0xff]  }
 0x77b   : > { %7677 = vmatpush1.bf16.msra.mxu1 %v18745_v60  ;;  %7763 = vmatpush1.bf16.msra.mxu0 %v18748_v57  ;;  %v18816_v60 = vld [vmem:[#allocation12 + $0x7ec] ss:$16 sps:$4 sm:$0xff]   ;;  %v6962_v57 = vrot.slane %v6960_v54, 1 }
 0x77c   : > { %7678 = vmatprep.subr.bf16.mxu1 %v18753_v42  ;;  %7764 = vmatprep.subr.bf16.mxu0 %v18756_v59  ;;  %v6965_v42 = vshll.u32 %v22029_v53, 16  ;;  %v18811_v59 = vld [vmem:[#allocation12 + $0x7e0] ss:$16 sps:$4 sm:$0xff]   ;;  %v18870_v54 = vld [vmem:[#allocation12 + $0x10c] ss:$16 sps:$4 sm:$0xff]  }
 0x77f   : > { %7679 = vmatpush1.bf16.msra.mxu1 %v18751_v61  ;;  %7765 = vmatpush1.bf16.msra.mxu0 %v18754_v1  ;;  %v18814_v61 = vld [vmem:[#allocation12 + $0x7e8] ss:$16 sps:$4 sm:$0xff]   ;;  %v6958_v1 = vshrl.u32 %v22027_v62, 16 }
 0x780   : > { %7680 = vmatprep.subr.bf16.mxu1 %v18759_v5  ;;  %7766 = vmatprep.subr.bf16.mxu0 %v18762_v7  ;;  %v18819_v5 = vld [vmem:[#allocation12 + $0x4] ss:$16 sps:$4 sm:$0xff]   ;;  %v18822_v7 = vld [vmem:[#allocation12 + $0xc] ss:$16 sps:$4 sm:$0xff]  }
 0x783   : > { %7681 = vmatpush1.bf16.msra.mxu1 %v18757_v8  ;;  %7767 = vmatpush1.bf16.msra.mxu0 %v18760_v16  ;;  %v6963_v8 = vor.u32 %v6962_v57, %v6958_v1  ;;  %v6967_v16 = vrot.slane %v6965_v42, 1  ;;  %v18871_v57 = vld [vmem:[#allocation12 + $0x120] ss:$16 sps:$4 sm:$0xff]   ;;  %v18874_v42 = vld [vmem:[#allocation12 + $0x128] ss:$16 sps:$4 sm:$0xff]  }
 0x784   : > { %7682 = vmatprep.subr.bf16.mxu1 %v18765_v6  ;;  %7768 = vmatprep.subr.bf16.mxu0 %v18768_v26  ;;  %v18817_v6 = vld [vmem:[#allocation12] ss:$16 sps:$4 sm:$0xff]   ;;  %v18820_v26 = vld [vmem:[#allocation12 + $0x8] ss:$16 sps:$4 sm:$0xff]  }
 0x785   : > { %v18877_v1 = vld [vmem:[#allocation12 + $0x140] ss:$16 sps:$4 sm:$0xff]  }
 0x787   : > { %7683 = vmatpush1.bf16.msra.mxu1 %v18763_v14  ;;  %7769 = vmatpush1.bf16.msra.mxu0 %v18766_v48  ;;  %v6968_v14 = vsel %vm868_vm0, %v6963_v8, %v6967_v16  ;;  %v18825_v48 = vld [vmem:[#allocation12 + $0x24] ss:$16 sps:$4 sm:$0xff]   ;;  %v18888_v8 = vld [vmem:[#allocation12 + $0x16c] ss:$16 sps:$4 sm:$0xff]   ;;  %v18883_v16 = vld [vmem:[#allocation12 + $0x160] ss:$16 sps:$4 sm:$0xff]  }
 0x788   : > { %7684 = vmatprep.subr.bf16.mxu1 %v18771_v17  ;;  %7770 = vmatprep.subr.bf16.mxu0 %v18774_v33  ;;  %v18828_v17 = vld [vmem:[#allocation12 + $0x2c] ss:$16 sps:$4 sm:$0xff]   ;;  %v18823_v33 = vld [vmem:[#allocation12 + $0x20] ss:$16 sps:$4 sm:$0xff]  }
 0x78b   : > { %7685 = vmatpush1.bf16.msra.mxu1 %v18769_v20  ;;  %7771 = vmatpush1.bf16.msra.mxu0 %v18772_v12  ;;  %v18826_v20 = vld [vmem:[#allocation12 + $0x28] ss:$16 sps:$4 sm:$0xff]   ;;  %v18831_v12 = vld [vmem:[#allocation12 + $0x44] ss:$16 sps:$4 sm:$0xff]  }
 0x78c   : > { %7686 = vmatprep.subr.bf16.mxu1 %v18777_v10  ;;  %7772 = vmatprep.subr.bf16.mxu0 %v18780_v21  ;;  %v18834_v10 = vld [vmem:[#allocation12 + $0x4c] ss:$16 sps:$4 sm:$0xff]   ;;  %v18829_v21 = vld [vmem:[#allocation12 + $0x40] ss:$16 sps:$4 sm:$0xff]  }
 0x78f   : > { %7687 = vmatpush1.bf16.msra.mxu1 %v18775_v25  ;;  %7773 = vmatpush1.bf16.msra.mxu0 %v18778_v44  ;;  %v18832_v25 = vld [vmem:[#allocation12 + $0x48] ss:$16 sps:$4 sm:$0xff]   ;;  %v18837_v44 = vld [vmem:[#allocation12 + $0x64] ss:$16 sps:$4 sm:$0xff]  }
 0x790   : > { %7688 = vmatprep.subr.bf16.mxu1 %v18783_v18  ;;  %7774 = vmatprep.subr.bf16.mxu0 %v18786_v11  ;;  %v18840_v18 = vld [vmem:[#allocation12 + $0x6c] ss:$16 sps:$4 sm:$0xff]   ;;  %v18835_v11 = vld [vmem:[#allocation12 + $0x60] ss:$16 sps:$4 sm:$0xff]  }
 0x793   : > { %7689 = vmatpush1.bf16.msra.mxu1 %v18781_v3  ;;  %7775 = vmatpush1.bf16.msra.mxu0 %v18784_v27  ;;  %v18838_v3 = vld [vmem:[#allocation12 + $0x68] ss:$16 sps:$4 sm:$0xff]   ;;  %v18843_v27 = vld [vmem:[#allocation12 + $0x84] ss:$16 sps:$4 sm:$0xff]  }
 0x794   : > { %7690 = vmatprep.subr.bf16.mxu1 %v18789_v29  ;;  %7776 = vmatprep.subr.bf16.mxu0 %v18792_v30  ;;  %v18846_v29 = vld [vmem:[#allocation12 + $0x8c] ss:$16 sps:$4 sm:$0xff]   ;;  %v18841_v30 = vld [vmem:[#allocation12 + $0x80] ss:$16 sps:$4 sm:$0xff]  }
 0x797   : > { %7691 = vmatpush1.bf16.msra.mxu1 %v18787_v31  ;;  %7777 = vmatpush1.bf16.msra.mxu0 %v18790_v32  ;;  %v18844_v31 = vld [vmem:[#allocation12 + $0x88] ss:$16 sps:$4 sm:$0xff]   ;;  %v18849_v32 = vld [vmem:[#allocation12 + $0xa4] ss:$16 sps:$4 sm:$0xff]  }
 0x798   : > { %7692 = vmatprep.subr.bf16.mxu1 %v18795_v34  ;;  %7778 = vmatprep.subr.bf16.mxu0 %v18798_v24  ;;  %v18852_v34 = vld [vmem:[#allocation12 + $0xac] ss:$16 sps:$4 sm:$0xff]   ;;  %v18847_v24 = vld [vmem:[#allocation12 + $0xa0] ss:$16 sps:$4 sm:$0xff]  }
 0x79b   : > { %7693 = vmatpush1.bf16.msra.mxu1 %v18793_v45  ;;  %7779 = vmatpush1.bf16.msra.mxu0 %v18796_v0  ;;  %v18855_v45 = vld [vmem:[#allocation12 + $0xc4] ss:$16 sps:$4 sm:$0xff]   ;;  %v18858_v0 = vld [vmem:[#allocation12 + $0xcc] ss:$16 sps:$4 sm:$0xff]  }
 0x79c   : > { %7694 = vmatprep.subr.bf16.mxu1 %v18801_v40  ;;  %7780 = vmatprep.subr.bf16.mxu0 %v18804_v47  ;;  %v18853_v40 = vld [vmem:[#allocation12 + $0xc0] ss:$16 sps:$4 sm:$0xff]   ;;  %v18856_v47 = vld [vmem:[#allocation12 + $0xc8] ss:$16 sps:$4 sm:$0xff]  }
 0x79f   : > { %7695 = vmatpush1.bf16.msra.mxu1 %v18799_v50  ;;  %7781 = vmatpush1.bf16.msra.mxu0 %v18802_v51  ;;  %v18864_v50 = vld [vmem:[#allocation12 + $0xec] ss:$16 sps:$4 sm:$0xff]   ;;  %v18859_v51 = vld [vmem:[#allocation12 + $0xe0] ss:$16 sps:$4 sm:$0xff]  }
 0x7a0   : > { %7696 = vmatprep.subr.bf16.mxu1 %v18807_v41  ;;  %7782 = vmatprep.subr.bf16.mxu0 %v18810_v52  ;;  %v18862_v41 = vld [vmem:[#allocation12 + $0xe8] ss:$16 sps:$4 sm:$0xff]   ;;  %v18867_v52 = vld [vmem:[#allocation12 + $0x104] ss:$16 sps:$4 sm:$0xff]  }
 0x7a3   : > { %7697 = vmatpush1.bf16.msra.mxu1 %v18805_v55  ;;  %7783 = vmatpush1.bf16.msra.mxu0 %v18808_v56  ;;  %v18865_v55 = vld [vmem:[#allocation12 + $0x100] ss:$16 sps:$4 sm:$0xff]   ;;  %v18868_v56 = vld [vmem:[#allocation12 + $0x108] ss:$16 sps:$4 sm:$0xff]  }
 0x7a4   : > { %7698 = vmatprep.subr.bf16.mxu1 %v18813_v28  ;;  %7784 = vmatprep.subr.bf16.mxu0 %v18816_v60  ;;  %v18873_v28 = vld [vmem:[#allocation12 + $0x124] ss:$16 sps:$4 sm:$0xff]   ;;  %v18876_v60 = vld [vmem:[#allocation12 + $0x12c] ss:$16 sps:$4 sm:$0xff]  }
 0x7a7   : > { %7699 = vmatpush1.bf16.msra.mxu1 %v18811_v59  ;;  %7785 = vmatpush1.bf16.msra.mxu0 %v18814_v61  ;;  %v18879_v59 = vld [vmem:[#allocation12 + $0x144] ss:$16 sps:$4 sm:$0xff]   ;;  %v18882_v61 = vld [vmem:[#allocation12 + $0x14c] ss:$16 sps:$4 sm:$0xff]  }
 0x7a8   : > { %8437 = vmatprep.subr.bf16.mxu1 %v18819_v5  ;;  %8523 = vmatprep.subr.bf16.mxu0 %v18822_v7  ;;  %v18880_v5 = vld [vmem:[#allocation12 + $0x148] ss:$16 sps:$4 sm:$0xff]   ;;  %v18885_v7 = vld [vmem:[#allocation12 + $0x164] ss:$16 sps:$4 sm:$0xff]  }
 0x7aa   : > { %7701 = vmatmul.mubr.bf16.vlgmr.msra.gmra.mrb[20].mxu1 %v6968_v14  ;;  %7787 = vmatmul.mubr.bf16.vlgmr.msra.gmra.mrb[28].mxu0 %v6968_v14  ;;  %v18894_v14 = vld [vmem:[#allocation12 + $0x18c] ss:$16 sps:$4 sm:$0xff]  }
 0x7ab   : > { %8438 = vmatpush1.bf16.msra.mxu1 %v18817_v6  ;;  %8469 = vmatprep.mubr.bf16.mxu1 %v22004_v4  ;;  %v18886_v6 = vld [vmem:[#allocation12 + $0x168] ss:$16 sps:$4 sm:$0xff]  }
 0x7ac   : > { %8524 = vmatpush1.bf16.msra.mxu0 %v18820_v26  ;;  %8555 = vmatprep.mubr.bf16.mxu0 %v22004_v4  ;;  %v18891_v26 = vld [vmem:[#allocation12 + $0x184] ss:$16 sps:$4 sm:$0xff]  }
 0x7ad   : > { %8439 = vmatprep.subr.bf16.mxu1 %v18825_v48  ;;  %8525 = vmatprep.subr.bf16.mxu0 %v18828_v17  ;;  %v18889_v48 = vld [vmem:[#allocation12 + $0x180] ss:$16 sps:$4 sm:$0xff]   ;;  %v18892_v17 = vld [vmem:[#allocation12 + $0x188] ss:$16 sps:$4 sm:$0xff]  }
 0x7af   : > { %8440 = vmatpush1.bf16.msra.mxu1 %v18823_v33  ;;  %v18897_v33 = vld [vmem:[#allocation12 + $0x1a4] ss:$16 sps:$4 sm:$0xff]  }
 0x7b0   : > { %8526 = vmatpush1.bf16.msra.mxu0 %v18826_v20  ;;  %8441 = vmatprep.subr.bf16.mxu1 %v18831_v12  ;;  %v18900_v20 = vld [vmem:[#allocation12 + $0x1ac] ss:$16 sps:$4 sm:$0xff]   ;;  %v18895_v12 = vld [vmem:[#allocation12 + $0x1a0] ss:$16 sps:$4 sm:$0xff]  }
 0x7b1   : > { %8527 = vmatprep.subr.bf16.mxu0 %v18834_v10  ;;  %v18898_v10 = vld [vmem:[#allocation12 + $0x1a8] ss:$16 sps:$4 sm:$0xff]  }
 0x7b3   : > { %8442 = vmatpush1.bf16.msra.mxu1 %v18829_v21  ;;  %v18903_v21 = vld [vmem:[#allocation12 + $0x1c4] ss:$16 sps:$4 sm:$0xff]  }
 0x7b4   : > { %8528 = vmatpush1.bf16.msra.mxu0 %v18832_v25  ;;  %8443 = vmatprep.subr.bf16.mxu1 %v18837_v44  ;;  %v18906_v25 = vld [vmem:[#allocation12 + $0x1cc] ss:$16 sps:$4 sm:$0xff]   ;;  %v18901_v44 = vld [vmem:[#allocation12 + $0x1c0] ss:$16 sps:$4 sm:$0xff]  }
 0x7b5   : > { %8529 = vmatprep.subr.bf16.mxu0 %v18840_v18  ;;  %v18904_v18 = vld [vmem:[#allocation12 + $0x1c8] ss:$16 sps:$4 sm:$0xff]  }
 0x7b7   : > { %8444 = vmatpush1.bf16.msra.mxu1 %v18835_v11  ;;  %v18909_v11 = vld [vmem:[#allocation12 + $0x1e4] ss:$16 sps:$4 sm:$0xff]  }
 0x7b8   : > { %8530 = vmatpush1.bf16.msra.mxu0 %v18838_v3  ;;  %8445 = vmatprep.subr.bf16.mxu1 %v18843_v27  ;;  %v18912_v3 = vld [vmem:[#allocation12 + $0x1ec] ss:$16 sps:$4 sm:$0xff]   ;;  %v18907_v27 = vld [vmem:[#allocation12 + $0x1e0] ss:$16 sps:$4 sm:$0xff]  }
 0x7b9   : > { %8531 = vmatprep.subr.bf16.mxu0 %v18846_v29  ;;  %v18910_v29 = vld [vmem:[#allocation12 + $0x1e8] ss:$16 sps:$4 sm:$0xff]  }
 0x7bb   : > { %8446 = vmatpush1.bf16.msra.mxu1 %v18841_v30  ;;  %v18915_v30 = vld [vmem:[#allocation12 + $0x204] ss:$16 sps:$4 sm:$0xff]  }
 0x7bc   : > { %8532 = vmatpush1.bf16.msra.mxu0 %v18844_v31  ;;  %8447 = vmatprep.subr.bf16.mxu1 %v18849_v32  ;;  %v18918_v31 = vld [vmem:[#allocation12 + $0x20c] ss:$16 sps:$4 sm:$0xff]   ;;  %v18913_v32 = vld [vmem:[#allocation12 + $0x200] ss:$16 sps:$4 sm:$0xff]  }
 0x7bd   : > { %8533 = vmatprep.subr.bf16.mxu0 %v18852_v34  ;;  %v18916_v34 = vld [vmem:[#allocation12 + $0x208] ss:$16 sps:$4 sm:$0xff]  }
 0x7bf   : > { %8448 = vmatpush1.bf16.msra.mxu1 %v18847_v24  ;;  %v18921_v24 = vld [vmem:[#allocation12 + $0x224] ss:$16 sps:$4 sm:$0xff]  }
 0x7c0   : > { %8534 = vmatpush1.bf16.msra.mxu0 %v18850_v43  ;;  %8449 = vmatprep.subr.bf16.mxu1 %v18855_v45  ;;  %v18924_v43 = vld [vmem:[#allocation12 + $0x22c] ss:$16 sps:$4 sm:$0xff]   ;;  %v18919_v45 = vld [vmem:[#allocation12 + $0x220] ss:$16 sps:$4 sm:$0xff]  }
 0x7c1   : > { %8535 = vmatprep.subr.bf16.mxu0 %v18858_v0  ;;  %v18922_v0 = vld [vmem:[#allocation12 + $0x228] ss:$16 sps:$4 sm:$0xff]  }
 0x7c3   : > { %8450 = vmatpush1.bf16.msra.mxu1 %v18853_v40  ;;  %v18927_v40 = vld [vmem:[#allocation12 + $0x244] ss:$16 sps:$4 sm:$0xff]  }
 0x7c4   : > { %8536 = vmatpush1.bf16.msra.mxu0 %v18856_v47  ;;  %8451 = vmatprep.subr.bf16.mxu1 %v18861_v49  ;;  %v18930_v47 = vld [vmem:[#allocation12 + $0x24c] ss:$16 sps:$4 sm:$0xff]   ;;  %v18925_v49 = vld [vmem:[#allocation12 + $0x240] ss:$16 sps:$4 sm:$0xff]  }
 0x7c5   : > { %8537 = vmatprep.subr.bf16.mxu0 %v18864_v50  ;;  %v18928_v50 = vld [vmem:[#allocation12 + $0x248] ss:$16 sps:$4 sm:$0xff]  }
 0x7c7   : > { %8452 = vmatpush1.bf16.msra.mxu1 %v18859_v51  ;;  %v18933_v51 = vld [vmem:[#allocation12 + $0x264] ss:$16 sps:$4 sm:$0xff]  }
 0x7c8   : > { %8538 = vmatpush1.bf16.msra.mxu0 %v18862_v41  ;;  %8453 = vmatprep.subr.bf16.mxu1 %v18867_v52  ;;  %v18936_v41 = vld [vmem:[#allocation12 + $0x26c] ss:$16 sps:$4 sm:$0xff]   ;;  %v18931_v52 = vld [vmem:[#allocation12 + $0x260] ss:$16 sps:$4 sm:$0xff]  }
 0x7c9   : > { %8539 = vmatprep.subr.bf16.mxu0 %v18870_v54  ;;  %v18934_v54 = vld [vmem:[#allocation12 + $0x268] ss:$16 sps:$4 sm:$0xff]  }
 0x7cb   : > { %8454 = vmatpush1.bf16.msra.mxu1 %v18865_v55  ;;  %v18939_v55 = vld [vmem:[#allocation12 + $0x284] ss:$16 sps:$4 sm:$0xff]  }
 0x7cc   : > { %8540 = vmatpush1.bf16.msra.mxu0 %v18868_v56  ;;  %8455 = vmatprep.subr.bf16.mxu1 %v18873_v28  ;;  %v18942_v56 = vld [vmem:[#allocation12 + $0x28c] ss:$16 sps:$4 sm:$0xff]   ;;  %v18937_v28 = vld [vmem:[#allocation12 + $0x280] ss:$16 sps:$4 sm:$0xff]  }
 0x7cd   : > { %8541 = vmatprep.subr.bf16.mxu0 %v18876_v60  ;;  %v18940_v60 = vld [vmem:[#allocation12 + $0x288] ss:$16 sps:$4 sm:$0xff]  }
 0x7cf   : > { %8456 = vmatpush1.bf16.msra.mxu1 %v18871_v57  ;;  %v18945_v57 = vld [vmem:[#allocation12 + $0x2a4] ss:$16 sps:$4 sm:$0xff]  }
 0x7d0   : > { %8542 = vmatpush1.bf16.msra.mxu0 %v18874_v42  ;;  %8457 = vmatprep.subr.bf16.mxu1 %v18879_v59  ;;  %v18948_v42 = vld [vmem:[#allocation12 + $0x2ac] ss:$16 sps:$4 sm:$0xff]   ;;  %v18943_v59 = vld [vmem:[#allocation12 + $0x2a0] ss:$16 sps:$4 sm:$0xff]  }
 0x7d1   : > { %8543 = vmatprep.subr.bf16.mxu0 %v18882_v61  ;;  %v18946_v61 = vld [vmem:[#allocation12 + $0x2a8] ss:$16 sps:$4 sm:$0xff]  }
 0x7d3   : > { %8458 = vmatpush1.bf16.msra.mxu1 %v18877_v1  ;;  %v18951_v1 = vld [vmem:[#allocation12 + $0x2c4] ss:$16 sps:$4 sm:$0xff]  }
 0x7d4   : > { %8544 = vmatpush1.bf16.msra.mxu0 %v18880_v5  ;;  %8459 = vmatprep.subr.bf16.mxu1 %v18885_v7  ;;  %v18954_v5 = vld [vmem:[#allocation12 + $0x2cc] ss:$16 sps:$4 sm:$0xff]   ;;  %v18949_v7 = vld [vmem:[#allocation12 + $0x2c0] ss:$16 sps:$4 sm:$0xff]  }
 0x7d5   : > { %8545 = vmatprep.subr.bf16.mxu0 %v18888_v8  ;;  %v18952_v8 = vld [vmem:[#allocation12 + $0x2c8] ss:$16 sps:$4 sm:$0xff]  }
 0x7d7   : > { %8460 = vmatpush1.bf16.msra.mxu1 %v18883_v16  ;;  %v18957_v16 = vld [vmem:[#allocation12 + $0x2e4] ss:$16 sps:$4 sm:$0xff]  }
 0x7d8   : > { %8546 = vmatpush1.bf16.msra.mxu0 %v18886_v6  ;;  %8461 = vmatprep.subr.bf16.mxu1 %v18891_v26  ;;  %v18960_v6 = vld [vmem:[#allocation12 + $0x2ec] ss:$16 sps:$4 sm:$0xff]   ;;  %v18955_v26 = vld [vmem:[#allocation12 + $0x2e0] ss:$16 sps:$4 sm:$0xff]  }
 0x7d9   : > { %8547 = vmatprep.subr.bf16.mxu0 %v18894_v14  ;;  %v18958_v14 = vld [vmem:[#allocation12 + $0x2e8] ss:$16 sps:$4 sm:$0xff]  }
 0x7db   : > { %8462 = vmatpush1.bf16.msra.mxu1 %v18889_v48  ;;  %v18963_v48 = vld [vmem:[#allocation12 + $0x304] ss:$16 sps:$4 sm:$0xff]  }
 0x7dc   : > { %8548 = vmatpush1.bf16.msra.mxu0 %v18892_v17  ;;  %8463 = vmatprep.subr.bf16.mxu1 %v18897_v33  ;;  %v18966_v17 = vld [vmem:[#allocation12 + $0x30c] ss:$16 sps:$4 sm:$0xff]   ;;  %v18961_v33 = vld [vmem:[#allocation12 + $0x300] ss:$16 sps:$4 sm:$0xff]  }
 0x7dd   : > { %8549 = vmatprep.subr.bf16.mxu0 %v18900_v20  ;;  %v18964_v20 = vld [vmem:[#allocation12 + $0x308] ss:$16 sps:$4 sm:$0xff]  }
 0x7df   : > { %8464 = vmatpush1.bf16.msra.mxu1 %v18895_v12  ;;  %v18969_v12 = vld [vmem:[#allocation12 + $0x324] ss:$16 sps:$4 sm:$0xff]  }
 0x7e0   : > { %8550 = vmatpush1.bf16.msra.mxu0 %v18898_v10  ;;  %8465 = vmatprep.subr.bf16.mxu1 %v18903_v21  ;;  %v18972_v10 = vld [vmem:[#allocation12 + $0x32c] ss:$16 sps:$4 sm:$0xff]   ;;  %v18967_v21 = vld [vmem:[#allocation12 + $0x320] ss:$16 sps:$4 sm:$0xff]  }
 0x7e1   : > { %8551 = vmatprep.subr.bf16.mxu0 %v18906_v25  ;;  %v18970_v25 = vld [vmem:[#allocation12 + $0x328] ss:$16 sps:$4 sm:$0xff]  }
 0x7e3   : > { %8466 = vmatpush1.bf16.msra.mxu1 %v18901_v44  ;;  %v18975_v44 = vld [vmem:[#allocation12 + $0x344] ss:$16 sps:$4 sm:$0xff]  }
 0x7e4   : > { %8552 = vmatpush1.bf16.msra.mxu0 %v18904_v18  ;;  %8467 = vmatprep.subr.bf16.mxu1 %v18909_v11  ;;  %v18978_v18 = vld [vmem:[#allocation12 + $0x34c] ss:$16 sps:$4 sm:$0xff]   ;;  %v18973_v11 = vld [vmem:[#allocation12 + $0x340] ss:$16 sps:$4 sm:$0xff]  }
 0x7e5   : > { %8553 = vmatprep.subr.bf16.mxu0 %v18912_v3  ;;  %v18976_v3 = vld [vmem:[#allocation12 + $0x348] ss:$16 sps:$4 sm:$0xff]  }
 0x7e7   : > { %8468 = vmatpush1.bf16.msra.mxu1 %v18907_v27  ;;  %v18981_v27 = vld [vmem:[#allocation12 + $0x364] ss:$16 sps:$4 sm:$0xff]  }
 0x7e8   : > { %8554 = vmatpush1.bf16.msra.mxu0 %v18910_v29  ;;  %8480 = vmatprep.subr.bf16.mxu1 %v18915_v30  ;;  %v18984_v29 = vld [vmem:[#allocation12 + $0x36c] ss:$16 sps:$4 sm:$0xff]   ;;  %v18979_v30 = vld [vmem:[#allocation12 + $0x360] ss:$16 sps:$4 sm:$0xff]  }
 0x7e9   : > { %8566 = vmatprep.subr.bf16.mxu0 %v18918_v31  ;;  %v18982_v31 = vld [vmem:[#allocation12 + $0x368] ss:$16 sps:$4 sm:$0xff]  }
 0x7ea   : > { %8470 = vmatmul.mubr.bf16.vlgmr.msra.gmra.mrb[20].mxu1 %v22002_v2 }
 0x7eb   : > { %8556 = vmatmul.mubr.bf16.vlgmr.msra.gmra.mrb[28].mxu0 %v22002_v2  ;;  %8481 = vmatpush1.bf16.msra.mxu1 %v18913_v32  ;;  %v18987_v32 = vld [vmem:[#allocation12 + $0x384] ss:$16 sps:$4 sm:$0xff]  }
 0x7ec   : > { %8512 = vmatprep.mubr.bf16.mxu1 %v22009_v9  ;;  %8567 = vmatpush1.bf16.msra.mxu0 %v18916_v34  ;;  %v18990_v34 = vld [vmem:[#allocation12 + $0x38c] ss:$16 sps:$4 sm:$0xff]  }
 0x7ed   : > { %8598 = vmatprep.mubr.bf16.mxu0 %v22009_v9  ;;  %8482 = vmatprep.subr.bf16.mxu1 %v18921_v24  ;;  %v18985_v24 = vld [vmem:[#allocation12 + $0x380] ss:$16 sps:$4 sm:$0xff]  }
 0x7ee   : > { %8568 = vmatprep.subr.bf16.mxu0 %v18924_v43  ;;  %v18988_v43 = vld [vmem:[#allocation12 + $0x388] ss:$16 sps:$4 sm:$0xff]  }
 0x7ef   : > { %8483 = vmatpush1.bf16.msra.mxu1 %v18919_v45  ;;  %v18993_v45 = vld [vmem:[#allocation12 + $0x3a4] ss:$16 sps:$4 sm:$0xff]  }
 0x7f0   : > { %8569 = vmatpush1.bf16.msra.mxu0 %v18922_v0  ;;  %8484 = vmatprep.subr.bf16.mxu1 %v18927_v40  ;;  %v18996_v0 = vld [vmem:[#allocation12 + $0x3ac] ss:$16 sps:$4 sm:$0xff]   ;;  %v18991_v40 = vld [vmem:[#allocation12 + $0x3a0] ss:$16 sps:$4 sm:$0xff]  }
 0x7f1   : > { %8570 = vmatprep.subr.bf16.mxu0 %v18930_v47  ;;  %v18994_v47 = vld [vmem:[#allocation12 + $0x3a8] ss:$16 sps:$4 sm:$0xff]  }
 0x7f3   : > { %8485 = vmatpush1.bf16.msra.mxu1 %v18925_v49  ;;  %v18999_v49 = vld [vmem:[#allocation12 + $0x3c4] ss:$16 sps:$4 sm:$0xff]  }
 0x7f4   : > { %8571 = vmatpush1.bf16.msra.mxu0 %v18928_v50  ;;  %8486 = vmatprep.subr.bf16.mxu1 %v18933_v51  ;;  %v19002_v50 = vld [vmem:[#allocation12 + $0x3cc] ss:$16 sps:$4 sm:$0xff]   ;;  %v18997_v51 = vld [vmem:[#allocation12 + $0x3c0] ss:$16 sps:$4 sm:$0xff]  }
 0x7f5   : > { %8572 = vmatprep.subr.bf16.mxu0 %v18936_v41  ;;  %v19000_v41 = vld [vmem:[#allocation12 + $0x3c8] ss:$16 sps:$4 sm:$0xff]  }
 0x7f7   : > { %8487 = vmatpush1.bf16.msra.mxu1 %v18931_v52  ;;  %v19005_v52 = vld [vmem:[#allocation12 + $0x3e4] ss:$16 sps:$4 sm:$0xff]  }
 0x7f8   : > { %8573 = vmatpush1.bf16.msra.mxu0 %v18934_v54  ;;  %8488 = vmatprep.subr.bf16.mxu1 %v18939_v55  ;;  %v19008_v54 = vld [vmem:[#allocation12 + $0x3ec] ss:$16 sps:$4 sm:$0xff]   ;;  %v19003_v55 = vld [vmem:[#allocation12 + $0x3e0] ss:$16 sps:$4 sm:$0xff]  }
 0x7f9   : > { %8574 = vmatprep.subr.bf16.mxu0 %v18942_v56  ;;  %v19006_v56 = vld [vmem:[#allocation12 + $0x3e8] ss:$16 sps:$4 sm:$0xff]  }
 0x7fb   : > { %8489 = vmatpush1.bf16.msra.mxu1 %v18937_v28  ;;  %v19011_v28 = vld [vmem:[#allocation12 + $0x804] ss:$16 sps:$4 sm:$0xff]  }
 0x7fc   : > { %8575 = vmatpush1.bf16.msra.mxu0 %v18940_v60  ;;  %8490 = vmatprep.subr.bf16.mxu1 %v18945_v57  ;;  %v19014_v60 = vld [vmem:[#allocation12 + $0x80c] ss:$16 sps:$4 sm:$0xff]   ;;  %v19009_v57 = vld [vmem:[#allocation12 + $0x800] ss:$16 sps:$4 sm:$0xff]  }
 0x7fd   : > { %8576 = vmatprep.subr.bf16.mxu0 %v18948_v42  ;;  %v8750_v42 = vrot.slane %v22011_v63, 1  ;;  %v19023_v63 = vld [vmem:[#allocation12 + $0x844] ss:$16 sps:$4 sm:$0xff]  }
 0x7ff   : > { %8491 = vmatpush1.bf16.msra.mxu1 %v18943_v59  ;;  %v19012_v59 = vld [vmem:[#allocation12 + $0x808] ss:$16 sps:$4 sm:$0xff]  }
 0x800   : > { %8577 = vmatpush1.bf16.msra.mxu0 %v18946_v61  ;;  %8492 = vmatprep.subr.bf16.mxu1 %v18951_v1  ;;  %v8749_v61 = vrot.slane %v22004_v4, 1  ;;  %v19017_v1 = vld [vmem:[#allocation12 + $0x824] ss:$16 sps:$4 sm:$0xff]   ;;  %v19021_v4 = vld [vmem:[#allocation12 + $0x840] ss:$16 sps:$4 sm:$0xff]  }
 0x801   : > { %8578 = vmatprep.subr.bf16.mxu0 %v18954_v5  ;;  %v19020_v5 = vld [vmem:[#allocation12 + $0x82c] ss:$16 sps:$4 sm:$0xff]  }
 0x803   : > { %8493 = vmatpush1.bf16.msra.mxu1 %v18949_v7  ;;  %v8751_v7 = vsel %vm1377_vm2, %v8749_v61, %v8750_v42  ;;  %v19083_v42 = vld [vmem:[#allocation12 + $0x984] ss:$16 sps:$4 sm:$0xff]   ;;  %v19081_v61 = vld [vmem:[#allocation12 + $0x980] ss:$16 sps:$4 sm:$0xff]  }
 0x804   : > { %8579 = vmatpush1.bf16.msra.mxu0 %v18952_v8  ;;  %8494 = vmatprep.subr.bf16.mxu1 %v18957_v16  ;;  %v19015_v8 = vld [vmem:[#allocation12 + $0x820] ss:$16 sps:$4 sm:$0xff]   ;;  %v19018_v16 = vld [vmem:[#allocation12 + $0x828] ss:$16 sps:$4 sm:$0xff]  }
 0x805   : > { %8580 = vmatprep.subr.bf16.mxu0 %v18960_v6  ;;  %v19026_v6 = vld [vmem:[#allocation12 + $0x84c] ss:$16 sps:$4 sm:$0xff]  }
 0x807   : > { %8495 = vmatpush1.bf16.msra.mxu1 %v18955_v26  ;;  %v19024_v26 = vld [vmem:[#allocation12 + $0x848] ss:$16 sps:$4 sm:$0xff]  }
 0x808   : > { %8581 = vmatpush1.bf16.msra.mxu0 %v18958_v14  ;;  %8496 = vmatprep.subr.bf16.mxu1 %v18963_v48  ;;  %v19029_v14 = vld [vmem:[#allocation12 + $0x864] ss:$16 sps:$4 sm:$0xff]   ;;  %v19032_v48 = vld [vmem:[#allocation12 + $0x86c] ss:$16 sps:$4 sm:$0xff]  }
 0x809   : > { %8582 = vmatprep.subr.bf16.mxu0 %v18966_v17  ;;  %v19027_v17 = vld [vmem:[#allocation12 + $0x860] ss:$16 sps:$4 sm:$0xff]  }
 0x80b   : > { %8497 = vmatpush1.bf16.msra.mxu1 %v18961_v33  ;;  %v19030_v33 = vld [vmem:[#allocation12 + $0x868] ss:$16 sps:$4 sm:$0xff]  }
 0x80c   : > { %8583 = vmatpush1.bf16.msra.mxu0 %v18964_v20  ;;  %8498 = vmatprep.subr.bf16.mxu1 %v18969_v12  ;;  %v19035_v20 = vld [vmem:[#allocation12 + $0x884] ss:$16 sps:$4 sm:$0xff]   ;;  %v19038_v12 = vld [vmem:[#allocation12 + $0x88c] ss:$16 sps:$4 sm:$0xff]  }
 0x80d   : > { %8584 = vmatprep.subr.bf16.mxu0 %v18972_v10  ;;  %v19033_v10 = vld [vmem:[#allocation12 + $0x880] ss:$16 sps:$4 sm:$0xff]  }
 0x80f   : > { %8499 = vmatpush1.bf16.msra.mxu1 %v18967_v21  ;;  %v19036_v21 = vld [vmem:[#allocation12 + $0x888] ss:$16 sps:$4 sm:$0xff]  }
 0x810   : > { %8585 = vmatpush1.bf16.msra.mxu0 %v18970_v25  ;;  %8500 = vmatprep.subr.bf16.mxu1 %v18975_v44  ;;  %v19041_v25 = vld [vmem:[#allocation12 + $0x8a4] ss:$16 sps:$4 sm:$0xff]   ;;  %v19044_v44 = vld [vmem:[#allocation12 + $0x8ac] ss:$16 sps:$4 sm:$0xff]  }
 0x811   : > { %8586 = vmatprep.subr.bf16.mxu0 %v18978_v18  ;;  %v19039_v18 = vld [vmem:[#allocation12 + $0x8a0] ss:$16 sps:$4 sm:$0xff]  }
 0x813   : > { %8501 = vmatpush1.bf16.msra.mxu1 %v18973_v11  ;;  %v19042_v11 = vld [vmem:[#allocation12 + $0x8a8] ss:$16 sps:$4 sm:$0xff]  }
 0x814   : > { %8587 = vmatpush1.bf16.msra.mxu0 %v18976_v3  ;;  %8502 = vmatprep.subr.bf16.mxu1 %v18981_v27  ;;  %v19047_v3 = vld [vmem:[#allocation12 + $0x8c4] ss:$16 sps:$4 sm:$0xff]   ;;  %v19050_v27 = vld [vmem:[#allocation12 + $0x8cc] ss:$16 sps:$4 sm:$0xff]  }
 0x815   : > { %8588 = vmatprep.subr.bf16.mxu0 %v18984_v29  ;;  %v19045_v29 = vld [vmem:[#allocation12 + $0x8c0] ss:$16 sps:$4 sm:$0xff]  }
 0x817   : > { %8503 = vmatpush1.bf16.msra.mxu1 %v18979_v30  ;;  %v19048_v30 = vld [vmem:[#allocation12 + $0x8c8] ss:$16 sps:$4 sm:$0xff]  }
 0x818   : > { %8589 = vmatpush1.bf16.msra.mxu0 %v18982_v31  ;;  %8504 = vmatprep.subr.bf16.mxu1 %v18987_v32  ;;  %v19053_v31 = vld [vmem:[#allocation12 + $0x8e4] ss:$16 sps:$4 sm:$0xff]   ;;  %v19056_v32 = vld [vmem:[#allocation12 + $0x8ec] ss:$16 sps:$4 sm:$0xff]  }
 0x819   : > { %8590 = vmatprep.subr.bf16.mxu0 %v18990_v34  ;;  %v19051_v34 = vld [vmem:[#allocation12 + $0x8e0] ss:$16 sps:$4 sm:$0xff]  }
 0x81b   : > { %8505 = vmatpush1.bf16.msra.mxu1 %v18985_v24  ;;  %v19054_v24 = vld [vmem:[#allocation12 + $0x8e8] ss:$16 sps:$4 sm:$0xff]  }
 0x81c   : > { %8591 = vmatpush1.bf16.msra.mxu0 %v18988_v43  ;;  %8506 = vmatprep.subr.bf16.mxu1 %v18993_v45  ;;  %v19059_v43 = vld [vmem:[#allocation12 + $0x904] ss:$16 sps:$4 sm:$0xff]   ;;  %v19062_v45 = vld [vmem:[#allocation12 + $0x90c] ss:$16 sps:$4 sm:$0xff]  }
 0x81d   : > { %8592 = vmatprep.subr.bf16.mxu0 %v18996_v0  ;;  %v19057_v0 = vld [vmem:[#allocation12 + $0x900] ss:$16 sps:$4 sm:$0xff]  }
 0x81f   : > { %8507 = vmatpush1.bf16.msra.mxu1 %v18991_v40  ;;  %v19060_v40 = vld [vmem:[#allocation12 + $0x908] ss:$16 sps:$4 sm:$0xff]  }
 0x820   : > { %8593 = vmatpush1.bf16.msra.mxu0 %v18994_v47  ;;  %8508 = vmatprep.subr.bf16.mxu1 %v18999_v49  ;;  %v19065_v47 = vld [vmem:[#allocation12 + $0x924] ss:$16 sps:$4 sm:$0xff]   ;;  %v19068_v49 = vld [vmem:[#allocation12 + $0x92c] ss:$16 sps:$4 sm:$0xff]  }
 0x821   : > { %8594 = vmatprep.subr.bf16.mxu0 %v19002_v50  ;;  %v19063_v50 = vld [vmem:[#allocation12 + $0x920] ss:$16 sps:$4 sm:$0xff]  }
 0x823   : > { %8509 = vmatpush1.bf16.msra.mxu1 %v18997_v51  ;;  %v19066_v51 = vld [vmem:[#allocation12 + $0x928] ss:$16 sps:$4 sm:$0xff]  }
 0x824   : > { %8595 = vmatpush1.bf16.msra.mxu0 %v19000_v41  ;;  %8510 = vmatprep.subr.bf16.mxu1 %v19005_v52  ;;  %v19071_v41 = vld [vmem:[#allocation12 + $0x944] ss:$16 sps:$4 sm:$0xff]   ;;  %v19074_v52 = vld [vmem:[#allocation12 + $0x94c] ss:$16 sps:$4 sm:$0xff]  }
 0x825   : > { %8596 = vmatprep.subr.bf16.mxu0 %v19008_v54  ;;  %v19069_v54 = vld [vmem:[#allocation12 + $0x940] ss:$16 sps:$4 sm:$0xff]  }
 0x827   : > { %8511 = vmatpush1.bf16.msra.mxu1 %v19003_v55  ;;  %v19072_v55 = vld [vmem:[#allocation12 + $0x948] ss:$16 sps:$4 sm:$0xff]  }
 0x828   : > { %8597 = vmatpush1.bf16.msra.mxu0 %v19006_v56  ;;  %9402 = vmatprep.subr.bf16.mxu1 %v19011_v28  ;;  %v19077_v56 = vld [vmem:[#allocation12 + $0x964] ss:$16 sps:$4 sm:$0xff]   ;;  %v19080_v28 = vld [vmem:[#allocation12 + $0x96c] ss:$16 sps:$4 sm:$0xff]  }
 0x829   : > { %9488 = vmatprep.subr.bf16.mxu0 %v19014_v60  ;;  %v19075_v60 = vld [vmem:[#allocation12 + $0x960] ss:$16 sps:$4 sm:$0xff]  }
 0x82a   : > { %8513 = vmatmul.mubr.bf16.vlgmr.msra.gmra.mrb[20].mxu1 %v22027_v62 }
 0x82b   : > { %8599 = vmatmul.mubr.bf16.vlgmr.msra.gmra.mrb[28].mxu0 %v22027_v62  ;;  %9403 = vmatpush1.bf16.msra.mxu1 %v19009_v57  ;;  %v19078_v57 = vld [vmem:[#allocation12 + $0x968] ss:$16 sps:$4 sm:$0xff]  }
 0x82c   : > { %9434 = vmatprep.mubr.bf16.mxu1 %v8751_v7  ;;  %9489 = vmatpush1.bf16.msra.mxu0 %v19012_v59  ;;  %v19086_v59 = vld [vmem:[#allocation12 + $0x98c] ss:$16 sps:$4 sm:$0xff]  }
 0x82d   : > { %9520 = vmatprep.mubr.bf16.mxu0 %v8751_v7  ;;  %9404 = vmatprep.subr.bf16.mxu1 %v19017_v1  ;;  %v19084_v1 = vld [vmem:[#allocation12 + $0x988] ss:$16 sps:$4 sm:$0xff]   ;;  %v19092_v7 = vld [vmem:[#allocation12 + $0x9ac] ss:$16 sps:$4 sm:$0xff]  }
 0x82e   : > { %9490 = vmatprep.subr.bf16.mxu0 %v19020_v5  ;;  %v19089_v5 = vld [vmem:[#allocation12 + $0x9a4] ss:$16 sps:$4 sm:$0xff]  }
 0x82f   : > { %9405 = vmatpush1.bf16.msra.mxu1 %v19015_v8  ;;  %v19087_v8 = vld [vmem:[#allocation12 + $0x9a0] ss:$16 sps:$4 sm:$0xff]  }
 0x830   : > { %9491 = vmatpush1.bf16.msra.mxu0 %v19018_v16  ;;  %9406 = vmatprep.subr.bf16.mxu1 %v19023_v63  ;;  %v19090_v16 = vld [vmem:[#allocation12 + $0x9a8] ss:$16 sps:$4 sm:$0xff]   ;;  %v19095_v63 = vld [vmem:[#allocation12 + $0x9c4] ss:$16 sps:$4 sm:$0xff]  }
 0x831   : > { %9492 = vmatprep.subr.bf16.mxu0 %v19026_v6  ;;  %v19098_v6 = vld [vmem:[#allocation12 + $0x9cc] ss:$16 sps:$4 sm:$0xff]  }
 0x833   : > { %9407 = vmatpush1.bf16.msra.mxu1 %v19021_v4  ;;  %v19093_v4 = vld [vmem:[#allocation12 + $0x9c0] ss:$16 sps:$4 sm:$0xff]  }
 0x834   : > { %9493 = vmatpush1.bf16.msra.mxu0 %v19024_v26  ;;  %9408 = vmatprep.subr.bf16.mxu1 %v19029_v14  ;;  %v19096_v26 = vld [vmem:[#allocation12 + $0x9c8] ss:$16 sps:$4 sm:$0xff]   ;;  %v19101_v14 = vld [vmem:[#allocation12 + $0x9e4] ss:$16 sps:$4 sm:$0xff]  }
 0x835   : > { %9494 = vmatprep.subr.bf16.mxu0 %v19032_v48  ;;  %v19104_v48 = vld [vmem:[#allocation12 + $0x9ec] ss:$16 sps:$4 sm:$0xff]  }
 0x837   : > { %9409 = vmatpush1.bf16.msra.mxu1 %v19027_v17  ;;  %v19099_v17 = vld [vmem:[#allocation12 + $0x9e0] ss:$16 sps:$4 sm:$0xff]  }
 0x838   : > { %9495 = vmatpush1.bf16.msra.mxu0 %v19030_v33  ;;  %9410 = vmatprep.subr.bf16.mxu1 %v19035_v20  ;;  %v19102_v33 = vld [vmem:[#allocation12 + $0x9e8] ss:$16 sps:$4 sm:$0xff]   ;;  %v19107_v20 = vld [vmem:[#allocation12 + $0xa04] ss:$16 sps:$4 sm:$0xff]  }
 0x839   : > { %9496 = vmatprep.subr.bf16.mxu0 %v19038_v12  ;;  %v8747_v12 = vrot.slane %v22006_v35, 1 }
 0x83b   : > { %9411 = vmatpush1.bf16.msra.mxu1 %v19033_v10  ;;  %v19110_v10 = vld [vmem:[#allocation12 + $0xa0c] ss:$16 sps:$4 sm:$0xff]  }
 0x83c   : > { %9497 = vmatpush1.bf16.msra.mxu0 %v19036_v21  ;;  %9412 = vmatprep.subr.bf16.mxu1 %v19041_v25  ;;  %v8746_v21 = vrot.slane %v22002_v2, 1  ;;  %v19105_v25 = vld [vmem:[#allocation12 + $0xa00] ss:$16 sps:$4 sm:$0xff]   ;;  %v19114_v2 = vld [vmem:[#allocation12 + $0xa28] ss:$16 sps:$4 sm:$0xff]  }
 0x83d   : > { %9498 = vmatprep.subr.bf16.mxu0 %v19044_v44  ;;  %v8756_v44 = vrot.slane %v22016_v19, 1  ;;  %v19119_v19 = vld [vmem:[#allocation12 + $0xa44] ss:$16 sps:$4 sm:$0xff]  }
 0x83f   : > { %9413 = vmatpush1.bf16.msra.mxu1 %v19039_v18  ;;  %v19108_v18 = vld [vmem:[#allocation12 + $0xa08] ss:$16 sps:$4 sm:$0xff]  }
 0x840   : > { %9499 = vmatpush1.bf16.msra.mxu0 %v19042_v11  ;;  %9414 = vmatprep.subr.bf16.mxu1 %v19047_v3  ;;  %v8748_v11 = vsel %vm1377_vm2, %v8746_v21, %v8747_v12  ;;  %v8755_v3 = vrot.slane %v22009_v9, 1  ;;  %v19120_v9 = vld [vmem:[#allocation12 + $0xa48] ss:$16 sps:$4 sm:$0xff]   ;;  %v19182_v21 = vld [vmem:[#allocation12 + $0xb8c] ss:$16 sps:$4 sm:$0xff]  }
 0x841   : > { %9500 = vmatprep.subr.bf16.mxu0 %v19050_v27  ;;  %v19113_v27 = vld [vmem:[#allocation12 + $0xa24] ss:$16 sps:$4 sm:$0xff]   ;;  %v19174_v12 = vld [vmem:[#allocation12 + $0xb68] ss:$16 sps:$4 sm:$0xff]  }
 0x842   : > { %v8757_v35 = vsel %vm1377_vm2, %v8755_v3, %v8756_v44  ;;  %v19180_v44 = vld [vmem:[#allocation12 + $0xb88] ss:$16 sps:$4 sm:$0xff]   ;;  %v19183_v3 = vld [vmem:[#allocation12 + $0xba0] ss:$16 sps:$4 sm:$0xff]  }
 0x843   : > { %9415 = vmatpush1.bf16.msra.mxu1 %v19045_v29  ;;  %v19116_v29 = vld [vmem:[#allocation12 + $0xa2c] ss:$16 sps:$4 sm:$0xff]  }
 0x844   : > { %9501 = vmatpush1.bf16.msra.mxu0 %v19048_v30  ;;  %9416 = vmatprep.subr.bf16.mxu1 %v19053_v31  ;;  %v19111_v30 = vld [vmem:[#allocation12 + $0xa20] ss:$16 sps:$4 sm:$0xff]   ;;  %v19122_v31 = vld [vmem:[#allocation12 + $0xa4c] ss:$16 sps:$4 sm:$0xff]  }
 0x845   : > { %9502 = vmatprep.subr.bf16.mxu0 %v19056_v32  ;;  %v19117_v32 = vld [vmem:[#allocation12 + $0xa40] ss:$16 sps:$4 sm:$0xff]  }
 0x847   : > { %9417 = vmatpush1.bf16.msra.mxu1 %v19051_v34  ;;  %v19125_v34 = vld [vmem:[#allocation12 + $0xa64] ss:$16 sps:$4 sm:$0xff]  }
 0x848   : > { %9503 = vmatpush1.bf16.msra.mxu0 %v19054_v24  ;;  %9418 = vmatprep.subr.bf16.mxu1 %v19059_v43  ;;  %v19128_v24 = vld [vmem:[#allocation12 + $0xa6c] ss:$16 sps:$4 sm:$0xff]   ;;  %v19123_v43 = vld [vmem:[#allocation12 + $0xa60] ss:$16 sps:$4 sm:$0xff]  }
 0x849   : > { %9504 = vmatprep.subr.bf16.mxu0 %v19062_v45  ;;  %v19126_v45 = vld [vmem:[#allocation12 + $0xa68] ss:$16 sps:$4 sm:$0xff]  }
 0x84b   : > { %9419 = vmatpush1.bf16.msra.mxu1 %v19057_v0  ;;  %v19131_v0 = vld [vmem:[#allocation12 + $0xa84] ss:$16 sps:$4 sm:$0xff]  }
 0x84c   : > { %9505 = vmatpush1.bf16.msra.mxu0 %v19060_v40  ;;  %9420 = vmatprep.subr.bf16.mxu1 %v19065_v47  ;;  %v19134_v40 = vld [vmem:[#allocation12 + $0xa8c] ss:$16 sps:$4 sm:$0xff]   ;;  %v19129_v47 = vld [vmem:[#allocation12 + $0xa80] ss:$16 sps:$4 sm:$0xff]  }
 0x84d   : > { %9506 = vmatprep.subr.bf16.mxu0 %v19068_v49  ;;  %v19132_v49 = vld [vmem:[#allocation12 + $0xa88] ss:$16 sps:$4 sm:$0xff]  }
 0x84f   : > { %9421 = vmatpush1.bf16.msra.mxu1 %v19063_v50  ;;  %v19137_v50 = vld [vmem:[#allocation12 + $0xaa4] ss:$16 sps:$4 sm:$0xff]  }
 0x850   : > { %9507 = vmatpush1.bf16.msra.mxu0 %v19066_v51  ;;  %9422 = vmatprep.subr.bf16.mxu1 %v19071_v41  ;;  %v19140_v51 = vld [vmem:[#allocation12 + $0xaac] ss:$16 sps:$4 sm:$0xff]   ;;  %v19135_v41 = vld [vmem:[#allocation12 + $0xaa0] ss:$16 sps:$4 sm:$0xff]  }
 0x851   : > { %9508 = vmatprep.subr.bf16.mxu0 %v19074_v52  ;;  %v19138_v52 = vld [vmem:[#allocation12 + $0xaa8] ss:$16 sps:$4 sm:$0xff]  }
 0x853   : > { %9423 = vmatpush1.bf16.msra.mxu1 %v19069_v54  ;;  %v19143_v54 = vld [vmem:[#allocation12 + $0xac4] ss:$16 sps:$4 sm:$0xff]  }
 0x854   : > { %9509 = vmatpush1.bf16.msra.mxu0 %v19072_v55  ;;  %9424 = vmatprep.subr.bf16.mxu1 %v19077_v56  ;;  %v19146_v55 = vld [vmem:[#allocation12 + $0xacc] ss:$16 sps:$4 sm:$0xff]   ;;  %v19141_v56 = vld [vmem:[#allocation12 + $0xac0] ss:$16 sps:$4 sm:$0xff]  }
 0x855   : > { %9510 = vmatprep.subr.bf16.mxu0 %v19080_v28  ;;  %v19144_v28 = vld [vmem:[#allocation12 + $0xac8] ss:$16 sps:$4 sm:$0xff]  }
 0x857   : > { %9425 = vmatpush1.bf16.msra.mxu1 %v19075_v60  ;;  %v19149_v60 = vld [vmem:[#allocation12 + $0xae4] ss:$16 sps:$4 sm:$0xff]  }
 0x858   : > { %9511 = vmatpush1.bf16.msra.mxu0 %v19078_v57  ;;  %9426 = vmatprep.subr.bf16.mxu1 %v19083_v42  ;;  %v19152_v57 = vld [vmem:[#allocation12 + $0xaec] ss:$16 sps:$4 sm:$0xff]   ;;  %v19147_v42 = vld [vmem:[#allocation12 + $0xae0] ss:$16 sps:$4 sm:$0xff]  }
 0x859   : > { %9512 = vmatprep.subr.bf16.mxu0 %v19086_v59  ;;  %v19150_v59 = vld [vmem:[#allocation12 + $0xae8] ss:$16 sps:$4 sm:$0xff]  }
 0x85b   : > { %9427 = vmatpush1.bf16.msra.mxu1 %v19081_v61  ;;  %v19155_v61 = vld [vmem:[#allocation12 + $0xb04] ss:$16 sps:$4 sm:$0xff]  }
 0x85c   : > { %9513 = vmatpush1.bf16.msra.mxu0 %v19084_v1  ;;  %9428 = vmatprep.subr.bf16.mxu1 %v19089_v5  ;;  %v19158_v1 = vld [vmem:[#allocation12 + $0xb0c] ss:$16 sps:$4 sm:$0xff]   ;;  %v19153_v5 = vld [vmem:[#allocation12 + $0xb00] ss:$16 sps:$4 sm:$0xff]  }
 0x85d   : > { %9514 = vmatprep.subr.bf16.mxu0 %v19092_v7  ;;  %v19156_v7 = vld [vmem:[#allocation12 + $0xb08] ss:$16 sps:$4 sm:$0xff]  }
 0x85f   : > { %9429 = vmatpush1.bf16.msra.mxu1 %v19087_v8  ;;  %v19161_v8 = vld [vmem:[#allocation12 + $0xb24] ss:$16 sps:$4 sm:$0xff]  }
 0x860   : > { %9515 = vmatpush1.bf16.msra.mxu0 %v19090_v16  ;;  %9430 = vmatprep.subr.bf16.mxu1 %v19095_v63  ;;  %v19164_v16 = vld [vmem:[#allocation12 + $0xb2c] ss:$16 sps:$4 sm:$0xff]   ;;  %v19159_v63 = vld [vmem:[#allocation12 + $0xb20] ss:$16 sps:$4 sm:$0xff]  }
 0x861   : > { %9516 = vmatprep.subr.bf16.mxu0 %v19098_v6  ;;  %v19162_v6 = vld [vmem:[#allocation12 + $0xb28] ss:$16 sps:$4 sm:$0xff]  }
 0x863   : > { %9431 = vmatpush1.bf16.msra.mxu1 %v19093_v4  ;;  %v19167_v4 = vld [vmem:[#allocation12 + $0xb44] ss:$16 sps:$4 sm:$0xff]  }
 0x864   : > { %9517 = vmatpush1.bf16.msra.mxu0 %v19096_v26  ;;  %9432 = vmatprep.subr.bf16.mxu1 %v19101_v14  ;;  %v19170_v26 = vld [vmem:[#allocation12 + $0xb4c] ss:$16 sps:$4 sm:$0xff]   ;;  %v19165_v14 = vld [vmem:[#allocation12 + $0xb40] ss:$16 sps:$4 sm:$0xff]  }
 0x865   : > { %9518 = vmatprep.subr.bf16.mxu0 %v19104_v48  ;;  %v19168_v48 = vld [vmem:[#allocation12 + $0xb48] ss:$16 sps:$4 sm:$0xff]  }
 0x867   : > { %9433 = vmatpush1.bf16.msra.mxu1 %v19099_v17  ;;  %v19173_v17 = vld [vmem:[#allocation12 + $0xb64] ss:$16 sps:$4 sm:$0xff]  }
 0x868   : > { %9519 = vmatpush1.bf16.msra.mxu0 %v19102_v33  ;;  %9445 = vmatprep.subr.bf16.mxu1 %v19107_v20  ;;  %v19176_v33 = vld [vmem:[#allocation12 + $0xb6c] ss:$16 sps:$4 sm:$0xff]   ;;  %v19171_v20 = vld [vmem:[#allocation12 + $0xb60] ss:$16 sps:$4 sm:$0xff]  }
 0x869   : > { %9531 = vmatprep.subr.bf16.mxu0 %v19110_v10  ;;  %v19179_v10 = vld [vmem:[#allocation12 + $0xb84] ss:$16 sps:$4 sm:$0xff]  }
 0x86a   : > { %9435 = vmatmul.mubr.bf16.vlgmr.msra.gmra.mrb[20].mxu1 %v8748_v11 }
 0x86b   : > { %9521 = vmatmul.mubr.bf16.vlgmr.msra.gmra.mrb[28].mxu0 %v8748_v11  ;;  %9446 = vmatpush1.bf16.msra.mxu1 %v19105_v25  ;;  %v19177_v25 = vld [vmem:[#allocation12 + $0xb80] ss:$16 sps:$4 sm:$0xff]   ;;  %v19188_v11 = vld [vmem:[#allocation12 + $0xbac] ss:$16 sps:$4 sm:$0xff]  }
 0x86c   : > { %9477 = vmatprep.mubr.bf16.mxu1 %v8757_v35  ;;  %9532 = vmatpush1.bf16.msra.mxu0 %v19108_v18  ;;  %v19185_v18 = vld [vmem:[#allocation12 + $0xba4] ss:$16 sps:$4 sm:$0xff]  }
 0x86d   : > { %9563 = vmatprep.mubr.bf16.mxu0 %v8757_v35  ;;  %9447 = vmatprep.subr.bf16.mxu1 %v19113_v27  ;;  %v19186_v27 = vld [vmem:[#allocation12 + $0xba8] ss:$16 sps:$4 sm:$0xff]   ;;  %v19194_v35 = vld [vmem:[#allocation12 + $0xbcc] ss:$16 sps:$4 sm:$0xff]  }
 0x86e   : > { %9533 = vmatprep.subr.bf16.mxu0 %v19116_v29  ;;  %v19191_v29 = vld [vmem:[#allocation12 + $0xbc4] ss:$16 sps:$4 sm:$0xff]  }
 0x86f   : > { %9448 = vmatpush1.bf16.msra.mxu1 %v19111_v30  ;;  %v19189_v30 = vld [vmem:[#allocation12 + $0xbc0] ss:$16 sps:$4 sm:$0xff]  }
 0x870   : > { %9534 = vmatpush1.bf16.msra.mxu0 %v19114_v2  ;;  %9449 = vmatprep.subr.bf16.mxu1 %v19119_v19  ;;  %v19192_v2 = vld [vmem:[#allocation12 + $0xbc8] ss:$16 sps:$4 sm:$0xff]   ;;  %v19197_v19 = vld [vmem:[#allocation12 + $0xbe4] ss:$16 sps:$4 sm:$0xff]  }
 0x871   : > { %9535 = vmatprep.subr.bf16.mxu0 %v19122_v31  ;;  %v19200_v31 = vld [vmem:[#allocation12 + $0xbec] ss:$16 sps:$4 sm:$0xff]  }
 0x873   : > { %9450 = vmatpush1.bf16.msra.mxu1 %v19117_v32  ;;  %v19195_v32 = vld [vmem:[#allocation12 + $0xbe0] ss:$16 sps:$4 sm:$0xff]  }
 0x874   : > { %9536 = vmatpush1.bf16.msra.mxu0 %v19120_v9  ;;  %9451 = vmatprep.subr.bf16.mxu1 %v19125_v34  ;;  %v19198_v9 = vld [vmem:[#allocation12 + $0xbe8] ss:$16 sps:$4 sm:$0xff]   ;;  %v8753_v34 = vrot.slane %v22029_v53, 1 }
 0x875   : > { %9537 = vmatprep.subr.bf16.mxu0 %v19128_v24  ;;  %v8752_v24 = vrot.slane %v22027_v62, 1  ;;  %v19216_v53 = vld [vmem:[#allocation13 + $0x248] ss:$16 sps:$4 sm:$0xff]  }
 0x876   : > { %v19222_v62 = vld [vmem:[#allocation13 + $0x268] ss:$16 sps:$4 sm:$0xff]  }
 0x877   : > { %9452 = vmatpush1.bf16.msra.mxu1 %v19123_v43  ;;  %v8754_v43 = vsel %vm1377_vm2, %v8752_v24, %v8753_v34  ;;  %v19251_v34 = vld [vmem:[#allocation13 + $0x304] ss:$16 sps:$4 sm:$0xff]   ;;  %v19249_v24 = vld [vmem:[#allocation13 + $0x300] ss:$16 sps:$4 sm:$0xff]  }
 0x878   : > { %9538 = vmatpush1.bf16.msra.mxu0 %v19126_v45  ;;  %9453 = vmatprep.subr.bf16.mxu1 %v19131_v0  ;;  %v19204_v45 = vld [vmem:[#allocation13 + $0x208] ss:$16 sps:$4 sm:$0xff]   ;;  %v19206_v0 = vld [vmem:[#allocation13 + $0x20c] ss:$16 sps:$4 sm:$0xff]  }
 0x879   : > { %9539 = vmatprep.subr.bf16.mxu0 %v19134_v40  ;;  %v19212_v40 = vld [vmem:[#allocation13 + $0x22c] ss:$16 sps:$4 sm:$0xff]  }
 0x87b   : > { %9454 = vmatpush1.bf16.msra.mxu1 %v19129_v47  ;;  %v19210_v47 = vld [vmem:[#allocation13 + $0x228] ss:$16 sps:$4 sm:$0xff]  }
 0x87c   : > { %9540 = vmatpush1.bf16.msra.mxu0 %v19132_v49  ;;  %9455 = vmatprep.subr.bf16.mxu1 %v19137_v50  ;;  %v19218_v49 = vld [vmem:[#allocation13 + $0x24c] ss:$16 sps:$4 sm:$0xff]  }
 0x87d   : > { %9541 = vmatprep.subr.bf16.mxu0 %v19140_v51  ;;  %v19224_v50 = vld [vmem:[#allocation13 + $0x26c] ss:$16 sps:$4 sm:$0xff]  }
 0x87e   : > { %v19230_v51 = vld [vmem:[#allocation13 + $0x28c] ss:$16 sps:$4 sm:$0xff]  }
 0x87f   : > { %9456 = vmatpush1.bf16.msra.mxu1 %v19135_v41  ;;  %v19228_v41 = vld [vmem:[#allocation13 + $0x288] ss:$16 sps:$4 sm:$0xff]  }
 0x880   : > { %9542 = vmatpush1.bf16.msra.mxu0 %v19138_v52  ;;  %9457 = vmatprep.subr.bf16.mxu1 %v19143_v54  ;;  %v19236_v52 = vld [vmem:[#allocation13 + $0x2ac] ss:$16 sps:$4 sm:$0xff]   ;;  %v19234_v54 = vld [vmem:[#allocation13 + $0x2a8] ss:$16 sps:$4 sm:$0xff]  }
 0x881   : > { %9543 = vmatprep.subr.bf16.mxu0 %v19146_v55  ;;  %v19242_v55 = vld [vmem:[#allocation13 + $0x2cc] ss:$16 sps:$4 sm:$0xff]  }
 0x883   : > { %9458 = vmatpush1.bf16.msra.mxu1 %v19141_v56  ;;  %v19240_v56 = vld [vmem:[#allocation13 + $0x2c8] ss:$16 sps:$4 sm:$0xff]  }
 0x884   : > { %9544 = vmatpush1.bf16.msra.mxu0 %v19144_v28  ;;  %9459 = vmatprep.subr.bf16.mxu1 %v19149_v60  ;;  %v19248_v28 = vld [vmem:[#allocation13 + $0x2ec] ss:$16 sps:$4 sm:$0xff]   ;;  %v19246_v60 = vld [vmem:[#allocation13 + $0x2e8] ss:$16 sps:$4 sm:$0xff]  }
 0x885   : > { %9545 = vmatprep.subr.bf16.mxu0 %v19152_v57  ;;  %v19254_v57 = vld [vmem:[#allocation13 + $0x30c] ss:$16 sps:$4 sm:$0xff]  }
 0x887   : > { %9460 = vmatpush1.bf16.msra.mxu1 %v19147_v42  ;;  %v19252_v42 = vld [vmem:[#allocation13 + $0x308] ss:$16 sps:$4 sm:$0xff]  }
 0x888   : > { %9546 = vmatpush1.bf16.msra.mxu0 %v19150_v59  ;;  %9461 = vmatprep.subr.bf16.mxu1 %v19155_v61  ;;  %v16198_v59 = vadd.s32 4294967288, %v21203_v36 }
 0x889   : > { %9547 = vmatprep.subr.bf16.mxu0 %v19158_v1 }
 0x88a   : > { %v9587_v61 = vmul.u32 2, %v16198_v59  ;;  %v19282_v59 = vld [vmem:[#allocation13 + $0x3a8] ss:$16 sps:$4 sm:$0xff]  }
 0x88b   : > { %9462 = vmatpush1.bf16.msra.mxu1 %v19153_v5 }
 0x88c   : > { %9548 = vmatpush1.bf16.msra.mxu0 %v19156_v7  ;;  %9463 = vmatprep.subr.bf16.mxu1 %v19161_v8  ;;  %v9588_v5 = vadd.s32 1, %v9587_v61  ;;  %v19287_v61 = vld [vmem:[#allocation13 + $0x3c4] ss:$16 sps:$4 sm:$0xff]  }
 0x88d   : > { %9549 = vmatprep.subr.bf16.mxu0 %v19164_v16 }
 0x88e   : > { %vm9589_vm0 = vcmp.eq.s32.totalorder %v21382_v58, %v9588_v5  ;;  %v19285_v5 = vld [vmem:[#allocation13 + $0x3c0] ss:$16 sps:$4 sm:$0xff]  }
 0x88f   : > { %9464 = vmatpush1.bf16.msra.mxu1 %v19159_v63  ;;  %vm9590_vm2 = vmor %vm21387_vm5, %vm9589_vm0 }
 0x890   : > { %9550 = vmatpush1.bf16.msra.mxu0 %v19162_v6  ;;  %9465 = vmatprep.subr.bf16.mxu1 %v19167_v4 }
 0x891   : > { %9551 = vmatprep.subr.bf16.mxu0 %v19170_v26 }
 0x893   : > { %9466 = vmatpush1.bf16.msra.mxu1 %v19165_v14 }
 0x894   : > { %9552 = vmatpush1.bf16.msra.mxu0 %v19168_v48  ;;  %9467 = vmatprep.subr.bf16.mxu1 %v19173_v17 }
 0x895   : > { %9553 = vmatprep.subr.bf16.mxu0 %v19176_v33 }
 0x897   : > { %9468 = vmatpush1.bf16.msra.mxu1 %v19171_v20 }
 0x898   : > { %9554 = vmatpush1.bf16.msra.mxu0 %v19174_v12  ;;  %9469 = vmatprep.subr.bf16.mxu1 %v19179_v10  ;;  %v19203_v10 = vld [vmem:[#allocation13 + $0x204] ss:$16 sps:$4 sm:$0xff]  }
 0x899   : > { %9555 = vmatprep.subr.bf16.mxu0 %v19182_v21  ;;  %v16199_v21 = vsel %vm9590_vm2, 1.0, %v20601_v15 }
 0x89b   : > { %9470 = vmatpush1.bf16.msra.mxu1 %v19177_v25  ;;  %v19201_v25 = vld [vmem:[#allocation13 + $0x200] ss:$16 sps:$4 sm:$0xff]  }
 0x89c   : > { %9556 = vmatpush1.bf16.msra.mxu0 %v19180_v44  ;;  %9471 = vmatprep.subr.bf16.mxu1 %v19185_v18  ;;  %v19209_v44 = vld [vmem:[#allocation13 + $0x224] ss:$16 sps:$4 sm:$0xff]   ;;  %v16200_v18 = vsel %vm9591_vm7, 1.0, %v20601_v15 }
 0x89d   : > { %9557 = vmatprep.subr.bf16.mxu0 %v19188_v11  ;;  %v19207_v11 = vld [vmem:[#allocation13 + $0x220] ss:$16 sps:$4 sm:$0xff]  }
 0x89f   : > { %9472 = vmatpush1.bf16.msra.mxu1 %v19183_v3  ;;  %v19215_v3 = vld [vmem:[#allocation13 + $0x244] ss:$16 sps:$4 sm:$0xff]  }
 0x8a0   : > { %9558 = vmatpush1.bf16.msra.mxu0 %v19186_v27  ;;  %9473 = vmatprep.subr.bf16.mxu1 %v19191_v29  ;;  %v19213_v27 = vld [vmem:[#allocation13 + $0x240] ss:$16 sps:$4 sm:$0xff]   ;;  %v19221_v29 = vld [vmem:[#allocation13 + $0x264] ss:$16 sps:$4 sm:$0xff]  }
 0x8a1   : > { %9559 = vmatprep.subr.bf16.mxu0 %v19194_v35  ;;  %v19225_v35 = vld [vmem:[#allocation13 + $0x280] ss:$16 sps:$4 sm:$0xff]  }
 0x8a3   : > { %9474 = vmatpush1.bf16.msra.mxu1 %v19189_v30  ;;  %v19233_v30 = vld [vmem:[#allocation13 + $0x2a4] ss:$16 sps:$4 sm:$0xff]  }
 0x8a4   : > { %9560 = vmatpush1.bf16.msra.mxu0 %v19192_v2  ;;  %9475 = vmatprep.subr.bf16.mxu1 %v19197_v19  ;;  %v19231_v2 = vld [vmem:[#allocation13 + $0x2a0] ss:$16 sps:$4 sm:$0xff]   ;;  %v19239_v19 = vld [vmem:[#allocation13 + $0x2c4] ss:$16 sps:$4 sm:$0xff]  }
 0x8a5   : > { %9561 = vmatprep.subr.bf16.mxu0 %v19200_v31  ;;  %v19237_v31 = vld [vmem:[#allocation13 + $0x2c0] ss:$16 sps:$4 sm:$0xff]  }
 0x8a7   : > { %9476 = vmatpush1.bf16.msra.mxu1 %v19195_v32  ;;  %v19245_v32 = vld [vmem:[#allocation13 + $0x2e4] ss:$16 sps:$4 sm:$0xff]  }
 0x8a8   : > { %9562 = vmatpush1.bf16.msra.mxu0 %v19198_v9  ;;  %v19243_v9 = vld [vmem:[#allocation13 + $0x2e0] ss:$16 sps:$4 sm:$0xff]  }
 0x8a9   : > { %10225 = vmatprep.subr.bf16.mxu0 %v19206_v0  ;;  %v19258_v0 = vld [vmem:[#allocation13 + $0x328] ss:$16 sps:$4 sm:$0xff]  }
 0x8aa   : > { %9478 = vmatmul.mubr.bf16.vlgmr.msra.gmra.mrb[20].mxu1 %v8754_v43 }
 0x8ab   : > { %9564 = vmatmul.mubr.bf16.vlgmr.msra.gmra.mrb[28].mxu0 %v8754_v43  ;;  %9667 = vmatprep.mubr.f32.mxu1 %v20601_v15  ;;  %v19255_v43 = vld [vmem:[#allocation13 + $0x320] ss:$16 sps:$4 sm:$0xff]  }
 0x8ac   : > { %10226 = vmatpush1.bf16.msra.mxu0 %v19204_v45  ;;  %v19257_v45 = vld [vmem:[#allocation13 + $0x324] ss:$16 sps:$4 sm:$0xff]  }
 0x8ad   : > { %10227 = vmatprep.subr.bf16.mxu0 %v19212_v40  ;;  %v19260_v40 = vld [vmem:[#allocation13 + $0x32c] ss:$16 sps:$4 sm:$0xff]  }
 0x8b0   : > { %10228 = vmatpush1.bf16.msra.mxu0 %v19210_v47  ;;  %v19263_v47 = vld [vmem:[#allocation13 + $0x344] ss:$16 sps:$4 sm:$0xff]  }
 0x8b1   : > { %10229 = vmatprep.subr.bf16.mxu0 %v19218_v49  ;;  %v19266_v49 = vld [vmem:[#allocation13 + $0x34c] ss:$16 sps:$4 sm:$0xff]  }
 0x8b4   : > { %10230 = vmatpush1.bf16.msra.mxu0 %v19216_v53  ;;  %v19261_v53 = vld [vmem:[#allocation13 + $0x340] ss:$16 sps:$4 sm:$0xff]  }
 0x8b5   : > { %10231 = vmatprep.subr.bf16.mxu0 %v19224_v50  ;;  %v19264_v50 = vld [vmem:[#allocation13 + $0x348] ss:$16 sps:$4 sm:$0xff]  }
 0x8b8   : > { %10232 = vmatpush1.bf16.msra.mxu0 %v19222_v62  ;;  %v19269_v62 = vld [vmem:[#allocation13 + $0x364] ss:$16 sps:$4 sm:$0xff]  }
 0x8b9   : > { %10233 = vmatprep.subr.bf16.mxu0 %v19230_v51  ;;  %v19267_v51 = vld [vmem:[#allocation13 + $0x360] ss:$16 sps:$4 sm:$0xff]  }
 0x8bc   : > { %10234 = vmatpush1.bf16.msra.mxu0 %v19228_v41  ;;  %v19270_v41 = vld [vmem:[#allocation13 + $0x368] ss:$16 sps:$4 sm:$0xff]  }
 0x8bd   : > { %10235 = vmatprep.subr.bf16.mxu0 %v19236_v52  ;;  %v19272_v52 = vld [vmem:[#allocation13 + $0x36c] ss:$16 sps:$4 sm:$0xff]  }
 0x8c0   : > { %10236 = vmatpush1.bf16.msra.mxu0 %v19234_v54  ;;  %v19275_v54 = vld [vmem:[#allocation13 + $0x384] ss:$16 sps:$4 sm:$0xff]  }
 0x8c1   : > { %10237 = vmatprep.subr.bf16.mxu0 %v19242_v55  ;;  %v19278_v55 = vld [vmem:[#allocation13 + $0x38c] ss:$16 sps:$4 sm:$0xff]  }
 0x8c4   : > { %10238 = vmatpush1.bf16.msra.mxu0 %v19240_v56  ;;  %v19273_v56 = vld [vmem:[#allocation13 + $0x380] ss:$16 sps:$4 sm:$0xff]  }
 0x8c5   : > { %10239 = vmatprep.subr.bf16.mxu0 %v19248_v28  ;;  %v19276_v28 = vld [vmem:[#allocation13 + $0x388] ss:$16 sps:$4 sm:$0xff]  }
 0x8c8   : > { %10240 = vmatpush1.bf16.msra.mxu0 %v19246_v60  ;;  %v19281_v60 = vld [vmem:[#allocation13 + $0x3a4] ss:$16 sps:$4 sm:$0xff]  }
 0x8c9   : > { %10241 = vmatprep.subr.bf16.mxu0 %v19254_v57  ;;  %v19284_v57 = vld [vmem:[#allocation13 + $0x3ac] ss:$16 sps:$4 sm:$0xff]  }
 0x8cc   : > { %10242 = vmatpush1.bf16.msra.mxu0 %v19252_v42  ;;  %v19279_v42 = vld [vmem:[#allocation13 + $0x3a0] ss:$16 sps:$4 sm:$0xff]  }
 0x8cd   : > { %10243 = vmatprep.subr.bf16.mxu0 %v19260_v40  ;;  %v19300_v40 = vld [vmem:[#allocation13 + $0x8] ss:$16 sps:$4 sm:$0xff]  }
 0x8d0   : > { %10244 = vmatpush1.bf16.msra.mxu0 %v19258_v0  ;;  %v19297_v0 = vld [vmem:[#allocation13] ss:$16 sps:$4 sm:$0xff]  }
 0x8d1   : > { %10245 = vmatprep.subr.bf16.mxu0 %v19266_v49  ;;  %v19305_v49 = vld [vmem:[#allocation13 + $0x24] ss:$16 sps:$4 sm:$0xff]  }
 0x8d4   : > { %10246 = vmatpush1.bf16.msra.mxu0 %v19264_v50  ;;  %v19303_v50 = vld [vmem:[#allocation13 + $0x20] ss:$16 sps:$4 sm:$0xff]  }
 0x8d5   : > { %10247 = vmatprep.subr.bf16.mxu0 %v19272_v52  ;;  %v19309_v52 = vld [vmem:[#allocation13 + $0x40] ss:$16 sps:$4 sm:$0xff]  }
 0x8d8   : > { %10248 = vmatpush1.bf16.msra.mxu0 %v19270_v41  ;;  %v19314_v41 = vld [vmem:[#allocation13 + $0x4c] ss:$16 sps:$4 sm:$0xff]  }
 0x8d9   : > { %10249 = vmatprep.subr.bf16.mxu0 %v19278_v55  ;;  %v19317_v55 = vld [vmem:[#allocation13 + $0x64] ss:$16 sps:$4 sm:$0xff]  }
 0x8dc   : > { %10250 = vmatpush1.bf16.msra.mxu0 %v19276_v28  ;;  %v19315_v28 = vld [vmem:[#allocation13 + $0x60] ss:$16 sps:$4 sm:$0xff]  }
 0x8dd   : > { %10251 = vmatprep.subr.bf16.mxu0 %v19284_v57  ;;  %v19323_v57 = vld [vmem:[#allocation13 + $0x84] ss:$16 sps:$4 sm:$0xff]  }
 0x8e0   : > { %10252 = vmatpush1.bf16.msra.mxu0 %v19282_v59  ;;  %v19321_v59 = vld [vmem:[#allocation13 + $0x80] ss:$16 sps:$4 sm:$0xff]  }
 0x97d   : > { %v9479_v1 = vpop.f32.mrb[20].mxu1 }
 0x97e   : > { %v9565_v7 = vpop.f32.mrb[28].mxu0  ;;  %v9481_v8 = vpop.f32.mrb[21].mxu1 }
 0x97f   : > { %v9582_v16 = vmax.f32 %v9479_v1, %v9565_v7  ;;  %v9567_v63 = vpop.f32.mrb[29].mxu0  ;;  %v9483_v6 = vpop.f32.mrb[22].mxu1  ;;  %v19290_v1 = vld [vmem:[#allocation13 + $0x3cc] ss:$16 sps:$4 sm:$0xff]   ;;  %v19288_v7 = vld [vmem:[#allocation13 + $0x3c8] ss:$16 sps:$4 sm:$0xff]  }
 0x980   : > { %v9583_v4 = vmax.f32 %v9481_v8, %v9567_v63  ;;  %v9569_v26 = vpop.f32.mrb[30].mxu0  ;;  %v9485_v14 = vpop.f32.mrb[23].mxu1  ;;  %10253 = vmatprep.subr.bf16.mxu0 %v19290_v1  ;;  %v19293_v8 = vld [vmem:[#allocation13 + $0x3e4] ss:$16 sps:$4 sm:$0xff]   ;;  %v19291_v63 = vld [vmem:[#allocation13 + $0x3e0] ss:$16 sps:$4 sm:$0xff]  }
 0x981   : > { %v9584_v48 = vmax.f32 %v9483_v6, %v9569_v26  ;;  %v9571_v17 = vpop.f32.mrb[31].mxu0  ;;  %10254 = vmatpush1.bf16.msra.mxu0 %v19288_v7  ;;  %v19294_v6 = vld [vmem:[#allocation13 + $0x3e8] ss:$16 sps:$4 sm:$0xff]   ;;  %v19302_v26 = vld [vmem:[#allocation13 + $0xc] ss:$16 sps:$4 sm:$0xff]  }
 0x982   : > { %v9585_v33 = vmax.f32 %v9485_v14, %v9571_v17  ;;  %v19329_v1 = vld [vmem:[#allocation13 + $0xa4] ss:$16 sps:$4 sm:$0xff]   ;;  %v19327_v7 = vld [vmem:[#allocation13 + $0xa0] ss:$16 sps:$4 sm:$0xff]  }
 0x983   : > { %v17089_v20 = vpack.c.bf16 %v9584_v48, %v9582_v16  ;;  %v19296_v16 = vld [vmem:[#allocation13 + $0x3ec] ss:$16 sps:$4 sm:$0xff]   ;;  %v9682_v48 = vld [vmem:[#allocation21] sm:$0x3] }
 0x984   : > { %v17087_v12 = vpack.c.bf16 %v9585_v33, %v9583_v4  ;;  %10255 = vmatprep.subr.bf16.mxu0 %v19296_v16  ;;  %v19299_v4 = vld [vmem:[#allocation13 + $0x4] ss:$16 sps:$4 sm:$0xff]   ;;  %v9687_v33 = vrot.slane %v9682_v48, %v21206_v23 }
 0x985   : > { %10256 = vmatpush1.bf16.msra.mxu0 %v19294_v6  ;;  %v19335_v16 = vld [vmem:[#allocation13 + $0xc4] ss:$16 sps:$4 sm:$0xff]   ;;  %v19333_v6 = vld [vmem:[#allocation13 + $0xc0] ss:$16 sps:$4 sm:$0xff]  }
 0x986   : > { %17088 = vmatprep.subr.bf16.mxu1 %v17087_v12  ;;  %10627 = vmatprep.subr.bf16.mxu0 %v19302_v26  ;;  %v9691_v12 = vrot.slane %v9682_v48, %v21209_v37  ;;  %v19341_v26 = vld [vmem:[#allocation13 + $0xe4] ss:$16 sps:$4 sm:$0xff]   ;;  %v19339_v48 = vld [vmem:[#allocation13 + $0xe0] ss:$16 sps:$4 sm:$0xff]  }
 0x987   : > { %17090 = vmatpush1.bf16.msra.mxu1 %v17089_v20 }
 0x988   : > { %10184 = vmatprep.subr.bf16.mxu1 %v19203_v10 }
 0x98a   : > { %16201 = vmatmul.mubr.msk.f32.vlgmr.msra.gmra.mrb[24].mxu1 %vm9596_vm4, %v16199_v21 }
 0x98b   : > { %9673 = vmatprep.mubr.f32.mxu1 %v20601_v15  ;;  %10185 = vmatpush1.bf16.msra.mxu1 %v19201_v25 }
 0x98c   : > { %10186 = vmatprep.subr.bf16.mxu1 %v19209_v44 }
 0x98e   : > { %16202 = vmatmul.mubr.msk.f32.gmra.mrb[26].mxu1 %vm9596_vm4, %v16200_v18 }
 0x98f   : > { %10187 = vmatpush1.bf16.msra.mxu1 %v19207_v11 }
 0x990   : > { %10188 = vmatprep.subr.bf16.mxu1 %v19215_v3 }
 0x993   : > { %10189 = vmatpush1.bf16.msra.mxu1 %v19213_v27 }
 0x994   : > { %10190 = vmatprep.subr.bf16.mxu1 %v19221_v29 }
 0x997   : > { %10191 = vmatpush1.bf16.msra.mxu1 %v19219_v46 }
 0x998   : > { %10192 = vmatprep.subr.bf16.mxu1 %v19227_v22 }
 0x99b   : > { %10193 = vmatpush1.bf16.msra.mxu1 %v19225_v35 }
 0x99c   : > { %10194 = vmatprep.subr.bf16.mxu1 %v19233_v30 }
 0x99f   : > { %10195 = vmatpush1.bf16.msra.mxu1 %v19231_v2 }
 0x9a0   : > { %10196 = vmatprep.subr.bf16.mxu1 %v19239_v19 }
 0x9a3   : > { %10197 = vmatpush1.bf16.msra.mxu1 %v19237_v31 }
 0x9a4   : > { %10198 = vmatprep.subr.bf16.mxu1 %v19245_v32 }
 0x9a7   : > { %10199 = vmatpush1.bf16.msra.mxu1 %v19243_v9 }
 0x9a8   : > { %10200 = vmatprep.subr.bf16.mxu1 %v19251_v34 }
 0x9ab   : > { %10201 = vmatpush1.bf16.msra.mxu1 %v19249_v24 }
 0x9ac   : > { %10202 = vmatprep.subr.bf16.mxu1 %v19257_v45 }
 0x9af   : > { %10203 = vmatpush1.bf16.msra.mxu1 %v19255_v43 }
 0x9b0   : > { %10204 = vmatprep.subr.bf16.mxu1 %v19263_v47 }
 0x9b3   : > { %10205 = vmatpush1.bf16.msra.mxu1 %v19261_v53  ;;  %v19308_v53 = vld [vmem:[#allocation13 + $0x2c] ss:$16 sps:$4 sm:$0xff]  }
 0x9b4   : > { %10206 = vmatprep.subr.bf16.mxu1 %v19269_v62  ;;  %v19306_v62 = vld [vmem:[#allocation13 + $0x28] ss:$16 sps:$4 sm:$0xff]  }
 0x9b7   : > { %10207 = vmatpush1.bf16.msra.mxu1 %v19267_v51  ;;  %v19311_v51 = vld [vmem:[#allocation13 + $0x44] ss:$16 sps:$4 sm:$0xff]  }
 0x9b8   : > { %10208 = vmatprep.subr.bf16.mxu1 %v19275_v54  ;;  %v19312_v54 = vld [vmem:[#allocation13 + $0x48] ss:$16 sps:$4 sm:$0xff]  }
 0x9bb   : > { %10209 = vmatpush1.bf16.msra.mxu1 %v19273_v56  ;;  %v19320_v56 = vld [vmem:[#allocation13 + $0x6c] ss:$16 sps:$4 sm:$0xff]  }
 0x9bc   : > { %10210 = vmatprep.subr.bf16.mxu1 %v19281_v60  ;;  %v19318_v60 = vld [vmem:[#allocation13 + $0x68] ss:$16 sps:$4 sm:$0xff]  }
 0x9bf   : > { %10211 = vmatpush1.bf16.msra.mxu1 %v19279_v42  ;;  %v19326_v42 = vld [vmem:[#allocation13 + $0x8c] ss:$16 sps:$4 sm:$0xff]  }
 0x9c0   : > { %10212 = vmatprep.subr.bf16.mxu1 %v19287_v61  ;;  %v19324_v61 = vld [vmem:[#allocation13 + $0x88] ss:$16 sps:$4 sm:$0xff]  }
 0x9c3   : > { %10213 = vmatpush1.bf16.msra.mxu1 %v19285_v5  ;;  %v19332_v5 = vld [vmem:[#allocation13 + $0xac] ss:$16 sps:$4 sm:$0xff]  }
 0x9c4   : > { %10214 = vmatprep.subr.bf16.mxu1 %v19293_v8  ;;  %v19330_v8 = vld [vmem:[#allocation13 + $0xa8] ss:$16 sps:$4 sm:$0xff]  }
 0x9c7   : > { %10215 = vmatpush1.bf16.msra.mxu1 %v19291_v63  ;;  %v19338_v63 = vld [vmem:[#allocation13 + $0xcc] ss:$16 sps:$4 sm:$0xff]  }
 0x9c8   : > { %10586 = vmatprep.subr.bf16.mxu1 %v19299_v4  ;;  %v19336_v4 = vld [vmem:[#allocation13 + $0xc8] ss:$16 sps:$4 sm:$0xff]  }
 0xa5d   : > { %v9669_v14 = vpop.f32.mrb[24].mxu1 }
 0xa5e   : > { %v9671_v17 = vpop.f32.mrb[25].mxu1 }
 0xa61   : > { %v9675_v20 = vpop.f32.mrb[26].mxu1 }
 0xa62   : > { %v9680_v10 = vmax.f32 %v9669_v14, %v9675_v20  ;;  %v9677_v21 = vpop.f32.mrb[27].mxu1  ;;  %v19344_v14 = vld [vmem:[#allocation13 + $0xec] ss:$16 sps:$4 sm:$0xff]  }
 0xa63   : > { %v9681_v25 = vmax.f32 %v9671_v17, %v9677_v21  ;;  %v19342_v17 = vld [vmem:[#allocation13 + $0xe8] ss:$16 sps:$4 sm:$0xff]   ;;  %v19350_v20 = vld [vmem:[#allocation13 + $0x10c] ss:$16 sps:$4 sm:$0xff]   ;;  %v19353_v21 = vld [vmem:[#allocation13 + $0x124] ss:$16 sps:$4 sm:$0xff]  }
 0xa64   : > { %v9694_v44 = vadd.f32 %v9687_v33, %v9680_v10  ;;  %v19347_v33 = vld [vmem:[#allocation13 + $0x104] ss:$16 sps:$4 sm:$0xff]   ;;  %v19348_v10 = vld [vmem:[#allocation13 + $0x108] ss:$16 sps:$4 sm:$0xff]  }
 0xa65   : > { %v9695_v18 = vadd.f32 %v9691_v12, %v9681_v25  ;;  %v19345_v12 = vld [vmem:[#allocation13 + $0x100] ss:$16 sps:$4 sm:$0xff]   ;;  %v19356_v25 = vld [vmem:[#allocation13 + $0x12c] ss:$16 sps:$4 sm:$0xff]  }
 0xa66   : > { %v9696_v11 = vmax.f32 %v9694_v44, 0.0  ;;  %v19351_v44 = vld [vmem:[#allocation13 + $0x120] ss:$16 sps:$4 sm:$0xff]  }
 0xa67   : > { %v9697_v3 = vmax.f32 %v9695_v18, 0.0  ;;  %v19354_v18 = vld [vmem:[#allocation13 + $0x128] ss:$16 sps:$4 sm:$0xff]  }
 0xa68   : > { %v9705_v27 = vrot.slane %v9696_v11, 7  ;;  %v19359_v11 = vld [vmem:[#allocation13 + $0x144] ss:$16 sps:$4 sm:$0xff]  }
 0xa69   : > { %v9706_v29 = vrot.slane %v9697_v3, 7  ;;  %v19362_v3 = vld [vmem:[#allocation13 + $0x14c] ss:$16 sps:$4 sm:$0xff]  }
 0xa6a   : > { %9709 = vst [vmem:[#allocation5] sm:$0xfe] %v9705_v27  ;;  %9711 = vst [vmem:[#allocation5 + $0x10] sm:$0x1] %v9705_v27  ;;  %v19357_v27 = vld [vmem:[#allocation13 + $0x140] ss:$16 sps:$4 sm:$0xff]  }
 0xa6b   : > { %9710 = vst [vmem:[#allocation5 + $0x8] sm:$0xfe] %v9706_v29  ;;  %9712 = vst [vmem:[#allocation5 + $0x18] sm:$0x1] %v9706_v29  ;;  %v19360_v29 = vld [vmem:[#allocation13 + $0x148] ss:$16 sps:$4 sm:$0xff]  }
 0xa71   : > { %v9713_v46 = vld [vmem:[#allocation5] sm:$0xff]  ;;  %v9715_v22 = vld [vmem:[#allocation5 + $0x10] sm:$0x3] }
 0xa72   : > { %v9714_v35 = vld [vmem:[#allocation5 + $0x8] sm:$0xff]  ;;  %v9716_v30 = vld [vmem:[#allocation5 + $0x18] sm:$0x3]  ;;  %v22070_v2 = vpack.c.bf16 %v9715_v22, %v9713_v46  ;;  %v19365_v46 = vld [vmem:[#allocation13 + $0x164] ss:$16 sps:$4 sm:$0xff]  }
 0xa73   : > { %v22072_v19 = vpack.c.bf16 %v9716_v30, %v9714_v35  ;;  %v19368_v22 = vld [vmem:[#allocation13 + $0x16c] ss:$16 sps:$4 sm:$0xff]   ;;  %v19363_v35 = vld [vmem:[#allocation13 + $0x160] ss:$16 sps:$4 sm:$0xff]   ;;  %v19366_v30 = vld [vmem:[#allocation13 + $0x168] ss:$16 sps:$4 sm:$0xff]  }
 0xa74   : > { %v9851_v31 = vshll.u32 %v22070_v2, 16  ;;  %v9849_v43 = vshrl.u32 %v22070_v2, 16 }
 0xa75   : > { %v9858_v32 = vshll.u32 %v22072_v19, 16  ;;  %v9856_v34 = vshrl.u32 %v22072_v19, 16 }
 0xa76   : > { %v9853_v9 = vrot.slane %v9851_v31, 1  ;;  %v19371_v31 = vld [vmem:[#allocation13 + $0x184] ss:$16 sps:$4 sm:$0xff]  }
 0xa77   : > { %v9860_v24 = vrot.slane %v9858_v32, 1  ;;  %v19374_v32 = vld [vmem:[#allocation13 + $0x18c] ss:$16 sps:$4 sm:$0xff]  }
 0xa78   : > { %v9854_v47 = vor.u32 %v9853_v9, %v9849_v43  ;;  %v19369_v9 = vld [vmem:[#allocation13 + $0x180] ss:$16 sps:$4 sm:$0xff]   ;;  %v19380_v43 = vld [vmem:[#allocation13 + $0x1ac] ss:$16 sps:$4 sm:$0xff]  }
 0xa79   : > { %v9861_v45 = vor.u32 %v9860_v24, %v9856_v34  ;;  %v19372_v34 = vld [vmem:[#allocation13 + $0x188] ss:$16 sps:$4 sm:$0xff]   ;;  %v19377_v24 = vld [vmem:[#allocation13 + $0x1a4] ss:$16 sps:$4 sm:$0xff]  }
 0xa7b   : > { %10216 = vmatprep.mubr.bf16.mxu1 %v9861_v45  ;;  %10257 = vmatprep.mubr.bf16.mxu0 %v9861_v45  ;;  %v19375_v45 = vld [vmem:[#allocation13 + $0x1a0] ss:$16 sps:$4 sm:$0xff]  }
 0xa7c   : > { %10217 = vmatmul.mubr.bf16.vlgmr.msra.gmra.mrb[28].mxu1 %v9854_v47  ;;  %10258 = vmatmul.mubr.bf16.vlgmr.msra.gmra.mrb[32].mxu0 %v9854_v47  ;;  %v19386_v47 = vld [vmem:[#allocation13 + $0x1cc] ss:$16 sps:$4 sm:$0xff]  }
 0xa7d   : > { %10587 = vmatpush1.bf16.msra.mxu1 %v19297_v0  ;;  %10628 = vmatpush1.bf16.msra.mxu0 %v19300_v40  ;;  %v19378_v0 = vld [vmem:[#allocation13 + $0x1a8] ss:$16 sps:$4 sm:$0xff]   ;;  %v19383_v40 = vld [vmem:[#allocation13 + $0x1c4] ss:$16 sps:$4 sm:$0xff]  }
 0xa7e   : > { %10618 = vmatprep.mubr.bf16.mxu1 %v22072_v19  ;;  %10659 = vmatprep.mubr.bf16.mxu0 %v22072_v19 }
 0xa7f   : > { %10588 = vmatprep.subr.bf16.mxu1 %v19305_v49  ;;  %10629 = vmatprep.subr.bf16.mxu0 %v19308_v53  ;;  %v19381_v49 = vld [vmem:[#allocation13 + $0x1c0] ss:$16 sps:$4 sm:$0xff]   ;;  %v19384_v53 = vld [vmem:[#allocation13 + $0x1c8] ss:$16 sps:$4 sm:$0xff]  }
 0xa81   : > { %10589 = vmatpush1.bf16.msra.mxu1 %v19303_v50  ;;  %10630 = vmatpush1.bf16.msra.mxu0 %v19306_v62  ;;  %v19389_v50 = vld [vmem:[#allocation13 + $0x1e4] ss:$16 sps:$4 sm:$0xff]   ;;  %v19392_v62 = vld [vmem:[#allocation13 + $0x1ec] ss:$16 sps:$4 sm:$0xff]  }
 0xa82   : > { %10590 = vmatprep.subr.bf16.mxu1 %v19311_v51  ;;  %10631 = vmatprep.subr.bf16.mxu0 %v19314_v41  ;;  %v19387_v51 = vld [vmem:[#allocation13 + $0x1e0] ss:$16 sps:$4 sm:$0xff]   ;;  %v19390_v41 = vld [vmem:[#allocation13 + $0x1e8] ss:$16 sps:$4 sm:$0xff]  }
 0xa85   : > { %10591 = vmatpush1.bf16.msra.mxu1 %v19309_v52  ;;  %10632 = vmatpush1.bf16.msra.mxu0 %v19312_v54  ;;  %v19395_v52 = vld [vmem:[#allocation13 + $0x404] ss:$16 sps:$4 sm:$0xff]   ;;  %v19398_v54 = vld [vmem:[#allocation13 + $0x40c] ss:$16 sps:$4 sm:$0xff]  }
 0xa86   : > { %10592 = vmatprep.subr.bf16.mxu1 %v19317_v55  ;;  %10633 = vmatprep.subr.bf16.mxu0 %v19320_v56  ;;  %v19393_v55 = vld [vmem:[#allocation13 + $0x400] ss:$16 sps:$4 sm:$0xff]   ;;  %v19396_v56 = vld [vmem:[#allocation13 + $0x408] ss:$16 sps:$4 sm:$0xff]  }
 0xa89   : > { %10593 = vmatpush1.bf16.msra.mxu1 %v19315_v28  ;;  %10634 = vmatpush1.bf16.msra.mxu0 %v19318_v60  ;;  %v10736_v28 = vrot.slane %v22072_v19, 1  ;;  %v19401_v60 = vld [vmem:[#allocation13 + $0x424] ss:$16 sps:$4 sm:$0xff]   ;;  %v19408_v19 = vld [vmem:[#allocation13 + $0x448] ss:$16 sps:$4 sm:$0xff]  }
 0xa8a   : > { %10594 = vmatprep.subr.bf16.mxu1 %v19323_v57  ;;  %10635 = vmatprep.subr.bf16.mxu0 %v19326_v42  ;;  %v19404_v57 = vld [vmem:[#allocation13 + $0x42c] ss:$16 sps:$4 sm:$0xff]   ;;  %v19399_v42 = vld [vmem:[#allocation13 + $0x420] ss:$16 sps:$4 sm:$0xff]  }
 0xa8d   : > { %10595 = vmatpush1.bf16.msra.mxu1 %v19321_v59  ;;  %10636 = vmatpush1.bf16.msra.mxu0 %v19324_v61  ;;  %v19402_v59 = vld [vmem:[#allocation13 + $0x428] ss:$16 sps:$4 sm:$0xff]   ;;  %v19407_v61 = vld [vmem:[#allocation13 + $0x444] ss:$16 sps:$4 sm:$0xff]  }
 0xa8e   : > { %10596 = vmatprep.subr.bf16.mxu1 %v19329_v1  ;;  %10637 = vmatprep.subr.bf16.mxu0 %v19332_v5  ;;  %v19410_v1 = vld [vmem:[#allocation13 + $0x44c] ss:$16 sps:$4 sm:$0xff]   ;;  %v19405_v5 = vld [vmem:[#allocation13 + $0x440] ss:$16 sps:$4 sm:$0xff]  }
 0xa91   : > { %10597 = vmatpush1.bf16.msra.mxu1 %v19327_v7  ;;  %10638 = vmatpush1.bf16.msra.mxu0 %v19330_v8  ;;  %v19413_v7 = vld [vmem:[#allocation13 + $0x464] ss:$16 sps:$4 sm:$0xff]   ;;  %v19416_v8 = vld [vmem:[#allocation13 + $0x46c] ss:$16 sps:$4 sm:$0xff]  }
 0xa92   : > { %10598 = vmatprep.subr.bf16.mxu1 %v19335_v16  ;;  %10639 = vmatprep.subr.bf16.mxu0 %v19338_v63  ;;  %v19411_v16 = vld [vmem:[#allocation13 + $0x460] ss:$16 sps:$4 sm:$0xff]   ;;  %v19414_v63 = vld [vmem:[#allocation13 + $0x468] ss:$16 sps:$4 sm:$0xff]  }
 0xa95   : > { %10599 = vmatpush1.bf16.msra.mxu1 %v19333_v6  ;;  %10640 = vmatpush1.bf16.msra.mxu0 %v19336_v4  ;;  %v19419_v6 = vld [vmem:[#allocation13 + $0x484] ss:$16 sps:$4 sm:$0xff]   ;;  %v19422_v4 = vld [vmem:[#allocation13 + $0x48c] ss:$16 sps:$4 sm:$0xff]  }
 0xa96   : > { %10600 = vmatprep.subr.bf16.mxu1 %v19341_v26  ;;  %10641 = vmatprep.subr.bf16.mxu0 %v19344_v14  ;;  %v19417_v26 = vld [vmem:[#allocation13 + $0x480] ss:$16 sps:$4 sm:$0xff]   ;;  %v19420_v14 = vld [vmem:[#allocation13 + $0x488] ss:$16 sps:$4 sm:$0xff]  }
 0xa99   : > { %10601 = vmatpush1.bf16.msra.mxu1 %v19339_v48  ;;  %10642 = vmatpush1.bf16.msra.mxu0 %v19342_v17  ;;  %v19425_v48 = vld [vmem:[#allocation13 + $0x4a4] ss:$16 sps:$4 sm:$0xff]   ;;  %v19428_v17 = vld [vmem:[#allocation13 + $0x4ac] ss:$16 sps:$4 sm:$0xff]  }
 0xa9a   : > { %10602 = vmatprep.subr.bf16.mxu1 %v19347_v33  ;;  %10643 = vmatprep.subr.bf16.mxu0 %v19350_v20  ;;  %v19423_v33 = vld [vmem:[#allocation13 + $0x4a0] ss:$16 sps:$4 sm:$0xff]   ;;  %v19426_v20 = vld [vmem:[#allocation13 + $0x4a8] ss:$16 sps:$4 sm:$0xff]  }
 0xa9d   : > { %10603 = vmatpush1.bf16.msra.mxu1 %v19345_v12  ;;  %10644 = vmatpush1.bf16.msra.mxu0 %v19348_v10  ;;  %v19431_v12 = vld [vmem:[#allocation13 + $0x4c4] ss:$16 sps:$4 sm:$0xff]   ;;  %v19434_v10 = vld [vmem:[#allocation13 + $0x4cc] ss:$16 sps:$4 sm:$0xff]  }
 0xa9e   : > { %10604 = vmatprep.subr.bf16.mxu1 %v19353_v21  ;;  %10645 = vmatprep.subr.bf16.mxu0 %v19356_v25  ;;  %v19429_v21 = vld [vmem:[#allocation13 + $0x4c0] ss:$16 sps:$4 sm:$0xff]   ;;  %v19432_v25 = vld [vmem:[#allocation13 + $0x4c8] ss:$16 sps:$4 sm:$0xff]  }
 0xaa1   : > { %10605 = vmatpush1.bf16.msra.mxu1 %v19351_v44  ;;  %10646 = vmatpush1.bf16.msra.mxu0 %v19354_v18  ;;  %v19437_v44 = vld [vmem:[#allocation13 + $0x4e4] ss:$16 sps:$4 sm:$0xff]   ;;  %v19440_v18 = vld [vmem:[#allocation13 + $0x4ec] ss:$16 sps:$4 sm:$0xff]  }
 0xaa2   : > { %10606 = vmatprep.subr.bf16.mxu1 %v19359_v11  ;;  %10647 = vmatprep.subr.bf16.mxu0 %v19362_v3  ;;  %v19435_v11 = vld [vmem:[#allocation13 + $0x4e0] ss:$16 sps:$4 sm:$0xff]   ;;  %v19438_v3 = vld [vmem:[#allocation13 + $0x4e8] ss:$16 sps:$4 sm:$0xff]  }
 0xaa5   : > { %10607 = vmatpush1.bf16.msra.mxu1 %v19357_v27  ;;  %10648 = vmatpush1.bf16.msra.mxu0 %v19360_v29  ;;  %v19443_v27 = vld [vmem:[#allocation13 + $0x504] ss:$16 sps:$4 sm:$0xff]   ;;  %v19446_v29 = vld [vmem:[#allocation13 + $0x50c] ss:$16 sps:$4 sm:$0xff]  }
 0xaa6   : > { %10608 = vmatprep.subr.bf16.mxu1 %v19365_v46  ;;  %10649 = vmatprep.subr.bf16.mxu0 %v19368_v22  ;;  %v19441_v46 = vld [vmem:[#allocation13 + $0x500] ss:$16 sps:$4 sm:$0xff]   ;;  %v19444_v22 = vld [vmem:[#allocation13 + $0x508] ss:$16 sps:$4 sm:$0xff]  }
 0xaa9   : > { %10609 = vmatpush1.bf16.msra.mxu1 %v19363_v35  ;;  %10650 = vmatpush1.bf16.msra.mxu0 %v19366_v30  ;;  %v19449_v35 = vld [vmem:[#allocation13 + $0x524] ss:$16 sps:$4 sm:$0xff]   ;;  %v19452_v30 = vld [vmem:[#allocation13 + $0x52c] ss:$16 sps:$4 sm:$0xff]  }
 0xaaa   : > { %10610 = vmatprep.subr.bf16.mxu1 %v19371_v31  ;;  %10651 = vmatprep.subr.bf16.mxu0 %v19374_v32  ;;  %v19447_v31 = vld [vmem:[#allocation13 + $0x520] ss:$16 sps:$4 sm:$0xff]   ;;  %v19450_v32 = vld [vmem:[#allocation13 + $0x528] ss:$16 sps:$4 sm:$0xff]  }
 0xaad   : > { %10611 = vmatpush1.bf16.msra.mxu1 %v19369_v9  ;;  %10652 = vmatpush1.bf16.msra.mxu0 %v19372_v34  ;;  %v19455_v9 = vld [vmem:[#allocation13 + $0x544] ss:$16 sps:$4 sm:$0xff]   ;;  %v19458_v34 = vld [vmem:[#allocation13 + $0x54c] ss:$16 sps:$4 sm:$0xff]  }
 0xaae   : > { %10612 = vmatprep.subr.bf16.mxu1 %v19377_v24  ;;  %10653 = vmatprep.subr.bf16.mxu0 %v19380_v43  ;;  %v19453_v24 = vld [vmem:[#allocation13 + $0x540] ss:$16 sps:$4 sm:$0xff]   ;;  %v19456_v43 = vld [vmem:[#allocation13 + $0x548] ss:$16 sps:$4 sm:$0xff]  }
 0xab1   : > { %10613 = vmatpush1.bf16.msra.mxu1 %v19375_v45  ;;  %10654 = vmatpush1.bf16.msra.mxu0 %v19378_v0  ;;  %v19461_v45 = vld [vmem:[#allocation13 + $0x564] ss:$16 sps:$4 sm:$0xff]   ;;  %v19464_v0 = vld [vmem:[#allocation13 + $0x56c] ss:$16 sps:$4 sm:$0xff]  }
 0xab2   : > { %10614 = vmatprep.subr.bf16.mxu1 %v19383_v40  ;;  %10655 = vmatprep.subr.bf16.mxu0 %v19386_v47  ;;  %v19459_v40 = vld [vmem:[#allocation13 + $0x560] ss:$16 sps:$4 sm:$0xff]   ;;  %v19462_v47 = vld [vmem:[#allocation13 + $0x568] ss:$16 sps:$4 sm:$0xff]  }
 0xab5   : > { %10615 = vmatpush1.bf16.msra.mxu1 %v19381_v49  ;;  %10656 = vmatpush1.bf16.msra.mxu0 %v19384_v53  ;;  %v19467_v49 = vld [vmem:[#allocation13 + $0x584] ss:$16 sps:$4 sm:$0xff]   ;;  %v19470_v53 = vld [vmem:[#allocation13 + $0x58c] ss:$16 sps:$4 sm:$0xff]  }
 0xab6   : > { %10616 = vmatprep.subr.bf16.mxu1 %v19389_v50  ;;  %10657 = vmatprep.subr.bf16.mxu0 %v19392_v62  ;;  %v19465_v50 = vld [vmem:[#allocation13 + $0x580] ss:$16 sps:$4 sm:$0xff]   ;;  %v19468_v62 = vld [vmem:[#allocation13 + $0x588] ss:$16 sps:$4 sm:$0xff]  }
 0xab9   : > { %10617 = vmatpush1.bf16.msra.mxu1 %v19387_v51  ;;  %10658 = vmatpush1.bf16.msra.mxu0 %v19390_v41  ;;  %v19473_v51 = vld [vmem:[#allocation13 + $0x5a4] ss:$16 sps:$4 sm:$0xff]   ;;  %v19476_v41 = vld [vmem:[#allocation13 + $0x5ac] ss:$16 sps:$4 sm:$0xff]  }
 0xaba   : > { %11059 = vmatprep.subr.bf16.mxu1 %v19395_v52  ;;  %11100 = vmatprep.subr.bf16.mxu0 %v19398_v54  ;;  %v19471_v52 = vld [vmem:[#allocation13 + $0x5a0] ss:$16 sps:$4 sm:$0xff]   ;;  %v19474_v54 = vld [vmem:[#allocation13 + $0x5a8] ss:$16 sps:$4 sm:$0xff]  }
 0xabc   : > { %10619 = vmatmul.mubr.bf16.vlgmr.msra.gmra.mrb[32].mxu1 %v22070_v2  ;;  %10660 = vmatmul.mubr.bf16.vlgmr.msra.gmra.mrb[36].mxu0 %v22070_v2 }
 0xabd   : > { %11060 = vmatpush1.bf16.msra.mxu1 %v19393_v55  ;;  %11091 = vmatprep.mubr.bf16.mxu1 %v10736_v28  ;;  %v19479_v55 = vld [vmem:[#allocation13 + $0x5c4] ss:$16 sps:$4 sm:$0xff]  }
 0xabe   : > { %11101 = vmatpush1.bf16.msra.mxu0 %v19396_v56  ;;  %11132 = vmatprep.mubr.bf16.mxu0 %v10736_v28  ;;  %v19482_v56 = vld [vmem:[#allocation13 + $0x5cc] ss:$16 sps:$4 sm:$0xff]   ;;  %v19477_v28 = vld [vmem:[#allocation13 + $0x5c0] ss:$16 sps:$4 sm:$0xff]  }
 0xabf   : > { %11061 = vmatprep.subr.bf16.mxu1 %v19401_v60  ;;  %11102 = vmatprep.subr.bf16.mxu0 %v19404_v57  ;;  %v19480_v60 = vld [vmem:[#allocation13 + $0x5c8] ss:$16 sps:$4 sm:$0xff]   ;;  %v19485_v57 = vld [vmem:[#allocation13 + $0x5e4] ss:$16 sps:$4 sm:$0xff]  }
 0xac1   : > { %11062 = vmatpush1.bf16.msra.mxu1 %v19399_v42  ;;  %v19488_v42 = vld [vmem:[#allocation13 + $0x5ec] ss:$16 sps:$4 sm:$0xff]  }
 0xac2   : > { %11103 = vmatpush1.bf16.msra.mxu0 %v19402_v59  ;;  %11063 = vmatprep.subr.bf16.mxu1 %v19407_v61  ;;  %v19483_v59 = vld [vmem:[#allocation13 + $0x5e0] ss:$16 sps:$4 sm:$0xff]   ;;  %v19486_v61 = vld [vmem:[#allocation13 + $0x5e8] ss:$16 sps:$4 sm:$0xff]  }
 0xac3   : > { %11104 = vmatprep.subr.bf16.mxu0 %v19410_v1  ;;  %v10735_v1 = vrot.slane %v22070_v2, 1  ;;  %v19501_v2 = vld [vmem:[#allocation15 + $0x440] ss:$16 sps:$4 sm:$0xff]  }
 0xac5   : > { %11064 = vmatpush1.bf16.msra.mxu1 %v19405_v5  ;;  %v19489_v5 = vld [vmem:[#allocation15 + $0x400] ss:$16 sps:$4 sm:$0xff]  }
 0xac6   : > { %11105 = vmatpush1.bf16.msra.mxu0 %v19408_v19  ;;  %11065 = vmatprep.subr.bf16.mxu1 %v19413_v7  ;;  %v19491_v19 = vld [vmem:[#allocation15 + $0x404] ss:$16 sps:$4 sm:$0xff]   ;;  %v19492_v7 = vld [vmem:[#allocation15 + $0x408] ss:$16 sps:$4 sm:$0xff]  }
 0xac7   : > { %11106 = vmatprep.subr.bf16.mxu0 %v19416_v8  ;;  %v19494_v8 = vld [vmem:[#allocation15 + $0x40c] ss:$16 sps:$4 sm:$0xff]  }
 0xac9   : > { %11066 = vmatpush1.bf16.msra.mxu1 %v19411_v16  ;;  %v19497_v16 = vld [vmem:[#allocation15 + $0x424] ss:$16 sps:$4 sm:$0xff]  }
 0xaca   : > { %11107 = vmatpush1.bf16.msra.mxu0 %v19414_v63  ;;  %11067 = vmatprep.subr.bf16.mxu1 %v19419_v6  ;;  %v19500_v63 = vld [vmem:[#allocation15 + $0x42c] ss:$16 sps:$4 sm:$0xff]   ;;  %v19495_v6 = vld [vmem:[#allocation15 + $0x420] ss:$16 sps:$4 sm:$0xff]  }
 0xacb   : > { %11108 = vmatprep.subr.bf16.mxu0 %v19422_v4  ;;  %v19498_v4 = vld [vmem:[#allocation15 + $0x428] ss:$16 sps:$4 sm:$0xff]  }
 0xacd   : > { %11068 = vmatpush1.bf16.msra.mxu1 %v19417_v26  ;;  %v19503_v26 = vld [vmem:[#allocation15 + $0x444] ss:$16 sps:$4 sm:$0xff]  }
 0xace   : > { %11109 = vmatpush1.bf16.msra.mxu0 %v19420_v14  ;;  %11069 = vmatprep.subr.bf16.mxu1 %v19425_v48  ;;  %v19506_v14 = vld [vmem:[#allocation15 + $0x44c] ss:$16 sps:$4 sm:$0xff]   ;;  %v19504_v48 = vld [vmem:[#allocation15 + $0x448] ss:$16 sps:$4 sm:$0xff]  }
 0xacf   : > { %11110 = vmatprep.subr.bf16.mxu0 %v19428_v17  ;;  %v19509_v17 = vld [vmem:[#allocation15 + $0x464] ss:$16 sps:$4 sm:$0xff]  }
 0xad1   : > { %11070 = vmatpush1.bf16.msra.mxu1 %v19423_v33  ;;  %v19512_v33 = vld [vmem:[#allocation15 + $0x46c] ss:$16 sps:$4 sm:$0xff]  }
 0xad2   : > { %11111 = vmatpush1.bf16.msra.mxu0 %v19426_v20  ;;  %11071 = vmatprep.subr.bf16.mxu1 %v19431_v12  ;;  %v19507_v20 = vld [vmem:[#allocation15 + $0x460] ss:$16 sps:$4 sm:$0xff]   ;;  %v19510_v12 = vld [vmem:[#allocation15 + $0x468] ss:$16 sps:$4 sm:$0xff]  }
 0xad3   : > { %11112 = vmatprep.subr.bf16.mxu0 %v19434_v10  ;;  %v19515_v10 = vld [vmem:[#allocation15 + $0x484] ss:$16 sps:$4 sm:$0xff]  }
 0xad5   : > { %11072 = vmatpush1.bf16.msra.mxu1 %v19429_v21  ;;  %v19518_v21 = vld [vmem:[#allocation15 + $0x48c] ss:$16 sps:$4 sm:$0xff]  }
 0xad6   : > { %11113 = vmatpush1.bf16.msra.mxu0 %v19432_v25  ;;  %11073 = vmatprep.subr.bf16.mxu1 %v19437_v44  ;;  %v19513_v25 = vld [vmem:[#allocation15 + $0x480] ss:$16 sps:$4 sm:$0xff]   ;;  %v19516_v44 = vld [vmem:[#allocation15 + $0x488] ss:$16 sps:$4 sm:$0xff]  }
 0xad7   : > { %11114 = vmatprep.subr.bf16.mxu0 %v19440_v18  ;;  %v19521_v18 = vld [vmem:[#allocation15 + $0x4a4] ss:$16 sps:$4 sm:$0xff]  }
 0xad9   : > { %11074 = vmatpush1.bf16.msra.mxu1 %v19435_v11  ;;  %v19524_v11 = vld [vmem:[#allocation15 + $0x4ac] ss:$16 sps:$4 sm:$0xff]  }
 0xada   : > { %11115 = vmatpush1.bf16.msra.mxu0 %v19438_v3  ;;  %11075 = vmatprep.subr.bf16.mxu1 %v19443_v27  ;;  %v19519_v3 = vld [vmem:[#allocation15 + $0x4a0] ss:$16 sps:$4 sm:$0xff]   ;;  %v19522_v27 = vld [vmem:[#allocation15 + $0x4a8] ss:$16 sps:$4 sm:$0xff]  }
 0xadb   : > { %11116 = vmatprep.subr.bf16.mxu0 %v19446_v29  ;;  %v19527_v29 = vld [vmem:[#allocation15 + $0x4c4] ss:$16 sps:$4 sm:$0xff]  }
 0xadd   : > { %11076 = vmatpush1.bf16.msra.mxu1 %v19441_v46  ;;  %v19530_v46 = vld [vmem:[#allocation15 + $0x4cc] ss:$16 sps:$4 sm:$0xff]  }
 0xade   : > { %11117 = vmatpush1.bf16.msra.mxu0 %v19444_v22  ;;  %11077 = vmatprep.subr.bf16.mxu1 %v19449_v35  ;;  %v19525_v22 = vld [vmem:[#allocation15 + $0x4c0] ss:$16 sps:$4 sm:$0xff]   ;;  %v19528_v35 = vld [vmem:[#allocation15 + $0x4c8] ss:$16 sps:$4 sm:$0xff]  }
 0xadf   : > { %11118 = vmatprep.subr.bf16.mxu0 %v19452_v30  ;;  %v19533_v30 = vld [vmem:[#allocation15 + $0x4e4] ss:$16 sps:$4 sm:$0xff]  }
 0xae1   : > { %11078 = vmatpush1.bf16.msra.mxu1 %v19447_v31  ;;  %v19536_v31 = vld [vmem:[#allocation15 + $0x4ec] ss:$16 sps:$4 sm:$0xff]  }
 0xae2   : > { %11119 = vmatpush1.bf16.msra.mxu0 %v19450_v32  ;;  %11079 = vmatprep.subr.bf16.mxu1 %v19455_v9  ;;  %v19531_v32 = vld [vmem:[#allocation15 + $0x4e0] ss:$16 sps:$4 sm:$0xff]   ;;  %v19534_v9 = vld [vmem:[#allocation15 + $0x4e8] ss:$16 sps:$4 sm:$0xff]  }
 0xae3   : > { %11120 = vmatprep.subr.bf16.mxu0 %v19458_v34  ;;  %v19539_v34 = vld [vmem:[#allocation15 + $0x504] ss:$16 sps:$4 sm:$0xff]  }
 0xae5   : > { %11080 = vmatpush1.bf16.msra.mxu1 %v19453_v24  ;;  %v19542_v24 = vld [vmem:[#allocation15 + $0x50c] ss:$16 sps:$4 sm:$0xff]  }
 0xae6   : > { %11121 = vmatpush1.bf16.msra.mxu0 %v19456_v43  ;;  %11081 = vmatprep.subr.bf16.mxu1 %v19461_v45  ;;  %v19537_v43 = vld [vmem:[#allocation15 + $0x500] ss:$16 sps:$4 sm:$0xff]   ;;  %v19540_v45 = vld [vmem:[#allocation15 + $0x508] ss:$16 sps:$4 sm:$0xff]  }
 0xae7   : > { %11122 = vmatprep.subr.bf16.mxu0 %v19464_v0  ;;  %v19545_v0 = vld [vmem:[#allocation15 + $0x524] ss:$16 sps:$4 sm:$0xff]  }
 0xae9   : > { %11082 = vmatpush1.bf16.msra.mxu1 %v19459_v40  ;;  %v19548_v40 = vld [vmem:[#allocation15 + $0x52c] ss:$16 sps:$4 sm:$0xff]  }
 0xaea   : > { %11123 = vmatpush1.bf16.msra.mxu0 %v19462_v47  ;;  %11083 = vmatprep.subr.bf16.mxu1 %v19467_v49  ;;  %v19543_v47 = vld [vmem:[#allocation15 + $0x520] ss:$16 sps:$4 sm:$0xff]   ;;  %v19546_v49 = vld [vmem:[#allocation15 + $0x528] ss:$16 sps:$4 sm:$0xff]  }
 0xaeb   : > { %11124 = vmatprep.subr.bf16.mxu0 %v19470_v53 }
 0xaed   : > { %11084 = vmatpush1.bf16.msra.mxu1 %v19465_v50 }
 0xaee   : > { %11125 = vmatpush1.bf16.msra.mxu0 %v19468_v62  ;;  %11085 = vmatprep.subr.bf16.mxu1 %v19473_v51 }
 0xaef   : > { %11126 = vmatprep.subr.bf16.mxu0 %v19476_v41 }
 0xaf1   : > { %11086 = vmatpush1.bf16.msra.mxu1 %v19471_v52 }
 0xaf2   : > { %11127 = vmatpush1.bf16.msra.mxu0 %v19474_v54  ;;  %11087 = vmatprep.subr.bf16.mxu1 %v19479_v55 }
 0xaf3   : > { %11128 = vmatprep.subr.bf16.mxu0 %v19482_v56  ;;  %v19551_v56 = vld [vmem:[#allocation15 + $0x544] ss:$16 sps:$4 sm:$0xff]  }
 0xaf5   : > { %11088 = vmatpush1.bf16.msra.mxu1 %v19477_v28  ;;  %v19554_v28 = vld [vmem:[#allocation15 + $0x54c] ss:$16 sps:$4 sm:$0xff]  }
 0xaf6   : > { %11129 = vmatpush1.bf16.msra.mxu0 %v19480_v60  ;;  %11089 = vmatprep.subr.bf16.mxu1 %v19485_v57  ;;  %v19549_v60 = vld [vmem:[#allocation15 + $0x540] ss:$16 sps:$4 sm:$0xff]   ;;  %v19552_v57 = vld [vmem:[#allocation15 + $0x548] ss:$16 sps:$4 sm:$0xff]  }
 0xaf7   : > { %11130 = vmatprep.subr.bf16.mxu0 %v19488_v42  ;;  %v19555_v42 = vld [vmem:[#allocation15 + $0x560] ss:$16 sps:$4 sm:$0xff]  }
 0xaf9   : > { %11090 = vmatpush1.bf16.msra.mxu1 %v19483_v59  ;;  %v19557_v59 = vld [vmem:[#allocation15 + $0x564] ss:$16 sps:$4 sm:$0xff]  }
 0xafa   : > { %11131 = vmatpush1.bf16.msra.mxu0 %v19486_v61  ;;  %12141 = vmatprep.subr.bf16.mxu1 %v19491_v19  ;;  %v19558_v61 = vld [vmem:[#allocation15 + $0x568] ss:$16 sps:$4 sm:$0xff]   ;;  %v19566_v19 = vld [vmem:[#allocation15 + $0x58c] ss:$16 sps:$4 sm:$0xff]  }
 0xafb   : > { %12223 = vmatprep.subr.bf16.mxu0 %v19494_v8  ;;  %v19564_v8 = vld [vmem:[#allocation15 + $0x588] ss:$16 sps:$4 sm:$0xff]  }
 0xafc   : > { %11092 = vmatmul.mubr.bf16.vlgmr.msra.gmra.mrb[36].mxu1 %v10735_v1 }
 0xafd   : > { %11133 = vmatmul.mubr.bf16.vlgmr.msra.gmra.mrb[40].mxu0 %v10735_v1  ;;  %12142 = vmatpush1.bf16.msra.mxu1 %v19489_v5  ;;  %v19560_v1 = vld [vmem:[#allocation15 + $0x56c] ss:$16 sps:$4 sm:$0xff]   ;;  %v19563_v5 = vld [vmem:[#allocation15 + $0x584] ss:$16 sps:$4 sm:$0xff]  }
 0xafe   : > { %12224 = vmatpush1.bf16.msra.mxu0 %v19492_v7  ;;  %12143 = vmatprep.subr.bf16.mxu1 %v19497_v16  ;;  %v19561_v7 = vld [vmem:[#allocation15 + $0x580] ss:$16 sps:$4 sm:$0xff]   ;;  %v19569_v16 = vld [vmem:[#allocation15 + $0x5a4] ss:$16 sps:$4 sm:$0xff]  }
 0xaff   : > { %12225 = vmatprep.subr.bf16.mxu0 %v19500_v63  ;;  %v19572_v63 = vld [vmem:[#allocation15 + $0x5ac] ss:$16 sps:$4 sm:$0xff]  }
 0xb01   : > { %12144 = vmatpush1.bf16.msra.mxu1 %v19495_v6  ;;  %v19567_v6 = vld [vmem:[#allocation15 + $0x5a0] ss:$16 sps:$4 sm:$0xff]  }
 0xb02   : > { %12226 = vmatpush1.bf16.msra.mxu0 %v19498_v4  ;;  %12145 = vmatprep.subr.bf16.mxu1 %v19503_v26  ;;  %v19570_v4 = vld [vmem:[#allocation15 + $0x5a8] ss:$16 sps:$4 sm:$0xff]   ;;  %v19575_v26 = vld [vmem:[#allocation15 + $0x5c4] ss:$16 sps:$4 sm:$0xff]  }
 0xb03   : > { %12227 = vmatprep.subr.bf16.mxu0 %v19506_v14  ;;  %v19578_v14 = vld [vmem:[#allocation15 + $0x5cc] ss:$16 sps:$4 sm:$0xff]  }
 0xb05   : > { %12146 = vmatpush1.bf16.msra.mxu1 %v19501_v2  ;;  %v19573_v2 = vld [vmem:[#allocation15 + $0x5c0] ss:$16 sps:$4 sm:$0xff]  }
 0xb06   : > { %12228 = vmatpush1.bf16.msra.mxu0 %v19504_v48  ;;  %12147 = vmatprep.subr.bf16.mxu1 %v19509_v17  ;;  %v19576_v48 = vld [vmem:[#allocation15 + $0x5c8] ss:$16 sps:$4 sm:$0xff]   ;;  %v19581_v17 = vld [vmem:[#allocation15 + $0x5e4] ss:$16 sps:$4 sm:$0xff]  }
 0xb07   : > { %12229 = vmatprep.subr.bf16.mxu0 %v19512_v33  ;;  %v19584_v33 = vld [vmem:[#allocation15 + $0x5ec] ss:$16 sps:$4 sm:$0xff]  }
 0xb09   : > { %12148 = vmatpush1.bf16.msra.mxu1 %v19507_v20  ;;  %v19579_v20 = vld [vmem:[#allocation15 + $0x5e0] ss:$16 sps:$4 sm:$0xff]  }
 0xb0a   : > { %12230 = vmatpush1.bf16.msra.mxu0 %v19510_v12  ;;  %12149 = vmatprep.subr.bf16.mxu1 %v19515_v10  ;;  %v19582_v12 = vld [vmem:[#allocation15 + $0x5e8] ss:$16 sps:$4 sm:$0xff]   ;;  %v19587_v10 = vld [vmem:[#allocation15 + $0x604] ss:$16 sps:$4 sm:$0xff]  }
 0xb0b   : > { %12231 = vmatprep.subr.bf16.mxu0 %v19518_v21  ;;  %v19590_v21 = vld [vmem:[#allocation15 + $0x60c] ss:$16 sps:$4 sm:$0xff]  }
 0xb0d   : > { %12150 = vmatpush1.bf16.msra.mxu1 %v19513_v25 }
 0xb0e   : > { %12232 = vmatpush1.bf16.msra.mxu0 %v19516_v44  ;;  %12151 = vmatprep.subr.bf16.mxu1 %v19521_v18 }
 0xb0f   : > { %12233 = vmatprep.subr.bf16.mxu0 %v19524_v11 }
 0xb11   : > { %12152 = vmatpush1.bf16.msra.mxu1 %v19519_v3 }
 0xb12   : > { %12234 = vmatpush1.bf16.msra.mxu0 %v19522_v27  ;;  %12153 = vmatprep.subr.bf16.mxu1 %v19527_v29 }
 0xb13   : > { %12235 = vmatprep.subr.bf16.mxu0 %v19530_v46 }
 0xb15   : > { %12154 = vmatpush1.bf16.msra.mxu1 %v19525_v22 }
 0xb16   : > { %12236 = vmatpush1.bf16.msra.mxu0 %v19528_v35  ;;  %12155 = vmatprep.subr.bf16.mxu1 %v19533_v30 }
 0xb17   : > { %12237 = vmatprep.subr.bf16.mxu0 %v19536_v31 }
 0xb19   : > { %12156 = vmatpush1.bf16.msra.mxu1 %v19531_v32  ;;  %v11145_v32 = vld [vmem:[#allocation22] sm:$0xf] }
 0xb1a   : > { %12238 = vmatpush1.bf16.msra.mxu0 %v19534_v9  ;;  %12157 = vmatprep.subr.bf16.mxu1 %v19539_v34  ;;  %v11150_v9 = vrot.slane %v11145_v32, %v21206_v23 }
 0xb1b   : > { %12239 = vmatprep.subr.bf16.mxu0 %v19542_v24  ;;  %v11158_v24 = vrot.slane %v11145_v32, %v21212_v38 }
 0xb1d   : > { %12158 = vmatpush1.bf16.msra.mxu1 %v19537_v43  ;;  %v11154_v43 = vrot.slane %v11145_v32, %v21209_v37 }
 0xb1e   : > { %12240 = vmatpush1.bf16.msra.mxu0 %v19540_v45  ;;  %12159 = vmatprep.subr.bf16.mxu1 %v19545_v0 }
 0xb1f   : > { %12241 = vmatprep.subr.bf16.mxu0 %v19548_v40 }
 0xb21   : > { %12160 = vmatpush1.bf16.msra.mxu1 %v19543_v47  ;;  %v11162_v47 = vrot.slane %v11145_v32, %v21215_v39  ;;  %v19597_v32 = vld [vmem:[#allocation15 + $0x640] ss:$16 sps:$4 sm:$0xff]  }
 0xb22   : > { %12242 = vmatpush1.bf16.msra.mxu0 %v19546_v49  ;;  %12161 = vmatprep.subr.bf16.mxu1 %v19551_v56 }
 0xb23   : > { %12243 = vmatprep.subr.bf16.mxu0 %v19554_v28 }
 0xb25   : > { %12162 = vmatpush1.bf16.msra.mxu1 %v19549_v60 }
 0xb26   : > { %12244 = vmatpush1.bf16.msra.mxu0 %v19552_v57  ;;  %12163 = vmatprep.subr.bf16.mxu1 %v19557_v59 }
 0xb27   : > { %12245 = vmatprep.subr.bf16.mxu0 %v19560_v1 }
 0xb29   : > { %12164 = vmatpush1.bf16.msra.mxu1 %v19555_v42 }
 0xb2a   : > { %12246 = vmatpush1.bf16.msra.mxu0 %v19558_v61  ;;  %12165 = vmatprep.subr.bf16.mxu1 %v19563_v5 }
 0xb2b   : > { %12247 = vmatprep.subr.bf16.mxu0 %v19566_v19 }
 0xb2d   : > { %12166 = vmatpush1.bf16.msra.mxu1 %v19561_v7 }
 0xb2e   : > { %12248 = vmatpush1.bf16.msra.mxu0 %v19564_v8  ;;  %12167 = vmatprep.subr.bf16.mxu1 %v19569_v16 }
 0xb2f   : > { %12249 = vmatprep.subr.bf16.mxu0 %v19572_v63 }
 0xb31   : > { %12168 = vmatpush1.bf16.msra.mxu1 %v19567_v6 }
 0xb32   : > { %12250 = vmatpush1.bf16.msra.mxu0 %v19570_v4  ;;  %12169 = vmatprep.subr.bf16.mxu1 %v19575_v26 }
 0xb33   : > { %12251 = vmatprep.subr.bf16.mxu0 %v19578_v14 }
 0xb35   : > { %12170 = vmatpush1.bf16.msra.mxu1 %v19573_v2 }
 0xb36   : > { %12252 = vmatpush1.bf16.msra.mxu0 %v19576_v48  ;;  %12171 = vmatprep.subr.bf16.mxu1 %v19581_v17 }
 0xb37   : > { %12253 = vmatprep.subr.bf16.mxu0 %v19584_v33 }
 0xb39   : > { %12172 = vmatpush1.bf16.msra.mxu1 %v19579_v20 }
 0xb3a   : > { %12254 = vmatpush1.bf16.msra.mxu0 %v19582_v12  ;;  %12182 = vmatprep.subr.bf16.mxu1 %v19587_v10 }
 0xb3b   : > { %12264 = vmatprep.subr.bf16.mxu0 %v19590_v21 }
 0xb4f   : > { %v10218_v53 = vpop.f32.mrb[28].mxu1  ;;  %v10259_v50 = vpop.f32.mrb[32].mxu0 }
 0xb50   : > { %v22084_v62 = vpop.f32.mrb[29].mxu1  ;;  %v22086_v51 = vpop.f32.mrb[33].mxu0 }
 0xb51   : > { %v10222_v41 = vpop.f32.mrb[30].mxu1  ;;  %v10263_v52 = vpop.f32.mrb[34].mxu0 }
 0xb52   : > { %v10223_v54 = vpop.f32.mrb[31].mxu1  ;;  %v10264_v55 = vpop.f32.mrb[35].mxu0 }
 0xb8f   : > { %v10620_v25 = vpop.f32.mrb[32].mxu1  ;;  %v10661_v44 = vpop.f32.mrb[36].mxu0 }
 0xb90   : > { %v10621_v18 = vadd.f32 %v10620_v25, %v10218_v53  ;;  %v10662_v11 = vadd.f32 %v10661_v44, %v10259_v50  ;;  %v10622_v3 = vpop.f32.mrb[33].mxu1  ;;  %v10663_v27 = vpop.f32.mrb[37].mxu0  ;;  %v19585_v44 = vld [vmem:[#allocation15 + $0x600] ss:$16 sps:$4 sm:$0xff]  }
 0xb91   : > { %v10623_v29 = vadd.f32 %v10622_v3, %v22084_v62  ;;  %v10664_v46 = vadd.f32 %v10663_v27, %v22086_v51  ;;  %v10624_v22 = vpop.f32.mrb[34].mxu1  ;;  %v10665_v35 = vpop.f32.mrb[38].mxu0  ;;  %v19593_v27 = vld [vmem:[#allocation15 + $0x624] ss:$16 sps:$4 sm:$0xff]  }
 0xb92   : > { %v10625_v30 = vpop.f32.mrb[35].mxu1  ;;  %v10666_v31 = vpop.f32.mrb[39].mxu0  ;;  %v19591_v22 = vld [vmem:[#allocation15 + $0x620] ss:$16 sps:$4 sm:$0xff]   ;;  %v19594_v35 = vld [vmem:[#allocation15 + $0x628] ss:$16 sps:$4 sm:$0xff]  }
 0xb93   : > { %v19599_v30 = vld [vmem:[#allocation15 + $0x644] ss:$16 sps:$4 sm:$0xff]   ;;  %v19602_v31 = vld [vmem:[#allocation15 + $0x64c] ss:$16 sps:$4 sm:$0xff]  }
 0xbcf   : > { %v11093_v34 = vpop.f32.mrb[36].mxu1 }
 0xbd0   : > { %v11141_v45 = vadd.f32 %v11093_v34, %v10621_v18  ;;  %v11134_v0 = vpop.f32.mrb[40].mxu0  ;;  %v11095_v40 = vpop.f32.mrb[37].mxu1  ;;  %v19588_v18 = vld [vmem:[#allocation15 + $0x608] ss:$16 sps:$4 sm:$0xff]   ;;  %v19605_v34 = vld [vmem:[#allocation15 + $0x664] ss:$16 sps:$4 sm:$0xff]  }
 0xbd1   : > { %v11143_v49 = vadd.f32 %v11134_v0, %v10662_v11  ;;  %v11142_v53 = vadd.f32 %v11095_v40, %v10623_v29  ;;  %v11136_v50 = vpop.f32.mrb[41].mxu0  ;;  %v11097_v62 = vpop.f32.mrb[38].mxu1  ;;  %v19596_v29 = vld [vmem:[#allocation15 + $0x62c] ss:$16 sps:$4 sm:$0xff]   ;;  %v19611_v0 = vld [vmem:[#allocation15 + $0x684] ss:$16 sps:$4 sm:$0xff]  }
 0xbd2   : > { %v11167_v51 = vadd.f32 %v11150_v9, %v11141_v45  ;;  %v11144_v41 = vadd.f32 %v11136_v50, %v10664_v46  ;;  %v11138_v52 = vpop.f32.mrb[42].mxu0  ;;  %v11098_v54 = vpop.f32.mrb[39].mxu1  ;;  %v19600_v9 = vld [vmem:[#allocation15 + $0x648] ss:$16 sps:$4 sm:$0xff]   ;;  %v19614_v40 = vld [vmem:[#allocation15 + $0x68c] ss:$16 sps:$4 sm:$0xff]  }
 0xbd3   : > { %v11169_v55 = vadd.f32 %v11158_v24, %v11143_v49  ;;  %v11168_v56 = vadd.f32 %v11154_v43, %v11142_v53  ;;  %v11139_v28 = vpop.f32.mrb[43].mxu0  ;;  %v19608_v24 = vld [vmem:[#allocation15 + $0x66c] ss:$16 sps:$4 sm:$0xff]   ;;  %v19603_v43 = vld [vmem:[#allocation15 + $0x660] ss:$16 sps:$4 sm:$0xff]  }
 0xbd4   : > { %v11171_v60 = vmax.f32 %v11167_v51, 0.0  ;;  %v11170_v38 = vadd.f32 %v11162_v47, %v11144_v41  ;;  %v19606_v45 = vld [vmem:[#allocation15 + $0x668] ss:$16 sps:$4 sm:$0xff]   ;;  %v19609_v47 = vld [vmem:[#allocation15 + $0x680] ss:$16 sps:$4 sm:$0xff]  }
 0xbd5   : > { %v11173_v57 = vmax.f32 %v11169_v55, 0.0  ;;  %v11172_v42 = vmax.f32 %v11168_v56, 0.0  ;;  %v19612_v49 = vld [vmem:[#allocation15 + $0x688] ss:$16 sps:$4 sm:$0xff]   ;;  %v19617_v53 = vld [vmem:[#allocation15 + $0x6a4] ss:$16 sps:$4 sm:$0xff]  }
 0xbd6   : > { %v11184_v59 = vrot.slane %v11171_v60, 7  ;;  %v11174_v61 = vmax.f32 %v11170_v38, 0.0  ;;  %v19620_v50 = vld [vmem:[#allocation15 + $0x6ac] ss:$16 sps:$4 sm:$0xff]   ;;  %v19615_v62 = vld [vmem:[#allocation15 + $0x6a0] ss:$16 sps:$4 sm:$0xff]  }
 0xbd7   : > { %v11186_v1 = vrot.slane %v11173_v57, 7  ;;  %v11185_v5 = vrot.slane %v11172_v42, 7  ;;  %v19618_v51 = vld [vmem:[#allocation15 + $0x6a8] ss:$16 sps:$4 sm:$0xff]   ;;  %v19623_v41 = vld [vmem:[#allocation15 + $0x6c4] ss:$16 sps:$4 sm:$0xff]  }
 0xbd8   : > { %11192 = vst [vmem:[#allocation6] sm:$0xfe] %v11184_v59  ;;  %11196 = vst [vmem:[#allocation6 + $0x20] sm:$0x1] %v11184_v59  ;;  %v11187_v39 = vrot.slane %v11174_v61, 7 }
 0xbd9   : > { %11194 = vst [vmem:[#allocation6 + $0x10] sm:$0xfe] %v11186_v1  ;;  %11198 = vst [vmem:[#allocation6 + $0x30] sm:$0x1] %v11186_v1  ;;  %v19626_v52 = vld [vmem:[#allocation15 + $0x6cc] ss:$16 sps:$4 sm:$0xff]  }
 0xbda   : > { %11193 = vst [vmem:[#allocation6 + $0x8] sm:$0xfe] %v11185_v5  ;;  %11197 = vst [vmem:[#allocation6 + $0x28] sm:$0x1] %v11185_v5  ;;  %v19621_v54 = vld [vmem:[#allocation15 + $0x6c0] ss:$16 sps:$4 sm:$0xff]  }
 0xbdb   : > { %11195 = vst [vmem:[#allocation6 + $0x18] sm:$0xfe] %v11187_v39  ;;  %11199 = vst [vmem:[#allocation6 + $0x38] sm:$0x1] %v11187_v39  ;;  %v19624_v55 = vld [vmem:[#allocation15 + $0x6c8] ss:$16 sps:$4 sm:$0xff]  }
 0xbdc   : > { %v19629_v56 = vld [vmem:[#allocation15 + $0x6e4] ss:$16 sps:$4 sm:$0xff]   ;;  %v19632_v28 = vld [vmem:[#allocation15 + $0x6ec] ss:$16 sps:$4 sm:$0xff]   ;;  %v19627_v60 = vld [vmem:[#allocation15 + $0x6e0] ss:$16 sps:$4 sm:$0xff]  }
 0xbdd   : > { %v19630_v38 = vld [vmem:[#allocation15 + $0x6e8] ss:$16 sps:$4 sm:$0xff]   ;;  %v19635_v57 = vld [vmem:[#allocation15 + $0x704] ss:$16 sps:$4 sm:$0xff]   ;;  %v19638_v42 = vld [vmem:[#allocation15 + $0x70c] ss:$16 sps:$4 sm:$0xff]  }
 0xbde   : > { %v19633_v59 = vld [vmem:[#allocation15 + $0x700] ss:$16 sps:$4 sm:$0xff]   ;;  %v19636_v61 = vld [vmem:[#allocation15 + $0x708] ss:$16 sps:$4 sm:$0xff]   ;;  %v19641_v1 = vld [vmem:[#allocation15 + $0x724] ss:$16 sps:$4 sm:$0xff]  }
 0xbdf   : > { %v11200_v19 = vld [vmem:[#allocation6] sm:$0xff]  ;;  %v19644_v5 = vld [vmem:[#allocation15 + $0x72c] ss:$16 sps:$4 sm:$0xff]  }
 0xbe0   : > { %v11204_v7 = vld [vmem:[#allocation6 + $0x20] sm:$0x3] }
 0xbe1   : > { %v11201_v8 = vld [vmem:[#allocation6 + $0x8] sm:$0xff]  ;;  %v22094_v63 = vpack.c.bf16 %v11204_v7, %v11200_v19  ;;  %v19639_v39 = vld [vmem:[#allocation15 + $0x720] ss:$16 sps:$4 sm:$0xff]   ;;  %v19647_v7 = vld [vmem:[#allocation15 + $0x744] ss:$16 sps:$4 sm:$0xff]  }
 0xbe2   : > { %v11205_v16 = vld [vmem:[#allocation6 + $0x28] sm:$0x3]  ;;  %v11203_v4 = vld [vmem:[#allocation6 + $0x18] sm:$0xff] }
 0xbe3   : > { %v22096_v6 = vpack.c.bf16 %v11205_v16, %v11201_v8  ;;  %v11207_v26 = vld [vmem:[#allocation6 + $0x38] sm:$0x3]  ;;  %v11472_v14 = vshll.u32 %v22094_v63, 16  ;;  %v11470_v10 = vshrl.u32 %v22094_v63, 16  ;;  %v19650_v8 = vld [vmem:[#allocation15 + $0x74c] ss:$16 sps:$4 sm:$0xff]  }
 0xbe4   : > { %v22099_v2 = vpack.c.bf16 %v11207_v26, %v11203_v4  ;;  %v19642_v19 = vld [vmem:[#allocation15 + $0x728] ss:$16 sps:$4 sm:$0xff]   ;;  %v19645_v16 = vld [vmem:[#allocation15 + $0x740] ss:$16 sps:$4 sm:$0xff]   ;;  %v19653_v26 = vld [vmem:[#allocation15 + $0x764] ss:$16 sps:$4 sm:$0xff]  }
 0xbe5   : > { %v11479_v48 = vshll.u32 %v22096_v6, 16  ;;  %v11474_v17 = vrot.slane %v11472_v14, 1  ;;  %v11477_v20 = vshrl.u32 %v22096_v6, 16  ;;  %v19648_v4 = vld [vmem:[#allocation15 + $0x748] ss:$16 sps:$4 sm:$0xff]  }
 0xbe6   : > { %v11493_v33 = vshll.u32 %v22099_v2, 16  ;;  %v11491_v3 = vshrl.u32 %v22099_v2, 16  ;;  %v19656_v14 = vld [vmem:[#allocation15 + $0x76c] ss:$16 sps:$4 sm:$0xff]  }
 0xbe7   : > { %v11481_v12 = vrot.slane %v11479_v48, 1  ;;  %v11475_v11 = vor.u32 %v11474_v17, %v11470_v10  ;;  %v19651_v48 = vld [vmem:[#allocation15 + $0x760] ss:$16 sps:$4 sm:$0xff]   ;;  %v19654_v17 = vld [vmem:[#allocation15 + $0x768] ss:$16 sps:$4 sm:$0xff]  }
 0xbe8   : > { %v11495_v21 = vrot.slane %v11493_v33, 1  ;;  %v19659_v33 = vld [vmem:[#allocation15 + $0x784] ss:$16 sps:$4 sm:$0xff]   ;;  %v19660_v10 = vld [vmem:[#allocation15 + $0x788] ss:$16 sps:$4 sm:$0xff]  }
 0xbe9   : > { %v11482_v25 = vor.u32 %v11481_v12, %v11477_v20  ;;  %v19662_v20 = vld [vmem:[#allocation15 + $0x78c] ss:$16 sps:$4 sm:$0xff]   ;;  %v19657_v12 = vld [vmem:[#allocation15 + $0x780] ss:$16 sps:$4 sm:$0xff]  }
 0xbea   : > { %v11496_v46 = vor.u32 %v11495_v21, %v11491_v3  ;;  %v19665_v21 = vld [vmem:[#allocation15 + $0x7a4] ss:$16 sps:$4 sm:$0xff]   ;;  %v19666_v3 = vld [vmem:[#allocation15 + $0x7a8] ss:$16 sps:$4 sm:$0xff]  }
 0xbeb   : > { %12173 = vmatprep.mubr.bf16.mxu1 %v11482_v25  ;;  %12255 = vmatprep.mubr.bf16.mxu0 %v11482_v25  ;;  %v19668_v25 = vld [vmem:[#allocation15 + $0x7ac] ss:$16 sps:$4 sm:$0xff]  }
 0xbec   : > { %12174 = vmatmul.mubr.bf16.vlgmr.msra.gmra.mrb[40].mxu1 %v11475_v11  ;;  %12256 = vmatmul.mubr.bf16.vlgmr.msra.gmra.mrb[44].mxu0 %v11475_v11  ;;  %v19663_v11 = vld [vmem:[#allocation15 + $0x7a0] ss:$16 sps:$4 sm:$0xff]  }
 0xbed   : > { %12183 = vmatpush1.bf16.msra.mxu1 %v19585_v44  ;;  %12265 = vmatpush1.bf16.msra.mxu0 %v19588_v18  ;;  %v11202_v44 = vld [vmem:[#allocation6 + $0x10] sm:$0xff] }
 0xbee   : > { %12214 = vmatprep.mubr.bf16.mxu1 %v11496_v46  ;;  %12296 = vmatprep.mubr.bf16.mxu0 %v11496_v46  ;;  %v11206_v18 = vld [vmem:[#allocation6 + $0x30] sm:$0x3] }
 0xbef   : > { %12184 = vmatprep.subr.bf16.mxu1 %v19593_v27  ;;  %12266 = vmatprep.subr.bf16.mxu0 %v19596_v29  ;;  %v19671_v27 = vld [vmem:[#allocation15 + $0x7c4] ss:$16 sps:$4 sm:$0xff]   ;;  %v19674_v29 = vld [vmem:[#allocation15 + $0x7cc] ss:$16 sps:$4 sm:$0xff]   ;;  %v22106_v46 = vpack.c.bf16 %v11206_v18, %v11202_v44  ;;  %v19735_v44 = vld [vmem:[#allocation15 + $0x120] ss:$16 sps:$4 sm:$0xff]  }
 0xbf0   : > { %v19738_v18 = vld [vmem:[#allocation15 + $0x128] ss:$16 sps:$4 sm:$0xff]  }
 0xbf1   : > { %12185 = vmatpush1.bf16.msra.mxu1 %v19591_v22  ;;  %12267 = vmatpush1.bf16.msra.mxu0 %v19594_v35  ;;  %v19669_v22 = vld [vmem:[#allocation15 + $0x7c0] ss:$16 sps:$4 sm:$0xff]   ;;  %v19672_v35 = vld [vmem:[#allocation15 + $0x7c8] ss:$16 sps:$4 sm:$0xff]  }
 0xbf2   : > { %12186 = vmatprep.subr.bf16.mxu1 %v19599_v30  ;;  %12268 = vmatprep.subr.bf16.mxu0 %v19602_v31  ;;  %v19677_v30 = vld [vmem:[#allocation15 + $0x7e4] ss:$16 sps:$4 sm:$0xff]   ;;  %v19680_v31 = vld [vmem:[#allocation15 + $0x7ec] ss:$16 sps:$4 sm:$0xff]  }
 0xbf5   : > { %12187 = vmatpush1.bf16.msra.mxu1 %v19597_v32  ;;  %12269 = vmatpush1.bf16.msra.mxu0 %v19600_v9  ;;  %v11486_v32 = vshll.u32 %v22106_v46, 16  ;;  %v19675_v9 = vld [vmem:[#allocation15 + $0x7e0] ss:$16 sps:$4 sm:$0xff]  }
 0xbf6   : > { %12188 = vmatprep.subr.bf16.mxu1 %v19605_v34  ;;  %12270 = vmatprep.subr.bf16.mxu0 %v19608_v24  ;;  %v19678_v34 = vld [vmem:[#allocation15 + $0x7e8] ss:$16 sps:$4 sm:$0xff]  }
 0xbf7   : > { %v11488_v24 = vrot.slane %v11486_v32, 1  ;;  %v19755_v32 = vld [vmem:[#allocation15 + $0x184] ss:$16 sps:$4 sm:$0xff]  }
 0xbf9   : > { %12189 = vmatpush1.bf16.msra.mxu1 %v19603_v43  ;;  %12271 = vmatpush1.bf16.msra.mxu0 %v19606_v45  ;;  %v19683_v43 = vld [vmem:[#allocation15 + $0x4] ss:$16 sps:$4 sm:$0xff]   ;;  %v19686_v45 = vld [vmem:[#allocation15 + $0xc] ss:$16 sps:$4 sm:$0xff]  }
 0xbfa   : > { %12190 = vmatprep.subr.bf16.mxu1 %v19611_v0  ;;  %12272 = vmatprep.subr.bf16.mxu0 %v19614_v40  ;;  %v11484_v0 = vshrl.u32 %v22106_v46, 16  ;;  %v19681_v40 = vld [vmem:[#allocation15] ss:$16 sps:$4 sm:$0xff]  }
 0xbfd   : > { %12191 = vmatpush1.bf16.msra.mxu1 %v19609_v47  ;;  %12273 = vmatpush1.bf16.msra.mxu0 %v19612_v49  ;;  %v11489_v47 = vor.u32 %v11488_v24, %v11484_v0  ;;  %v19684_v49 = vld [vmem:[#allocation15 + $0x8] ss:$16 sps:$4 sm:$0xff]   ;;  %v19759_v0 = vld [vmem:[#allocation15 + $0x1a0] ss:$16 sps:$4 sm:$0xff]  }
 0xbfe   : > { %12192 = vmatprep.subr.bf16.mxu1 %v19617_v53  ;;  %12274 = vmatprep.subr.bf16.mxu0 %v19620_v50  ;;  %v19689_v53 = vld [vmem:[#allocation15 + $0x24] ss:$16 sps:$4 sm:$0xff]   ;;  %v19692_v50 = vld [vmem:[#allocation15 + $0x2c] ss:$16 sps:$4 sm:$0xff]   ;;  %v19756_v24 = vld [vmem:[#allocation15 + $0x188] ss:$16 sps:$4 sm:$0xff]  }
 0xc01   : > { %12193 = vmatpush1.bf16.msra.mxu1 %v19615_v62  ;;  %12275 = vmatpush1.bf16.msra.mxu0 %v19618_v51  ;;  %v19687_v62 = vld [vmem:[#allocation15 + $0x20] ss:$16 sps:$4 sm:$0xff]   ;;  %v19690_v51 = vld [vmem:[#allocation15 + $0x28] ss:$16 sps:$4 sm:$0xff]  }
 0xc02   : > { %12194 = vmatprep.subr.bf16.mxu1 %v19623_v41  ;;  %12276 = vmatprep.subr.bf16.mxu0 %v19626_v52  ;;  %v19695_v41 = vld [vmem:[#allocation15 + $0x44] ss:$16 sps:$4 sm:$0xff]   ;;  %v19698_v52 = vld [vmem:[#allocation15 + $0x4c] ss:$16 sps:$4 sm:$0xff]  }
 0xc05   : > { %12195 = vmatpush1.bf16.msra.mxu1 %v19621_v54  ;;  %12277 = vmatpush1.bf16.msra.mxu0 %v19624_v55  ;;  %v19693_v54 = vld [vmem:[#allocation15 + $0x40] ss:$16 sps:$4 sm:$0xff]   ;;  %v19696_v55 = vld [vmem:[#allocation15 + $0x48] ss:$16 sps:$4 sm:$0xff]  }
 0xc06   : > { %12196 = vmatprep.subr.bf16.mxu1 %v19629_v56  ;;  %12278 = vmatprep.subr.bf16.mxu0 %v19632_v28  ;;  %v19701_v56 = vld [vmem:[#allocation15 + $0x64] ss:$16 sps:$4 sm:$0xff]   ;;  %v19704_v28 = vld [vmem:[#allocation15 + $0x6c] ss:$16 sps:$4 sm:$0xff]  }
 0xc09   : > { %12197 = vmatpush1.bf16.msra.mxu1 %v19627_v60  ;;  %12279 = vmatpush1.bf16.msra.mxu0 %v19630_v38  ;;  %v19699_v60 = vld [vmem:[#allocation15 + $0x60] ss:$16 sps:$4 sm:$0xff]   ;;  %v19702_v38 = vld [vmem:[#allocation15 + $0x68] ss:$16 sps:$4 sm:$0xff]  }
 0xc0a   : > { %12198 = vmatprep.subr.bf16.mxu1 %v19635_v57  ;;  %12280 = vmatprep.subr.bf16.mxu0 %v19638_v42  ;;  %v19707_v57 = vld [vmem:[#allocation15 + $0x84] ss:$16 sps:$4 sm:$0xff]   ;;  %v19710_v42 = vld [vmem:[#allocation15 + $0x8c] ss:$16 sps:$4 sm:$0xff]  }
 0xc0d   : > { %12199 = vmatpush1.bf16.msra.mxu1 %v19633_v59  ;;  %12281 = vmatpush1.bf16.msra.mxu0 %v19636_v61  ;;  %v19705_v59 = vld [vmem:[#allocation15 + $0x80] ss:$16 sps:$4 sm:$0xff]   ;;  %v19708_v61 = vld [vmem:[#allocation15 + $0x88] ss:$16 sps:$4 sm:$0xff]  }
 0xc0e   : > { %12200 = vmatprep.subr.bf16.mxu1 %v19641_v1  ;;  %12282 = vmatprep.subr.bf16.mxu0 %v19644_v5  ;;  %v19713_v1 = vld [vmem:[#allocation15 + $0xa4] ss:$16 sps:$4 sm:$0xff]   ;;  %v19716_v5 = vld [vmem:[#allocation15 + $0xac] ss:$16 sps:$4 sm:$0xff]  }
 0xc11   : > { %12201 = vmatpush1.bf16.msra.mxu1 %v19639_v39  ;;  %12283 = vmatpush1.bf16.msra.mxu0 %v19642_v19  ;;  %v19711_v39 = vld [vmem:[#allocation15 + $0xa0] ss:$16 sps:$4 sm:$0xff]   ;;  %v19714_v19 = vld [vmem:[#allocation15 + $0xa8] ss:$16 sps:$4 sm:$0xff]  }
 0xc12   : > { %12202 = vmatprep.subr.bf16.mxu1 %v19647_v7  ;;  %12284 = vmatprep.subr.bf16.mxu0 %v19650_v8  ;;  %v19719_v7 = vld [vmem:[#allocation15 + $0xc4] ss:$16 sps:$4 sm:$0xff]   ;;  %v19722_v8 = vld [vmem:[#allocation15 + $0xcc] ss:$16 sps:$4 sm:$0xff]  }
 0xc15   : > { %12203 = vmatpush1.bf16.msra.mxu1 %v19645_v16  ;;  %12285 = vmatpush1.bf16.msra.mxu0 %v19648_v4  ;;  %v19717_v16 = vld [vmem:[#allocation15 + $0xc0] ss:$16 sps:$4 sm:$0xff]   ;;  %v19720_v4 = vld [vmem:[#allocation15 + $0xc8] ss:$16 sps:$4 sm:$0xff]  }
 0xc16   : > { %12204 = vmatprep.subr.bf16.mxu1 %v19653_v26  ;;  %12286 = vmatprep.subr.bf16.mxu0 %v19656_v14  ;;  %v19725_v26 = vld [vmem:[#allocation15 + $0xe4] ss:$16 sps:$4 sm:$0xff]   ;;  %v19728_v14 = vld [vmem:[#allocation15 + $0xec] ss:$16 sps:$4 sm:$0xff]  }
 0xc19   : > { %12205 = vmatpush1.bf16.msra.mxu1 %v19651_v48  ;;  %12287 = vmatpush1.bf16.msra.mxu0 %v19654_v17  ;;  %v19723_v48 = vld [vmem:[#allocation15 + $0xe0] ss:$16 sps:$4 sm:$0xff]   ;;  %v19726_v17 = vld [vmem:[#allocation15 + $0xe8] ss:$16 sps:$4 sm:$0xff]  }
 0xc1a   : > { %12206 = vmatprep.subr.bf16.mxu1 %v19659_v33  ;;  %12288 = vmatprep.subr.bf16.mxu0 %v19662_v20  ;;  %v19731_v33 = vld [vmem:[#allocation15 + $0x104] ss:$16 sps:$4 sm:$0xff]   ;;  %v19734_v20 = vld [vmem:[#allocation15 + $0x10c] ss:$16 sps:$4 sm:$0xff]  }
 0xc1d   : > { %12207 = vmatpush1.bf16.msra.mxu1 %v19657_v12  ;;  %12289 = vmatpush1.bf16.msra.mxu0 %v19660_v10  ;;  %v19729_v12 = vld [vmem:[#allocation15 + $0x100] ss:$16 sps:$4 sm:$0xff]   ;;  %v19732_v10 = vld [vmem:[#allocation15 + $0x108] ss:$16 sps:$4 sm:$0xff]  }
 0xc1e   : > { %12208 = vmatprep.subr.bf16.mxu1 %v19665_v21  ;;  %12290 = vmatprep.subr.bf16.mxu0 %v19668_v25  ;;  %v19737_v21 = vld [vmem:[#allocation15 + $0x124] ss:$16 sps:$4 sm:$0xff]   ;;  %v19740_v25 = vld [vmem:[#allocation15 + $0x12c] ss:$16 sps:$4 sm:$0xff]  }
 0xc21   : > { %12209 = vmatpush1.bf16.msra.mxu1 %v19663_v11  ;;  %12291 = vmatpush1.bf16.msra.mxu0 %v19666_v3  ;;  %v19743_v11 = vld [vmem:[#allocation15 + $0x144] ss:$16 sps:$4 sm:$0xff]   ;;  %v19746_v3 = vld [vmem:[#allocation15 + $0x14c] ss:$16 sps:$4 sm:$0xff]  }
 0xc22   : > { %12210 = vmatprep.subr.bf16.mxu1 %v19671_v27  ;;  %12292 = vmatprep.subr.bf16.mxu0 %v19674_v29  ;;  %v19741_v27 = vld [vmem:[#allocation15 + $0x140] ss:$16 sps:$4 sm:$0xff]   ;;  %v19744_v29 = vld [vmem:[#allocation15 + $0x148] ss:$16 sps:$4 sm:$0xff]  }
 0xc25   : > { %12211 = vmatpush1.bf16.msra.mxu1 %v19669_v22  ;;  %12293 = vmatpush1.bf16.msra.mxu0 %v19672_v35  ;;  %v19749_v22 = vld [vmem:[#allocation15 + $0x164] ss:$16 sps:$4 sm:$0xff]   ;;  %v19752_v35 = vld [vmem:[#allocation15 + $0x16c] ss:$16 sps:$4 sm:$0xff]  }
 0xc26   : > { %12212 = vmatprep.subr.bf16.mxu1 %v19677_v30  ;;  %12294 = vmatprep.subr.bf16.mxu0 %v19680_v31  ;;  %v19747_v30 = vld [vmem:[#allocation15 + $0x160] ss:$16 sps:$4 sm:$0xff]   ;;  %v19750_v31 = vld [vmem:[#allocation15 + $0x168] ss:$16 sps:$4 sm:$0xff]  }
 0xc29   : > { %12213 = vmatpush1.bf16.msra.mxu1 %v19675_v9  ;;  %12295 = vmatpush1.bf16.msra.mxu0 %v19678_v34  ;;  %v19758_v9 = vld [vmem:[#allocation15 + $0x18c] ss:$16 sps:$4 sm:$0xff]   ;;  %v19753_v34 = vld [vmem:[#allocation15 + $0x180] ss:$16 sps:$4 sm:$0xff]  }
 0xc2a   : > { %12945 = vmatprep.subr.bf16.mxu1 %v19683_v43  ;;  %13027 = vmatprep.subr.bf16.mxu0 %v19686_v45  ;;  %v19761_v43 = vld [vmem:[#allocation15 + $0x1a4] ss:$16 sps:$4 sm:$0xff]   ;;  %v19764_v45 = vld [vmem:[#allocation15 + $0x1ac] ss:$16 sps:$4 sm:$0xff]  }
 0xc2c   : > { %12215 = vmatmul.mubr.bf16.vlgmr.msra.gmra.mrb[40].mxu1 %v11489_v47  ;;  %12297 = vmatmul.mubr.bf16.vlgmr.msra.gmra.mrb[44].mxu0 %v11489_v47  ;;  %v19767_v47 = vld [vmem:[#allocation15 + $0x1c4] ss:$16 sps:$4 sm:$0xff]  }
 0xc2d   : > { %12946 = vmatpush1.bf16.msra.mxu1 %v19681_v40  ;;  %12977 = vmatprep.mubr.bf16.mxu1 %v22096_v6  ;;  %v19762_v40 = vld [vmem:[#allocation15 + $0x1a8] ss:$16 sps:$4 sm:$0xff]  }
 0xc2e   : > { %13028 = vmatpush1.bf16.msra.mxu0 %v19684_v49  ;;  %13059 = vmatprep.mubr.bf16.mxu0 %v22096_v6  ;;  %v19770_v49 = vld [vmem:[#allocation15 + $0x1cc] ss:$16 sps:$4 sm:$0xff]  }
 0xc2f   : > { %12947 = vmatprep.subr.bf16.mxu1 %v19689_v53  ;;  %13029 = vmatprep.subr.bf16.mxu0 %v19692_v50  ;;  %v19765_v53 = vld [vmem:[#allocation15 + $0x1c0] ss:$16 sps:$4 sm:$0xff]   ;;  %v19768_v50 = vld [vmem:[#allocation15 + $0x1c8] ss:$16 sps:$4 sm:$0xff]  }
 0xc31   : > { %12948 = vmatpush1.bf16.msra.mxu1 %v19687_v62  ;;  %v19773_v62 = vld [vmem:[#allocation15 + $0x1e4] ss:$16 sps:$4 sm:$0xff]  }
 0xc32   : > { %13030 = vmatpush1.bf16.msra.mxu0 %v19690_v51  ;;  %12949 = vmatprep.subr.bf16.mxu1 %v19695_v41  ;;  %v19776_v51 = vld [vmem:[#allocation15 + $0x1ec] ss:$16 sps:$4 sm:$0xff]   ;;  %v19771_v41 = vld [vmem:[#allocation15 + $0x1e0] ss:$16 sps:$4 sm:$0xff]  }
 0xc33   : > { %13031 = vmatprep.subr.bf16.mxu0 %v19698_v52  ;;  %v19774_v52 = vld [vmem:[#allocation15 + $0x1e8] ss:$16 sps:$4 sm:$0xff]  }
 0xc35   : > { %12950 = vmatpush1.bf16.msra.mxu1 %v19693_v54  ;;  %v19779_v54 = vld [vmem:[#allocation15 + $0x204] ss:$16 sps:$4 sm:$0xff]  }
 0xc36   : > { %13032 = vmatpush1.bf16.msra.mxu0 %v19696_v55  ;;  %12951 = vmatprep.subr.bf16.mxu1 %v19701_v56  ;;  %v19782_v55 = vld [vmem:[#allocation15 + $0x20c] ss:$16 sps:$4 sm:$0xff]   ;;  %v19777_v56 = vld [vmem:[#allocation15 + $0x200] ss:$16 sps:$4 sm:$0xff]  }
 0xc37   : > { %13033 = vmatprep.subr.bf16.mxu0 %v19704_v28  ;;  %v19780_v28 = vld [vmem:[#allocation15 + $0x208] ss:$16 sps:$4 sm:$0xff]  }
 0xc39   : > { %12952 = vmatpush1.bf16.msra.mxu1 %v19699_v60  ;;  %v19785_v60 = vld [vmem:[#allocation15 + $0x224] ss:$16 sps:$4 sm:$0xff]  }
 0xc3a   : > { %13034 = vmatpush1.bf16.msra.mxu0 %v19702_v38  ;;  %12953 = vmatprep.subr.bf16.mxu1 %v19707_v57  ;;  %v19788_v38 = vld [vmem:[#allocation15 + $0x22c] ss:$16 sps:$4 sm:$0xff]   ;;  %v19783_v57 = vld [vmem:[#allocation15 + $0x220] ss:$16 sps:$4 sm:$0xff]  }
 0xc3b   : > { %13035 = vmatprep.subr.bf16.mxu0 %v19710_v42  ;;  %v19786_v42 = vld [vmem:[#allocation15 + $0x228] ss:$16 sps:$4 sm:$0xff]  }
 0xc3d   : > { %12954 = vmatpush1.bf16.msra.mxu1 %v19705_v59  ;;  %v19791_v59 = vld [vmem:[#allocation15 + $0x244] ss:$16 sps:$4 sm:$0xff]  }
 0xc3e   : > { %13036 = vmatpush1.bf16.msra.mxu0 %v19708_v61  ;;  %12955 = vmatprep.subr.bf16.mxu1 %v19713_v1  ;;  %v19794_v61 = vld [vmem:[#allocation15 + $0x24c] ss:$16 sps:$4 sm:$0xff]   ;;  %v19789_v1 = vld [vmem:[#allocation15 + $0x240] ss:$16 sps:$4 sm:$0xff]  }
 0xc3f   : > { %13037 = vmatprep.subr.bf16.mxu0 %v19716_v5  ;;  %v19792_v5 = vld [vmem:[#allocation15 + $0x248] ss:$16 sps:$4 sm:$0xff]  }
 0xc41   : > { %12956 = vmatpush1.bf16.msra.mxu1 %v19711_v39  ;;  %v19797_v39 = vld [vmem:[#allocation15 + $0x264] ss:$16 sps:$4 sm:$0xff]  }
 0xc42   : > { %13038 = vmatpush1.bf16.msra.mxu0 %v19714_v19  ;;  %12957 = vmatprep.subr.bf16.mxu1 %v19719_v7  ;;  %v19800_v19 = vld [vmem:[#allocation15 + $0x26c] ss:$16 sps:$4 sm:$0xff]   ;;  %v19795_v7 = vld [vmem:[#allocation15 + $0x260] ss:$16 sps:$4 sm:$0xff]  }
 0xc43   : > { %13039 = vmatprep.subr.bf16.mxu0 %v19722_v8  ;;  %v19798_v8 = vld [vmem:[#allocation15 + $0x268] ss:$16 sps:$4 sm:$0xff]  }
 0xc45   : > { %12958 = vmatpush1.bf16.msra.mxu1 %v19717_v16  ;;  %v19803_v16 = vld [vmem:[#allocation15 + $0x284] ss:$16 sps:$4 sm:$0xff]  }
 0xc46   : > { %13040 = vmatpush1.bf16.msra.mxu0 %v19720_v4  ;;  %12959 = vmatprep.subr.bf16.mxu1 %v19725_v26  ;;  %v19806_v4 = vld [vmem:[#allocation15 + $0x28c] ss:$16 sps:$4 sm:$0xff]   ;;  %v19801_v26 = vld [vmem:[#allocation15 + $0x280] ss:$16 sps:$4 sm:$0xff]  }
 0xc47   : > { %13041 = vmatprep.subr.bf16.mxu0 %v19728_v14  ;;  %v19804_v14 = vld [vmem:[#allocation15 + $0x288] ss:$16 sps:$4 sm:$0xff]  }
 0xc49   : > { %12960 = vmatpush1.bf16.msra.mxu1 %v19723_v48  ;;  %v19809_v48 = vld [vmem:[#allocation15 + $0x2a4] ss:$16 sps:$4 sm:$0xff]  }
 0xc4a   : > { %13042 = vmatpush1.bf16.msra.mxu0 %v19726_v17  ;;  %12961 = vmatprep.subr.bf16.mxu1 %v19731_v33  ;;  %v19812_v17 = vld [vmem:[#allocation15 + $0x2ac] ss:$16 sps:$4 sm:$0xff]   ;;  %v19807_v33 = vld [vmem:[#allocation15 + $0x2a0] ss:$16 sps:$4 sm:$0xff]  }
 0xc4b   : > { %13043 = vmatprep.subr.bf16.mxu0 %v19734_v20  ;;  %v19810_v20 = vld [vmem:[#allocation15 + $0x2a8] ss:$16 sps:$4 sm:$0xff]  }
 0xc4d   : > { %12962 = vmatpush1.bf16.msra.mxu1 %v19729_v12  ;;  %v19815_v12 = vld [vmem:[#allocation15 + $0x2c4] ss:$16 sps:$4 sm:$0xff]  }
 0xc4e   : > { %13044 = vmatpush1.bf16.msra.mxu0 %v19732_v10  ;;  %12963 = vmatprep.subr.bf16.mxu1 %v19737_v21  ;;  %v19818_v10 = vld [vmem:[#allocation15 + $0x2cc] ss:$16 sps:$4 sm:$0xff]   ;;  %v19813_v21 = vld [vmem:[#allocation15 + $0x2c0] ss:$16 sps:$4 sm:$0xff]  }
 0xc4f   : > { %13045 = vmatprep.subr.bf16.mxu0 %v19740_v25  ;;  %v19816_v25 = vld [vmem:[#allocation15 + $0x2c8] ss:$16 sps:$4 sm:$0xff]  }
 0xc51   : > { %12964 = vmatpush1.bf16.msra.mxu1 %v19735_v44  ;;  %v19821_v44 = vld [vmem:[#allocation15 + $0x2e4] ss:$16 sps:$4 sm:$0xff]  }
 0xc52   : > { %13046 = vmatpush1.bf16.msra.mxu0 %v19738_v18  ;;  %12965 = vmatprep.subr.bf16.mxu1 %v19743_v11  ;;  %v19824_v18 = vld [vmem:[#allocation15 + $0x2ec] ss:$16 sps:$4 sm:$0xff]   ;;  %v19819_v11 = vld [vmem:[#allocation15 + $0x2e0] ss:$16 sps:$4 sm:$0xff]  }
 0xc53   : > { %13047 = vmatprep.subr.bf16.mxu0 %v19746_v3  ;;  %v19822_v3 = vld [vmem:[#allocation15 + $0x2e8] ss:$16 sps:$4 sm:$0xff]  }
 0xc55   : > { %12966 = vmatpush1.bf16.msra.mxu1 %v19741_v27  ;;  %v19827_v27 = vld [vmem:[#allocation15 + $0x304] ss:$16 sps:$4 sm:$0xff]  }
 0xc56   : > { %13048 = vmatpush1.bf16.msra.mxu0 %v19744_v29  ;;  %12967 = vmatprep.subr.bf16.mxu1 %v19749_v22  ;;  %v19830_v29 = vld [vmem:[#allocation15 + $0x30c] ss:$16 sps:$4 sm:$0xff]   ;;  %v19825_v22 = vld [vmem:[#allocation15 + $0x300] ss:$16 sps:$4 sm:$0xff]  }
 0xc57   : > { %13049 = vmatprep.subr.bf16.mxu0 %v19752_v35  ;;  %v19828_v35 = vld [vmem:[#allocation15 + $0x308] ss:$16 sps:$4 sm:$0xff]  }
 0xc59   : > { %12968 = vmatpush1.bf16.msra.mxu1 %v19747_v30  ;;  %v19833_v30 = vld [vmem:[#allocation15 + $0x324] ss:$16 sps:$4 sm:$0xff]  }
 0xc5a   : > { %13050 = vmatpush1.bf16.msra.mxu0 %v19750_v31  ;;  %12969 = vmatprep.subr.bf16.mxu1 %v19755_v32  ;;  %v19836_v31 = vld [vmem:[#allocation15 + $0x32c] ss:$16 sps:$4 sm:$0xff]   ;;  %v19831_v32 = vld [vmem:[#allocation15 + $0x320] ss:$16 sps:$4 sm:$0xff]  }
 0xc5b   : > { %13051 = vmatprep.subr.bf16.mxu0 %v19758_v9  ;;  %v19834_v9 = vld [vmem:[#allocation15 + $0x328] ss:$16 sps:$4 sm:$0xff]  }
 0xc5d   : > { %12970 = vmatpush1.bf16.msra.mxu1 %v19753_v34  ;;  %v19839_v34 = vld [vmem:[#allocation15 + $0x344] ss:$16 sps:$4 sm:$0xff]  }
 0xc5e   : > { %13052 = vmatpush1.bf16.msra.mxu0 %v19756_v24  ;;  %12971 = vmatprep.subr.bf16.mxu1 %v19761_v43  ;;  %v19842_v24 = vld [vmem:[#allocation15 + $0x34c] ss:$16 sps:$4 sm:$0xff]   ;;  %v19837_v43 = vld [vmem:[#allocation15 + $0x340] ss:$16 sps:$4 sm:$0xff]  }
 0xc5f   : > { %13053 = vmatprep.subr.bf16.mxu0 %v19764_v45  ;;  %v19840_v45 = vld [vmem:[#allocation15 + $0x348] ss:$16 sps:$4 sm:$0xff]  }
 0xc61   : > { %12972 = vmatpush1.bf16.msra.mxu1 %v19759_v0  ;;  %v19845_v0 = vld [vmem:[#allocation15 + $0x364] ss:$16 sps:$4 sm:$0xff]  }
 0xc62   : > { %13054 = vmatpush1.bf16.msra.mxu0 %v19762_v40  ;;  %12973 = vmatprep.subr.bf16.mxu1 %v19767_v47  ;;  %v19848_v40 = vld [vmem:[#allocation15 + $0x36c] ss:$16 sps:$4 sm:$0xff]   ;;  %v19843_v47 = vld [vmem:[#allocation15 + $0x360] ss:$16 sps:$4 sm:$0xff]  }
 0xc63   : > { %13055 = vmatprep.subr.bf16.mxu0 %v19770_v49  ;;  %v19846_v49 = vld [vmem:[#allocation15 + $0x368] ss:$16 sps:$4 sm:$0xff]  }
 0xc65   : > { %12974 = vmatpush1.bf16.msra.mxu1 %v19765_v53  ;;  %v19851_v53 = vld [vmem:[#allocation15 + $0x384] ss:$16 sps:$4 sm:$0xff]  }
 0xc66   : > { %13056 = vmatpush1.bf16.msra.mxu0 %v19768_v50  ;;  %12975 = vmatprep.subr.bf16.mxu1 %v19773_v62  ;;  %v19854_v50 = vld [vmem:[#allocation15 + $0x38c] ss:$16 sps:$4 sm:$0xff]   ;;  %v19849_v62 = vld [vmem:[#allocation15 + $0x380] ss:$16 sps:$4 sm:$0xff]  }
 0xc67   : > { %13057 = vmatprep.subr.bf16.mxu0 %v19776_v51  ;;  %v19852_v51 = vld [vmem:[#allocation15 + $0x388] ss:$16 sps:$4 sm:$0xff]  }
 0xc69   : > { %12976 = vmatpush1.bf16.msra.mxu1 %v19771_v41  ;;  %v19857_v41 = vld [vmem:[#allocation15 + $0x3a4] ss:$16 sps:$4 sm:$0xff]  }
 0xc6a   : > { %13058 = vmatpush1.bf16.msra.mxu0 %v19774_v52  ;;  %12986 = vmatprep.subr.bf16.mxu1 %v19779_v54  ;;  %v19860_v52 = vld [vmem:[#allocation15 + $0x3ac] ss:$16 sps:$4 sm:$0xff]   ;;  %v19855_v54 = vld [vmem:[#allocation15 + $0x3a0] ss:$16 sps:$4 sm:$0xff]  }
 0xc6b   : > { %13068 = vmatprep.subr.bf16.mxu0 %v19782_v55  ;;  %v19858_v55 = vld [vmem:[#allocation15 + $0x3a8] ss:$16 sps:$4 sm:$0xff]  }
 0xc6c   : > { %12978 = vmatmul.mubr.bf16.vlgmr.msra.gmra.mrb[40].mxu1 %v22094_v63 }
 0xc6d   : > { %13060 = vmatmul.mubr.bf16.vlgmr.msra.gmra.mrb[44].mxu0 %v22094_v63  ;;  %12987 = vmatpush1.bf16.msra.mxu1 %v19777_v56  ;;  %v19863_v56 = vld [vmem:[#allocation15 + $0x3c4] ss:$16 sps:$4 sm:$0xff]  }
 0xc6e   : > { %13018 = vmatprep.mubr.bf16.mxu1 %v22099_v2  ;;  %13069 = vmatpush1.bf16.msra.mxu0 %v19780_v28  ;;  %v19866_v28 = vld [vmem:[#allocation15 + $0x3cc] ss:$16 sps:$4 sm:$0xff]  }
 0xc6f   : > { %13100 = vmatprep.mubr.bf16.mxu0 %v22099_v2  ;;  %12988 = vmatprep.subr.bf16.mxu1 %v19785_v60  ;;  %v19861_v60 = vld [vmem:[#allocation15 + $0x3c0] ss:$16 sps:$4 sm:$0xff]  }
 0xc70   : > { %13070 = vmatprep.subr.bf16.mxu0 %v19788_v38  ;;  %v19864_v38 = vld [vmem:[#allocation15 + $0x3c8] ss:$16 sps:$4 sm:$0xff]  }
 0xc71   : > { %12989 = vmatpush1.bf16.msra.mxu1 %v19783_v57  ;;  %v19869_v57 = vld [vmem:[#allocation15 + $0x3e4] ss:$16 sps:$4 sm:$0xff]  }
 0xc72   : > { %13071 = vmatpush1.bf16.msra.mxu0 %v19786_v42  ;;  %12990 = vmatprep.subr.bf16.mxu1 %v19791_v59  ;;  %v19872_v42 = vld [vmem:[#allocation15 + $0x3ec] ss:$16 sps:$4 sm:$0xff]   ;;  %v19867_v59 = vld [vmem:[#allocation15 + $0x3e0] ss:$16 sps:$4 sm:$0xff]  }
 0xc73   : > { %13072 = vmatprep.subr.bf16.mxu0 %v19794_v61  ;;  %v19870_v61 = vld [vmem:[#allocation15 + $0x3e8] ss:$16 sps:$4 sm:$0xff]  }
 0xc75   : > { %12991 = vmatpush1.bf16.msra.mxu1 %v19789_v1  ;;  %v19875_v1 = vld [vmem:[#allocation15 + $0x804] ss:$16 sps:$4 sm:$0xff]  }
 0xc76   : > { %13073 = vmatpush1.bf16.msra.mxu0 %v19792_v5  ;;  %12992 = vmatprep.subr.bf16.mxu1 %v19797_v39  ;;  %v19878_v5 = vld [vmem:[#allocation15 + $0x80c] ss:$16 sps:$4 sm:$0xff]   ;;  %v19873_v39 = vld [vmem:[#allocation15 + $0x800] ss:$16 sps:$4 sm:$0xff]  }
 0xc77   : > { %13074 = vmatprep.subr.bf16.mxu0 %v19800_v19  ;;  %v19876_v19 = vld [vmem:[#allocation15 + $0x808] ss:$16 sps:$4 sm:$0xff]  }
 0xc79   : > { %12993 = vmatpush1.bf16.msra.mxu1 %v19795_v7  ;;  %v19881_v7 = vld [vmem:[#allocation15 + $0x824] ss:$16 sps:$4 sm:$0xff]  }
 0xc7a   : > { %13075 = vmatpush1.bf16.msra.mxu0 %v19798_v8  ;;  %12994 = vmatprep.subr.bf16.mxu1 %v19803_v16  ;;  %v13243_v8 = vrot.slane %v22096_v6, 1  ;;  %v19884_v16 = vld [vmem:[#allocation15 + $0x82c] ss:$16 sps:$4 sm:$0xff]  }
 0xc7b   : > { %13076 = vmatprep.subr.bf16.mxu0 %v19806_v4  ;;  %v19879_v4 = vld [vmem:[#allocation15 + $0x820] ss:$16 sps:$4 sm:$0xff]   ;;  %v19896_v6 = vld [vmem:[#allocation15 + $0x86c] ss:$16 sps:$4 sm:$0xff]  }
 0xc7d   : > { %12995 = vmatpush1.bf16.msra.mxu1 %v19801_v26  ;;  %v19882_v26 = vld [vmem:[#allocation15 + $0x828] ss:$16 sps:$4 sm:$0xff]  }
 0xc7e   : > { %13077 = vmatpush1.bf16.msra.mxu0 %v19804_v14  ;;  %12996 = vmatprep.subr.bf16.mxu1 %v19809_v48  ;;  %v19887_v14 = vld [vmem:[#allocation15 + $0x844] ss:$16 sps:$4 sm:$0xff]   ;;  %v19890_v48 = vld [vmem:[#allocation15 + $0x84c] ss:$16 sps:$4 sm:$0xff]  }
 0xc7f   : > { %13078 = vmatprep.subr.bf16.mxu0 %v19812_v17  ;;  %v19885_v17 = vld [vmem:[#allocation15 + $0x840] ss:$16 sps:$4 sm:$0xff]  }
 0xc81   : > { %12997 = vmatpush1.bf16.msra.mxu1 %v19807_v33  ;;  %v19888_v33 = vld [vmem:[#allocation15 + $0x848] ss:$16 sps:$4 sm:$0xff]  }
 0xc82   : > { %13079 = vmatpush1.bf16.msra.mxu0 %v19810_v20  ;;  %12998 = vmatprep.subr.bf16.mxu1 %v19815_v12  ;;  %v19893_v20 = vld [vmem:[#allocation15 + $0x864] ss:$16 sps:$4 sm:$0xff]   ;;  %v19891_v12 = vld [vmem:[#allocation15 + $0x860] ss:$16 sps:$4 sm:$0xff]  }
 0xc83   : > { %13080 = vmatprep.subr.bf16.mxu0 %v19818_v10  ;;  %v19894_v10 = vld [vmem:[#allocation15 + $0x868] ss:$16 sps:$4 sm:$0xff]  }
 0xc85   : > { %12999 = vmatpush1.bf16.msra.mxu1 %v19813_v21  ;;  %v19899_v21 = vld [vmem:[#allocation15 + $0x884] ss:$16 sps:$4 sm:$0xff]  }
 0xc86   : > { %13081 = vmatpush1.bf16.msra.mxu0 %v19816_v25  ;;  %13000 = vmatprep.subr.bf16.mxu1 %v19821_v44  ;;  %v19902_v25 = vld [vmem:[#allocation15 + $0x88c] ss:$16 sps:$4 sm:$0xff]   ;;  %v19897_v44 = vld [vmem:[#allocation15 + $0x880] ss:$16 sps:$4 sm:$0xff]  }
 0xc87   : > { %13082 = vmatprep.subr.bf16.mxu0 %v19824_v18  ;;  %v19900_v18 = vld [vmem:[#allocation15 + $0x888] ss:$16 sps:$4 sm:$0xff]  }
 0xc89   : > { %13001 = vmatpush1.bf16.msra.mxu1 %v19819_v11  ;;  %v19905_v11 = vld [vmem:[#allocation15 + $0x8a4] ss:$16 sps:$4 sm:$0xff]  }
 0xc8a   : > { %13083 = vmatpush1.bf16.msra.mxu0 %v19822_v3  ;;  %13002 = vmatprep.subr.bf16.mxu1 %v19827_v27  ;;  %v19908_v3 = vld [vmem:[#allocation15 + $0x8ac] ss:$16 sps:$4 sm:$0xff]   ;;  %v19903_v27 = vld [vmem:[#allocation15 + $0x8a0] ss:$16 sps:$4 sm:$0xff]  }
 0xc8b   : > { %13084 = vmatprep.subr.bf16.mxu0 %v19830_v29  ;;  %v19906_v29 = vld [vmem:[#allocation15 + $0x8a8] ss:$16 sps:$4 sm:$0xff]  }
 0xc8d   : > { %13003 = vmatpush1.bf16.msra.mxu1 %v19825_v22  ;;  %v19911_v22 = vld [vmem:[#allocation15 + $0x8c4] ss:$16 sps:$4 sm:$0xff]  }
 0xc8e   : > { %13085 = vmatpush1.bf16.msra.mxu0 %v19828_v35  ;;  %13004 = vmatprep.subr.bf16.mxu1 %v19833_v30  ;;  %v19914_v35 = vld [vmem:[#allocation15 + $0x8cc] ss:$16 sps:$4 sm:$0xff]   ;;  %v19909_v30 = vld [vmem:[#allocation15 + $0x8c0] ss:$16 sps:$4 sm:$0xff]  }
 0xc8f   : > { %13086 = vmatprep.subr.bf16.mxu0 %v19836_v31  ;;  %v19912_v31 = vld [vmem:[#allocation15 + $0x8c8] ss:$16 sps:$4 sm:$0xff]  }
 0xc91   : > { %13005 = vmatpush1.bf16.msra.mxu1 %v19831_v32  ;;  %v19917_v32 = vld [vmem:[#allocation15 + $0x8e4] ss:$16 sps:$4 sm:$0xff]  }
 0xc92   : > { %13087 = vmatpush1.bf16.msra.mxu0 %v19834_v9  ;;  %13006 = vmatprep.subr.bf16.mxu1 %v19839_v34  ;;  %v19920_v9 = vld [vmem:[#allocation15 + $0x8ec] ss:$16 sps:$4 sm:$0xff]   ;;  %v19915_v34 = vld [vmem:[#allocation15 + $0x8e0] ss:$16 sps:$4 sm:$0xff]  }
 0xc93   : > { %13088 = vmatprep.subr.bf16.mxu0 %v19842_v24  ;;  %v19918_v24 = vld [vmem:[#allocation15 + $0x8e8] ss:$16 sps:$4 sm:$0xff]  }
 0xc95   : > { %13007 = vmatpush1.bf16.msra.mxu1 %v19837_v43  ;;  %v19923_v43 = vld [vmem:[#allocation15 + $0x904] ss:$16 sps:$4 sm:$0xff]  }
 0xc96   : > { %13089 = vmatpush1.bf16.msra.mxu0 %v19840_v45  ;;  %13008 = vmatprep.subr.bf16.mxu1 %v19845_v0  ;;  %v19926_v45 = vld [vmem:[#allocation15 + $0x90c] ss:$16 sps:$4 sm:$0xff]   ;;  %v19921_v0 = vld [vmem:[#allocation15 + $0x900] ss:$16 sps:$4 sm:$0xff]  }
 0xc97   : > { %13090 = vmatprep.subr.bf16.mxu0 %v19848_v40  ;;  %v19924_v40 = vld [vmem:[#allocation15 + $0x908] ss:$16 sps:$4 sm:$0xff]  }
 0xc99   : > { %13009 = vmatpush1.bf16.msra.mxu1 %v19843_v47  ;;  %v19929_v47 = vld [vmem:[#allocation15 + $0x924] ss:$16 sps:$4 sm:$0xff]  }
 0xc9a   : > { %13091 = vmatpush1.bf16.msra.mxu0 %v19846_v49  ;;  %13010 = vmatprep.subr.bf16.mxu1 %v19851_v53  ;;  %v19932_v49 = vld [vmem:[#allocation15 + $0x92c] ss:$16 sps:$4 sm:$0xff]   ;;  %v19927_v53 = vld [vmem:[#allocation15 + $0x920] ss:$16 sps:$4 sm:$0xff]  }
 0xc9b   : > { %13092 = vmatprep.subr.bf16.mxu0 %v19854_v50  ;;  %v19930_v50 = vld [vmem:[#allocation15 + $0x928] ss:$16 sps:$4 sm:$0xff]  }
 0xc9d   : > { %13011 = vmatpush1.bf16.msra.mxu1 %v19849_v62  ;;  %v19935_v62 = vld [vmem:[#allocation15 + $0x944] ss:$16 sps:$4 sm:$0xff]  }
 0xc9e   : > { %13093 = vmatpush1.bf16.msra.mxu0 %v19852_v51  ;;  %13012 = vmatprep.subr.bf16.mxu1 %v19857_v41  ;;  %v19938_v51 = vld [vmem:[#allocation15 + $0x94c] ss:$16 sps:$4 sm:$0xff]   ;;  %v19933_v41 = vld [vmem:[#allocation15 + $0x940] ss:$16 sps:$4 sm:$0xff]  }
 0xc9f   : > { %13094 = vmatprep.subr.bf16.mxu0 %v19860_v52  ;;  %v19936_v52 = vld [vmem:[#allocation15 + $0x948] ss:$16 sps:$4 sm:$0xff]  }
 0xca1   : > { %13013 = vmatpush1.bf16.msra.mxu1 %v19855_v54  ;;  %v19941_v54 = vld [vmem:[#allocation15 + $0x964] ss:$16 sps:$4 sm:$0xff]  }
 0xca2   : > { %13095 = vmatpush1.bf16.msra.mxu0 %v19858_v55  ;;  %13014 = vmatprep.subr.bf16.mxu1 %v19863_v56  ;;  %v19944_v55 = vld [vmem:[#allocation15 + $0x96c] ss:$16 sps:$4 sm:$0xff]   ;;  %v19939_v56 = vld [vmem:[#allocation15 + $0x960] ss:$16 sps:$4 sm:$0xff]  }
 0xca3   : > { %13096 = vmatprep.subr.bf16.mxu0 %v19866_v28  ;;  %v19942_v28 = vld [vmem:[#allocation15 + $0x968] ss:$16 sps:$4 sm:$0xff]  }
 0xca5   : > { %13015 = vmatpush1.bf16.msra.mxu1 %v19861_v60  ;;  %v19947_v60 = vld [vmem:[#allocation15 + $0x984] ss:$16 sps:$4 sm:$0xff]  }
 0xca6   : > { %13097 = vmatpush1.bf16.msra.mxu0 %v19864_v38  ;;  %13016 = vmatprep.subr.bf16.mxu1 %v19869_v57  ;;  %v19950_v38 = vld [vmem:[#allocation15 + $0x98c] ss:$16 sps:$4 sm:$0xff]   ;;  %v19945_v57 = vld [vmem:[#allocation15 + $0x980] ss:$16 sps:$4 sm:$0xff]  }
 0xca7   : > { %13098 = vmatprep.subr.bf16.mxu0 %v19872_v42  ;;  %v19948_v42 = vld [vmem:[#allocation15 + $0x988] ss:$16 sps:$4 sm:$0xff]  }
 0xca9   : > { %13017 = vmatpush1.bf16.msra.mxu1 %v19867_v59  ;;  %v19953_v59 = vld [vmem:[#allocation15 + $0x9a4] ss:$16 sps:$4 sm:$0xff]  }
 0xcaa   : > { %13099 = vmatpush1.bf16.msra.mxu0 %v19870_v61  ;;  %13890 = vmatprep.subr.bf16.mxu1 %v19875_v1  ;;  %v19956_v61 = vld [vmem:[#allocation15 + $0x9ac] ss:$16 sps:$4 sm:$0xff]   ;;  %v19951_v1 = vld [vmem:[#allocation15 + $0x9a0] ss:$16 sps:$4 sm:$0xff]  }
 0xcab   : > { %13972 = vmatprep.subr.bf16.mxu0 %v19878_v5  ;;  %v19954_v5 = vld [vmem:[#allocation15 + $0x9a8] ss:$16 sps:$4 sm:$0xff]  }
 0xcac   : > { %13019 = vmatmul.mubr.bf16.vlgmr.msra.gmra.mrb[40].mxu1 %v22106_v46 }
 0xcad   : > { %13101 = vmatmul.mubr.bf16.vlgmr.msra.gmra.mrb[44].mxu0 %v22106_v46  ;;  %13891 = vmatpush1.bf16.msra.mxu1 %v19873_v39  ;;  %v19959_v39 = vld [vmem:[#allocation15 + $0x9c4] ss:$16 sps:$4 sm:$0xff]  }
 0xcae   : > { %13922 = vmatprep.mubr.bf16.mxu1 %v13243_v8  ;;  %13973 = vmatpush1.bf16.msra.mxu0 %v19876_v19  ;;  %v19962_v19 = vld [vmem:[#allocation15 + $0x9cc] ss:$16 sps:$4 sm:$0xff]  }
 0xcaf   : > { %14004 = vmatprep.mubr.bf16.mxu0 %v13243_v8  ;;  %13892 = vmatprep.subr.bf16.mxu1 %v19881_v7  ;;  %v19957_v7 = vld [vmem:[#allocation15 + $0x9c0] ss:$16 sps:$4 sm:$0xff]   ;;  %v19960_v8 = vld [vmem:[#allocation15 + $0x9c8] ss:$16 sps:$4 sm:$0xff]  }
 0xcb0   : > { %13974 = vmatprep.subr.bf16.mxu0 %v19884_v16  ;;  %v19965_v16 = vld [vmem:[#allocation15 + $0x9e4] ss:$16 sps:$4 sm:$0xff]  }
 0xcb1   : > { %13893 = vmatpush1.bf16.msra.mxu1 %v19879_v4  ;;  %v19968_v4 = vld [vmem:[#allocation15 + $0x9ec] ss:$16 sps:$4 sm:$0xff]  }
 0xcb2   : > { %13975 = vmatpush1.bf16.msra.mxu0 %v19882_v26  ;;  %13894 = vmatprep.subr.bf16.mxu1 %v19887_v14  ;;  %v19963_v26 = vld [vmem:[#allocation15 + $0x9e0] ss:$16 sps:$4 sm:$0xff]   ;;  %v19966_v14 = vld [vmem:[#allocation15 + $0x9e8] ss:$16 sps:$4 sm:$0xff]  }
 0xcb3   : > { %13976 = vmatprep.subr.bf16.mxu0 %v19890_v48  ;;  %v19971_v48 = vld [vmem:[#allocation15 + $0xa04] ss:$16 sps:$4 sm:$0xff]  }
 0xcb5   : > { %13895 = vmatpush1.bf16.msra.mxu1 %v19885_v17  ;;  %v19974_v17 = vld [vmem:[#allocation15 + $0xa0c] ss:$16 sps:$4 sm:$0xff]  }
 0xcb6   : > { %13977 = vmatpush1.bf16.msra.mxu0 %v19888_v33  ;;  %13896 = vmatprep.subr.bf16.mxu1 %v19893_v20  ;;  %v19969_v33 = vld [vmem:[#allocation15 + $0xa00] ss:$16 sps:$4 sm:$0xff]   ;;  %v13242_v20 = vrot.slane %v22094_v63, 1 }
 0xcb7   : > { %13978 = vmatprep.subr.bf16.mxu0 %v19896_v6  ;;  %v19972_v6 = vld [vmem:[#allocation15 + $0xa08] ss:$16 sps:$4 sm:$0xff]   ;;  %v19981_v63 = vld [vmem:[#allocation15 + $0xa40] ss:$16 sps:$4 sm:$0xff]  }
 0xcb9   : > { %13897 = vmatpush1.bf16.msra.mxu1 %v19891_v12  ;;  %v19977_v12 = vld [vmem:[#allocation15 + $0xa24] ss:$16 sps:$4 sm:$0xff]  }
 0xcba   : > { %13979 = vmatpush1.bf16.msra.mxu0 %v19894_v10  ;;  %13898 = vmatprep.subr.bf16.mxu1 %v19899_v21  ;;  %v13245_v10 = vrot.slane %v22099_v2, 1  ;;  %v19980_v21 = vld [vmem:[#allocation15 + $0xa2c] ss:$16 sps:$4 sm:$0xff]  }
 0xcbb   : > { %13980 = vmatprep.subr.bf16.mxu0 %v19902_v25  ;;  %v19975_v25 = vld [vmem:[#allocation15 + $0xa20] ss:$16 sps:$4 sm:$0xff]   ;;  %v19992_v2 = vld [vmem:[#allocation15 + $0xa6c] ss:$16 sps:$4 sm:$0xff]  }
 0xcbd   : > { %13899 = vmatpush1.bf16.msra.mxu1 %v19897_v44  ;;  %v19978_v44 = vld [vmem:[#allocation15 + $0xa28] ss:$16 sps:$4 sm:$0xff]  }
 0xcbe   : > { %13981 = vmatpush1.bf16.msra.mxu0 %v19900_v18  ;;  %13900 = vmatprep.subr.bf16.mxu1 %v19905_v11  ;;  %v19983_v18 = vld [vmem:[#allocation15 + $0xa44] ss:$16 sps:$4 sm:$0xff]   ;;  %v19986_v11 = vld [vmem:[#allocation15 + $0xa4c] ss:$16 sps:$4 sm:$0xff]  }
 0xcbf   : > { %13982 = vmatprep.subr.bf16.mxu0 %v19908_v3  ;;  %v19984_v3 = vld [vmem:[#allocation15 + $0xa48] ss:$16 sps:$4 sm:$0xff]  }
 0xcc1   : > { %13901 = vmatpush1.bf16.msra.mxu1 %v19903_v27  ;;  %v19989_v27 = vld [vmem:[#allocation15 + $0xa64] ss:$16 sps:$4 sm:$0xff]  }
 0xcc2   : > { %13983 = vmatpush1.bf16.msra.mxu0 %v19906_v29  ;;  %13902 = vmatprep.subr.bf16.mxu1 %v19911_v22  ;;  %v19987_v29 = vld [vmem:[#allocation15 + $0xa60] ss:$16 sps:$4 sm:$0xff]   ;;  %v19990_v22 = vld [vmem:[#allocation15 + $0xa68] ss:$16 sps:$4 sm:$0xff]  }
 0xcc3   : > { %13984 = vmatprep.subr.bf16.mxu0 %v19914_v35  ;;  %v19995_v35 = vld [vmem:[#allocation15 + $0xa84] ss:$16 sps:$4 sm:$0xff]  }
 0xcc5   : > { %13903 = vmatpush1.bf16.msra.mxu1 %v19909_v30  ;;  %v19998_v30 = vld [vmem:[#allocation15 + $0xa8c] ss:$16 sps:$4 sm:$0xff]  }
 0xcc6   : > { %13985 = vmatpush1.bf16.msra.mxu0 %v19912_v31  ;;  %13904 = vmatprep.subr.bf16.mxu1 %v19917_v32  ;;  %v19993_v31 = vld [vmem:[#allocation15 + $0xa80] ss:$16 sps:$4 sm:$0xff]   ;;  %v19996_v32 = vld [vmem:[#allocation15 + $0xa88] ss:$16 sps:$4 sm:$0xff]  }
 0xcc7   : > { %13986 = vmatprep.subr.bf16.mxu0 %v19920_v9  ;;  %v20001_v9 = vld [vmem:[#allocation15 + $0xaa4] ss:$16 sps:$4 sm:$0xff]  }
 0xcc9   : > { %13905 = vmatpush1.bf16.msra.mxu1 %v19915_v34  ;;  %v20004_v34 = vld [vmem:[#allocation15 + $0xaac] ss:$16 sps:$4 sm:$0xff]  }
 0xcca   : > { %13987 = vmatpush1.bf16.msra.mxu0 %v19918_v24  ;;  %13906 = vmatprep.subr.bf16.mxu1 %v19923_v43  ;;  %v19999_v24 = vld [vmem:[#allocation15 + $0xaa0] ss:$16 sps:$4 sm:$0xff]   ;;  %v20002_v43 = vld [vmem:[#allocation15 + $0xaa8] ss:$16 sps:$4 sm:$0xff]  }
 0xccb   : > { %13988 = vmatprep.subr.bf16.mxu0 %v19926_v45  ;;  %v20007_v45 = vld [vmem:[#allocation15 + $0xac4] ss:$16 sps:$4 sm:$0xff]  }
 0xccd   : > { %13907 = vmatpush1.bf16.msra.mxu1 %v19921_v0  ;;  %v20010_v0 = vld [vmem:[#allocation15 + $0xacc] ss:$16 sps:$4 sm:$0xff]  }
 0xcce   : > { %13989 = vmatpush1.bf16.msra.mxu0 %v19924_v40  ;;  %13908 = vmatprep.subr.bf16.mxu1 %v19929_v47  ;;  %v20005_v40 = vld [vmem:[#allocation15 + $0xac0] ss:$16 sps:$4 sm:$0xff]   ;;  %v20008_v47 = vld [vmem:[#allocation15 + $0xac8] ss:$16 sps:$4 sm:$0xff]  }
 0xccf   : > { %13990 = vmatprep.subr.bf16.mxu0 %v19932_v49  ;;  %v20013_v49 = vld [vmem:[#allocation15 + $0xae4] ss:$16 sps:$4 sm:$0xff]  }
 0xcd1   : > { %13909 = vmatpush1.bf16.msra.mxu1 %v19927_v53  ;;  %v20016_v53 = vld [vmem:[#allocation15 + $0xaec] ss:$16 sps:$4 sm:$0xff]  }
 0xcd2   : > { %13991 = vmatpush1.bf16.msra.mxu0 %v19930_v50  ;;  %13910 = vmatprep.subr.bf16.mxu1 %v19935_v62  ;;  %v20011_v50 = vld [vmem:[#allocation15 + $0xae0] ss:$16 sps:$4 sm:$0xff]   ;;  %v20014_v62 = vld [vmem:[#allocation15 + $0xae8] ss:$16 sps:$4 sm:$0xff]  }
 0xcd3   : > { %13992 = vmatprep.subr.bf16.mxu0 %v19938_v51  ;;  %v20019_v51 = vld [vmem:[#allocation15 + $0xb04] ss:$16 sps:$4 sm:$0xff]  }
 0xcd5   : > { %13911 = vmatpush1.bf16.msra.mxu1 %v19933_v41  ;;  %v20022_v41 = vld [vmem:[#allocation15 + $0xb0c] ss:$16 sps:$4 sm:$0xff]  }
 0xcd6   : > { %13993 = vmatpush1.bf16.msra.mxu0 %v19936_v52  ;;  %13912 = vmatprep.subr.bf16.mxu1 %v19941_v54  ;;  %v20017_v52 = vld [vmem:[#allocation15 + $0xb00] ss:$16 sps:$4 sm:$0xff]   ;;  %v20020_v54 = vld [vmem:[#allocation15 + $0xb08] ss:$16 sps:$4 sm:$0xff]  }
 0xcd7   : > { %13994 = vmatprep.subr.bf16.mxu0 %v19944_v55  ;;  %v20025_v55 = vld [vmem:[#allocation15 + $0xb24] ss:$16 sps:$4 sm:$0xff]  }
 0xcd9   : > { %13913 = vmatpush1.bf16.msra.mxu1 %v19939_v56  ;;  %v20028_v56 = vld [vmem:[#allocation15 + $0xb2c] ss:$16 sps:$4 sm:$0xff]  }
 0xcda   : > { %13995 = vmatpush1.bf16.msra.mxu0 %v19942_v28  ;;  %13914 = vmatprep.subr.bf16.mxu1 %v19947_v60  ;;  %v20023_v28 = vld [vmem:[#allocation15 + $0xb20] ss:$16 sps:$4 sm:$0xff]   ;;  %v20026_v60 = vld [vmem:[#allocation15 + $0xb28] ss:$16 sps:$4 sm:$0xff]  }
 0xcdb   : > { %13996 = vmatprep.subr.bf16.mxu0 %v19950_v38  ;;  %v20031_v38 = vld [vmem:[#allocation15 + $0xb44] ss:$16 sps:$4 sm:$0xff]  }
 0xcdd   : > { %13915 = vmatpush1.bf16.msra.mxu1 %v19945_v57  ;;  %v20034_v57 = vld [vmem:[#allocation15 + $0xb4c] ss:$16 sps:$4 sm:$0xff]  }
 0xcde   : > { %13997 = vmatpush1.bf16.msra.mxu0 %v19948_v42  ;;  %13916 = vmatprep.subr.bf16.mxu1 %v19953_v59  ;;  %v20029_v42 = vld [vmem:[#allocation15 + $0xb40] ss:$16 sps:$4 sm:$0xff]   ;;  %v20032_v59 = vld [vmem:[#allocation15 + $0xb48] ss:$16 sps:$4 sm:$0xff]  }
 0xcdf   : > { %13998 = vmatprep.subr.bf16.mxu0 %v19956_v61  ;;  %v20037_v61 = vld [vmem:[#allocation15 + $0xb64] ss:$16 sps:$4 sm:$0xff]  }
 0xce1   : > { %13917 = vmatpush1.bf16.msra.mxu1 %v19951_v1  ;;  %v20040_v1 = vld [vmem:[#allocation15 + $0xb6c] ss:$16 sps:$4 sm:$0xff]  }
 0xce2   : > { %13999 = vmatpush1.bf16.msra.mxu0 %v19954_v5  ;;  %13918 = vmatprep.subr.bf16.mxu1 %v19959_v39  ;;  %v20035_v5 = vld [vmem:[#allocation15 + $0xb60] ss:$16 sps:$4 sm:$0xff]   ;;  %v20038_v39 = vld [vmem:[#allocation15 + $0xb68] ss:$16 sps:$4 sm:$0xff]  }
 0xce3   : > { %14000 = vmatprep.subr.bf16.mxu0 %v19962_v19  ;;  %v20043_v19 = vld [vmem:[#allocation15 + $0xb84] ss:$16 sps:$4 sm:$0xff]  }
 0xce5   : > { %13919 = vmatpush1.bf16.msra.mxu1 %v19957_v7  ;;  %v20046_v7 = vld [vmem:[#allocation15 + $0xb8c] ss:$16 sps:$4 sm:$0xff]  }
 0xce6   : > { %14001 = vmatpush1.bf16.msra.mxu0 %v19960_v8  ;;  %13920 = vmatprep.subr.bf16.mxu1 %v19965_v16  ;;  %v20041_v8 = vld [vmem:[#allocation15 + $0xb80] ss:$16 sps:$4 sm:$0xff]   ;;  %v20044_v16 = vld [vmem:[#allocation15 + $0xb88] ss:$16 sps:$4 sm:$0xff]  }
 0xce7   : > { %14002 = vmatprep.subr.bf16.mxu0 %v19968_v4  ;;  %v20049_v4 = vld [vmem:[#allocation15 + $0xba4] ss:$16 sps:$4 sm:$0xff]  }
 0xce9   : > { %13921 = vmatpush1.bf16.msra.mxu1 %v19963_v26  ;;  %v20052_v26 = vld [vmem:[#allocation15 + $0xbac] ss:$16 sps:$4 sm:$0xff]  }
 0xcea   : > { %14003 = vmatpush1.bf16.msra.mxu0 %v19966_v14  ;;  %13931 = vmatprep.subr.bf16.mxu1 %v19971_v48  ;;  %v20047_v14 = vld [vmem:[#allocation15 + $0xba0] ss:$16 sps:$4 sm:$0xff]   ;;  %v20050_v48 = vld [vmem:[#allocation15 + $0xba8] ss:$16 sps:$4 sm:$0xff]  }
 0xceb   : > { %14013 = vmatprep.subr.bf16.mxu0 %v19974_v17  ;;  %v20055_v17 = vld [vmem:[#allocation15 + $0xbc4] ss:$16 sps:$4 sm:$0xff]  }
 0xcec   : > { %13923 = vmatmul.mubr.bf16.vlgmr.msra.gmra.mrb[40].mxu1 %v13242_v20 }
 0xced   : > { %14005 = vmatmul.mubr.bf16.vlgmr.msra.gmra.mrb[44].mxu0 %v13242_v20  ;;  %13932 = vmatpush1.bf16.msra.mxu1 %v19969_v33  ;;  %v20058_v33 = vld [vmem:[#allocation15 + $0xbcc] ss:$16 sps:$4 sm:$0xff]   ;;  %v20053_v20 = vld [vmem:[#allocation15 + $0xbc0] ss:$16 sps:$4 sm:$0xff]  }
 0xcee   : > { %13963 = vmatprep.mubr.bf16.mxu1 %v13245_v10  ;;  %14014 = vmatpush1.bf16.msra.mxu0 %v19972_v6  ;;  %v20056_v6 = vld [vmem:[#allocation15 + $0xbc8] ss:$16 sps:$4 sm:$0xff]  }
 0xcef   : > { %14045 = vmatprep.mubr.bf16.mxu0 %v13245_v10  ;;  %13933 = vmatprep.subr.bf16.mxu1 %v19977_v12  ;;  %v20061_v12 = vld [vmem:[#allocation15 + $0xbe4] ss:$16 sps:$4 sm:$0xff]   ;;  %v20064_v10 = vld [vmem:[#allocation15 + $0xbec] ss:$16 sps:$4 sm:$0xff]  }
 0xcf0   : > { %14015 = vmatprep.subr.bf16.mxu0 %v19980_v21  ;;  %v20059_v21 = vld [vmem:[#allocation15 + $0xbe0] ss:$16 sps:$4 sm:$0xff]  }
 0xcf1   : > { %13934 = vmatpush1.bf16.msra.mxu1 %v19975_v25  ;;  %v20062_v25 = vld [vmem:[#allocation15 + $0xbe8] ss:$16 sps:$4 sm:$0xff]  }
 0xcf2   : > { %14016 = vmatpush1.bf16.msra.mxu0 %v19978_v44  ;;  %13935 = vmatprep.subr.bf16.mxu1 %v19983_v18  ;;  %v13244_v44 = vrot.slane %v22106_v46, 1  ;;  %v16798_v18 = vld [vmem:[%s22688_s22 + $0x180] sm:$0xff]  ;;  %v16783_v46 = vld [vmem:[%s22688_s22 + $0x108] sm:$0xff] }
 0xcf3   : > { %14017 = vmatprep.subr.bf16.mxu0 %v19986_v11  ;;  %v16799_v11 = vld [vmem:[%s22688_s22 + $0x188] sm:$0xff] }
 0xcf5   : > { %13936 = vmatpush1.bf16.msra.mxu1 %v19981_v63  ;;  %v17091_v63 = vpack.c.bf16 %v16799_v11, %v16798_v18  ;;  %v14188_v18 = vld [vmem:[%s22688_s22 + $0xb0] sm:$0xff]  ;;  %v14189_v11 = vld [vmem:[%s22688_s22 + $0xb8] sm:$0xff] }
 0xcf6   : > { %14018 = vmatpush1.bf16.msra.mxu0 %v19984_v3  ;;  %13937 = vmatprep.subr.bf16.mxu1 %v19989_v27  ;;  %v16782_v3 = vld [vmem:[%s22688_s22 + $0x100] sm:$0xff] }
 0xcf7   : > { %14019 = vmatprep.subr.bf16.mxu0 %v19992_v2  ;;  %v17093_v27 = vpack.c.bf16 %v16783_v46, %v16782_v3  ;;  %v16800_v2 = vld [vmem:[%s22688_s22 + $0x190] sm:$0xff]  ;;  %v17135_v3 = vpack.c.bf16 %v14189_v11, %v14188_v18 }
 0xcf8   : > { %v14172_v46 = vld [vmem:[%s22688_s22 + $0x30] sm:$0xff] }
 0xcf9   : > { %13938 = vmatpush1.bf16.msra.mxu1 %v19987_v29  ;;  %v16801_v29 = vld [vmem:[%s22688_s22 + $0x198] sm:$0xff] }
 0xcfa   : > { %14020 = vmatpush1.bf16.msra.mxu0 %v19990_v22  ;;  %13939 = vmatprep.subr.bf16.mxu1 %v19995_v35  ;;  %v16784_v22 = vld [vmem:[%s22688_s22 + $0x110] sm:$0xff]  ;;  %v17095_v35 = vpack.c.bf16 %v16801_v29, %v16800_v2  ;;  %v14190_v2 = vld [vmem:[%s22688_s22 + $0xc0] sm:$0xff]  ;;  %v14191_v29 = vld [vmem:[%s22688_s22 + $0xc8] sm:$0xff] }
 0xcfb   : > { %14021 = vmatprep.subr.bf16.mxu0 %v19998_v30  ;;  %v16785_v30 = vld [vmem:[%s22688_s22 + $0x118] sm:$0xff] }
 0xcfd   : > { %13940 = vmatpush1.bf16.msra.mxu1 %v19993_v31  ;;  %v17097_v31 = vpack.c.bf16 %v16785_v30, %v16784_v22  ;;  %v14174_v30 = vld [vmem:[%s22688_s22 + $0x40] sm:$0xff] }
 0xcfe   : > { %14022 = vmatpush1.bf16.msra.mxu0 %v19996_v32  ;;  %13941 = vmatprep.subr.bf16.mxu1 %v20001_v9  ;;  %v16802_v32 = vld [vmem:[%s22688_s22 + $0x1a0] sm:$0xff]  ;;  %v16803_v9 = vld [vmem:[%s22688_s22 + $0x1a8] sm:$0xff] }
 0xcff   : > { %14023 = vmatprep.subr.bf16.mxu0 %v20004_v34  ;;  %v16786_v34 = vld [vmem:[%s22688_s22 + $0x120] sm:$0xff] }
 0xd01   : > { %13942 = vmatpush1.bf16.msra.mxu1 %v19999_v24  ;;  %v17099_v24 = vpack.c.bf16 %v16803_v9, %v16802_v32  ;;  %v14192_v32 = vld [vmem:[%s22688_s22 + $0xd0] sm:$0xff]  ;;  %v14193_v9 = vld [vmem:[%s22688_s22 + $0xd8] sm:$0xff] }
 0xd02   : > { %14024 = vmatpush1.bf16.msra.mxu0 %v20002_v43  ;;  %13943 = vmatprep.subr.bf16.mxu1 %v20007_v45  ;;  %v16787_v43 = vld [vmem:[%s22688_s22 + $0x128] sm:$0xff] }
 0xd03   : > { %14025 = vmatprep.subr.bf16.mxu0 %v20010_v0  ;;  %v17101_v45 = vpack.c.bf16 %v16787_v43, %v16786_v34  ;;  %v16804_v0 = vld [vmem:[%s22688_s22 + $0x1b0] sm:$0xff] }
 0xd04   : > { %v14176_v43 = vld [vmem:[%s22688_s22 + $0x50] sm:$0xff] }
 0xd05   : > { %13944 = vmatpush1.bf16.msra.mxu1 %v20005_v40  ;;  %v16805_v40 = vld [vmem:[%s22688_s22 + $0x1b8] sm:$0xff] }
 0xd06   : > { %14026 = vmatpush1.bf16.msra.mxu0 %v20008_v47  ;;  %13945 = vmatprep.subr.bf16.mxu1 %v20013_v49  ;;  %v16788_v47 = vld [vmem:[%s22688_s22 + $0x130] sm:$0xff]  ;;  %v17103_v49 = vpack.c.bf16 %v16805_v40, %v16804_v0 }
 0xd07   : > { %14027 = vmatprep.subr.bf16.mxu0 %v20016_v53  ;;  %v16789_v53 = vld [vmem:[%s22688_s22 + $0x138] sm:$0xff]  ;;  %v16808_v40 = vld [vmem:[%s22688_s22 + $0x1d0] sm:$0xff] }
 0xd09   : > { %13946 = vmatpush1.bf16.msra.mxu1 %v20011_v50  ;;  %v17105_v50 = vpack.c.bf16 %v16789_v53, %v16788_v47  ;;  %v16809_v47 = vld [vmem:[%s22688_s22 + $0x1d8] sm:$0xff]  ;;  %v16792_v53 = vld [vmem:[%s22688_s22 + $0x150] sm:$0xff] }
 0xd0a   : > { %14028 = vmatpush1.bf16.msra.mxu0 %v20014_v62  ;;  %13947 = vmatprep.subr.bf16.mxu1 %v20019_v51  ;;  %v16806_v62 = vld [vmem:[%s22688_s22 + $0x1c0] sm:$0xff]  ;;  %v16807_v51 = vld [vmem:[%s22688_s22 + $0x1c8] sm:$0xff] }
 0xd0b   : > { %14029 = vmatprep.subr.bf16.mxu0 %v20022_v41  ;;  %v16790_v41 = vld [vmem:[%s22688_s22 + $0x140] sm:$0xff] }
 0xd0d   : > { %13948 = vmatpush1.bf16.msra.mxu1 %v20017_v52  ;;  %v17107_v52 = vpack.c.bf16 %v16807_v51, %v16806_v62  ;;  %v14194_v51 = vld [vmem:[%s22688_s22 + $0xe0] sm:$0xff] }
 0xd0e   : > { %14030 = vmatpush1.bf16.msra.mxu0 %v20020_v54  ;;  %13949 = vmatprep.subr.bf16.mxu1 %v20025_v55  ;;  %v16791_v54 = vld [vmem:[%s22688_s22 + $0x148] sm:$0xff] }
 0xd0f   : > { %14031 = vmatprep.subr.bf16.mxu0 %v20028_v56  ;;  %v17109_v55 = vpack.c.bf16 %v16791_v54, %v16790_v41  ;;  %v16779_v56 = vadd.s32 4294967292, %v21203_v36  ;;  %v14166_v36 = vld [vmem:[%s22688_s22] sm:$0xff]  ;;  %v14195_v41 = vld [vmem:[%s22688_s22 + $0xe8] sm:$0xff] }
 0xd10   : > { %v14178_v54 = vld [vmem:[%s22688_s22 + $0x60] sm:$0xff] }
 0xd11   : > { %13950 = vmatpush1.bf16.msra.mxu1 %v20023_v28  ;;  %v14061_v28 = vmul.u32 2, %v16779_v56 }
 0xd12   : > { %14032 = vmatpush1.bf16.msra.mxu0 %v20026_v60  ;;  %13951 = vmatprep.subr.bf16.mxu1 %v20031_v38 }
 0xd13   : > { %14033 = vmatprep.subr.bf16.mxu0 %v20034_v57  ;;  %v14062_v60 = vadd.s32 1, %v14061_v28  ;;  %v14182_v57 = vld [vmem:[%s22688_s22 + $0x80] sm:$0xff] }
 0xd14   : > { %v16810_v28 = vld [vmem:[%s22688_s22 + $0x1e0] sm:$0xff] }
 0xd15   : > { %13952 = vmatpush1.bf16.msra.mxu1 %v20029_v42  ;;  %vm14063_vm8 = vcmp.eq.s32.totalorder %v21382_v58, %v14062_v60  ;;  %v14183_v42 = vld [vmem:[%s22688_s22 + $0x88] sm:$0xff] }
 0xd16   : > { %14034 = vmatpush1.bf16.msra.mxu0 %v20032_v59  ;;  %13953 = vmatprep.subr.bf16.mxu1 %v20037_v61  ;;  %vm14064_vm9 = vmor %vm21387_vm5, %vm14063_vm8  ;;  %v14167_v58 = vld [vmem:[%s22688_s22 + $0x8] sm:$0xff]  ;;  %vm14067_vm5 = vcmask 64512  }
 0xd17   : > { %14035 = vmatprep.subr.bf16.mxu0 %v20040_v1  ;;  %v16811_v60 = vld [vmem:[%s22688_s22 + $0x1e8] sm:$0xff] }
 0xd19   : > { %13954 = vmatpush1.bf16.msra.mxu1 %v20035_v5 }
 0xd1a   : > { %14036 = vmatpush1.bf16.msra.mxu0 %v20038_v39  ;;  %13955 = vmatprep.subr.bf16.mxu1 %v20043_v19  ;;  %v14184_v19 = vld [vmem:[%s22688_s22 + $0x90] sm:$0xff] }
 0xd1b   : > { %14037 = vmatprep.subr.bf16.mxu0 %v20046_v7 }
 0xd1d   : > { %13956 = vmatpush1.bf16.msra.mxu1 %v20041_v8 }
 0xd1e   : > { %14038 = vmatpush1.bf16.msra.mxu0 %v20044_v16  ;;  %13957 = vmatprep.subr.bf16.mxu1 %v20049_v4  ;;  %v17123_v4 = vpack.c.bf16 %v14183_v42, %v14182_v57  ;;  %v16794_v57 = vld [vmem:[%s22688_s22 + $0x160] sm:$0xff]  ;;  %v16795_v42 = vld [vmem:[%s22688_s22 + $0x168] sm:$0xff] }
 0xd1f   : > { %14039 = vmatprep.subr.bf16.mxu0 %v20052_v26 }
 0xd21   : > { %13958 = vmatpush1.bf16.msra.mxu1 %v20047_v14  ;;  %v16780_v14 = vsel %vm14064_vm9, 1.0, %v20601_v15 }
 0xd22   : > { %14040 = vmatpush1.bf16.msra.mxu0 %v20050_v48  ;;  %13959 = vmatprep.subr.bf16.mxu1 %v20055_v17  ;;  %v17125_v48 = vpack.c.bf16 %v14167_v58, %v14166_v36  ;;  %v17127_v17 = vpack.c.bf16 %v14185_v13, %v14184_v19  ;;  %v14197_v36 = vld [vmem:[%s22688_s22 + $0xf8] sm:$0xff]  ;;  %v14180_v58 = vld [vmem:[%s22688_s22 + $0x70] sm:$0xff] }
 0xd23   : > { %14041 = vmatprep.subr.bf16.mxu0 %v20058_v33  ;;  %v14168_v33 = vld [vmem:[%s22688_s22 + $0x10] sm:$0xff]  ;;  %v16813_v19 = vld [vmem:[%s22688_s22 + $0x1f8] sm:$0xff] }
 0xd25   : > { %13960 = vmatpush1.bf16.msra.mxu1 %v20053_v20  ;;  %v14169_v20 = vld [vmem:[%s22688_s22 + $0x18] sm:$0xff] }
 0xd26   : > { %14042 = vmatpush1.bf16.msra.mxu0 %v20056_v6  ;;  %13961 = vmatprep.subr.bf16.mxu1 %v20061_v12  ;;  %v14186_v6 = vld [vmem:[%s22688_s22 + $0xa0] sm:$0xff]  ;;  %v14187_v12 = vld [vmem:[%s22688_s22 + $0xa8] sm:$0xff] }
 0xd27   : > { %14043 = vmatprep.subr.bf16.mxu0 %v20064_v10  ;;  %v17129_v10 = vpack.c.bf16 %v14169_v20, %v14168_v33  ;;  %v16831_v33 = vld [vmem:[%s22688_s22 + $0x288] sm:$0xff] }
 0xd29   : > { %13962 = vmatpush1.bf16.msra.mxu1 %v20059_v21  ;;  %v17131_v21 = vpack.c.bf16 %v14187_v12, %v14186_v6  ;;  %v14150_v6 = vld [vmem:[#allocation24] sm:$0x3] }
 0xd2a   : > { %14044 = vmatpush1.bf16.msra.mxu0 %v20062_v25  ;;  %v14170_v25 = vld [vmem:[%s22688_s22 + $0x20] sm:$0xff]  ;;  %v14159_v18 = vrot.slane %v14150_v6, %v21209_v37  ;;  %v16865_v37 = vld [vmem:[%s22688_s22 + $0x398] sm:$0xff] }
 0xd2b   : > { %17092 = vmatprep.subr.bf16.mxu0 %v17091_v63 }
 0xd2c   : > { %13964 = vmatmul.mubr.bf16.vlgmr.msra.gmra.mrb[40].mxu1 %v13244_v44 }
 0xd2d   : > { %14046 = vmatmul.mubr.bf16.vlgmr.msra.gmra.mrb[44].mxu0 %v13244_v44  ;;  %14135 = vmatprep.mubr.f32.mxu1 %v20601_v15  ;;  %v14171_v44 = vld [vmem:[%s22688_s22 + $0x28] sm:$0xff] }
 0xd2e   : > { %17094 = vmatpush3.bf16.msra.mxu0 %v17093_v27  ;;  %v17133_v63 = vpack.c.bf16 %v14171_v44, %v14170_v25  ;;  %v14173_v27 = vld [vmem:[%s22688_s22 + $0x38] sm:$0xff] }
 0xd2f   : > { %17096 = vmatprep.subr.bf16.mxu0 %v17095_v35  ;;  %v17137_v22 = vpack.c.bf16 %v14173_v27, %v14172_v46  ;;  %v17139_v35 = vpack.c.bf16 %v14191_v29, %v14190_v2  ;;  %v16846_v46 = vld [vmem:[%s22688_s22 + $0x300] sm:$0xff]  ;;  %v16847_v27 = vld [vmem:[%s22688_s22 + $0x308] sm:$0xff] }
 0xd32   : > { %17098 = vmatpush3.bf16.msra.mxu0 %v17097_v31  ;;  %v14175_v31 = vld [vmem:[%s22688_s22 + $0x48] sm:$0xff] }
 0xd33   : > { %17100 = vmatprep.subr.bf16.mxu0 %v17099_v24  ;;  %v17141_v34 = vpack.c.bf16 %v14175_v31, %v14174_v30  ;;  %v17143_v24 = vpack.c.bf16 %v14193_v9, %v14192_v32  ;;  %v17189_v31 = vpack.c.bf16 %v16847_v27, %v16846_v46  ;;  %v16832_v32 = vld [vmem:[%s22688_s22 + $0x290] sm:$0xff]  ;;  %v16833_v9 = vld [vmem:[%s22688_s22 + $0x298] sm:$0xff] }
 0xd34   : > { %v16841_v46 = vld [vmem:[%s22688_s22 + $0x2d8] sm:$0xff] }
 0xd36   : > { %17102 = vmatpush3.bf16.msra.mxu0 %v17101_v45  ;;  %v14177_v45 = vld [vmem:[%s22688_s22 + $0x58] sm:$0xff] }
 0xd37   : > { %17104 = vmatprep.subr.bf16.mxu0 %v17103_v49  ;;  %v17145_v0 = vpack.c.bf16 %v14177_v45, %v14176_v43  ;;  %v17111_v49 = vpack.c.bf16 %v16809_v47, %v16808_v40  ;;  %v16849_v43 = vld [vmem:[%s22688_s22 + $0x318] sm:$0xff]  ;;  %v16866_v40 = vld [vmem:[%s22688_s22 + $0x3a0] sm:$0xff]  ;;  %v16867_v47 = vld [vmem:[%s22688_s22 + $0x3a8] sm:$0xff] }
 0xd3a   : > { %17106 = vmatpush3.bf16.msra.mxu0 %v17105_v50  ;;  %v16793_v50 = vld [vmem:[%s22688_s22 + $0x158] sm:$0xff] }
 0xd3b   : > { %17108 = vmatprep.subr.bf16.mxu0 %v17107_v52  ;;  %v17113_v62 = vpack.c.bf16 %v16793_v50, %v16792_v53  ;;  %v17147_v52 = vpack.c.bf16 %v14195_v41, %v14194_v51  ;;  %v17159_v53 = vpack.c.bf16 %v16833_v9, %v16832_v32  ;;  %v16817_v51 = vld [vmem:[%s22688_s22 + $0x218] sm:$0xff] }
 0xd3c   : > { %v16825_v32 = vld [vmem:[%s22688_s22 + $0x258] sm:$0xff] }
 0xd3e   : > { %17110 = vmatpush3.bf16.msra.mxu0 %v17109_v55  ;;  %v14179_v55 = vld [vmem:[%s22688_s22 + $0x68] sm:$0xff] }
 0xd3f   : > { %17112 = vmatprep.subr.bf16.mxu0 %v17111_v49  ;;  %v17149_v56 = vpack.c.bf16 %v14179_v55, %v14178_v54  ;;  %v16834_v54 = vld [vmem:[%s22688_s22 + $0x2a0] sm:$0xff]  ;;  %v16835_v55 = vld [vmem:[%s22688_s22 + $0x2a8] sm:$0xff] }
 0xd42   : > { %17114 = vmatpush3.bf16.msra.mxu0 %v17113_v62  ;;  %v16816_v62 = vld [vmem:[%s22688_s22 + $0x210] sm:$0xff] }
 0xdff   : > { %v13965_v38 = vpop.f32.mrb[40].mxu1 }
 0xe00   : > { %v14047_v59 = vpop.f32.mrb[44].mxu0  ;;  %v13967_v61 = vpop.f32.mrb[41].mxu1 }
 0xe01   : > { %v14058_v1 = vmax.f32 %v13965_v38, %v14047_v59  ;;  %v14049_v5 = vpop.f32.mrb[45].mxu0  ;;  %v13969_v39 = vpop.f32.mrb[42].mxu1  ;;  %v17115_v38 = vpack.c.bf16 %v16811_v60, %v16810_v28  ;;  %v17117_v59 = vpack.c.bf16 %v16795_v42, %v16794_v57  ;;  %v16850_v28 = vld [vmem:[%s22688_s22 + $0x320] sm:$0xff]  ;;  %v16851_v60 = vld [vmem:[%s22688_s22 + $0x328] sm:$0xff]  ;;  %v16868_v57 = vld [vmem:[%s22688_s22 + $0x3b0] sm:$0xff] }
 0xe02   : > { %v14059_v7 = vmax.f32 %v13967_v61, %v14049_v5  ;;  %v14051_v8 = vpop.f32.mrb[46].mxu0  ;;  %v13970_v16 = vpop.f32.mrb[43].mxu1  ;;  %v14196_v61 = vld [vmem:[%s22688_s22 + $0xf0] sm:$0xff]  ;;  %v14181_v5 = vld [vmem:[%s22688_s22 + $0x78] sm:$0xff] }
 0xe03   : > { %v14052_v26 = vpop.f32.mrb[47].mxu0  ;;  %17116 = vmatprep.subr.bf16.mxu0 %v17115_v38  ;;  %v16812_v39 = vld [vmem:[%s22688_s22 + $0x1f0] sm:$0xff]  ;;  %v17153_v13 = vpack.c.bf16 %v14181_v5, %v14180_v58  ;;  %v16797_v16 = vld [vmem:[%s22688_s22 + $0x178] sm:$0xff]  ;;  %v17161_v38 = vpack.c.bf16 %v16817_v51, %v16816_v62  ;;  %v17197_v58 = vpack.c.bf16 %v16851_v60, %v16850_v28  ;;  %v16827_v62 = vld [vmem:[%s22688_s22 + $0x268] sm:$0xff] }
 0xe04   : > { %14071 = vmatprep.subr.mxu1 %v14059_v7  ;;  %17118 = vmatpush3.bf16.msra.mxu0 %v17117_v59  ;;  %v17119_v7 = vpack.c.bf16 %v16813_v19, %v16812_v39  ;;  %v16796_v8 = vld [vmem:[%s22688_s22 + $0x170] sm:$0xff]  ;;  %v16869_v42 = vld [vmem:[%s22688_s22 + $0x3b8] sm:$0xff]  ;;  %v17163_v59 = vpack.c.bf16 %v16835_v55, %v16834_v54 }
 0xe05   : > { %14072 = vmatpush1.msra.mxu1 %v14058_v1  ;;  %v17151_v1 = vpack.c.bf16 %v14197_v36, %v14196_v61  ;;  %v17121_v26 = vpack.c.bf16 %v16797_v16, %v16796_v8  ;;  %v16818_v61 = vld [vmem:[%s22688_s22 + $0x220] sm:$0xff]  ;;  %v16819_v36 = vld [vmem:[%s22688_s22 + $0x228] sm:$0xff]  ;;  %v16837_v5 = vld [vmem:[%s22688_s22 + $0x2b8] sm:$0xff]  ;;  %v17199_v39 = vpack.c.bf16 %v16869_v42, %v16868_v57 }
 0xe06   : > { %16781 = vmatmul.mubr.msk.f32.vlgmr.msra.gmra.mrb[44].mxu1 %vm14067_vm5, %v16780_v14  ;;  %17124 = vmatprep.subr.bf16.mxu1 %v17123_v4  ;;  %v16862_v4 = vld [vmem:[%s22688_s22 + $0x380] sm:$0xff]  ;;  %v16863_v14 = vld [vmem:[%s22688_s22 + $0x388] sm:$0xff]  ;;  %v16852_v19 = vld [vmem:[%s22688_s22 + $0x330] sm:$0xff] }
 0xe07   : > { %17126 = vmatpush3.bf16.msra.mxu1 %v17125_v48  ;;  %17120 = vmatprep.subr.bf16.mxu0 %v17119_v7  ;;  %v17187_v48 = vpack.c.bf16 %v16863_v14, %v16862_v4  ;;  %v17165_v7 = vpack.c.bf16 %v16819_v36, %v16818_v61  ;;  %v16870_v8 = vld [vmem:[%s22688_s22 + $0x3c0] sm:$0xff]  ;;  %v16871_v16 = vld [vmem:[%s22688_s22 + $0x3c8] sm:$0xff]  ;;  %v16821_v14 = vld [vmem:[%s22688_s22 + $0x238] sm:$0xff] }
 0xe08   : > { %17128 = vmatprep.subr.bf16.mxu1 %v17127_v17  ;;  %v16830_v17 = vld [vmem:[%s22688_s22 + $0x280] sm:$0xff]  ;;  %17122 = vmatpush3.bf16.msra.mxu0 %v17121_v26  ;;  %v16820_v26 = vld [vmem:[%s22688_s22 + $0x230] sm:$0xff]  ;;  %v16829_v57 = vld [vmem:[%s22688_s22 + $0x278] sm:$0xff] }
 0xe09   : > { %v17155_v20 = vpack.c.bf16 %v16831_v33, %v16830_v17  ;;  %v16838_v17 = vld [vmem:[%s22688_s22 + $0x2c0] sm:$0xff]  ;;  %v16839_v33 = vld [vmem:[%s22688_s22 + $0x2c8] sm:$0xff]  ;;  %v16860_v55 = vld [vmem:[%s22688_s22 + $0x370] sm:$0xff] }
 0xe0b   : > { %17130 = vmatpush3.bf16.msra.mxu1 %v17129_v10  ;;  %17156 = vmatprep.subr.bf16.mxu0 %v17155_v20  ;;  %v17203_v20 = vpack.c.bf16 %v16871_v16, %v16870_v8  ;;  %v14600_v8 = vld [vmem:[#allocation25 + $0x20] sm:$0xff]  ;;  %v14601_v16 = vld [vmem:[#allocation25 + $0x28] sm:$0xff] }
 0xe0c   : > { %17132 = vmatprep.subr.bf16.mxu1 %v17131_v21  ;;  %v14155_v21 = vrot.slane %v14150_v6, %v21206_v23  ;;  %v16864_v23 = vld [vmem:[%s22688_s22 + $0x390] sm:$0xff]  ;;  %v16854_v6 = vld [vmem:[%s22688_s22 + $0x340] sm:$0xff] }
 0xe0f   : > { %17134 = vmatpush3.bf16.msra.mxu1 %v17133_v63 }
 0xe10   : > { %17136 = vmatprep.subr.bf16.mxu1 %v17135_v3 }
 0xe13   : > { %17138 = vmatpush3.bf16.msra.mxu1 %v17137_v22  ;;  %v16814_v22 = vld [vmem:[%s22688_s22 + $0x200] sm:$0xff] }
 0xe14   : > { %17140 = vmatprep.subr.bf16.mxu1 %v17139_v35  ;;  %v16815_v35 = vld [vmem:[%s22688_s22 + $0x208] sm:$0xff] }
 0xe17   : > { %17142 = vmatpush3.bf16.msra.mxu1 %v17141_v34  ;;  %v17191_v34 = vpack.c.bf16 %v16865_v37, %v16864_v23  ;;  %v16857_v23 = vld [vmem:[%s22688_s22 + $0x358] sm:$0xff] }
 0xe18   : > { %17144 = vmatprep.subr.bf16.mxu1 %v17143_v24  ;;  %v16848_v24 = vld [vmem:[%s22688_s22 + $0x310] sm:$0xff] }
 0xe19   : > { %v17193_v41 = vpack.c.bf16 %v16849_v43, %v16848_v24  ;;  %v16843_v24 = vld [vmem:[%s22688_s22 + $0x2e8] sm:$0xff] }
 0xe1b   : > { %17146 = vmatpush3.bf16.msra.mxu1 %v17145_v0  ;;  %v17157_v0 = vpack.c.bf16 %v16815_v35, %v16814_v22  ;;  %v16874_v22 = vld [vmem:[%s22688_s22 + $0x3e0] sm:$0xff]  ;;  %v16875_v35 = vld [vmem:[%s22688_s22 + $0x3e8] sm:$0xff] }
 0xe1c   : > { %17148 = vmatprep.subr.bf16.mxu1 %v17147_v52  ;;  %v17211_v43 = vpack.c.bf16 %v16875_v35, %v16874_v22 }
 0xe1f   : > { %17150 = vmatpush3.bf16.msra.mxu1 %v17149_v56  ;;  %v17195_v56 = vpack.c.bf16 %v16867_v47, %v16866_v40  ;;  %v16876_v47 = vld [vmem:[%s22688_s22 + $0x3f0] sm:$0xff] }
 0xe20   : > { %17152 = vmatprep.subr.bf16.mxu1 %v17151_v1  ;;  %v16836_v1 = vld [vmem:[%s22688_s22 + $0x2b0] sm:$0xff] }
 0xe21   : > { %v17167_v4 = vpack.c.bf16 %v16837_v5, %v16836_v1  ;;  %v14597_v1 = vld [vmem:[#allocation25 + $0x8] sm:$0xff]  ;;  %v20602_v5 = vmov 0.0|0.0  }
 0xe23   : > { %17154 = vmatpush3.bf16.msra.mxu1 %v17153_v13  ;;  %v16853_v13 = vld [vmem:[%s22688_s22 + $0x338] sm:$0xff] }
 0xe24   : > { %17188 = vmatprep.subr.bf16.mxu1 %v17187_v48  ;;  %v17201_v48 = vpack.c.bf16 %v16853_v13, %v16852_v19  ;;  %v14598_v19 = vld [vmem:[#allocation25 + $0x10] sm:$0xff]  ;;  %v14599_v13 = vld [vmem:[#allocation25 + $0x18] sm:$0xff] }
 0xed9   : > { %v14137_v12 = vpop.f32.mrb[44].mxu1 }
 0xeda   : > { %v14144_v10 = vrot.slane %v14137_v12, 4  ;;  %v14139_v25 = vpop.f32.mrb[45].mxu1 }
 0xedb   : > { %v14145_v44 = vrot.slane %v14139_v25, 4 }
 0xedc   : > { %v14148_v11 = vmax.f32 %v14137_v12, %v14144_v10  ;;  %v16855_v12 = vld [vmem:[%s22688_s22 + $0x348] sm:$0xff]  ;;  %v17169_v10 = vpack.c.bf16 %v16821_v14, %v16820_v26  ;;  %v14603_v26 = vld [vmem:[#allocation25 + $0x38] sm:$0xff] }
 0xedd   : > { %v14149_v63 = vmax.f32 %v14139_v25, %v14145_v44  ;;  %v16873_v25 = vld [vmem:[%s22688_s22 + $0x3d8] sm:$0xff]  ;;  %v17171_v44 = vpack.c.bf16 %v16839_v33, %v16838_v17  ;;  %v14681_v17 = vld [vmem:[%s22689_s26 + $0x8] sm:$0xff]  ;;  %v14682_v33 = vld [vmem:[%s22689_s26 + $0x10] sm:$0xff] }
 0xede   : > { %v14162_v3 = vadd.f32 %v14155_v21, %v14148_v11  ;;  %v16872_v21 = vld [vmem:[%s22688_s22 + $0x3d0] sm:$0xff]  ;;  %v16823_v11 = vld [vmem:[%s22688_s22 + $0x248] sm:$0xff] }
 0xedf   : > { %v14163_v2 = vadd.f32 %v14159_v18, %v14149_v63  ;;  %v16822_v18 = vld [vmem:[%s22688_s22 + $0x240] sm:$0xff]  ;;  %v17205_v63 = vpack.c.bf16 %v16855_v12, %v16854_v6  ;;  %v17207_v27 = vpack.c.bf16 %v16873_v25, %v16872_v21  ;;  %v14683_v6 = vld [vmem:[%s22689_s26 + $0x18] sm:$0xff] }
 0xee0   : > { %v22346_v29 = vmax.f32 %v14162_v3, 0.0  ;;  %v16840_v3 = vld [vmem:[%s22688_s22 + $0x2d0] sm:$0xff]  ;;  %v17173_v37 = vpack.c.bf16 %v16823_v11, %v16822_v18  ;;  %v14684_v12 = vld [vmem:[%s22689_s26 + $0x20] sm:$0xff] }
 0xee1   : > { %v14165_v30 = vmax.f32 %v14163_v2, 0.0  ;;  %v16856_v2 = vld [vmem:[%s22688_s22 + $0x350] sm:$0xff] }
 0xee2   : > { %v14233_v49 = vrot.slane %v22346_v29, 1  ;;  %v17209_v9 = vpack.c.bf16 %v16857_v23, %v16856_v2  ;;  %v14518_v61 = vrot.slane %v22346_v29, 3  ;;  %v14410_v36 = vrot.slane %v22346_v29, 2 }
 0xee3   : > { %14371 = vmatprep.mubr.f32.mxu1 %v14165_v30  ;;  %v14234_v45 = vrot.slane %v14165_v30, 1  ;;  %v14519_v50 = vrot.slane %v14165_v30, 3  ;;  %v14411_v52 = vrot.slane %v14165_v30, 2  ;;  %v17175_v30 = vpack.c.bf16 %v16841_v46, %v16840_v3 }
 0xee4   : > { %14372 = vmatmul.mubr.f32.vlgmr.msra.gmra.mrb[46].mxu1 %v22346_v29  ;;  %v14602_v29 = vld [vmem:[#allocation25 + $0x30] sm:$0xff] }
 0xee5   : > { %17190 = vmatpush3.bf16.msra.mxu1 %v17189_v31  ;;  %14301 = vmatprep.mubr.f32.mxu0 %v14234_v45  ;;  %v16824_v31 = vld [vmem:[%s22688_s22 + $0x250] sm:$0xff]  ;;  %v16858_v45 = vld [vmem:[%s22688_s22 + $0x360] sm:$0xff]  ;;  %v17229_v14 = vpack.c.bf16 %v14603_v26, %v14602_v29 }
 0xee6   : > { %14302 = vmatmul.mubr.f32.vlgmr.msra.gmra.mrb[48].mxu0 %v14233_v49  ;;  %17192 = vmatprep.subr.bf16.mxu1 %v17191_v34  ;;  %v16842_v34 = vld [vmem:[%s22688_s22 + $0x2e0] sm:$0xff]  ;;  %v17177_v40 = vpack.c.bf16 %v16825_v32, %v16824_v31  ;;  %v16877_v49 = vld [vmem:[%s22688_s22 + $0x3f8] sm:$0xff] }
 0xee7   : > { %17158 = vmatpush3.bf16.msra.mxu0 %v17157_v0  ;;  %14478 = vmatprep.mubr.f32.mxu0 %v14411_v52  ;;  %v16859_v0 = vld [vmem:[%s22688_s22 + $0x368] sm:$0xff]  ;;  %v16845_v52 = vld [vmem:[%s22688_s22 + $0x2f8] sm:$0xff]  ;;  %v17215_v54 = vpack.c.bf16 %v16877_v49, %v16876_v47  ;;  %v14593_v31 = vld [vmem:[#allocation27] sm:$0x1] }
 0xee8   : > { %17160 = vmatprep.subr.bf16.mxu0 %v17159_v53  ;;  %14586 = vmatprep.mubr.f32.mxu1 %v14519_v50  ;;  %v17179_v53 = vpack.c.bf16 %v16843_v24, %v16842_v34  ;;  %v16826_v50 = vld [vmem:[%s22688_s22 + $0x260] sm:$0xff]  ;;  %v17213_v51 = vpack.c.bf16 %v16859_v0, %v16858_v45  ;;  %v14686_v24 = vld [vmem:[%s22689_s26 + $0x30] sm:$0xff] }
 0xee9   : > { %17194 = vmatpush3.bf16.msra.mxu1 %v17193_v41  ;;  %v16844_v41 = vld [vmem:[%s22688_s22 + $0x2f0] sm:$0xff]  ;;  %v17181_v28 = vpack.c.bf16 %v16827_v62, %v16826_v50  ;;  %v14604_v0 = vld [vmem:[#allocation28] sm:$0x1]  ;;  %v14688_v50 = vld [vmem:[#allocation30] sm:$0x1] }
 0xeea   : > { %17196 = vmatprep.subr.bf16.mxu1 %v17195_v56  ;;  %v16861_v56 = vld [vmem:[%s22688_s22 + $0x378] sm:$0xff]  ;;  %v17183_v60 = vpack.c.bf16 %v16845_v52, %v16844_v41 }
 0xeeb   : > { %17162 = vmatpush3.bf16.msra.mxu0 %v17161_v38  ;;  %v16828_v38 = vld [vmem:[%s22688_s22 + $0x270] sm:$0xff]  ;;  %v17217_v42 = vpack.c.bf16 %v16861_v56, %v16860_v55 }
 0xeec   : > { %17164 = vmatprep.subr.bf16.mxu0 %v17163_v59  ;;  %v17185_v59 = vpack.c.bf16 %v16829_v57, %v16828_v38 }
 0xeed   : > { %17198 = vmatpush3.bf16.msra.mxu1 %v17197_v58  ;;  %v14596_v58 = vld [vmem:[#allocation25] sm:$0xff] }
 0xeee   : > { %17200 = vmatprep.subr.bf16.mxu1 %v17199_v39  ;;  %v17220_v39 = vpack.c.bf16 %v14597_v1, %v14596_v58 }
 0xeef   : > { %17166 = vmatpush3.bf16.msra.mxu0 %v17165_v7  ;;  %v17223_v7 = vpack.c.bf16 %v14599_v13, %v14598_v19 }
 0xef0   : > { %17168 = vmatprep.subr.bf16.mxu0 %v17167_v4  ;;  %v17226_v4 = vpack.c.bf16 %v14601_v16, %v14600_v8 }
 0xef1   : > { %17202 = vmatpush3.bf16.msra.mxu1 %v17201_v48  ;;  %v14680_v48 = vld [vmem:[%s22689_s26] sm:$0xff] }
 0xef2   : > { %17204 = vmatprep.subr.bf16.mxu1 %v17203_v20  ;;  %v17232_v20 = vpack.c.bf16 %v14681_v17, %v14680_v48 }
 0xef3   : > { %17170 = vmatpush3.bf16.msra.mxu0 %v17169_v10  ;;  %v14685_v10 = vld [vmem:[%s22689_s26 + $0x28] sm:$0xff] }
 0xef4   : > { %17172 = vmatprep.subr.bf16.mxu0 %v17171_v44  ;;  %v17238_v21 = vpack.c.bf16 %v14685_v10, %v14684_v12 }
 0xef5   : > { %17206 = vmatpush3.bf16.msra.mxu1 %v17205_v63 }
 0xef6   : > { %17208 = vmatprep.subr.bf16.mxu1 %v17207_v27 }
 0xef7   : > { %17174 = vmatpush3.bf16.msra.mxu0 %v17173_v37 }
 0xef8   : > { %17176 = vmatprep.subr.bf16.mxu0 %v17175_v30 }
 0xef9   : > { %17210 = vmatpush3.bf16.msra.mxu1 %v17209_v9 }
 0xefa   : > { %17212 = vmatprep.subr.bf16.mxu1 %v17211_v43  ;;  %v14687_v43 = vld [vmem:[%s22689_s26 + $0x38] sm:$0xff] }
 0xefb   : > { %17178 = vmatpush3.bf16.msra.mxu0 %v17177_v40  ;;  %v17241_v45 = vpack.c.bf16 %v14687_v43, %v14686_v24 }
 0xefc   : > { %17180 = vmatprep.subr.bf16.mxu0 %v17179_v53 }
 0xefd   : > { %17214 = vmatpush3.bf16.msra.mxu1 %v17213_v51 }
 0xefe   : > { %17216 = vmatprep.subr.bf16.mxu1 %v17215_v54 }
 0xeff   : > { %17182 = vmatpush3.bf16.msra.mxu0 %v17181_v28 }
 0xf00   : > { %17184 = vmatprep.subr.bf16.mxu0 %v17183_v60 }
 0xf01   : > { %17218 = vmatpush3.bf16.msra.mxu1 %v17217_v42 }
 0xf02   : > { %17231 = vmatprep.subr.bf16.mxu1 %v20602_v5 }
 0xf03   : > { %17186 = vmatpush3.bf16.msra.mxu0 %v17185_v59 }
 0xf04   : > { %14587 = vmatmul.mubr.f32.vlgmr.msra.gmra.mrb[48].mxu1 %v14518_v61  ;;  %17219 = vmatprep.subr.bf16.mxu0 %v20602_v5 }
 0xf05   : > { %17076 = vmatprep.mubr.msk.f32.mxu1 %vm20603_vm10, %v20601_v15  ;;  %17233 = vmatpush3.bf16.msra.mxu1 %v17232_v20 }
 0xf06   : > { %14479 = vmatmul.mubr.f32.vlgmr.msra.gmra.mrb[50].mxu0 %v14410_v36  ;;  %17234 = vmatprep.subr.bf16.mxu1 %v20602_v5 }
 0xf07   : > { %17221 = vmatpush3.bf16.msra.mxu0 %v17220_v39  ;;  %17057 = vmatprep.mubr.msk.f32.mxu0 %vm20603_vm10, %v20601_v15  ;;  %v17235_v15 = vpack.c.bf16 %v14683_v6, %v14682_v33 }
 0xf08   : > { %17222 = vmatprep.subr.bf16.mxu0 %v20602_v5 }
 0xf09   : > { %17236 = vmatpush3.bf16.msra.mxu1 %v17235_v15 }
 0xf0a   : > { %17237 = vmatprep.subr.bf16.mxu1 %v20602_v5 }
 0xf0b   : > { %17224 = vmatpush3.bf16.msra.mxu0 %v17223_v7 }
 0xf0c   : > { %17225 = vmatprep.subr.bf16.mxu0 %v20602_v5 }
 0xf0d   : > { %17239 = vmatpush3.bf16.msra.mxu1 %v17238_v21 }
 0xf0e   : > { %17240 = vmatprep.subr.bf16.mxu1 %v20602_v5 }
 0xf0f   : > { %17227 = vmatpush3.bf16.msra.mxu0 %v17226_v4 }
 0xf10   : > { %17228 = vmatprep.subr.bf16.mxu0 %v20602_v5 }
 0xf11   : > { %17242 = vmatpush3.bf16.msra.mxu1 %v17241_v45 }
 0xf13   : > { %17230 = vmatpush3.bf16.msra.mxu0 %v17229_v14 }
 0xfb7   : > { %v16950_v25 = vpop.f32.mrb[46].mxu1 }
 0xfb8   : > { %v16951_v44 = vpop.f32.mrb[47].mxu1 }
 0xfb9   : > { %v16915_v18 = vpop.f32.mrb[48].mxu0  ;;  %v16952_v11 = vadd.f32 %v16951_v44, %v16950_v25 }
 0xfba   : > { %v16916_v63 = vpop.f32.mrb[49].mxu0 }
 0xfbb   : > { %v16917_v3 = vadd.f32 %v16916_v63, %v16915_v18 }
 0xfbd   : > { %v14374_v46 = vadd.f32 %v16952_v11, %v16917_v3 }
 0xfd7   : > { %v17020_v27 = vpop.f32.mrb[48].mxu1 }
 0xfd8   : > { %v17021_v2 = vpop.f32.mrb[49].mxu1 }
 0xfd9   : > { %v17022_v23 = vadd.f32 %v17021_v2, %v17020_v27  ;;  %v16985_v37 = vpop.f32.mrb[50].mxu0 }
 0xfda   : > { %v16986_v22 = vpop.f32.mrb[51].mxu0 }
 0xfdb   : > { %v16987_v35 = vadd.f32 %v16986_v22, %v16985_v37 }
 0xfdd   : > { %v14484_v30 = vadd.f32 %v16987_v35, %v14374_v46 }
 0xfdf   : > { %v14592_v32 = vadd.f32 %v17022_v23, %v14484_v30 }
 0xfe1   : > { %v14594_v9 = vadd.f32 %v14593_v31, %v14592_v32 }
 0xfe3   : > { %v14595_v34 = vmax.f32 %v14594_v9, 0.0 }
 0xfe5   : > { %17058 = vmatmul.mubr.msk.f32.vlgmr.msra.gmra.mrb[52].mxu0 %vm14605_vm11, %v14595_v34 }
0x10b8   : > { %v14675_v40 = vpop.f32.mrb[52].mxu0 }
0x10b9   : > { %v14676_v47 = vadd.f32 %v14675_v40, %v14604_v0  ;;  %v17059_v49 = vpop.f32.mrb[53].mxu0 }
0x10bb   : > { %v14679_v53 = vmax.f32 %v14676_v47, 0.0 }
0x10bd   : > { %17077 = vmatmul.mubr.msk.f32.vlgmr.msra.gmra.mrb[50].mxu1 %vm14605_vm11, %v14679_v53 }
0x1190   : > { %v14758_v62 = vpop.f32.mrb[50].mxu1 }
0x1191   : > { %v14759_v51 = vadd.f32 %v14758_v62, %v14688_v50  ;;  %v17078_v41 = vpop.f32.mrb[51].mxu1 }
0x1193   : > { %14763 = vst.msk [vmem:[%s794_s28] sm:$0x1] %vm14762_vm12, %v14759_v51 }
0x1194   : > { %20498 = shalt.err (!%p20495_p1)
}
0x1195   : > { %s20499_s2 = scalar_lea.hbm %s22551_s1, 16  ;;  %s20503_s30 = scalar_lea.hbm %s22692_s13, 32 }
0x1196   : > { %p20500_p6 = scmp.ne.s32.totalorder %s22551_s1, %s20499_s2  ;;  %p20504_p10 = scmp.lt.u32.totalorder %s22551_s1, %s22692_s13 }
0x1197   : > { %p20505_p0 = scmp.lt.u32.totalorder %s20503_s30, %s20499_s2  ;;  %p20507_p3 = scmp.lt.u32.totalorder %s20499_s2, %s22551_s1 }
0x1198   : > { %p20501_p9 = pnand %p20500_p6, %p22693_p4 }
0x1199   : > { %p20506_p2 = por %p20505_p0, %p20504_p10 }
0x119a   : > { %p20502_p5 = pneg %p20501_p9 }
0x119b   : > { %p20508_p12 = por %p20507_p3, %p20506_p2 }
0x119d   : > { %p20509_p7 = pnand %p20508_p12, %p20502_p5 }
0x119f   : > { %20512 = shalt.err (!%p20509_p7)
}
0x11a0   : > { %17512 = dma.vmem_to_hbm [thread:$0]  (%p22693_p4), %s22553_s20, 16, %s22551_s1, %s14765_s24  }
0x11a1 PF: > { %s22694_s5 = sld [smem:[#allocation44_spill]]  ;;  %s22695_s3 = sld [smem:[#allocation41_spill]] }
0x11a2   : > { %s22696_s21 = sld [smem:[#allocation49_spill]] }
0x11a7   : > { %p17594_p8 = scmp.ge.s32.totalorder %s22694_s5, 2  ;;  %s14789_s29 = sand.u32 1, %s22695_s3  }
0x11a8   : > { %p22697_p11 = scmp.ne.s32.totalorder %s22696_s21, 0  ;;  %s14790_s28 = scalar_lea.sflag [#allocation9], %s14789_s29 }
0x11aa   : > { %p17561_p13 = pnand %p17594_p8, %p22697_p11 }
0x11ac   : > { %20562 = dma.done.wait (!%p17561_p13), %s14790_s28, 16  }
0x11ad   : > { %20564 = vsyncadd (!%p17561_p13), %s14790_s28, 4294967280  ;;  %s22698_s21 = sld [smem:[#allocation46_spill]]  ;;  %s22699_s0 = sld [smem:[#allocation42_spill]] }
0x11ae   : > { %s22700_s30 = sld [smem:[#allocation43_spill]]  ;;  %s22701_s20 = sld [smem:[#allocation47_spill]] }
0x11b3   : > { %p37_p1 = scmp.ge.s32.totalorder %s22698_s21, 4  }
0x11b5   :  { %39 = sbr.rel (!%p37_p1) target bundleno = 20 (0x14), region = 212 }
0x11bc   :  { %14794 = vsyncpa [#allocation8], 1 }
0x11bd   :  { %14796 = vsyncpa [#allocation8 + $0x1], 1 }
0x11be   :  { %14797 = vsyncpa [#allocation11], 1 }
0x11bf   :  { %14798 = vsyncpa [#allocation14], 1 }
0x11c0   :  { %14799 = vsyncpa [#allocation17], 1 }
0x11c1   :  { %14800 = vsyncpa [#allocation20], 1 }
0x11c2   :  { %14801 = vsyncpa [#allocation23], 1 }
0x11c3   :  { %14802 = vsyncpa [#allocation26], 1 }
0x11c4   :  { %14803 = vsyncpa [#allocation29], 1 }
0x11c5   :  { %14804 = vsyncpa [#allocation9], 1 }
0x11c6   :  { %14806 = vsyncpa [#allocation9 + $0x1], 1 }

</bundles_post_ra>
